<compile_context>
chip_gen: v7x
topology: tpu7x:2x2x1
jax: 0.10.0
libtpu: 0.0.40
codegen_flags: <defaults>
</compile_context>

<pallas_src>
import math
import functools

import numpy as np
import jax
import jax.numpy as jnp
from jax import lax
from jax.experimental import pallas as pl
from jax.experimental.pallas import tpu as pltpu


# ----------------------------------------------------------------------------
# Generation-aware tuning knobs
# ----------------------------------------------------------------------------

def _tpu_generation():
    try:
        kind = jax.devices()[0].device_kind.lower()
    except Exception:
        return 6
    digits = ""
    for ch in kind:
        if ch.isdigit():
            digits += ch
        elif digits:
            break
    try:
        return int(digits) if digits else 6
    except ValueError:
        return 6


_GEN = _tpu_generation()


def _vmem_limit_bytes():
    try:
        cap = int(pltpu.get_tpu_info().vmem_capacity_bytes)
    except Exception:
        cap = (64 if _GEN >= 7 else 128) * 1024 * 1024
    # Leave headroom for Mosaic-internal scratch.
    return min((cap * 3) // 4, 100 * 1024 * 1024)


_VMEM_LIMIT = _vmem_limit_bytes()

if _GEN >= 7:            # v7x: 64 MiB VMEM, 2x256 MXU, 2 TC/chip
    _QKV_TM, _QKV_TK = 128, 256
    _LIN_TM, _LIN_TN, _LIN_TK = 256, 256, 256
    _ATTN_TQ, _ATTN_TKV = 256, 512
elif _GEN == 6:          # v6e: 128 MiB VMEM, 2x256 MXU
    _QKV_TM, _QKV_TK = 256, 512
    _LIN_TM, _LIN_TN, _LIN_TK = 256, 256, 512
    _ATTN_TQ, _ATTN_TKV = 256, 512
else:                    # v5e and older: 4x128 MXU, lowest HBM BW
    _QKV_TM, _QKV_TK = 256, 1024
    _LIN_TM, _LIN_TN, _LIN_TK = 256, 512, 1024
    _ATTN_TQ, _ATTN_TKV = 128, 512

_EXP_BF16 = _GEN >= 6    # bf16 EUP exists on v6e/v7x only


# ----------------------------------------------------------------------------
# Small helpers
# ----------------------------------------------------------------------------

def _sublane_align(dtype):
    return {4: 8, 2: 16, 1: 32}.get(jnp.dtype(dtype).itemsize, 8)


def _pick_tile(dim, preferred, align):
    """Largest tile <= preferred that divides `dim` and is a multiple of
    `align`; falls back to the full dim (always legal for a BlockSpec)."""
    if dim <= preferred:
        return dim
    t = (preferred // align) * align
    while t >= align:
        if dim % t == 0:
            return t
        t -= align
    return dim


def _round_up(x, m):
    return ((x + m - 1) // m) * m


def _rope_permutation(heads, dh):
    """Per-head feature permutation mapping rotate_half layout -> interleaved
    source index.  Applying it to the q/k projection columns (and gammas /
    biases) lets the attention kernel use the cheap roll(Dh/2) RoPE form while
    matching interleaved-RoPE math exactly (attention scores are invariant to
    a feature permutation shared by q and k)."""
    half = dh // 2
    j = np.arange(dh)
    src = np.where(j < half, 2 * j, 2 * (j - half) + 1)
    return (np.arange(heads)[:, None] * dh + src[None, :]).reshape(-1)


def _stream_ids(batch, img_len, txt_len, tm):
    """Per M-block stream id (0 = img weights, 1 = txt weights)."""
    per_batch = np.concatenate([
        np.zeros(img_len // tm, np.int32),
        np.ones(txt_len // tm, np.int32)])
    return jnp.asarray(np.tile(per_batch, batch))


# ----------------------------------------------------------------------------
# Kernel: fused [to_q | to_k | to_v] projection + RMSNorm(q, k) * gamma,
# both streams in one call (stream selected via scalar-prefetched block ids)
# ----------------------------------------------------------------------------

def _qkv_rmsnorm_kernel(sid_ref, x_ref, w_ref, b_ref, gq_ref, gk_ref,
                        q_ref, k_ref, v_ref, acc_ref, *, eps, inner):
    kk = pl.program_id(1)

    @pl.when(kk == 0)
    def _():
        acc_ref[...] = jnp.zeros_like(acc_ref)

    acc_ref[...] += jnp.dot(x_ref[...], w_ref[0],
                            preferred_element_type=jnp.float32)

    @pl.when(kk == pl.num_programs(1) - 1)
    def _():
        y = acc_ref[...] + b_ref[0]                       # (tm, 3*inner) f32
        q = y[:, :inner]
        k = y[:, inner:2 * inner]
        v = y[:, 2 * inner:]
        # RMSNorm over the full inner_dim (matches nn.RMSNorm(inner_dim)).
        q = q * lax.rsqrt(jnp.mean(q * q, axis=-1, keepdims=True) + eps)
        k = k * lax.rsqrt(jnp.mean(k * k, axis=-1, keepdims=True) + eps)
        q_ref[...] = (q * gq_ref[0]).astype(q_ref.dtype)
        k_ref[...] = (k * gk_ref[0]).astype(k_ref.dtype)
        v_ref[...] = v.astype(v_ref.dtype)


def pallas_qkv_rmsnorm_dual(x, w, b, gq, gk, sid, tm, eps):
    M, Din = x.shape
    three_inner = w.shape[-1]
    inner = three_inner // 3
    tk = _pick_tile(Din, _QKV_TK, 128)
    grid = (M // tm, Din // tk)

    cost = pl.CostEstimate(
        flops=2 * M * Din * three_inner,
        transcendentals=0,
        bytes_accessed=(M * Din + 2 * Din * three_inner + 3 * M * inner)
        * x.dtype.itemsize)

    kern = functools.partial(_qkv_rmsnorm_kernel, eps=eps, inner=inner)
    out_sds = jax.ShapeDtypeStruct((M, inner), x.dtype)
    out_spec = pl.BlockSpec((tm, inner), lambda i, kk, sid: (i, 0))

    return pl.pallas_call(
        kern,
        out_shape=(out_sds, out_sds, out_sds),
        grid_spec=pltpu.PrefetchScalarGridSpec(
            num_scalar_prefetch=1,
            grid=grid,
            in_specs=[
                pl.BlockSpec((tm, tk), lambda i, kk, sid: (i, kk)),
                pl.BlockSpec((1, tk, three_inner),
                             lambda i, kk, sid: (sid[i], kk, 0)),
                pl.BlockSpec((1, 1, three_inner),
                             lambda i, kk, sid: (sid[i], 0, 0)),
                pl.BlockSpec((1, 1, inner), lambda i, kk, sid: (sid[i], 0, 0)),
                pl.BlockSpec((1, 1, inner), lambda i, kk, sid: (sid[i], 0, 0)),
            ],
            out_specs=(out_spec, out_spec, out_spec),
            scratch_shapes=[pltpu.VMEM((tm, three_inner), jnp.float32)]),
        compiler_params=pltpu.CompilerParams(
            dimension_semantics=("parallel", "arbitrary"),
            vmem_limit_bytes=_VMEM_LIMIT),
        cost_estimate=cost,
    )(sid, x, w, b, gq, gk)


# ----------------------------------------------------------------------------
# Kernel: tiled Linear for to_out / to_out_t (both streams in one call)
# ----------------------------------------------------------------------------

def _linear_dual_kernel(sid_ref, x_ref, w_ref, b_ref, o_ref, acc_ref):
    kk = pl.program_id(2)

    @pl.when(kk == 0)
    def _():
        acc_ref[...] = jnp.zeros_like(acc_ref)

    acc_ref[...] += jnp.dot(x_ref[...], w_ref[0],
                            preferred_element_type=jnp.float32)

    @pl.when(kk == pl.num_programs(2) - 1)
    def _():
        o_ref[...] = (acc_ref[...] + b_ref[0]).astype(o_ref.dtype)


def pallas_linear_dual(x, w, b, sid, tm):
    M, Din = x.shape
    Dout = w.shape[-1]
    tn = _pick_tile(Dout, _LIN_TN, 128)
    tk = _pick_tile(Din, _LIN_TK, 128)
    grid = (M // tm, Dout // tn, Din // tk)

    cost = pl.CostEstimate(
        flops=2 * M * Din * Dout,
        transcendentals=0,
        bytes_accessed=(M * Din + 2 * Din * Dout + M * Dout) * x.dtype.itemsize)

    return pl.pallas_call(
        _linear_dual_kernel,
        out_shape=jax.ShapeDtypeStruct((M, Dout), x.dtype),
        grid_spec=pltpu.PrefetchScalarGridSpec(
            num_scalar_prefetch=1,
            grid=grid,
            in_specs=[
                pl.BlockSpec((tm, tk), lambda i, j, kk, sid: (i, kk)),
                pl.BlockSpec((1, tk, tn), lambda i, j, kk, sid: (sid[i], kk, j)),
                pl.BlockSpec((1, 1, tn), lambda i, j, kk, sid: (sid[i], 0, j)),
            ],
            out_specs=pl.BlockSpec((tm, tn), lambda i, j, kk, sid: (i, j)),
            scratch_shapes=[pltpu.VMEM((tm, tn), jnp.float32)]),
        compiler_params=pltpu.CompilerParams(
            dimension_semantics=("parallel", "parallel", "arbitrary"),
            vmem_limit_bytes=_VMEM_LIMIT),
        cost_estimate=cost,
    )(sid, x, w, b)


# ----------------------------------------------------------------------------
# Kernel: flash attention (online softmax) with fused RoPE + folded scale
# ----------------------------------------------------------------------------

def _flash_attn_kernel(cq_ref, sq_ref, ck_ref, sk_ref, q_ref, k_ref, v_ref,
                       o_ref, m_sc, l_sc, acc_sc, q_sc,
                       *, dh_half, tkv, l_valid, exp_bf16):
    kv = pl.program_id(3)

    @pl.when(kv == 0)
    def _():
        m_sc[...] = jnp.full(m_sc.shape, -jnp.inf, dtype=m_sc.dtype)
        l_sc[...] = jnp.zeros_like(l_sc)
        acc_sc[...] = jnp.zeros_like(acc_sc)
        # RoPE on the q tile, once per (b, h, qi); the 1/sqrt(Dh) softmax
        # scale is pre-folded into the cq/sq tables.
        q32 = q_ref[0].astype(jnp.float32)
        q_rot = q32 * cq_ref[...] + pltpu.roll(q32, dh_half, axis=1) * sq_ref[...]
        q_sc[...] = q_rot.astype(q_sc.dtype)

    # RoPE on the k tile (VPU/XLU slots, hidden under the MXU work).
    k32 = k_ref[0].astype(jnp.float32)
    k_rot = (k32 * ck_ref[...] + pltpu.roll(k32, dh_half, axis=1) * sk_ref[...]
             ).astype(k_ref.dtype)

    # q @ k^T without an explicit transpose: contract last dim of both.
    s = lax.dot_general(q_sc[...], k_rot, (((1,), (1,)), ((), ())),
                        preferred_element_type=jnp.float32)       # (tq, tkv)

    if l_valid is not None:   # static: only emitted when the sequence is padded
        kpos = kv * tkv + lax.broadcasted_iota(jnp.int32, s.shape, 1)
        s = jnp.where(kpos < l_valid, s, -jnp.inf)
    # TODO(synk): masked / img_masks attention variants would bias `s` here.

    m_prev = m_sc[...]
    m_new = jnp.maximum(m_prev, jnp.max(s, axis=-1, keepdims=True))
    alpha = jnp.exp(m_prev - m_new)
    x = s - m_new
    p = jnp.exp(x.astype(jnp.bfloat16)) if exp_bf16 else jnp.exp(x)

    l_sc[...] = alpha * l_sc[...] + jnp.sum(p.astype(jnp.float32), axis=-1,
                                            keepdims=True)
    acc_sc[...] = alpha * acc_sc[...] + jnp.dot(
        p.astype(v_ref.dtype), v_ref[0], preferred_element_type=jnp.float32)
    m_sc[...] = m_new

    @pl.when(kv == pl.num_programs(3) - 1)
    def _():
        inv = pl.reciprocal(l_sc[...], approx=True)
        o_ref[0] = (acc_sc[...] * inv).astype(o_ref.dtype)


def _attn_tiles(L, tq_pref, tkv_pref, align):
    tq = _pick_tile(L, tq_pref, align)
    tkv = _pick_tile(L, tkv_pref, align)
    if tq <= tq_pref and tkv <= tkv_pref:
        return tq, tkv, L
    # No aligned divisor of L: pad the sequence and mask the padded keys
    # instead of silently falling back to a full (L, L) score tile.
    tq, tkv = tq_pref, tkv_pref
    unit = tq * tkv // math.gcd(tq, tkv)
    return tq, tkv, _round_up(L, unit)


def pallas_flash_attention(q, k, v, cos_tab, sin_tab, heads, scale):
    """q/k/v: (B, L, heads*Dh) channels-last (head picked by index_map, no
    transposes); cos_tab/sin_tab: (L, Dh) rotate_half-form RoPE tables."""
    B, L, inner = q.shape
    assert inner % heads == 0
    Dh = inner // heads
    assert Dh % 128 == 0, (
        "head_dim must be a multiple of 128 for the transpose-free layout")
    align = _sublane_align(q.dtype)
    tq, tkv, Lp = _attn_tiles(L, _ATTN_TQ, _ATTN_TKV, align)

    l_valid = None
    if Lp != L:
        pad = Lp - L
        q = jnp.pad(q, ((0, 0), (0, pad), (0, 0)))
        k = jnp.pad(k, ((0, 0), (0, pad), (0, 0)))
        v = jnp.pad(v, ((0, 0), (0, pad), (0, 0)))
        cos_tab = jnp.pad(cos_tab, ((0, pad), (0, 0)))
        sin_tab = jnp.pad(sin_tab, ((0, pad), (0, 0)))
        l_valid = L

    cq = (cos_tab * scale).astype(jnp.float32)   # softmax scale folded into q
    sq = (sin_tab * scale).astype(jnp.float32)
    ck = cos_tab.astype(jnp.float32)
    sk = sin_tab.astype(jnp.float32)

    cost = pl.CostEstimate(
        flops=4 * B * heads * Lp * Lp * Dh,
        transcendentals=B * heads * Lp * Lp,
        bytes_accessed=4 * B * Lp * inner * q.dtype.itemsize)

    kern = functools.partial(_flash_attn_kernel, dh_half=Dh // 2, tkv=tkv,
                             l_valid=l_valid, exp_bf16=_EXP_BF16)

    rope_q_spec = pl.BlockSpec((tq, Dh), lambda b, h, qi, ki: (qi, 0))
    rope_k_spec = pl.BlockSpec((tkv, Dh), lambda b, h, qi, ki: (ki, 0))
    q_spec = pl.BlockSpec((1, tq, Dh), lambda b, h, qi, ki: (b, qi, h))
    kv_spec = pl.BlockSpec((1, tkv, Dh), lambda b, h, qi, ki: (b, ki, h))

    out = pl.pallas_call(
        kern,
        out_shape=jax.ShapeDtypeStruct((B, Lp, inner), q.dtype),
        grid=(B, heads, Lp // tq, Lp // tkv),
        in_specs=[rope_q_spec, rope_q_spec, rope_k_spec, rope_k_spec,
                  q_spec, kv_spec, kv_spec],
        out_specs=pl.BlockSpec((1, tq, Dh), lambda b, h, qi, ki: (b, qi, h)),
        scratch_shapes=[
            pltpu.VMEM((tq, 1), jnp.float32),     # running max m
            pltpu.VMEM((tq, 1), jnp.float32),     # running denom l
            pltpu.VMEM((tq, Dh), jnp.float32),    # output accumulator
            pltpu.VMEM((tq, Dh), q.dtype),        # RoPE-rotated (scaled) q tile
        ],
        compiler_params=pltpu.CompilerParams(
            dimension_semantics=("parallel", "parallel", "parallel",
                                 "arbitrary"),
            vmem_limit_bytes=_VMEM_LIMIT),
        cost_estimate=cost,
    )(cq, sq, ck, sk, q, k, v)
    return out[:, :L] if Lp != L else out


# ----------------------------------------------------------------------------
# RoPE table construction (rotate_half form, from the interleaved freqs_cis)
# ----------------------------------------------------------------------------

def build_rope(seq_len, head_dim, theta=10000.0):
    pos = jnp.arange(seq_len, dtype=jnp.float32)
    idx = jnp.arange(head_dim // 2, dtype=jnp.float32)
    freqs = pos[:, None] / (theta ** (2.0 * idx / head_dim))[None, :]
    cos, sin = jnp.cos(freqs), jnp.sin(freqs)
    rot = jnp.stack(
        [jnp.stack([cos, -sin], axis=-1),
         jnp.stack([sin, cos], axis=-1)],
        axis=-2)                                  # (L, Dh/2, 2, 2)
    return rot[None, :, None]                     # (1, L, 1, Dh/2, 2, 2)


def _rope_tables(rope):
    """Interleaved freqs_cis (1, L, 1, Dh/2, 2, 2) -> rotate_half-form (L, Dh)
    cos / signed-sin tables (consumed by the flash kernel)."""
    rot = rope[0, :, 0]                           # (L, Dh/2, 2, 2)
    cos = rot[:, :, 0, 0]
    sin = rot[:, :, 1, 0]
    cos_full = jnp.concatenate([cos, cos], axis=-1)
    sin_signed = jnp.concatenate([-sin, sin], axis=-1)
    return cos_full.astype(jnp.float32), sin_signed.astype(jnp.float32)


def apply_rope(xq, xk, freqs_cis):
    # Reference-path RoPE (interleaved form), mirrors the PyTorch apply_rope.
    def ap(x):
        xs = x.astype(jnp.float32).reshape(*x.shape[:-1], -1, 1, 2)
        out = freqs_cis[..., 0] * xs[..., 0] + freqs_cis[..., 1] * xs[..., 1]
        return out.reshape(x.shape).astype(x.dtype)
    return ap(xq), ap(xk)


# ----------------------------------------------------------------------------
# Parameters (f32 masters) + one-time kernel packing (fuse / permute / bf16)
# ----------------------------------------------------------------------------

def init_hd_attention_params(key, query_dim, heads, dim_head):
    inner = heads * dim_head
    assert query_dim == inner, "HDAttention default path needs query_dim == inner_dim"
    ks = jax.random.split(key, 12)

    def lin(k, din, dout):
        kw, kb = jax.random.split(k)
        w = jax.random.normal(kw, (din, dout), jnp.float32) / math.sqrt(din)
        b = jax.random.normal(kb, (1, dout), jnp.float32) * 0.01
        return (w, b)

    def gamma(k, n):
        return 1.0 + 0.1 * jax.random.normal(k, (1, n), jnp.float32)

    return {
        "to_q": lin(ks[0], query_dim, inner),
        "to_k": lin(ks[1], inner, inner),
        "to_v": lin(ks[2], inner, inner),
        "to_out": lin(ks[3], inner, query_dim),
        "q_g": gamma(ks[4], inner),
        "k_g": gamma(ks[5], inner),
        "to_q_t": lin(ks[6], query_dim, inner),
        "to_k_t": lin(ks[7], inner, inner),
        "to_v_t": lin(ks[8], inner, inner),
        "to_out_t": lin(ks[9], inner, query_dim),
        "q_g_t": gamma(ks[10], inner),
        "k_g_t": gamma(ks[11], inner),
    }


def pack_hd_attention_params(p, heads, dim_head, compute_dtype=jnp.bfloat16):
    """One-time, outside-jit preprocessing:
       * fuse [Wq|Wk|Wv] per stream, stack the img/txt streams,
       * permute the q/k columns (and biases / RMSNorm gammas) into
         rotate_half RoPE layout (kernel then uses pltpu.roll(Dh/2)),
       * cast MXU operands (weights) to bf16; biases/gammas stay f32."""
    perm = _rope_permutation(heads, dim_head)

    def fuse(wq, bq, wk, bk, wv, bv, gq, gk):
        w = jnp.concatenate([wq[:, perm], wk[:, perm], wv], axis=1)
        b = jnp.concatenate([bq[:, perm], bk[:, perm], bv], axis=1)
        return w, b, gq[:, perm], gk[:, perm]

    wi, bi, gqi, gki = fuse(*p["to_q"], *p["to_k"], *p["to_v"],
                            p["q_g"], p["k_g"])
    wt, bt, gqt, gkt = fuse(*p["to_q_t"], *p["to_k_t"], *p["to_v_t"],
                            p["q_g_t"], p["k_g_t"])
    return {
        "w_qkv": jnp.stack([wi, wt]).astype(compute_dtype),
        "b_qkv": jnp.stack([bi, bt]).astype(jnp.float32),
        "g_q": jnp.stack([gqi, gqt]).astype(jnp.float32),
        "g_k": jnp.stack([gki, gkt]).astype(jnp.float32),
        "w_out": jnp.stack([p["to_out"][0], p["to_out_t"][0]]).astype(compute_dtype),
        "b_out": jnp.stack([p["to_out"][1], p["to_out_t"][1]]).astype(jnp.float32),
    }


# ----------------------------------------------------------------------------
# Forward
# ----------------------------------------------------------------------------

@functools.partial(jax.jit, static_argnames=("heads", "eps"))
def hd_attention_forward(packed, img, txt, rope, *, heads, eps=1e-5):
    B, Li, qd = img.shape
    Lt = txt.shape[1]
    L = Li + Lt
    inner = packed["w_qkv"].shape[-1] // 3
    Dh = inner // heads
    cdt = packed["w_qkv"].dtype
    align = _sublane_align(cdt)

    g = math.gcd(Li, Lt)
    assert g % 8 == 0, (
        "TODO(synk): fall back to per-stream projection calls when img/txt "
        "lengths share no sublane-aligned tile")

    # Both streams go through ONE fused QKV call / ONE out-projection call; an
    # SMEM-prefetched per-block stream id picks the stacked img/txt weights in
    # the index_map (no per-stream launches, no q/k/v concats in HBM).
    x = jnp.concatenate([img, txt], axis=1).astype(cdt).reshape(B * L, qd)

    tm_qkv = _pick_tile(g, _QKV_TM, align)
    sid_qkv = _stream_ids(B, Li, Lt, tm_qkv)
    q, k, v = pallas_qkv_rmsnorm_dual(
        x, packed["w_qkv"], packed["b_qkv"], packed["g_q"], packed["g_k"],
        sid_qkv, tm_qkv, eps)

    q = q.reshape(B, L, inner)
    k = k.reshape(B, L, inner)
    v = v.reshape(B, L, inner)

    # RoPE tables (rotate_half form); the rotation itself (and the 1/sqrt(Dh)
    # softmax scale) is fused into the flash-attention kernel.
    cos_tab, sin_tab = _rope_tables(rope)
    scale = 1.0 / math.sqrt(Dh)
    attn = pallas_flash_attention(q, k, v, cos_tab, sin_tab, heads, scale)

    tm_lin = _pick_tile(g, _LIN_TM, align)
    sid_lin = _stream_ids(B, Li, Lt, tm_lin)
    out = pallas_linear_dual(attn.reshape(B * L, inner),
                             packed["w_out"], packed["b_out"],
                             sid_lin, tm_lin)
    out = out.reshape(B, L, qd).astype(img.dtype)

    # TODO(synk): cache_v / attninj slerp & adain interpolation and the
    # update_cross_attn weight-editing branch (matrix inverse on weights) are
    # host-side control paths and are not part of this kernel.
    return out[:, :Li], out[:, Li:]


# ----------------------------------------------------------------------------
# Pure-JAX reference (original interleaved-RoPE formulation, f32 params)
# ----------------------------------------------------------------------------

def hd_attention_reference(p, img, txt, rope, heads, eps=1e-5):
    inner = p["to_q"][0].shape[1]
    Dh = inner // heads
    B, Li, _ = img.shape
    Lt = txt.shape[1]
    L = Li + Lt

    def lin(x, wb):
        return x @ wb[0] + wb[1]

    def rms(x, g):
        return x * lax.rsqrt(jnp.mean(x * x, axis=-1, keepdims=True) + eps) * g

    iq = rms(lin(img, p["to_q"]), p["q_g"])
    ik = rms(lin(img, p["to_k"]), p["k_g"])
    iv = lin(img, p["to_v"])
    tq = rms(lin(txt, p["to_q_t"]), p["q_g_t"])
    tk = rms(lin(txt, p["to_k_t"]), p["k_g_t"])
    tv = lin(txt, p["to_v_t"])

    q = jnp.concatenate([iq, tq], axis=1).reshape(B, L, heads, Dh)
    k = jnp.concatenate([ik, tk], axis=1).reshape(B, L, heads, Dh)
    v = jnp.concatenate([iv, tv], axis=1).reshape(B, L, heads, Dh)
    q, k = apply_rope(q, k, rope)

    s = jnp.einsum("blhd,bmhd->bhlm", q, k) * (1.0 / math.sqrt(Dh))
    pr = jax.nn.softmax(s, axis=-1)
    o = jnp.einsum("bhlm,bmhd->blhd", pr, v).reshape(B, L, inner)

    img_o = lin(o[:, :Li], p["to_out"])
    txt_o = lin(o[:, Li:], p["to_out_t"])
    return img_o, txt_o


# ----------------------------------------------------------------------------
# Demo
# ----------------------------------------------------------------------------

if __name__ == "__main__":
    # Small-but-representative shapes: heads=2, dim_head=128 (HiDream head dim),
    # query_dim = inner_dim = 256, img_len=256, txt_len=128 (total seq 384 so
    # the flash KV reduction and the M-tiling of the projections are exercised).
    B, heads, dim_head = 2, 2, 128
    query_dim = heads * dim_head
    Li, Lt = 256, 128

    key = jax.random.PRNGKey(0)
    k_img, k_txt, k_par = jax.random.split(key, 3)

    img = jax.random.normal(k_img, (B, Li, query_dim), jnp.float32)
    txt = jax.random.normal(k_txt, (B, Lt, query_dim), jnp.float32)
    rope = build_rope(Li + Lt, dim_head)
    params = init_hd_attention_params(k_par, query_dim, heads, dim_head)
    packed = pack_hd_attention_params(params, heads, dim_head, jnp.bfloat16)

    img_out, txt_out = hd_attention_forward(packed, img, txt, rope,
                                            heads=heads, eps=1e-5)
    jax.block_until_ready((img_out, txt_out))

    assert img_out.shape == (B, Li, query_dim)
    assert txt_out.shape == (B, Lt, query_dim)
    assert bool(jnp.all(jnp.isfinite(img_out)))
    assert bool(jnp.all(jnp.isfinite(txt_out)))

    # Per-tensor relative check against a pure-JAX f32 reference (bf16 MXU
    # path + approximate reciprocal => a few percent tolerance).
    ref_img, ref_txt = hd_attention_reference(params, img, txt, rope, heads)

    def rel_err(a, b):
        return float(jnp.max(jnp.abs(a - b)) / (jnp.max(jnp.abs(b)) + 1e-6))

    err = max(rel_err(img_out, ref_img), rel_err(txt_out, ref_txt))
    assert err < 6e-2, f"kernel/reference mismatch: relative err = {err}"

    print("KERNEL_OK")
</pallas_src>

<mosaic_0001>
module attributes {stable_mosaic.version = 11 : i64} {
  func.func @_qkv_rmsnorm_kernel(%arg0: i32, %arg1: i32, %arg2: memref<6xi32, #tpu.memory_space<smem>>, %arg3: memref<128x256xbf16, #tpu.memory_space<vmem>>, %arg4: memref<1x256x768xbf16, #tpu.memory_space<vmem>>, %arg5: memref<1x1x768xf32, #tpu.memory_space<vmem>>, %arg6: memref<1x1x256xf32, #tpu.memory_space<vmem>>, %arg7: memref<1x1x256xf32, #tpu.memory_space<vmem>>, %arg8: memref<128x256xbf16, #tpu.memory_space<vmem>>, %arg9: memref<128x256xbf16, #tpu.memory_space<vmem>>, %arg10: memref<128x256xbf16, #tpu.memory_space<vmem>>, %arg11: memref<128x768xf32, #tpu.memory_space<vmem>>) attributes {dimension_semantics = [#tpu.dimension_semantics<parallel>, #tpu.dimension_semantics<arbitrary>], iteration_bounds = array<i64: 6, 1>, scalar_prefetch = 1 : i64, scratch_operands = 1 : i64, tpu.core_type = #tpu.core_type<tc>, window_params = [{transform_indices = @transform_0, window_bounds = array<i64: 128, 256>}, {transform_indices = @transform_1, window_bounds = array<i64: 1, 256, 768>}, {transform_indices = @transform_2, window_bounds = array<i64: 1, 1, 768>}, {transform_indices = @transform_3, window_bounds = array<i64: 1, 1, 256>}, {transform_indices = @transform_4, window_bounds = array<i64: 1, 1, 256>}, {transform_indices = @transform_5, window_bounds = array<i64: 128, 256>}, {transform_indices = @transform_6, window_bounds = array<i64: 128, 256>}, {transform_indices = @transform_7, window_bounds = array<i64: 128, 256>}]} {
    %c0_i32 = arith.constant 0 : i32
    %0 = arith.cmpi eq, %arg1, %c0_i32 : i32
    %1 = arith.extui %0 : i1 to i32
    %c0_i32_0 = arith.constant 0 : i32
    %2 = arith.cmpi ne, %1, %c0_i32_0 : i32
    scf.if %2 {
      %cst_11 = arith.constant 0.000000e+00 : f32
      %13 = vector.broadcast %cst_11 : f32 to vector<128x768xf32>
      %c0_12 = arith.constant 0 : index
      %c0_13 = arith.constant 0 : index
      %14 = vector.load %arg11[%c0_12, %c0_13] : memref<128x768xf32, #tpu.memory_space<vmem>>, vector<128x768xf32>
      tpu.vector_store %arg11[%c0_12, %c0_13], %13 {strides = array<i32>} : memref<128x768xf32, #tpu.memory_space<vmem>>, vector<128x768xf32>,
    } else {
    }
    %c0 = arith.constant 0 : index
    %c0_1 = arith.constant 0 : index
    %3 = vector.load %arg11[%c0, %c0_1] : memref<128x768xf32, #tpu.memory_space<vmem>>, vector<128x768xf32>
    %c0_2 = arith.constant 0 : index
    %c0_3 = arith.constant 0 : index
    %4 = vector.load %arg3[%c0_2, %c0_3] : memref<128x256xbf16, #tpu.memory_space<vmem>>, vector<128x256xbf16>
    %c0_4 = arith.constant 0 : index
    %c0_5 = arith.constant 0 : index
    %c0_6 = arith.constant 0 : index
    %5 = vector.load %arg4[%c0_4, %c0_5, %c0_6] : memref<1x256x768xbf16, #tpu.memory_space<vmem>>, vector<1x256x768xbf16>
    %6 = vector.shape_cast %5 : vector<1x256x768xbf16> to vector<256x768xbf16>
    %cst = arith.constant dense<0.000000e+00> : vector<128x768xf32>
    %7 = tpu.matmul %4, %6, %cst {dimension_numbers = #tpu.dot_dimension_numbers<[1], [0], [0], [1], [0, 0, 1, 1], [], []>} : vector<128x256xbf16>, vector<256x768xbf16>, vector<128x768xf32> -> vector<128x768xf32>
    %8 = arith.addf %3, %7 : vector<128x768xf32>
    %c0_7 = arith.constant 0 : index
    %c0_8 = arith.constant 0 : index
    %9 = vector.load %arg11[%c0_7, %c0_8] : memref<128x768xf32, #tpu.memory_space<vmem>>, vector<128x768xf32>
    tpu.vector_store %arg11[%c0_7, %c0_8], %8 {strides = array<i32>} : memref<128x768xf32, #tpu.memory_space<vmem>>, vector<128x768xf32>,
    %c0_i32_9 = arith.constant 0 : i32
    %10 = arith.cmpi eq, %arg1, %c0_i32_9 : i32
    %11 = arith.extui %10 : i1 to i32
    %c0_i32_10 = arith.constant 0 : i32
    %12 = arith.cmpi ne, %11, %c0_i32_10 : i32
    scf.if %12 {
      %c0_11 = arith.constant 0 : index
      %c0_12 = arith.constant 0 : index
      %13 = vector.load %arg11[%c0_11, %c0_12] : memref<128x768xf32, #tpu.memory_space<vmem>>, vector<128x768xf32>
      %c0_13 = arith.constant 0 : index
      %c0_14 = arith.constant 0 : index
      %c0_15 = arith.constant 0 : index
      %14 = vector.load %arg5[%c0_13, %c0_14, %c0_15] : memref<1x1x768xf32, #tpu.memory_space<vmem>>, vector<1x1x768xf32>
      %15 = vector.shape_cast %14 : vector<1x1x768xf32> to vector<1x768xf32>
      %16 = vector.broadcast %15 : vector<1x768xf32> to vector<128x768xf32>
      %17 = arith.addf %13, %16 : vector<128x768xf32>
      %18 = vector.extract_strided_slice %17 {offsets = [0, 0], sizes = [128, 256], strides = [1, 1]} : vector<128x768xf32> to vector<128x256xf32>
      %19 = vector.extract_strided_slice %17 {offsets = [0, 256], sizes = [128, 256], strides = [1, 1]} : vector<128x768xf32> to vector<128x256xf32>
      %20 = vector.extract_strided_slice %17 {offsets = [0, 512], sizes = [128, 256], strides = [1, 1]} : vector<128x768xf32> to vector<128x256xf32>
      %21 = arith.mulf %18, %18 : vector<128x256xf32>
      %cst_16 = arith.constant dense<0.000000e+00> : vector<128xf32>
      %22 = vector.multi_reduction <add>, %21, %cst_16 [1] : vector<128x256xf32> to vector<128xf32>
      %23 = vector.shape_cast %22 : vector<128xf32> to vector<128x1xf32>
      %cst_17 = arith.constant 2.560000e+02 : f32
      %24 = vector.broadcast %cst_17 : f32 to vector<128x1xf32>
      %25 = arith.divf %23, %24 : vector<128x1xf32>
      %cst_18 = arith.constant 9.99999974E-6 : f32
      %26 = vector.broadcast %cst_18 : f32 to vector<128x1xf32>
      %27 = arith.addf %25, %26 : vector<128x1xf32>
      %28 = math.rsqrt %27 : vector<128x1xf32>
      %29 = vector.broadcast %28 : vector<128x1xf32> to vector<128x256xf32>
      %30 = arith.mulf %18, %29 : vector<128x256xf32>
      %31 = arith.mulf %19, %19 : vector<128x256xf32>
      %cst_19 = arith.constant dense<0.000000e+00> : vector<128xf32>
      %32 = vector.multi_reduction <add>, %31, %cst_19 [1] : vector<128x256xf32> to vector<128xf32>
      %33 = vector.shape_cast %32 : vector<128xf32> to vector<128x1xf32>
      %cst_20 = arith.constant 2.560000e+02 : f32
      %34 = vector.broadcast %cst_20 : f32 to vector<128x1xf32>
      %35 = arith.divf %33, %34 : vector<128x1xf32>
      %cst_21 = arith.constant 9.99999974E-6 : f32
      %36 = vector.broadcast %cst_21 : f32 to vector<128x1xf32>
      %37 = arith.addf %35, %36 : vector<128x1xf32>
      %38 = math.rsqrt %37 : vector<128x1xf32>
      %39 = vector.broadcast %38 : vector<128x1xf32> to vector<128x256xf32>
      %40 = arith.mulf %19, %39 : vector<128x256xf32>
      %c0_22 = arith.constant 0 : index
      %c0_23 = arith.constant 0 : index
      %c0_24 = arith.constant 0 : index
      %41 = vector.load %arg6[%c0_22, %c0_23, %c0_24] : memref<1x1x256xf32, #tpu.memory_space<vmem>>, vector<1x1x256xf32>
      %42 = vector.shape_cast %41 : vector<1x1x256xf32> to vector<1x256xf32>
      %43 = vector.broadcast %42 : vector<1x256xf32> to vector<128x256xf32>
      %44 = arith.mulf %30, %43 : vector<128x256xf32>
      %45 = arith.truncf %44 : vector<128x256xf32> to vector<128x256xbf16>
      %c0_25 = arith.constant 0 : index
      %c0_26 = arith.constant 0 : index
      %46 = vector.load %arg8[%c0_25, %c0_26] : memref<128x256xbf16, #tpu.memory_space<vmem>>, vector<128x256xbf16>
      tpu.vector_store %arg8[%c0_25, %c0_26], %45 {strides = array<i32>} : memref<128x256xbf16, #tpu.memory_space<vmem>>, vector<128x256xbf16>,
      %c0_27 = arith.constant 0 : index
      %c0_28 = arith.constant 0 : index
      %c0_29 = arith.constant 0 : index
      %47 = vector.load %arg7[%c0_27, %c0_28, %c0_29] : memref<1x1x256xf32, #tpu.memory_space<vmem>>, vector<1x1x256xf32>
      %48 = vector.shape_cast %47 : vector<1x1x256xf32> to vector<1x256xf32>
      %49 = vector.broadcast %48 : vector<1x256xf32> to vector<128x256xf32>
      %50 = arith.mulf %40, %49 : vector<128x256xf32>
      %51 = arith.truncf %50 : vector<128x256xf32> to vector<128x256xbf16>
      %c0_30 = arith.constant 0 : index
      %c0_31 = arith.constant 0 : index
      %52 = vector.load %arg9[%c0_30, %c0_31] : memref<128x256xbf16, #tpu.memory_space<vmem>>, vector<128x256xbf16>
      tpu.vector_store %arg9[%c0_30, %c0_31], %51 {strides = array<i32>} : memref<128x256xbf16, #tpu.memory_space<vmem>>, vector<128x256xbf16>,
      %53 = arith.truncf %20 : vector<128x256xf32> to vector<128x256xbf16>
      %c0_32 = arith.constant 0 : index
      %c0_33 = arith.constant 0 : index
      %54 = vector.load %arg10[%c0_32, %c0_33] : memref<128x256xbf16, #tpu.memory_space<vmem>>, vector<128x256xbf16>
      tpu.vector_store %arg10[%c0_32, %c0_33], %53 {strides = array<i32>} : memref<128x256xbf16, #tpu.memory_space<vmem>>, vector<128x256xbf16>,
    } else {
    }
    return
  }
  func.func @transform_0(%arg0: i32, %arg1: i32, %arg2: memref<6xi32, #tpu.memory_space<smem>>) -> (i32, i32) {
    %c0_i32 = arith.constant 0 : i32
    return %arg0, %arg1 : i32, i32
  }
  func.func @transform_1(%arg0: i32, %arg1: i32, %arg2: memref<6xi32, #tpu.memory_space<smem>>) -> (i32, i32, i32) {
    %0 = arith.index_cast %arg0 : i32 to index
    %1 = memref.load %arg2[%0] : memref<6xi32, #tpu.memory_space<smem>>
    %c0_i32 = arith.constant 0 : i32
    %c0_i32_0 = arith.constant 0 : i32
    return %1, %arg1, %c0_i32 : i32, i32, i32
  }
  func.func @transform_2(%arg0: i32, %arg1: i32, %arg2: memref<6xi32, #tpu.memory_space<smem>>) -> (i32, i32, i32) {
    %0 = arith.index_cast %arg0 : i32 to index
    %1 = memref.load %arg2[%0] : memref<6xi32, #tpu.memory_space<smem>>
    %c0_i32 = arith.constant 0 : i32
    %c0_i32_0 = arith.constant 0 : i32
    %c0_i32_1 = arith.constant 0 : i32
    return %1, %c0_i32, %c0_i32_0 : i32, i32, i32
  }
  func.func @transform_3(%arg0: i32, %arg1: i32, %arg2: memref<6xi32, #tpu.memory_space<smem>>) -> (i32, i32, i32) {
    %0 = arith.index_cast %arg0 : i32 to index
    %1 = memref.load %arg2[%0] : memref<6xi32, #tpu.memory_space<smem>>
    %c0_i32 = arith.constant 0 : i32
    %c0_i32_0 = arith.constant 0 : i32
    %c0_i32_1 = arith.constant 0 : i32
    return %1, %c0_i32, %c0_i32_0 : i32, i32, i32
  }
  func.func @transform_4(%arg0: i32, %arg1: i32, %arg2: memref<6xi32, #tpu.memory_space<smem>>) -> (i32, i32, i32) {
    %0 = arith.index_cast %arg0 : i32 to index
    %1 = memref.load %arg2[%0] : memref<6xi32, #tpu.memory_space<smem>>
    %c0_i32 = arith.constant 0 : i32
    %c0_i32_0 = arith.constant 0 : i32
    %c0_i32_1 = arith.constant 0 : i32
    return %1, %c0_i32, %c0_i32_0 : i32, i32, i32
  }
  func.func @transform_5(%arg0: i32, %arg1: i32, %arg2: memref<6xi32, #tpu.memory_space<smem>>) -> (i32, i32) {
    %c0_i32 = arith.constant 0 : i32
    %c0_i32_0 = arith.constant 0 : i32
    return %arg0, %c0_i32 : i32, i32
  }
  func.func @transform_6(%arg0: i32, %arg1: i32, %arg2: memref<6xi32, #tpu.memory_space<smem>>) -> (i32, i32) {
    %c0_i32 = arith.constant 0 : i32
    %c0_i32_0 = arith.constant 0 : i32
    return %arg0, %c0_i32 : i32, i32
  }
  func.func @transform_7(%arg0: i32, %arg1: i32, %arg2: memref<6xi32, #tpu.memory_space<smem>>) -> (i32, i32) {
    %c0_i32 = arith.constant 0 : i32
    %c0_i32_0 = arith.constant 0 : i32
    return %arg0, %c0_i32 : i32, i32
  }
}

module attributes {stable_mosaic.version = 11 : i64} {
  func.func @_flash_attn_kernel(%arg0: i32, %arg1: i32, %arg2: i32, %arg3: i32, %arg4: memref<192x128xf32, #tpu.memory_space<vmem>>, %arg5: memref<192x128xf32, #tpu.memory_space<vmem>>, %arg6: memref<384x128xf32, #tpu.memory_space<vmem>>, %arg7: memref<384x128xf32, #tpu.memory_space<vmem>>, %arg8: memref<1x192x128xbf16, #tpu.memory_space<vmem>>, %arg9: memref<1x384x128xbf16, #tpu.memory_space<vmem>>, %arg10: memref<1x384x128xbf16, #tpu.memory_space<vmem>>, %arg11: memref<1x192x128xbf16, #tpu.memory_space<vmem>>, %arg12: memref<192x1xf32, #tpu.memory_space<vmem>>, %arg13: memref<192x1xf32, #tpu.memory_space<vmem>>, %arg14: memref<192x128xf32, #tpu.memory_space<vmem>>, %arg15: memref<192x128xbf16, #tpu.memory_space<vmem>>) attributes {dimension_semantics = [#tpu.dimension_semantics<parallel>, #tpu.dimension_semantics<parallel>, #tpu.dimension_semantics<parallel>, #tpu.dimension_semantics<arbitrary>], iteration_bounds = array<i64: 2, 2, 2, 1>, scalar_prefetch = 0 : i64, scratch_operands = 4 : i64, tpu.core_type = #tpu.core_type<tc>, window_params = [{transform_indices = @transform_0, window_bounds = array<i64: 192, 128>}, {transform_indices = @transform_1, window_bounds = array<i64: 192, 128>}, {transform_indices = @transform_2, window_bounds = array<i64: 384, 128>}, {transform_indices = @transform_3, window_bounds = array<i64: 384, 128>}, {transform_indices = @transform_4, window_bounds = array<i64: 1, 192, 128>}, {transform_indices = @transform_5, window_bounds = array<i64: 1, 384, 128>}, {transform_indices = @transform_6, window_bounds = array<i64: 1, 384, 128>}, {transform_indices = @transform_7, window_bounds = array<i64: 1, 192, 128>}]} {
    %c0_i32 = arith.constant 0 : i32
    %0 = arith.cmpi eq, %arg3, %c0_i32 : i32
    %1 = arith.extui %0 : i1 to i32
    %c0_i32_0 = arith.constant 0 : i32
    %2 = arith.cmpi ne, %1, %c0_i32_0 : i32
    scf.if %2 {
      %cst_29 = arith.constant 0xFF800000 : f32
      %44 = vector.broadcast %cst_29 : f32 to vector<192x1xf32>
      %c0_30 = arith.constant 0 : index
      %c0_31 = arith.constant 0 : index
      %45 = vector.load %arg12[%c0_30, %c0_31] : memref<192x1xf32, #tpu.memory_space<vmem>>, vector<192x1xf32>
      tpu.vector_store %arg12[%c0_30, %c0_31], %44 {strides = array<i32>} : memref<192x1xf32, #tpu.memory_space<vmem>>, vector<192x1xf32>,
      %cst_32 = arith.constant 0.000000e+00 : f32
      %46 = vector.broadcast %cst_32 : f32 to vector<192x1xf32>
      %c0_33 = arith.constant 0 : index
      %c0_34 = arith.constant 0 : index
      %47 = vector.load %arg13[%c0_33, %c0_34] : memref<192x1xf32, #tpu.memory_space<vmem>>, vector<192x1xf32>
      tpu.vector_store %arg13[%c0_33, %c0_34], %46 {strides = array<i32>} : memref<192x1xf32, #tpu.memory_space<vmem>>, vector<192x1xf32>,
      %cst_35 = arith.constant 0.000000e+00 : f32
      %48 = vector.broadcast %cst_35 : f32 to vector<192x128xf32>
      %c0_36 = arith.constant 0 : index
      %c0_37 = arith.constant 0 : index
      %49 = vector.load %arg14[%c0_36, %c0_37] : memref<192x128xf32, #tpu.memory_space<vmem>>, vector<192x128xf32>
      tpu.vector_store %arg14[%c0_36, %c0_37], %48 {strides = array<i32>} : memref<192x128xf32, #tpu.memory_space<vmem>>, vector<192x128xf32>,
      %c0_38 = arith.constant 0 : index
      %c0_39 = arith.constant 0 : index
      %c0_40 = arith.constant 0 : index
      %50 = vector.load %arg8[%c0_38, %c0_39, %c0_40] : memref<1x192x128xbf16, #tpu.memory_space<vmem>>, vector<1x192x128xbf16>
      %51 = vector.shape_cast %50 : vector<1x192x128xbf16> to vector<192x128xbf16>
      %52 = arith.extf %51 : vector<192x128xbf16> to vector<192x128xf32>
      %c0_41 = arith.constant 0 : index
      %c0_42 = arith.constant 0 : index
      %53 = vector.load %arg4[%c0_41, %c0_42] : memref<192x128xf32, #tpu.memory_space<vmem>>, vector<192x128xf32>
      %54 = arith.mulf %52, %53 : vector<192x128xf32>
      %c64_i32_43 = arith.constant 64 : i32
      %55 = tpu.dynamic_rotate %52 by %c64_i32_43 dim 1 : vector<192x128xf32>, i32 -> vector<192x128xf32>
      %c0_44 = arith.constant 0 : index
      %c0_45 = arith.constant 0 : index
      %56 = vector.load %arg5[%c0_44, %c0_45] : memref<192x128xf32, #tpu.memory_space<vmem>>, vector<192x128xf32>
      %57 = arith.mulf %55, %56 : vector<192x128xf32>
      %58 = arith.addf %54, %57 : vector<192x128xf32>
      %59 = arith.truncf %58 : vector<192x128xf32> to vector<192x128xbf16>
      %c0_46 = arith.constant 0 : index
      %c0_47 = arith.constant 0 : index
      %60 = vector.load %arg15[%c0_46, %c0_47] : memref<192x128xbf16, #tpu.memory_space<vmem>>, vector<192x128xbf16>
      tpu.vector_store %arg15[%c0_46, %c0_47], %59 {strides = array<i32>} : memref<192x128xbf16, #tpu.memory_space<vmem>>, vector<192x128xbf16>,
    } else {
    }
    %c0 = arith.constant 0 : index
    %c0_1 = arith.constant 0 : index
    %c0_2 = arith.constant 0 : index
    %3 = vector.load %arg9[%c0, %c0_1, %c0_2] : memref<1x384x128xbf16, #tpu.memory_space<vmem>>, vector<1x384x128xbf16>
    %4 = vector.shape_cast %3 : vector<1x384x128xbf16> to vector<384x128xbf16>
    %5 = arith.extf %4 : vector<384x128xbf16> to vector<384x128xf32>
    %c0_3 = arith.constant 0 : index
    %c0_4 = arith.constant 0 : index
    %6 = vector.load %arg6[%c0_3, %c0_4] : memref<384x128xf32, #tpu.memory_space<vmem>>, vector<384x128xf32>
    %7 = arith.mulf %5, %6 : vector<384x128xf32>
    %c64_i32 = arith.constant 64 : i32
    %8 = tpu.dynamic_rotate %5 by %c64_i32 dim 1 : vector<384x128xf32>, i32 -> vector<384x128xf32>
    %c0_5 = arith.constant 0 : index
    %c0_6 = arith.constant 0 : index
    %9 = vector.load %arg7[%c0_5, %c0_6] : memref<384x128xf32, #tpu.memory_space<vmem>>, vector<384x128xf32>
    %10 = arith.mulf %8, %9 : vector<384x128xf32>
    %11 = arith.addf %7, %10 : vector<384x128xf32>
    %12 = arith.truncf %11 : vector<384x128xf32> to vector<384x128xbf16>
    %c0_7 = arith.constant 0 : index
    %c0_8 = arith.constant 0 : index
    %13 = vector.load %arg15[%c0_7, %c0_8] : memref<192x128xbf16, #tpu.memory_space<vmem>>, vector<192x128xbf16>
    %cst = arith.constant dense<0.000000e+00> : vector<192x384xf32>
    %14 = tpu.matmul %13, %12, %cst {dimension_numbers = #tpu.dot_dimension_numbers<[1], [1], [0], [0], [0, 0, 1, 0], [], []>} : vector<192x128xbf16>, vector<384x128xbf16>, vector<192x384xf32> -> vector<192x384xf32>
    %c0_9 = arith.constant 0 : index
    %c0_10 = arith.constant 0 : index
    %15 = vector.load %arg12[%c0_9, %c0_10] : memref<192x1xf32, #tpu.memory_space<vmem>>, vector<192x1xf32>
    %cst_11 = arith.constant dense<0xFF800000> : vector<192xf32>
    %16 = vector.multi_reduction <maximumf>, %14, %cst_11 [1] : vector<192x384xf32> to vector<192xf32>
    %17 = vector.shape_cast %16 : vector<192xf32> to vector<192x1xf32>
    %18 = arith.maximumf %15, %17 : vector<192x1xf32>
    %19 = arith.subf %15, %18 : vector<192x1xf32>
    %20 = math.exp %19 : vector<192x1xf32>
    %21 = vector.broadcast %18 : vector<192x1xf32> to vector<192x384xf32>
    %22 = arith.subf %14, %21 : vector<192x384xf32>
    %23 = arith.truncf %22 : vector<192x384xf32> to vector<192x384xbf16>
    %24 = math.exp %23 : vector<192x384xbf16>
    %c0_12 = arith.constant 0 : index
    %c0_13 = arith.constant 0 : index
    %25 = vector.load %arg13[%c0_12, %c0_13] : memref<192x1xf32, #tpu.memory_space<vmem>>, vector<192x1xf32>
    %26 = arith.mulf %20, %25 : vector<192x1xf32>
    %27 = arith.extf %24 : vector<192x384xbf16> to vector<192x384xf32>
    %cst_14 = arith.constant dense<0.000000e+00> : vector<192xf32>
    %28 = vector.multi_reduction <add>, %27, %cst_14 [1] : vector<192x384xf32> to vector<192xf32>
    %29 = vector.shape_cast %28 : vector<192xf32> to vector<192x1xf32>
    %30 = arith.addf %26, %29 : vector<192x1xf32>
    %c0_15 = arith.constant 0 : index
    %c0_16 = arith.constant 0 : index
    %31 = vector.load %arg13[%c0_15, %c0_16] : memref<192x1xf32, #tpu.memory_space<vmem>>, vector<192x1xf32>
    tpu.vector_store %arg13[%c0_15, %c0_16], %30 {strides = array<i32>} : memref<192x1xf32, #tpu.memory_space<vmem>>, vector<192x1xf32>,
    %c0_17 = arith.constant 0 : index
    %c0_18 = arith.constant 0 : index
    %32 = vector.load %arg14[%c0_17, %c0_18] : memref<192x128xf32, #tpu.memory_space<vmem>>, vector<192x128xf32>
    %33 = vector.broadcast %20 : vector<192x1xf32> to vector<192x128xf32>
    %34 = arith.mulf %33, %32 : vector<192x128xf32>
    %c0_19 = arith.constant 0 : index
    %c0_20 = arith.constant 0 : index
    %c0_21 = arith.constant 0 : index
    %35 = vector.load %arg10[%c0_19, %c0_20, %c0_21] : memref<1x384x128xbf16, #tpu.memory_space<vmem>>, vector<1x384x128xbf16>
    %36 = vector.shape_cast %35 : vector<1x384x128xbf16> to vector<384x128xbf16>
    %cst_22 = arith.constant dense<0.000000e+00> : vector<192x128xf32>
    %37 = tpu.matmul %24, %36, %cst_22 {dimension_numbers = #tpu.dot_dimension_numbers<[1], [0], [0], [1], [0, 0, 1, 1], [], []>} : vector<192x384xbf16>, vector<384x128xbf16>, vector<192x128xf32> -> vector<192x128xf32>
    %38 = arith.addf %34, %37 : vector<192x128xf32>
    %c0_23 = arith.constant 0 : index
    %c0_24 = arith.constant 0 : index
    %39 = vector.load %arg14[%c0_23, %c0_24] : memref<192x128xf32, #tpu.memory_space<vmem>>, vector<192x128xf32>
    tpu.vector_store %arg14[%c0_23, %c0_24], %38 {strides = array<i32>} : memref<192x128xf32, #tpu.memory_space<vmem>>, vector<192x128xf32>,
    %c0_25 = arith.constant 0 : index
    %c0_26 = arith.constant 0 : index
    %40 = vector.load %arg12[%c0_25, %c0_26] : memref<192x1xf32, #tpu.memory_space<vmem>>, vector<192x1xf32>
    tpu.vector_store %arg12[%c0_25, %c0_26], %18 {strides = array<i32>} : memref<192x1xf32, #tpu.memory_space<vmem>>, vector<192x1xf32>,
    %c0_i32_27 = arith.constant 0 : i32
    %41 = arith.cmpi eq, %arg3, %c0_i32_27 : i32
    %42 = arith.extui %41 : i1 to i32
    %c0_i32_28 = arith.constant 0 : i32
    %43 = arith.cmpi ne, %42, %c0_i32_28 : i32
    scf.if %43 {
      %c0_29 = arith.constant 0 : index
      %c0_30 = arith.constant 0 : index
      %44 = vector.load %arg13[%c0_29, %c0_30] : memref<192x1xf32, #tpu.memory_space<vmem>>, vector<192x1xf32>
      %45 = tpu.reciprocal %44 {approx = true} : vector<192x1xf32> -> vector<192x1xf32>
      %c0_31 = arith.constant 0 : index
      %c0_32 = arith.constant 0 : index
      %46 = vector.load %arg14[%c0_31, %c0_32] : memref<192x128xf32, #tpu.memory_space<vmem>>, vector<192x128xf32>
      %47 = vector.broadcast %45 : vector<192x1xf32> to vector<192x128xf32>
      %48 = arith.mulf %46, %47 : vector<192x128xf32>
      %49 = arith.truncf %48 : vector<192x128xf32> to vector<192x128xbf16>
      %c0_33 = arith.constant 0 : index
      %c0_34 = arith.constant 0 : index
      %c0_35 = arith.constant 0 : index
      %50 = vector.load %arg11[%c0_33, %c0_34, %c0_35] : memref<1x192x128xbf16, #tpu.memory_space<vmem>>, vector<1x192x128xbf16>
      %51 = vector.shape_cast %50 : vector<1x192x128xbf16> to vector<192x128xbf16>
      %52 = vector.shape_cast %49 : vector<192x128xbf16> to vector<1x192x128xbf16>
      tpu.vector_store %arg11[%c0_33, %c0_34, %c0_35], %52 {strides = array<i32>} : memref<1x192x128xbf16, #tpu.memory_space<vmem>>, vector<1x192x128xbf16>,
    } else {
    }
    return
  }
  func.func @transform_0(%arg0: i32, %arg1: i32, %arg2: i32, %arg3: i32) -> (i32, i32) {
    %c0_i32 = arith.constant 0 : i32
    %c0_i32_0 = arith.constant 0 : i32
    return %arg2, %c0_i32 : i32, i32
  }
  func.func @transform_1(%arg0: i32, %arg1: i32, %arg2: i32, %arg3: i32) -> (i32, i32) {
    %c0_i32 = arith.constant 0 : i32
    %c0_i32_0 = arith.constant 0 : i32
    return %arg2, %c0_i32 : i32, i32
  }
  func.func @transform_2(%arg0: i32, %arg1: i32, %arg2: i32, %arg3: i32) -> (i32, i32) {
    %c0_i32 = arith.constant 0 : i32
    %c0_i32_0 = arith.constant 0 : i32
    return %arg3, %c0_i32 : i32, i32
  }
  func.func @transform_3(%arg0: i32, %arg1: i32, %arg2: i32, %arg3: i32) -> (i32, i32) {
    %c0_i32 = arith.constant 0 : i32
    %c0_i32_0 = arith.constant 0 : i32
    return %arg3, %c0_i32 : i32, i32
  }
  func.func @transform_4(%arg0: i32, %arg1: i32, %arg2: i32, %arg3: i32) -> (i32, i32, i32) {
    %c0_i32 = arith.constant 0 : i32
    return %arg0, %arg2, %arg1 : i32, i32, i32
  }
  func.func @transform_5(%arg0: i32, %arg1: i32, %arg2: i32, %arg3: i32) -> (i32, i32, i32) {
    %c0_i32 = arith.constant 0 : i32
    return %arg0, %arg3, %arg1 : i32, i32, i32
  }
  func.func @transform_6(%arg0: i32, %arg1: i32, %arg2: i32, %arg3: i32) -> (i32, i32, i32) {
    %c0_i32 = arith.constant 0 : i32
    return %arg0, %arg3, %arg1 : i32, i32, i32
  }
  func.func @transform_7(%arg0: i32, %arg1: i32, %arg2: i32, %arg3: i32) -> (i32, i32, i32) {
    %c0_i32 = arith.constant 0 : i32
    return %arg0, %arg2, %arg1 : i32, i32, i32
  }
}

module attributes {stable_mosaic.version = 11 : i64} {
  func.func @_linear_dual_kernel(%arg0: i32, %arg1: i32, %arg2: i32, %arg3: memref<6xi32, #tpu.memory_space<smem>>, %arg4: memref<128x256xbf16, #tpu.memory_space<vmem>>, %arg5: memref<1x256x256xbf16, #tpu.memory_space<vmem>>, %arg6: memref<1x1x256xf32, #tpu.memory_space<vmem>>, %arg7: memref<128x256xbf16, #tpu.memory_space<vmem>>, %arg8: memref<128x256xf32, #tpu.memory_space<vmem>>) attributes {dimension_semantics = [#tpu.dimension_semantics<parallel>, #tpu.dimension_semantics<parallel>, #tpu.dimension_semantics<arbitrary>], iteration_bounds = array<i64: 6, 1, 1>, scalar_prefetch = 1 : i64, scratch_operands = 1 : i64, tpu.core_type = #tpu.core_type<tc>, window_params = [{transform_indices = @transform_0, window_bounds = array<i64: 128, 256>}, {transform_indices = @transform_1, window_bounds = array<i64: 1, 256, 256>}, {transform_indices = @transform_2, window_bounds = array<i64: 1, 1, 256>}, {transform_indices = @transform_3, window_bounds = array<i64: 128, 256>}]} {
    %c0_i32 = arith.constant 0 : i32
    %0 = arith.cmpi eq, %arg2, %c0_i32 : i32
    %1 = arith.extui %0 : i1 to i32
    %c0_i32_0 = arith.constant 0 : i32
    %2 = arith.cmpi ne, %1, %c0_i32_0 : i32
    scf.if %2 {
      %cst_11 = arith.constant 0.000000e+00 : f32
      %13 = vector.broadcast %cst_11 : f32 to vector<128x256xf32>
      %c0_12 = arith.constant 0 : index
      %c0_13 = arith.constant 0 : index
      %14 = vector.load %arg8[%c0_12, %c0_13] : memref<128x256xf32, #tpu.memory_space<vmem>>, vector<128x256xf32>
      tpu.vector_store %arg8[%c0_12, %c0_13], %13 {strides = array<i32>} : memref<128x256xf32, #tpu.memory_space<vmem>>, vector<128x256xf32>,
    } else {
    }
    %c0 = arith.constant 0 : index
    %c0_1 = arith.constant 0 : index
    %3 = vector.load %arg8[%c0, %c0_1] : memref<128x256xf32, #tpu.memory_space<vmem>>, vector<128x256xf32>
    %c0_2 = arith.constant 0 : index
    %c0_3 = arith.constant 0 : index
    %4 = vector.load %arg4[%c0_2, %c0_3] : memref<128x256xbf16, #tpu.memory_space<vmem>>, vector<128x256xbf16>
    %c0_4 = arith.constant 0 : index
    %c0_5 = arith.constant 0 : index
    %c0_6 = arith.constant 0 : index
    %5 = vector.load %arg5[%c0_4, %c0_5, %c0_6] : memref<1x256x256xbf16, #tpu.memory_space<vmem>>, vector<1x256x256xbf16>
    %6 = vector.shape_cast %5 : vector<1x256x256xbf16> to vector<256x256xbf16>
    %cst = arith.constant dense<0.000000e+00> : vector<128x256xf32>
    %7 = tpu.matmul %4, %6, %cst {dimension_numbers = #tpu.dot_dimension_numbers<[1], [0], [0], [1], [0, 0, 1, 1], [], []>} : vector<128x256xbf16>, vector<256x256xbf16>, vector<128x256xf32> -> vector<128x256xf32>
    %8 = arith.addf %3, %7 : vector<128x256xf32>
    %c0_7 = arith.constant 0 : index
    %c0_8 = arith.constant 0 : index
    %9 = vector.load %arg8[%c0_7, %c0_8] : memref<128x256xf32, #tpu.memory_space<vmem>>, vector<128x256xf32>
    tpu.vector_store %arg8[%c0_7, %c0_8], %8 {strides = array<i32>} : memref<128x256xf32, #tpu.memory_space<vmem>>, vector<128x256xf32>,
    %c0_i32_9 = arith.constant 0 : i32
    %10 = arith.cmpi eq, %arg2, %c0_i32_9 : i32
    %11 = arith.extui %10 : i1 to i32
    %c0_i32_10 = arith.constant 0 : i32
    %12 = arith.cmpi ne, %11, %c0_i32_10 : i32
    scf.if %12 {
      %c0_11 = arith.constant 0 : index
      %c0_12 = arith.constant 0 : index
      %13 = vector.load %arg8[%c0_11, %c0_12] : memref<128x256xf32, #tpu.memory_space<vmem>>, vector<128x256xf32>
      %c0_13 = arith.constant 0 : index
      %c0_14 = arith.constant 0 : index
      %c0_15 = arith.constant 0 : index
      %14 = vector.load %arg6[%c0_13, %c0_14, %c0_15] : memref<1x1x256xf32, #tpu.memory_space<vmem>>, vector<1x1x256xf32>
      %15 = vector.shape_cast %14 : vector<1x1x256xf32> to vector<1x256xf32>
      %16 = vector.broadcast %15 : vector<1x256xf32> to vector<128x256xf32>
      %17 = arith.addf %13, %16 : vector<128x256xf32>
      %18 = arith.truncf %17 : vector<128x256xf32> to vector<128x256xbf16>
      %c0_16 = arith.constant 0 : index
      %c0_17 = arith.constant 0 : index
      %19 = vector.load %arg7[%c0_16, %c0_17] : memref<128x256xbf16, #tpu.memory_space<vmem>>, vector<128x256xbf16>
      tpu.vector_store %arg7[%c0_16, %c0_17], %18 {strides = array<i32>} : memref<128x256xbf16, #tpu.memory_space<vmem>>, vector<128x256xbf16>,
    } else {
    }
    return
  }
  func.func @transform_0(%arg0: i32, %arg1: i32, %arg2: i32, %arg3: memref<6xi32, #tpu.memory_space<smem>>) -> (i32, i32) {
    %c0_i32 = arith.constant 0 : i32
    return %arg0, %arg2 : i32, i32
  }
  func.func @transform_1(%arg0: i32, %arg1: i32, %arg2: i32, %arg3: memref<6xi32, #tpu.memory_space<smem>>) -> (i32, i32, i32) {
    %0 = arith.index_cast %arg0 : i32 to index
    %1 = memref.load %arg3[%0] : memref<6xi32, #tpu.memory_space<smem>>
    %c0_i32 = arith.constant 0 : i32
    return %1, %arg2, %arg1 : i32, i32, i32
  }
  func.func @transform_2(%arg0: i32, %arg1: i32, %arg2: i32, %arg3: memref<6xi32, #tpu.memory_space<smem>>) -> (i32, i32, i32) {
    %0 = arith.index_cast %arg0 : i32 to index
    %1 = memref.load %arg3[%0] : memref<6xi32, #tpu.memory_space<smem>>
    %c0_i32 = arith.constant 0 : i32
    %c0_i32_0 = arith.constant 0 : i32
    return %1, %c0_i32, %arg1 : i32, i32, i32
  }
  func.func @transform_3(%arg0: i32, %arg1: i32, %arg2: i32, %arg3: memref<6xi32, #tpu.memory_space<smem>>) -> (i32, i32) {
    %c0_i32 = arith.constant 0 : i32
    return %arg0, %arg1 : i32, i32
  }
}

</mosaic_0001>

<bundles_post_ra>
// kernel: hd_attention_forward.5
= control target key start
LH: loop header
LB: loop body
LE: loop exit
PB: predicated region body
PF: predicated region fallthrough
CT: control target
= control target key end

     0   :  { %s2334_s0 = inlined_call_operand.hbm [shape: s32[6], index: 0, kind: input, shape index: {}]   ;;  %s2335_s1 = inlined_call_operand.hbm [shape: bf16[768,256], index: 1, kind: input, shape index: {}]   ;;  %s2336_s2 = inlined_call_operand.hbm [shape: bf16[2,256,256], index: 2, kind: input, shape index: {}]   ;;  %s2337_s3 = inlined_call_operand.hbm [shape: f32[2,1,256], index: 3, kind: input, shape index: {}]   ;;  %s2338_s4 = inlined_call_operand.hbm [shape: bf16[768,256], index: 4, kind: output, shape index: {}]  }
   0x1   :  { %2353 = sst [smem:[#allocation28_spill]] %s2335_s1  ;;  %s1553_s17 = scalar_lea.hbm %s2334_s0, 16 }
   0x2   :  { %2354 = sst [smem:[#allocation29_spill]] %s2336_s2  ;;  %p1554_p0 = scmp.ne.s32.totalorder %s2334_s0, %s1553_s17 }
   0x3   :  { %p1557_p1 = scmp.lt.u32.totalorder %s1553_s17, %s2334_s0 }
   0x5   :  { %p1559_p2 = pnand %p1557_p1, %p1554_p0 }
   0x7   :  { %1562 = shalt.err (!%p1559_p2)  }
   0x8   :  { %s1795_s22 = smov [#allocation4]  }
   0x9   :  { %10 = dma.hbm_to_smem %s2334_s0, 16, %s1795_s22, [#allocation3] }
   0xa   :  { %1729 = dma.done.wait [#allocation3], 16 }
   0xb   :  { %1730 = vsyncadd [#allocation3], 4294967280 }
   0xc   :  { %12 = sfence }
   0xd   :  { %13 = vsyncpa [#allocation6], 0 }
   0xe   :  { %15 = vsyncpa [#allocation6 + $0x1], 0 }
   0xf   :  { %16 = vsyncpa [#allocation9], 0 }
  0x10   :  { %18 = vsyncpa [#allocation9 + $0x1], 0 }
  0x11   :  { %19 = vsyncpa [#allocation7], 0 }
  0x12   :  { %21 = vsyncpa [#allocation7 + $0x1], 0  ;;  %s1841_s25 = smov 0   ;;  %s1843_s26 = smov 0  }
  0x13   :  { %s1845_s27 = smov 0   ;;  %s1847_s28 = smov 0  }
  0x14   :  { %s1849_s29 = smov 0   ;;  %s1851_s0 = smov 0  }
  0x15   :  { %s1853_s30 = smov 0   ;;  %s1855_s5 = smov 0  }
  0x16   :  { %s1857_s6 = smov 0   ;;  %s1859_s7 = smov 0  }
  0x17   :  { %s1861_s8 = smov 0   ;;  %s1863_s9 = smov 0  }
  0x18 LB: > { %2355 = sst [smem:[#allocation21_spill]] %s1769_s0  ;;  %s1900_s10 = sadd.s32 4294967295, %s1793_s9   ;;  %s1793_s9 = sphi %s1863_s9, %s27_s9   ;;  %s1789_s8 = sphi %s1861_s8, %s2404_s8   ;;  %s1785_s7 = sphi %s1859_s7, %s2403_s7   ;;  %s1781_s6 = sphi %s1857_s6, %s2394_s6   ;;  %s1777_s5 = sphi %s1855_s5, %s2402_s5   ;;  %s1773_s30 = sphi %s1853_s30, %s2401_s30   ;;  %s1769_s0 = sphi %s1851_s0, %s2392_s0   ;;  %s1765_s29 = sphi %s1849_s29, %s2400_s29   ;;  %s1761_s28 = sphi %s1847_s28, %s2399_s28   ;;  %s1757_s27 = sphi %s1845_s27, %s2398_s27   ;;  %s1753_s26 = sphi %s1843_s26, %s2397_s26   ;;  %s1749_s25 = sphi %s1841_s25, %s2396_s25  }
  0x19   : > { %2356 = sst [smem:[#allocation22_spill]] %s1773_s30  ;;  %s46_s11 = sadd.s32 1, %s1789_s8 }
  0x1a   : > { %2357 = sst [smem:[#allocation23_spill]] %s1781_s6  ;;  %p48_p3 = scmp.ge.s32.totalorder %s46_s11, 6 }
  0x1b   : > { %p2341_p4 = scmp.eq.s32.totalorder %s1793_s9, 0  ;;  %p2340_p5 = scmp.eq.s32.totalorder %s1900_s10, 0 }
  0x1c   : > { %s78_s12 = sld [smem:[#allocation4 + %s1789_s8]]  ;;  %s2406_s11 = smov (%p48_p3, %s46_s11), 0 }
  0x1d   : > { %2358 = sst [smem:[#allocation24_spill]] %s2406_s11  ;;  %s87_s13 = sadd.s32 1, %s1769_s0 }
  0x1e   : > { %p94_p6 = scmp.ne.s32.totalorder %s1769_s0, %s1765_s29  ;;  %s79_s14 = sld [smem:[#allocation4 + %s2406_s11]] }
  0x1f   : > { %p100_p7 = scmp.ne.s32.totalorder %s1765_s29, %s1761_s28  ;;  %p2339_p10 = scmp.lt.s32.totalorder %s1793_s9, 6 }
  0x20   : > { %p1915_p8 = por %p94_p6, %p2341_p4  ;;  %s206_s17 = sand.u32 1, %s1793_s9  }
  0x21   : > { %p1921_p9 = por %p100_p7, %p2340_p5  ;;  %s208_s18 = sand.u32 1, %s1769_s0  }
  0x22   : > { %s1213_s19 = sshll.u32 %s208_s18, 8  ;;  %p1946_p12 = pnand %p2339_p10, %p1915_p8 }
  0x23   : > { %s2360_s16 = scalar_select %p1921_p9, 1, 0 }
  0x24   : > { %s80_s20 = ssub.s32 %s78_s12, %s79_s14  ;;  %s210_s21 = scalar_lea.vmem [#allocation8], %s1213_s19 }
  0x25   : > { %p85_p11 = scmp.eq.s32.totalorder %s80_s20, 0  ;;  %s223_s22 = sshll.u32 %s210_s21, 4  ;;  %s1940_s22 = int_to_ptr.vmem [resolvable:$true] %s223_s22 }
  0x26   : > { %s1349_s23 = scalar_select %p1915_p8, [#allocation4], [#allocation12] }
  0x27   : > { %s1931_s24 = scalar_select %p85_p11, %s1769_s0, %s87_s13  }
  0x28   : > { %s1350_s28 = scalar_select %p1915_p8, %s1789_s8, 0 }
  0x29   : > { %2361 = sst [smem:[#allocation25_spill]] %s1931_s24  ;;  %s2408_s23 = smov (!%p2339_p10, %s1349_s23), [#allocation14] }
  0x2a   : > { %s2410_s28 = smov (!%p2339_p10, %s1350_s28), 0  ;;  %p1219_p13 = scmp.ge.s32.totalorder %s1793_s9, 1 }
  0x2b   : > { %s211_s14 = sld [smem:[%s2408_s23 + %s2410_s28]]  ;;  %p253_p0 = scmp.lt.s32.totalorder %s1793_s9, 7 }
  0x2c   : > { %s2364_s2 = sld [smem:[#allocation29_spill]]  ;;  %s1206_s15 = sadd.s32 4294967294, %s1793_s9  }
  0x2d   : > { %p1952_p1 = pnand %p1219_p13, %p253_p0  ;;  %s1962_s24 = scalar_lea.sflag [#allocation9], %s206_s17 }
  0x2e   : > { %p1565_p3 = pneg %p1946_p12 }
  0x31   : > { %s1296_s18 = sshll.u32 %s211_s14, 12 }
  0x32   : > { %s1959_s21 = scalar_lea.hbm %s2364_s2, %s1296_s18  ;;  %s1568_s18 = scalar_lea.hbm %s2364_s2, 8192 }
  0x33   : > { %s1563_s23 = scalar_lea.hbm %s1959_s21, 4096  ;;  %p1569_p8 = scmp.lt.u32.totalorder %s1959_s21, %s2364_s2 }
  0x34   : > { %p1564_p2 = scmp.ne.s32.totalorder %s1959_s21, %s1563_s23  ;;  %p1570_p11 = scmp.lt.u32.totalorder %s1568_s18, %s1563_s23 }
  0x35   : > { %p1572_p0 = scmp.lt.u32.totalorder %s1563_s23, %s1959_s21 }
  0x36   : > { %p1566_p6 = pnand %p1565_p3, %p1564_p2  ;;  %p1571_p13 = por %p1570_p11, %p1569_p8 }
  0x38   : > { %p1567_p7 = pneg %p1566_p6  ;;  %p1573_p10 = por %p1572_p0, %p1571_p13 }
  0x3a   : > { %p1574_p5 = pnand %p1573_p10, %p1567_p7 }
  0x3c   : > { %1577 = shalt.err (!%p1574_p5)
}
  0x3d   : > { %s1578_s17 = scalar_lea.vmem %s1940_s22, 4096  ;;  %s1796_s28 = smov [#allocation8]  }
  0x3e   : > { %p1579_p2 = scmp.ne.s32.totalorder %s1940_s22, %s1578_s17  ;;  %s1583_s14 = sshll.u32 %s1796_s28, 4  ;;  %s1584_s14 = int_to_ptr.vmem [resolvable:$false] %s1583_s14 }
  0x3f   : > { %s1585_s19 = scalar_lea.vmem %s1584_s14, 8192  ;;  %p1586_p9 = scmp.lt.s32.totalorder %s1940_s22, %s1584_s14 }
  0x40   : > { %p1581_p6 = pnand %p1579_p2, %p1565_p3  ;;  %p1587_p8 = scmp.lt.s32.totalorder %s1585_s19, %s1578_s17 }
  0x42   : > { %p1582_p4 = pneg %p1581_p6  ;;  %p1588_p11 = por %p1587_p8, %p1586_p9 }
  0x44   : > { %p1589_p13 = pnand %p1588_p11, %p1582_p4 }
  0x46   : > { %1592 = shalt.err (!%p1589_p13)
}
  0x47   : > { %s2343_s23 = smov 128   ;;  %s2344_s18 = smov 8  }
  0x48   : > { %1368 = dma.hbm_to_vmem [thread:$0]  (!%p1946_p12), %s1959_s21, 4096, %s1940_s22, %s1962_s24, %s2343_s23, %s2343_s23, %s2344_s18  }
  0x49   : > { %s50_s20 = ssub.s32 %s1789_s8, %s2406_s11  ;;  %s55_s17 = sadd.s32 1, %s1781_s6 }
  0x4a   : > { %p53_p4 = scmp.eq.s32.totalorder %s50_s20, 0  ;;  %p62_p5 = scmp.ne.s32.totalorder %s1781_s6, %s1777_s5 }
  0x4b   : > { %p68_p9 = scmp.ne.s32.totalorder %s1777_s5, %s1773_s30  ;;  %p156_p10 = scmp.eq.s32.totalorder %s1900_s10, 5 }
  0x4c   : > { %s2002_s28 = scalar_select %p53_p4, %s1781_s6, %s55_s17  }
  0x4d   : > { %p2366_p3 = scmp.eq.s32.totalorder %s1793_s9, 0  ;;  %p2367_p0 = scmp.eq.s32.totalorder %s1900_s10, 0 }
  0x4e   : > { %2365 = sst [smem:[#allocation26_spill]] %s2002_s28  ;;  %p2012_p6 = por %p156_p10, %p62_p5 }
  0x4f   : > { %p64_p7 = por %p2366_p3, %p62_p5  ;;  %p2008_p2 = por %p2367_p0, %p68_p9 }
  0x50   : > { %s2369_s12 = scalar_select %p2012_p6, 1, 0 }
  0x51   : > { %s2368_s14 = scalar_select %p2008_p2, 1, 0 }
  0x52   : > { %p162_p12 = scmp.eq.s32.totalorder %s1206_s15, 5  ;;  %s182_s22 = sand.u32 1, %s1781_s6  }
  0x53   : > { %s1295_s21 = sshll.u32 %s1789_s8, 11  ;;  %s1209_s20 = sshll.u32 %s182_s22, 7 }
  0x54   : > { %p2020_p8 = por %p162_p12, %p68_p9  ;;  %s2372_s1 = sld [smem:[#allocation28_spill]] }
  0x55   : > { %p2373_p11 = scmp.lt.s32.totalorder %s1793_s9, 6  ;;  %s186_s15 = scalar_lea.vmem [#allocation5], %s1209_s20 }
  0x56   : > { %s2370_s19 = scalar_select %p2020_p8, 1, 0 }
  0x57   : > { %p2031_p13 = pnand %p2373_p11, %p64_p7  ;;  %s196_s28 = sshll.u32 %s186_s15, 4  ;;  %s2035_s28 = int_to_ptr.vmem [resolvable:$true] %s196_s28 }
  0x58   : > { %2371 = sst [smem:[#allocation27_spill]] %s2370_s19  ;;  %s2037_s6 = scalar_lea.sflag [#allocation6], %s182_s22 }
  0x59   : > { %p1595_p5 = pneg %p2031_p13 }
  0x5a   : > { %s2027_s18 = scalar_lea.hbm %s2372_s1, %s1295_s21  ;;  %s1598_s0 = scalar_lea.hbm %s2372_s1, 12288 }
  0x5b   : > { %s1593_s23 = scalar_lea.hbm %s2027_s18, 2048  ;;  %p1599_p3 = scmp.lt.u32.totalorder %s2027_s18, %s2372_s1 }
  0x5c   : > { %p1594_p4 = scmp.ne.s32.totalorder %s2027_s18, %s1593_s23  ;;  %p1600_p7 = scmp.lt.u32.totalorder %s1598_s0, %s1593_s23 }
  0x5d   : > { %p1602_p12 = scmp.lt.u32.totalorder %s1593_s23, %s2027_s18 }
  0x5e   : > { %p1596_p9 = pnand %p1595_p5, %p1594_p4  ;;  %p1601_p0 = por %p1600_p7, %p1599_p3 }
  0x60   : > { %p1597_p10 = pneg %p1596_p9  ;;  %p1603_p11 = por %p1602_p12, %p1601_p0 }
  0x62   : > { %p1604_p8 = pnand %p1603_p11, %p1597_p10 }
  0x64   : > { %1607 = shalt.err (!%p1604_p8)
}
  0x65   : > { %s1608_s22 = scalar_lea.vmem %s2035_s28, 2048  ;;  %s1799_s20 = smov [#allocation5]  }
  0x66   : > { %p1609_p4 = scmp.ne.s32.totalorder %s2035_s28, %s1608_s22  ;;  %s1613_s15 = sshll.u32 %s1799_s20, 4  ;;  %s1614_s15 = int_to_ptr.vmem [resolvable:$false] %s1613_s15 }
  0x67   : > { %s1615_s30 = scalar_lea.vmem %s1614_s15, 4096  ;;  %p1616_p2 = scmp.lt.s32.totalorder %s2035_s28, %s1614_s15 }
  0x68   : > { %p1611_p9 = pnand %p1609_p4, %p1595_p5  ;;  %p1617_p3 = scmp.lt.s32.totalorder %s1615_s30, %s1608_s22 }
  0x6a   : > { %p1612_p6 = pneg %p1611_p9  ;;  %p1618_p7 = por %p1617_p3, %p1616_p2 }
  0x6c   : > { %p1619_p0 = pnand %p1618_p7, %p1612_p6 }
  0x6e   : > { %1622 = shalt.err (!%p1619_p0)
}
  0x6f   : > { %s2375_s0 = smov 8   ;;  %s2376_s19 = smov 128  }
  0x70   : > { %1363 = dma.hbm_to_vmem [thread:$0]  (!%p2031_p13), %s2027_s18, 2048, %s2035_s28, %s2037_s6, %s2376_s19, %s2376_s19, %s2375_s0  }
  0x71   : > { %s110_s2 = sld [smem:[#allocation4 + %s1789_s8]]  ;;  %p124_p2 = scmp.ne.s32.totalorder %s1757_s27, %s1753_s26 }
  0x72   : > { %s111_s23 = sld [smem:[#allocation4 + %s2406_s11]]  ;;  %p130_p6 = scmp.ne.s32.totalorder %s1753_s26, %s1749_s25 }
  0x73   : > { %p2377_p8 = scmp.eq.s32.totalorder %s1900_s10, 0  ;;  %s235_s17 = sand.u32 1, %s1757_s27  }
  0x74   : > { %p2379_p10 = scmp.eq.s32.totalorder %s1793_s9, 0  ;;  %s117_s22 = sadd.s32 1, %s1757_s27 }
  0x75   : > { %p2076_p5 = por %p130_p6, %p2377_p8  ;;  %s1216_s15 = sshll.u32 %s235_s17, 1 }
  0x76   : > { %p126_p12 = por %p124_p2, %p2379_p10  ;;  %p2380_p4 = scmp.lt.s32.totalorder %s1793_s9, 6 }
  0x77   : > { %s2378_s21 = scalar_select %p2076_p5, 1, 0 }
  0x78   : > { %s112_s20 = ssub.s32 %s110_s2, %s111_s23  ;;  %p2086_p13 = pnand %p2380_p4, %p126_p12 }
  0x79   : > { %p115_p11 = scmp.eq.s32.totalorder %s112_s20, 0  ;;  %p2382_p9 = pmov %p2380_p4 }
  0x7a   : > { %s1352_s25 = scalar_select %p126_p12, [#allocation4], [#allocation13] }
  0x7b   : > { %s2091_s18 = scalar_select %p115_p11, %s1757_s27, %s117_s22  }
  0x7c   : > { %s1353_s28 = scalar_select %p126_p12, %s1789_s8, 0 }
  0x7d   : > { %s2412_s25 = smov (!%p2382_p9, %s1352_s25), [#allocation15]  ;;  %p2383_p3 = pmov %p2380_p4 }
  0x7e   : > { %s237_s0 = scalar_lea.vmem [#allocation10], %s1216_s15  ;;  %p1625_p0 = pneg %p2086_p13 }
  0x7f   : > { %s2414_s28 = smov (!%p2383_p3, %s1353_s28), 0  ;;  %s248_s19 = sshll.u32 %s237_s0, 4  ;;  %s2098_s19 = int_to_ptr.vmem [resolvable:$true] %s248_s19 }
  0x80   : > { %s238_s30 = sld [smem:[%s2412_s25 + %s2414_s28]]  ;;  %s1628_s15 = scalar_lea.hbm %s2337_s3, 64 }
  0x86   : > { %s1297_s2 = sshll.u32 %s238_s30, 5 }
  0x87   : > { %s246_s20 = scalar_lea.hbm %s2337_s3, %s1297_s2 }
  0x88   : > { %s1623_s1 = scalar_lea.hbm %s246_s20, 32  ;;  %p1629_p8 = scmp.lt.u32.totalorder %s246_s20, %s2337_s3 }
  0x89   : > { %p1624_p7 = scmp.ne.s32.totalorder %s246_s20, %s1623_s1  ;;  %p1630_p10 = scmp.lt.u32.totalorder %s1628_s15, %s1623_s1 }
  0x8a   : > { %p1632_p11 = scmp.lt.u32.totalorder %s1623_s1, %s246_s20 }
  0x8b   : > { %p1626_p2 = pnand %p1625_p0, %p1624_p7  ;;  %p1631_p12 = por %p1630_p10, %p1629_p8 }
  0x8d   : > { %p1627_p6 = pneg %p1626_p2  ;;  %p1633_p4 = por %p1632_p11, %p1631_p12 }
  0x8f   : > { %p1634_p9 = pnand %p1633_p4, %p1627_p6 }
  0x91   : > { %1637 = shalt.err (!%p1634_p9)
}
  0x92   : > { %s1638_s30 = scalar_lea.vmem %s2098_s19, 32  ;;  %s1800_s11 = smov [#allocation10]  }
  0x93   : > { %p1639_p3 = scmp.ne.s32.totalorder %s2098_s19, %s1638_s30  ;;  %s1643_s0 = sshll.u32 %s1800_s11, 4  ;;  %s1644_s0 = int_to_ptr.vmem [resolvable:$false] %s1643_s0 }
  0x94   : > { %s1645_s2 = scalar_lea.vmem %s1644_s0, 64  ;;  %p1646_p5 = scmp.lt.s32.totalorder %s2098_s19, %s1644_s0 }
  0x95   : > { %p1641_p7 = pnand %p1639_p3, %p1625_p0  ;;  %p1647_p8 = scmp.lt.s32.totalorder %s1645_s2, %s1638_s30 }
  0x97   : > { %p1642_p2 = pneg %p1641_p7  ;;  %p1648_p10 = por %p1647_p8, %p1646_p5 }
  0x99   : > { %p1649_p12 = pnand %p1648_p10, %p1642_p2 }
  0x9b   : > { %1652 = shalt.err (!%p1649_p12)
}
  0x9c   : > { %1373 = dma.hbm_to_vmem [thread:$0]  (!%p2086_p13), %s246_s20, 32, %s2098_s19, %s1962_s24  }
  0x9d   : > { %257 = sbr.rel (%p1952_p1) target bundleno = 497 (0x1f1), region = 32  ;;  %s2127_s1 = sand.u32 (!%p1952_p1), 1, %s1777_s5  }
  0x9e   : > { %s1220_s23 = sshll.u32 (!%p1952_p1), %s2127_s1, 7  ;;  %s260_s17 = scalar_lea.sflag (!%p1952_p1), [#allocation6], %s2127_s1 }
  0x9f   : > { %s2133_s22 = scalar_lea.vmem (!%p1952_p1), [#allocation5], %s1220_s23  ;;  %p2384_p5 = scmp.ne.s32.totalorder (!%p1952_p1), %s2368_s14, 0 }
  0xa4   : > { %1732 = dma.done.wait (%p2384_p5), %s260_s17, 2048  }
  0xa5   : > { %1734 = vsyncadd (%p2384_p5), %s260_s17, 4294965248  ;;  %s268_s24 = sand.u32 1, %s1900_s10   ;;  %s270_s13 = sand.u32 1, %s1765_s29  }
  0xa6   : > { %s1221_s6 = sshll.u32 %s270_s13, 8  ;;  %s269_s19 = scalar_lea.sflag [#allocation9], %s268_s24 }
  0xa7   : > { %s2141_s20 = scalar_lea.vmem [#allocation8], %s1221_s6  ;;  %p2385_p1 = scmp.ne.s32.totalorder %s2360_s16, 0 }
  0xa9   : > { %1736 = dma.done.wait (%p2385_p1), %s269_s19, 4096  }
  0xaa   : > { %1738 = vsyncadd (%p2385_p1), %s269_s19, 4294963200  ;;  %s279_s15 = sand.u32 1, %s1753_s26   ;;  %p2386_p13 = scmp.ne.s32.totalorder %s2378_s21, 0 }
  0xab   : > { %s2148_s25 = sshll.u32 %s279_s15, 1 }
  0xac   : > { %s281_s14 = scalar_lea.vmem [#allocation10], %s2148_s25 }
  0xad   : > { %1740 = dma.done.wait (%p2386_p13), %s269_s19, 32  }
  0xae   : > { %1742 = vsyncadd (%p2386_p13), %s269_s19, 4294967264  ;;  %v1481_v0 = vld [vmem:[%s2141_s20 + $0x4] ss:$8 sps:$4 sm:$0xff]   ;;  %v1483_v1 = vld [vmem:[%s2141_s20] ss:$8 sps:$4 sm:$0xff]   ;;  %v893_v48 = vlaneseq  ;;  %s2219_s10 = scalar_lea.vmem [#allocation11], %s1220_s23 }
  0xaf   : > { %679 = vmatprep.subr.bf16.mxu0 %v1481_v0  ;;  %1316 = vmatprep.subr.bf16.mxu1 %v1481_v0  ;;  %v1484_v2 = vld [vmem:[%s2141_s20 + $0x14] ss:$8 sps:$4 sm:$0xff]   ;;  %v1486_v3 = vld [vmem:[%s2141_s20 + $0x10] ss:$8 sps:$4 sm:$0xff]   ;;  %v1487_v4 = vld [vmem:[%s2141_s20 + $0x24] ss:$8 sps:$4 sm:$0xff]  }
  0xb0   : > { %680 = vmatpush1.bf16.msra.mxu0 %v1483_v1  ;;  %1332 = vmatpush1.bf16.msra.mxu1 %v1483_v1  ;;  %v1489_v5 = vld [vmem:[%s2141_s20 + $0x20] ss:$8 sps:$4 sm:$0xff]   ;;  %v1490_v6 = vld [vmem:[%s2141_s20 + $0x34] ss:$8 sps:$4 sm:$0xff]   ;;  %v1492_v7 = vld [vmem:[%s2141_s20 + $0x30] ss:$8 sps:$4 sm:$0xff]  }
  0xb1   : > { %681 = vmatprep.subr.bf16.mxu0 %v1484_v2  ;;  %1317 = vmatprep.subr.bf16.mxu1 %v1484_v2  ;;  %v1493_v8 = vld [vmem:[%s2141_s20 + $0x44] ss:$8 sps:$4 sm:$0xff]   ;;  %v1495_v9 = vld [vmem:[%s2141_s20 + $0x40] ss:$8 sps:$4 sm:$0xff]   ;;  %v1496_v10 = vld [vmem:[%s2141_s20 + $0x54] ss:$8 sps:$4 sm:$0xff]  }
  0xb2   : > { %v1498_v11 = vld [vmem:[%s2141_s20 + $0x50] ss:$8 sps:$4 sm:$0xff]   ;;  %v1499_v12 = vld [vmem:[%s2141_s20 + $0x64] ss:$8 sps:$4 sm:$0xff]   ;;  %v1501_v14 = vld [vmem:[%s2141_s20 + $0x60] ss:$8 sps:$4 sm:$0xff]  }
  0xb3   : > { %v1531_v13 = vld [vmem:[%s2133_s22 + $0x4] ss:$8 sps:$4 sm:$0xff]   ;;  %v1502_v16 = vld [vmem:[%s2141_s20 + $0x74] ss:$8 sps:$4 sm:$0xff]   ;;  %v1504_v17 = vld [vmem:[%s2141_s20 + $0x70] ss:$8 sps:$4 sm:$0xff]  }
  0xb4   : > { %682 = vmatpush1.bf16.msra.mxu0 %v1486_v3  ;;  %1333 = vmatpush1.bf16.msra.mxu1 %v1486_v3  ;;  %v1534_v15 = vld [vmem:[%s2133_s22 + $0x44] ss:$8 sps:$4 sm:$0xff]   ;;  %v1507_v19 = vld [vmem:[%s2141_s20 + $0x80] ss:$8 sps:$4 sm:$0xff]   ;;  %v1508_v20 = vld [vmem:[%s2141_s20 + $0x94] ss:$8 sps:$4 sm:$0xff]  }
  0xb5   : > { %683 = vmatprep.subr.bf16.mxu0 %v1487_v4  ;;  %1318 = vmatprep.subr.bf16.mxu1 %v1487_v4  ;;  %v1505_v18 = vld [vmem:[%s2141_s20 + $0x84] ss:$8 sps:$4 sm:$0xff]   ;;  %v1510_v21 = vld [vmem:[%s2141_s20 + $0x90] ss:$8 sps:$4 sm:$0xff]   ;;  %v1513_v23 = vld [vmem:[%s2141_s20 + $0xa0] ss:$8 sps:$4 sm:$0xff]  }
  0xb6   : > { %711 = vmatprep.mubr.bf16.mxu0 %v1531_v13  ;;  %751 = vmatprep.mubr.bf16.mxu1 %v1534_v15  ;;  %v1511_v22 = vld [vmem:[%s2141_s20 + $0xa4] ss:$8 sps:$4 sm:$0xff]   ;;  %v1514_v24 = vld [vmem:[%s2141_s20 + $0xb4] ss:$8 sps:$4 sm:$0xff]   ;;  %v1516_v25 = vld [vmem:[%s2141_s20 + $0xb0] ss:$8 sps:$4 sm:$0xff]  }
  0xb7   : > { %v1517_v26 = vld [vmem:[%s2141_s20 + $0xc4] ss:$8 sps:$4 sm:$0xff]   ;;  %v1519_v27 = vld [vmem:[%s2141_s20 + $0xc0] ss:$8 sps:$4 sm:$0xff]   ;;  %v1520_v28 = vld [vmem:[%s2141_s20 + $0xd4] ss:$8 sps:$4 sm:$0xff]  }
  0xb8   : > { %684 = vmatpush1.bf16.msra.mxu0 %v1489_v5  ;;  %1334 = vmatpush1.bf16.msra.mxu1 %v1489_v5  ;;  %v1522_v29 = vld [vmem:[%s2141_s20 + $0xd0] ss:$8 sps:$4 sm:$0xff]   ;;  %v1523_v30 = vld [vmem:[%s2141_s20 + $0xe4] ss:$8 sps:$4 sm:$0xff]   ;;  %v1525_v31 = vld [vmem:[%s2141_s20 + $0xe0] ss:$8 sps:$4 sm:$0xff]  }
  0xb9   : > { %685 = vmatprep.subr.bf16.mxu0 %v1490_v6  ;;  %1319 = vmatprep.subr.bf16.mxu1 %v1490_v6  ;;  %v1526_v32 = vld [vmem:[%s2141_s20 + $0xf4] ss:$8 sps:$4 sm:$0xff]   ;;  %v1528_v33 = vld [vmem:[%s2141_s20 + $0xf0] ss:$8 sps:$4 sm:$0xff]   ;;  %v1529_v34 = vld [vmem:[%s2133_s22] ss:$8 sps:$4 sm:$0xff]  }
  0xba   : > { %v1532_v35 = vld [vmem:[%s2133_s22 + $0x40] ss:$8 sps:$4 sm:$0xff]   ;;  %v1535_v36 = vld [vmem:[%s2133_s22 + $0x14] ss:$8 sps:$4 sm:$0xff]   ;;  %v1539_v38 = vld [vmem:[%s2133_s22 + $0x10] ss:$8 sps:$4 sm:$0xff]  }
  0xbb   : > { %v1537_v37 = vld [vmem:[%s2133_s22 + $0x54] ss:$8 sps:$4 sm:$0xff]   ;;  %v1540_v39 = vld [vmem:[%s2133_s22 + $0x50] ss:$8 sps:$4 sm:$0xff]   ;;  %v1541_v40 = vld [vmem:[%s2133_s22 + $0x24] ss:$8 sps:$4 sm:$0xff]  }
  0xbc   : > { %686 = vmatpush1.bf16.msra.mxu0 %v1492_v7  ;;  %1335 = vmatpush1.bf16.msra.mxu1 %v1492_v7  ;;  %v1543_v41 = vld [vmem:[%s2133_s22 + $0x64] ss:$8 sps:$4 sm:$0xff]   ;;  %v1545_v42 = vld [vmem:[%s2133_s22 + $0x20] ss:$8 sps:$4 sm:$0xff]   ;;  %v1547_v44 = vld [vmem:[%s2133_s22 + $0x34] ss:$8 sps:$4 sm:$0xff]  }
  0xbd   : > { %687 = vmatprep.subr.bf16.mxu0 %v1493_v8  ;;  %1320 = vmatprep.subr.bf16.mxu1 %v1493_v8  ;;  %v1546_v43 = vld [vmem:[%s2133_s22 + $0x60] ss:$8 sps:$4 sm:$0xff]   ;;  %v1549_v45 = vld [vmem:[%s2133_s22 + $0x74] ss:$8 sps:$4 sm:$0xff]   ;;  %v1551_v46 = vld [vmem:[%s2133_s22 + $0x30] ss:$8 sps:$4 sm:$0xff]  }
  0xbe   : > { %v1552_v47 = vld [vmem:[%s2133_s22 + $0x70] ss:$8 sps:$4 sm:$0xff]   ;;  %v894_v49 = vshrl.u32 %v893_v48, 7  ;;  %v891_v51 = vld [vmem:[%s281_s14] sm:$0x3]  ;;  %s1315_s16 = sshll.u32 %s1785_s7, 11 }
  0xbf   : > { %s1064_s21 = sshll.u32 %s2219_s10, 4  ;;  %s2262_s7 = scalar_lea.hbm %s2338_s4, %s1315_s16  ;;  %s2264_s21 = int_to_ptr.vmem [resolvable:$true] %s1064_s21 }
  0xc0   : > { %688 = vmatpush1.bf16.msra.mxu0 %v1495_v9  ;;  %1336 = vmatpush1.bf16.msra.mxu1 %v1495_v9  ;;  %v895_v50 = vsub.s32 0, %v894_v49  ;;  %v899_v52 = vsub.s32 1, %v894_v49  ;;  %s1048_s11 = scalar_lea.sflag [#allocation7], %s2127_s1  ;;  %s1653_s0 = scalar_lea.vmem %s2264_s21, 2048 }
  0xc1   : > { %689 = vmatprep.subr.bf16.mxu0 %v1496_v10  ;;  %1321 = vmatprep.subr.bf16.mxu1 %v1496_v10  ;;  %p1654_p0 = scmp.ne.s32.totalorder %s2264_s21, %s1653_s0  ;;  %p2387_p6 = scmp.ne.s32.totalorder %s2369_s12, 0 }
  0xc2   : > { %v2205_v53 = vrot.slane %v891_v51, %v895_v50  ;;  %v2207_v54 = vrot.slane %v891_v51, %v899_v52  ;;  %s1801_s2 = smov [#allocation11]  }
  0xc3   : > { %p1655_p11 = pnand %p1654_p0, %p2387_p6  ;;  %s1657_s23 = sshll.u32 %s1801_s2, 4  ;;  %s1658_s23 = int_to_ptr.vmem [resolvable:$false] %s1657_s23 }
  0xc4   : > { %690 = vmatpush1.bf16.msra.mxu0 %v1498_v11  ;;  %1337 = vmatpush1.bf16.msra.mxu1 %v1498_v11  ;;  %s1659_s17 = scalar_lea.vmem %s1658_s23, 4096  ;;  %p1660_p9 = scmp.lt.s32.totalorder %s2264_s21, %s1658_s23 }
  0xc5   : > { %691 = vmatprep.subr.bf16.mxu0 %v1499_v12  ;;  %1322 = vmatprep.subr.bf16.mxu1 %v1499_v12  ;;  %p1656_p4 = pneg %p1655_p11  ;;  %p1661_p3 = scmp.lt.s32.totalorder %s1659_s17, %s1653_s0 }
  0xc7   : > { %p1662_p7 = por %p1661_p3, %p1660_p9 }
  0xc8   : > { %692 = vmatpush1.bf16.msra.mxu0 %v1501_v14  ;;  %1338 = vmatpush1.bf16.msra.mxu1 %v1501_v14 }
  0xc9   : > { %693 = vmatprep.subr.bf16.mxu0 %v1502_v16  ;;  %1323 = vmatprep.subr.bf16.mxu1 %v1502_v16  ;;  %p1663_p2 = pnand %p1662_p7, %p1656_p4 }
  0xcc   : > { %694 = vmatpush1.bf16.msra.mxu0 %v1504_v17  ;;  %1339 = vmatpush1.bf16.msra.mxu1 %v1504_v17 }
  0xcd   : > { %695 = vmatprep.subr.bf16.mxu0 %v1505_v18  ;;  %1324 = vmatprep.subr.bf16.mxu1 %v1505_v18 }
  0xd0   : > { %696 = vmatpush1.bf16.msra.mxu0 %v1507_v19  ;;  %1340 = vmatpush1.bf16.msra.mxu1 %v1507_v19 }
  0xd1   : > { %697 = vmatprep.subr.bf16.mxu0 %v1508_v20  ;;  %1325 = vmatprep.subr.bf16.mxu1 %v1508_v20 }
  0xd4   : > { %698 = vmatpush1.bf16.msra.mxu0 %v1510_v21  ;;  %1341 = vmatpush1.bf16.msra.mxu1 %v1510_v21 }
  0xd5   : > { %699 = vmatprep.subr.bf16.mxu0 %v1511_v22  ;;  %1326 = vmatprep.subr.bf16.mxu1 %v1511_v22 }
  0xd8   : > { %700 = vmatpush1.bf16.msra.mxu0 %v1513_v23  ;;  %1342 = vmatpush1.bf16.msra.mxu1 %v1513_v23 }
  0xd9   : > { %701 = vmatprep.subr.bf16.mxu0 %v1514_v24  ;;  %1327 = vmatprep.subr.bf16.mxu1 %v1514_v24 }
  0xdc   : > { %702 = vmatpush1.bf16.msra.mxu0 %v1516_v25  ;;  %1343 = vmatpush1.bf16.msra.mxu1 %v1516_v25 }
  0xdd   : > { %703 = vmatprep.subr.bf16.mxu0 %v1517_v26  ;;  %1328 = vmatprep.subr.bf16.mxu1 %v1517_v26 }
  0xe0   : > { %704 = vmatpush1.bf16.msra.mxu0 %v1519_v27  ;;  %1344 = vmatpush1.bf16.msra.mxu1 %v1519_v27 }
  0xe1   : > { %705 = vmatprep.subr.bf16.mxu0 %v1520_v28  ;;  %1329 = vmatprep.subr.bf16.mxu1 %v1520_v28 }
  0xe4   : > { %706 = vmatpush1.bf16.msra.mxu0 %v1522_v29  ;;  %1345 = vmatpush1.bf16.msra.mxu1 %v1522_v29 }
  0xe5   : > { %707 = vmatprep.subr.bf16.mxu0 %v1523_v30  ;;  %1330 = vmatprep.subr.bf16.mxu1 %v1523_v30 }
  0xe8   : > { %708 = vmatpush1.bf16.msra.mxu0 %v1525_v31  ;;  %1346 = vmatpush1.bf16.msra.mxu1 %v1525_v31 }
  0xe9   : > { %709 = vmatprep.subr.bf16.mxu0 %v1526_v32  ;;  %1331 = vmatprep.subr.bf16.mxu1 %v1526_v32 }
  0xec   : > { %710 = vmatpush1.bf16.msra.mxu0 %v1528_v33  ;;  %1347 = vmatpush1.bf16.msra.mxu1 %v1528_v33 }
  0xef   : > { %712 = vmatmul.mubr.bf16.vlgmr.msra.gmra.mrb[0].mxu0 %v1529_v34  ;;  %752 = vmatmul.mubr.bf16.vlgmr.msra.gmra.mrb[0].mxu1 %v1532_v35 }
  0xf0   : > { %721 = vmatprep.mubr.bf16.mxu0 %v1535_v36  ;;  %761 = vmatprep.mubr.bf16.mxu1 %v1537_v37 }
  0xf7   : > { %722 = vmatmul.mubr.bf16.gmra.mrb[4].mxu0 %v1539_v38  ;;  %762 = vmatmul.mubr.bf16.gmra.mrb[4].mxu1 %v1540_v39 }
  0xf8   : > { %731 = vmatprep.mubr.bf16.mxu0 %v1541_v40  ;;  %771 = vmatprep.mubr.bf16.mxu1 %v1543_v41 }
  0xff   : > { %732 = vmatmul.mubr.bf16.gmra.mrb[8].mxu0 %v1545_v42  ;;  %772 = vmatmul.mubr.bf16.gmra.mrb[8].mxu1 %v1546_v43 }
 0x100   : > { %741 = vmatprep.mubr.bf16.mxu0 %v1547_v44  ;;  %781 = vmatprep.mubr.bf16.mxu1 %v1549_v45 }
 0x107   : > { %742 = vmatmul.mubr.bf16.gmra.mrb[12].mxu0 %v1551_v46  ;;  %782 = vmatmul.mubr.bf16.gmra.mrb[12].mxu1 %v1552_v47 }
 0x1c2   : > { %v713_v55 = vpop.f32.mrb[0].mxu0  ;;  %v753_v56 = vpop.f32.mrb[0].mxu1 }
 0x1c3   : > { %v903_v57 = vadd.f32 %v2205_v53, %v713_v55  ;;  %v919_v58 = vadd.f32 %v2205_v53, %v753_v56  ;;  %v715_v59 = vpop.f32.mrb[1].mxu0  ;;  %v755_v60 = vpop.f32.mrb[1].mxu1 }
 0x1c4   : > { %v904_v61 = vadd.f32 %v2207_v54, %v715_v59  ;;  %v920_v62 = vadd.f32 %v2207_v54, %v755_v60  ;;  %v717_v63 = vpop.f32.mrb[2].mxu0  ;;  %v757_v0 = vpop.f32.mrb[2].mxu1 }
 0x1c5   : > { %v905_v1 = vadd.f32 %v2205_v53, %v717_v63  ;;  %v921_v2 = vadd.f32 %v2205_v53, %v757_v0  ;;  %v719_v3 = vpop.f32.mrb[3].mxu0  ;;  %v759_v4 = vpop.f32.mrb[3].mxu1 }
 0x1c6   : > { %v1298_v5 = vpack.c.bf16 %v904_v61, %v903_v57  ;;  %v1306_v6 = vpack.c.bf16 %v920_v62, %v919_v58  ;;  %v906_v7 = vadd.f32 %v2207_v54, %v719_v3  ;;  %v922_v8 = vadd.f32 %v2207_v54, %v759_v4 }
 0x1c8   : > { %1031 = vst [vmem:[%s2219_s10] sm:$0xff] %v1298_v5  ;;  %1039 = vst [vmem:[%s2219_s10 + $0x40] sm:$0xff] %v1306_v6  ;;  %v1299_v9 = vpack.c.bf16 %v906_v7, %v905_v1  ;;  %v1307_v10 = vpack.c.bf16 %v922_v8, %v921_v2 }
 0x1ca   : > { %1032 = vst [vmem:[%s2219_s10 + $0x8] sm:$0xff] %v1299_v9  ;;  %1040 = vst [vmem:[%s2219_s10 + $0x48] sm:$0xff] %v1307_v10  ;;  %v723_v11 = vpop.f32.mrb[4].mxu0  ;;  %v763_v12 = vpop.f32.mrb[4].mxu1 }
 0x1cb   : > { %v907_v13 = vadd.f32 %v2205_v53, %v723_v11  ;;  %v923_v14 = vadd.f32 %v2205_v53, %v763_v12  ;;  %v725_v15 = vpop.f32.mrb[5].mxu0  ;;  %v765_v16 = vpop.f32.mrb[5].mxu1 }
 0x1cc   : > { %v908_v17 = vadd.f32 %v2207_v54, %v725_v15  ;;  %v924_v18 = vadd.f32 %v2207_v54, %v765_v16  ;;  %v727_v19 = vpop.f32.mrb[6].mxu0  ;;  %v767_v20 = vpop.f32.mrb[6].mxu1 }
 0x1cd   : > { %v909_v21 = vadd.f32 %v2205_v53, %v727_v19  ;;  %v925_v22 = vadd.f32 %v2205_v53, %v767_v20  ;;  %v729_v23 = vpop.f32.mrb[7].mxu0  ;;  %v769_v24 = vpop.f32.mrb[7].mxu1 }
 0x1ce   : > { %v1300_v25 = vpack.c.bf16 %v908_v17, %v907_v13  ;;  %v1308_v26 = vpack.c.bf16 %v924_v18, %v923_v14  ;;  %v910_v27 = vadd.f32 %v2207_v54, %v729_v23  ;;  %v926_v28 = vadd.f32 %v2207_v54, %v769_v24 }
 0x1d0   : > { %1033 = vst [vmem:[%s2219_s10 + $0x10] sm:$0xff] %v1300_v25  ;;  %1041 = vst [vmem:[%s2219_s10 + $0x50] sm:$0xff] %v1308_v26  ;;  %v1301_v29 = vpack.c.bf16 %v910_v27, %v909_v21  ;;  %v1309_v30 = vpack.c.bf16 %v926_v28, %v925_v22 }
 0x1d2   : > { %1034 = vst [vmem:[%s2219_s10 + $0x18] sm:$0xff] %v1301_v29  ;;  %1042 = vst [vmem:[%s2219_s10 + $0x58] sm:$0xff] %v1309_v30  ;;  %v733_v31 = vpop.f32.mrb[8].mxu0  ;;  %v773_v32 = vpop.f32.mrb[8].mxu1 }
 0x1d3   : > { %v911_v33 = vadd.f32 %v2205_v53, %v733_v31  ;;  %v927_v34 = vadd.f32 %v2205_v53, %v773_v32  ;;  %v735_v35 = vpop.f32.mrb[9].mxu0  ;;  %v775_v36 = vpop.f32.mrb[9].mxu1 }
 0x1d4   : > { %v912_v37 = vadd.f32 %v2207_v54, %v735_v35  ;;  %v928_v38 = vadd.f32 %v2207_v54, %v775_v36  ;;  %v737_v39 = vpop.f32.mrb[10].mxu0  ;;  %v777_v40 = vpop.f32.mrb[10].mxu1 }
 0x1d5   : > { %v913_v41 = vadd.f32 %v2205_v53, %v737_v39  ;;  %v929_v42 = vadd.f32 %v2205_v53, %v777_v40  ;;  %v739_v43 = vpop.f32.mrb[11].mxu0  ;;  %v779_v44 = vpop.f32.mrb[11].mxu1 }
 0x1d6   : > { %v1302_v45 = vpack.c.bf16 %v912_v37, %v911_v33  ;;  %v1310_v46 = vpack.c.bf16 %v928_v38, %v927_v34  ;;  %v914_v47 = vadd.f32 %v2207_v54, %v739_v43  ;;  %v930_v48 = vadd.f32 %v2207_v54, %v779_v44 }
 0x1d8   : > { %1035 = vst [vmem:[%s2219_s10 + $0x20] sm:$0xff] %v1302_v45  ;;  %1043 = vst [vmem:[%s2219_s10 + $0x60] sm:$0xff] %v1310_v46  ;;  %v1303_v49 = vpack.c.bf16 %v914_v47, %v913_v41  ;;  %v1311_v50 = vpack.c.bf16 %v930_v48, %v929_v42 }
 0x1da   : > { %1036 = vst [vmem:[%s2219_s10 + $0x28] sm:$0xff] %v1303_v49  ;;  %1044 = vst [vmem:[%s2219_s10 + $0x68] sm:$0xff] %v1311_v50  ;;  %v743_v51 = vpop.f32.mrb[12].mxu0  ;;  %v783_v52 = vpop.f32.mrb[12].mxu1 }
 0x1db   : > { %v915_v55 = vadd.f32 %v2205_v53, %v743_v51  ;;  %v931_v56 = vadd.f32 %v2205_v53, %v783_v52  ;;  %v745_v57 = vpop.f32.mrb[13].mxu0  ;;  %v785_v58 = vpop.f32.mrb[13].mxu1 }
 0x1dc   : > { %v916_v59 = vadd.f32 %v2207_v54, %v745_v57  ;;  %v932_v60 = vadd.f32 %v2207_v54, %v785_v58  ;;  %v747_v61 = vpop.f32.mrb[14].mxu0  ;;  %v787_v62 = vpop.f32.mrb[14].mxu1 }
 0x1dd   : > { %v917_v63 = vadd.f32 %v2205_v53, %v747_v61  ;;  %v933_v0 = vadd.f32 %v2205_v53, %v787_v62  ;;  %v749_v1 = vpop.f32.mrb[15].mxu0  ;;  %v789_v2 = vpop.f32.mrb[15].mxu1 }
 0x1de   : > { %v1304_v3 = vpack.c.bf16 %v916_v59, %v915_v55  ;;  %v1312_v4 = vpack.c.bf16 %v932_v60, %v931_v56  ;;  %v918_v5 = vadd.f32 %v2207_v54, %v749_v1  ;;  %v934_v6 = vadd.f32 %v2207_v54, %v789_v2 }
 0x1e0   : > { %1037 = vst [vmem:[%s2219_s10 + $0x30] sm:$0xff] %v1304_v3  ;;  %1045 = vst [vmem:[%s2219_s10 + $0x70] sm:$0xff] %v1312_v4  ;;  %v1305_v53 = vpack.c.bf16 %v918_v5, %v917_v63  ;;  %v1313_v7 = vpack.c.bf16 %v934_v6, %v933_v0 }
 0x1e2   : > { %1038 = vst [vmem:[%s2219_s10 + $0x38] sm:$0xff] %v1305_v53  ;;  %1046 = vst [vmem:[%s2219_s10 + $0x78] sm:$0xff] %v1313_v7 }
 0x1e3   : > { %1666 = shalt.err (!%p1663_p2)
}
 0x1e4   : > { %s1667_s22 = scalar_lea.hbm %s2262_s7, 2048  ;;  %s1671_s6 = scalar_lea.hbm %s2338_s4, 12288 }
 0x1e5   : > { %p1668_p8 = scmp.ne.s32.totalorder %s2262_s7, %s1667_s22  ;;  %p1672_p5 = scmp.lt.u32.totalorder %s2262_s7, %s2338_s4 }
 0x1e6   : > { %p1673_p1 = scmp.lt.u32.totalorder %s1671_s6, %s1667_s22  ;;  %p1675_p0 = scmp.lt.u32.totalorder %s1667_s22, %s2262_s7 }
 0x1e7   : > { %p1669_p10 = pnand %p1668_p8, %p2387_p6 }
 0x1e8   : > { %p1674_p13 = por %p1673_p1, %p1672_p5 }
 0x1e9   : > { %p1670_p12 = pneg %p1669_p10 }
 0x1ea   : > { %p1676_p11 = por %p1675_p0, %p1674_p13 }
 0x1ec   : > { %p1677_p4 = pnand %p1676_p11, %p1670_p12 }
 0x1ee   : > { %1680 = shalt.err (!%p1677_p4)
}
 0x1ef   : > { %s1802_s15 = smov 128   ;;  %s1803_s25 = smov 8  }
 0x1f0   : > { %1358 = dma.vmem_to_hbm [thread:$0]  (%p2387_p6), %s2264_s21, 2048, %s2262_s7, %s1048_s11, %s1802_s15, %s1802_s15, %s1803_s25  }
 0x1f1 PF: > { %s2388_s14 = sld [smem:[#allocation22_spill]]  ;;  %s2389_s10 = sld [smem:[#allocation27_spill]] }
 0x1f2   : > { %p1379_p9 = scmp.ge.s32.totalorder %s1793_s9, 2 }
 0x1f7   : > { %s1079_s16 = sand.u32 1, %s2388_s14   ;;  %p2390_p3 = scmp.ne.s32.totalorder %s2389_s10, 0 }
 0x1f8   : > { %s1080_s28 = scalar_lea.sflag [#allocation7], %s1079_s16 }
 0x1f9   : > { %p1375_p7 = pnand %p1379_p9, %p2390_p3 }
 0x1fb   : > { %1744 = dma.done.wait (!%p1375_p7), %s1080_s28, 2048  }
 0x1fc   : > { %1746 = vsyncadd (!%p1375_p7), %s1080_s28, 4294965248  ;;  %s27_s9 = sadd.s32 1, %s1793_s9   ;;  %s2391_s12 = sld [smem:[#allocation21_spill]] }
 0x1fd   : > { %p24_p2 = scmp.ge.s32.totalorder %s27_s9, 8   ;;  %s2392_s0 = sld [smem:[#allocation25_spill]] }
 0x1fe   : > { %s2393_s1 = sld [smem:[#allocation23_spill]]  ;;  %s2394_s6 = sld [smem:[#allocation26_spill]] }
 0x1ff   : > { %s2395_s21 = sld [smem:[#allocation24_spill]]  ;;  %s2396_s25 = smov %s1753_s26 }
 0x200   : > { %s2397_s26 = smov %s1757_s27  ;;  %s2398_s27 = smov %s2091_s18 }
 0x201   : > { %s2399_s28 = smov %s1765_s29  ;;  %s2401_s30 = smov %s1777_s5 }
 0x202   : > { %s2400_s29 = smov %s2391_s12  ;;  %s2403_s7 = smov %s1789_s8 }
 0x203   :  { %26 = sbr.rel (!%p24_p2) target bundleno = 24 (0x18), region = 109 }
 0x204   : > { %s2402_s5 = smov %s2393_s1 }
 0x205   : > { %s2404_s8 = smov %s2395_s21 }
 0x20a   :  { %1085 = vsyncpa [#allocation6], 1 }
 0x20b   :  { %1087 = vsyncpa [#allocation6 + $0x1], 1 }
 0x20c   :  { %1088 = vsyncpa [#allocation9], 1 }
 0x20d   :  { %1090 = vsyncpa [#allocation9 + $0x1], 1 }
 0x20e   :  { %1091 = vsyncpa [#allocation7], 1 }
 0x20f   :  { %1093 = vsyncpa [#allocation7 + $0x1], 1 }

// kernel: hd_attention_forward.4
= control target key start
LH: loop header
LB: loop body
LE: loop exit
PB: predicated region body
PF: predicated region fallthrough
CT: control target
= control target key end

     0   :  { %s7863_s0 = inlined_call_operand.hbm [shape: f32[384,128], index: 0, kind: input, shape index: {}]   ;;  %s7864_s1 = inlined_call_operand.hbm [shape: f32[384,128], index: 1, kind: input, shape index: {}]   ;;  %s7865_s2 = inlined_call_operand.hbm [shape: f32[384,128], index: 2, kind: input, shape index: {}]   ;;  %s7866_s3 = inlined_call_operand.hbm [shape: f32[384,128], index: 3, kind: input, shape index: {}]   ;;  %s7867_s4 = inlined_call_operand.hbm [shape: bf16[2,384,256], index: 4, kind: input, shape index: {}]   ;;  %s7868_s5 = inlined_call_operand.hbm [shape: bf16[2,384,256], index: 5, kind: input, shape index: {}]   ;;  %s7869_s6 = inlined_call_operand.hbm [shape: bf16[2,384,256], index: 6, kind: input, shape index: {}]   ;;  %s7870_s7 = inlined_call_operand.hbm [shape: bf16[2,384,256], index: 7, kind: output, shape index: {}]  }
   0x1   :  { %8085 = sst [smem:[#allocation109_spill]] %s7863_s0 }
   0x2   :  { %8086 = sst [smem:[#allocation110_spill]] %s7864_s1 }
   0x3   :  { %8087 = sst [smem:[#allocation111_spill]] %s7865_s2 }
   0x4   :  { %8088 = sst [smem:[#allocation112_spill]] %s7866_s3 }
   0x5   :  { %8089 = sst [smem:[#allocation113_spill]] %s7867_s4 }
   0x6   :  { %8090 = sst [smem:[#allocation114_spill]] %s7868_s5 }
   0x7   :  { %8091 = sst [smem:[#allocation115_spill]] %s7869_s6 }
   0x8   :  { %8092 = sst [smem:[#allocation116_spill]] %s7870_s7 }
   0x9   :  { %12 = vsyncpa [#allocation7], 0 }
   0xa   :  { %14 = vsyncpa [#allocation7 + $0x1], 0 }
   0xb   :  { %15 = vsyncpa [#allocation10], 0 }
   0xc   :  { %17 = vsyncpa [#allocation10 + $0x1], 0 }
   0xd   :  { %18 = vsyncpa [#allocation13], 0 }
   0xe   :  { %19 = vsyncpa [#allocation8], 0 }
   0xf   :  { %21 = vsyncpa [#allocation8 + $0x1], 0  ;;  %s5325_s24 = smov 0   ;;  %s5327_s25 = smov 0  }
  0x10   :  { %s5329_s26 = smov 0   ;;  %s5331_s27 = smov 0  }
  0x11   :  { %s5333_s28 = smov 0   ;;  %s5335_s29 = smov 0  }
  0x12   :  { %s5337_s30 = smov 0   ;;  %s5339_s8 = smov 0  }
  0x13   :  { %s5341_s9 = smov 0   ;;  %s5343_s10 = smov 0  }
  0x14   :  { %s5345_s11 = smov 0   ;;  %s5347_s12 = smov 0  }
  0x15   :  { %s5349_s13 = smov 0   ;;  %s5351_s14 = smov 0  }
  0x16   :  { %s5353_s15 = smov 0   ;;  %s5355_s16 = smov 0  }
  0x17 LB: > { %8093 = sst [smem:[#allocation26_spill]] %s5217_s27  ;;  %s5404_s17 = sadd.s32 4294967295, %s5265_s16   ;;  %s5265_s16 = sphi %s5355_s16, %s27_s16   ;;  %s5261_s15 = sphi %s5353_s15, %s8460_s15   ;;  %s5257_s14 = sphi %s5351_s14, %s8459_s14   ;;  %s5253_s13 = sphi %s5349_s13, %s8448_s13   ;;  %s5249_s12 = sphi %s5347_s12, %s8458_s12   ;;  %s5245_s11 = sphi %s5345_s11, %s8457_s11   ;;  %s5241_s10 = sphi %s5343_s10, %s8447_s10   ;;  %s5237_s9 = sphi %s5341_s9, %s8446_s9   ;;  %s5233_s8 = sphi %s5339_s8, %s8445_s8   ;;  %s5229_s30 = sphi %s5337_s30, %s8444_s30   ;;  %s5225_s29 = sphi %s5335_s29, %s8456_s29   ;;  %s5221_s28 = sphi %s5333_s28, %s8455_s28   ;;  %s5217_s27 = sphi %s5331_s27, %s8454_s27   ;;  %s5213_s26 = sphi %s5329_s26, %s8453_s26   ;;  %s5209_s25 = sphi %s5327_s25, %s8452_s25   ;;  %s5205_s24 = sphi %s5325_s24, %s8451_s24  }
  0x18   : > { %8094 = sst [smem:[#allocation27_spill]] %s5233_s8  ;;  %s3703_s18 = sadd.s32 4294967294, %s5265_s16  }
  0x19   : > { %8095 = sst [smem:[#allocation28_spill]] %s5237_s9  ;;  %p7874_p0 = scmp.eq.s32.totalorder %s5404_s17, 0 }
  0x1a   : > { %8096 = sst [smem:[#allocation29_spill]] %s5241_s10  ;;  %p181_p1 = scmp.ne.s32.totalorder %s5221_s28, %s5217_s27 }
  0x1b   : > { %8097 = sst [smem:[#allocation30_spill]] %s5245_s11  ;;  %p211_p2 = scmp.ne.s32.totalorder %s5209_s25, %s5205_s24 }
  0x1c   : > { %8098 = sst [smem:[#allocation31_spill]] %s5249_s12  ;;  %p5414_p4 = por %p181_p1, %p7874_p0 }
  0x1d   : > { %8099 = sst [smem:[#allocation32_spill]] %s5253_s13  ;;  %p275_p5 = scmp.eq.s32.totalorder %s3703_s18, 7 }
  0x1e   : > { %s8100_s19 = scalar_select %p5414_p4, 1, 0 }
  0x1f   : > { %p5420_p6 = por %p211_p2, %p7874_p0  ;;  %p3704_p7 = scmp.ge.s32.totalorder %s5265_s16, 1 }
  0x20   : > { %8101 = sst [smem:[#allocation33_spill]] %s8100_s19  ;;  %p5425_p8 = por %p275_p5, %p181_p1 }
  0x21   : > { %s8102_s20 = scalar_select %p5420_p6, 1, 0 }
  0x22   : > { %s8104_s21 = scalar_select %p5425_p8, 1, 0 }
  0x23   : > { %8103 = sst [smem:[#allocation34_spill]] %s8102_s20  ;;  %p282_p9 = scmp.lt.s32.totalorder %s5265_s16, 9 }
  0x24   : > { %8105 = sst [smem:[#allocation35_spill]] %s8104_s21  ;;  %s5267_s23 = smov [#allocation11]  }
  0x25   : > { %p5430_p10 = pnand %p3704_p7, %p282_p9  ;;  %s297_s24 = sshll.u32 %s5267_s23, 4  ;;  %s298_s24 = int_to_ptr.vmem [resolvable:$true] %s297_s24 }
  0x26   : > { %s8109_s2 = sld [smem:[#allocation111_spill]] }
  0x27   : > { %s8106_s22 = scalar_select %p5430_p10, 1, 0 }
  0x28   : > { %p4326_p11 = pneg %p5430_p10 }
  0x29   : > { %8107 = sst [smem:[#allocation36_spill]] %s8106_s22 }
  0x2a   : > { %p5438_p12 = pnand %p4326_p11, %p7874_p0 }
  0x2c   : > { %s4873_s21 = scalar_lea.hbm %s8109_s2, 6144  ;;  %p7895_p1 = pneg %p5438_p12 }
  0x2d   : > { %p4874_p13 = scmp.ne.s32.totalorder %s8109_s2, %s4873_s21  ;;  %p4880_p7 = scmp.lt.u32.totalorder %s4873_s21, %s8109_s2 }
  0x2f   : > { %p4876_p2 = pnand %p7895_p1, %p4874_p13 }
  0x31   : > { %p4877_p5 = pneg %p4876_p2 }
  0x33   : > { %p4882_p9 = pnand %p4880_p7, %p4877_p5 }
  0x35   : > { %4885 = shalt.err (!%p4882_p9)
}
  0x36   : > { %s4886_s7 = scalar_lea.vmem %s298_s24, 6144  ;;  %p4894_p8 = scmp.lt.s32.totalorder %s298_s24, %s298_s24 }
  0x37   : > { %p4887_p11 = scmp.ne.s32.totalorder %s298_s24, %s4886_s7  ;;  %p4895_p6 = scmp.lt.s32.totalorder %s4886_s7, %s4886_s7 }
  0x39   : > { %p4889_p3 = pnand %p4887_p11, %p7895_p1  ;;  %p4896_p4 = por %p4895_p6, %p4894_p8 }
  0x3b   : > { %p4890_p0 = pneg %p4889_p3 }
  0x3d   : > { %p4897_p10 = pnand %p4896_p4, %p4890_p0 }
  0x3f   : > { %4900 = shalt.err (!%p4897_p10)
}
  0x40   : > { %s7882_s27 = smov 128   ;;  %s7884_s10 = smov 8  }
  0x41   : > { %4329 = dma.hbm_to_vmem [thread:$0]  (!%p5438_p12), %s8109_s2, 6144, %s298_s24, [#allocation10], %s7882_s27, %s7882_s27, %s7884_s10  }
  0x42   : > { %s45_s21 = sadd.s32 1, %s5253_s13  ;;  %s49_s23 = sadd.s32 1, %s5257_s14 }
  0x43   : > { %p47_p0 = scmp.ge.s32.totalorder %s45_s21, 2  ;;  %s53_s7 = sadd.s32 1, %s5261_s15 }
  0x44   : > { %s60_s20 = sadd.s32 1, %s5237_s9  ;;  %p67_p3 = scmp.ne.s32.totalorder %s5237_s9, %s5233_s8 }
  0x45   : > { %s8462_s21 = smov (%p47_p0, %s45_s21), 0  ;;  %s8464_s23 = smov (!%p47_p0, %s49_s23), %s5257_s14 }
  0x46   : > { %8110 = sst [smem:[#allocation37_spill]] %s8462_s21  ;;  %s57_s19 = ssub.s32 %s5253_s13, %s8462_s21 }
  0x47   : > { %p51_p4 = scmp.ge.s32.totalorder %s8464_s23, 2  ;;  %p58_p6 = scmp.eq.s32.totalorder %s57_s19, 0 }
  0x48   : > { %p7897_p8 = scmp.eq.s32.totalorder %s5265_s16, 0  ;;  %p73_p10 = scmp.ne.s32.totalorder %s5233_s8, %s5229_s30 }
  0x49   : > { %s8466_s23 = smov (%p51_p4, %s8464_s23), 0  ;;  %s8468_s7 = smov (!%p51_p4, %s53_s7), %s5261_s15 }
  0x4a   : > { %8111 = sst [smem:[#allocation38_spill]] %s8466_s23  ;;  %p55_p13 = scmp.ge.s32.totalorder %s8468_s7, 2 }
  0x4b   : > { %s5485_s24 = scalar_select %p58_p6, %s5237_s9, %s60_s20  }
  0x4c   : > { %p5489_p2 = por %p7897_p8, %p67_p3  ;;  %p8114_p5 = scmp.eq.s32.totalorder %s5404_s17, 0 }
  0x4d   : > { %8112 = sst [smem:[#allocation39_spill]] %s5485_s24  ;;  %s164_s12 = ssub.s32 %s5257_s14, %s8466_s23 }
  0x4e   : > { %p5495_p7 = por %p8114_p5, %p73_p10  ;;  %s8470_s7 = smov (%p55_p13, %s8468_s7), 0 }
  0x4f   : > { %8117 = sst [smem:[#allocation41_spill]] %s8470_s7  ;;  %p7896_p9 = scmp.lt.s32.totalorder %s5265_s16, 8 }
  0x50   : > { %s8115_s30 = scalar_select %p5495_p7, 1, 0 }
  0x51   : > { %s161_s27 = ssub.s32 %s5261_s15, %s8470_s7  ;;  %p5521_p3 = pnand %p7896_p9, %p5489_p2 }
  0x52   : > { %8116 = sst [smem:[#allocation40_spill]] %s8115_s30  ;;  %s163_s10 = sor.u32 %s161_s27, %s57_s19 }
  0x53   : > { %s195_s2 = sor.u32 %s164_s12, %s161_s27  ;;  %s5507_s21 = sor.u32 %s164_s12, %s163_s10 }
  0x54   : > { %p5509_p11 = scmp.eq.s32.totalorder %s195_s2, 0  ;;  %s329_s30 = sand.u32 1, %s5237_s9  }
  0x55   : > { %s5515_s23 = smul.u32 192, %s329_s30  ;;  %s8120_s0 = sld [smem:[#allocation109_spill]] }
  0x56   : > { %s8118_s24 = scalar_select %p5509_p11, 1, 0 }
  0x57   : > { %s7893_s19 = smul.u32 3072, %s5253_s13  ;;  %s331_s11 = scalar_lea.vmem [#allocation6], %s5515_s23 }
  0x58   : > { %s338_s30 = sshll.u32 %s331_s11, 4  ;;  %s8121_s7 = sand.u32 1, %s5265_s16   ;;  %s5534_s30 = int_to_ptr.vmem [resolvable:$true] %s338_s30 }
  0x59   : > { %s5539_s9 = scalar_lea.sflag [#allocation7], %s8121_s7  ;;  %p4903_p6 = pneg %p5521_p3 }
  0x5b   : > { %s5531_s10 = scalar_lea.hbm %s8120_s0, %s7893_s19  ;;  %s4906_s19 = scalar_lea.hbm %s8120_s0, 6144 }
  0x5c   : > { %s4901_s8 = scalar_lea.hbm %s5531_s10, 3072  ;;  %p4907_p2 = scmp.lt.u32.totalorder %s5531_s10, %s8120_s0 }
  0x5d   : > { %p4902_p4 = scmp.ne.s32.totalorder %s5531_s10, %s4901_s8  ;;  %p4908_p5 = scmp.lt.u32.totalorder %s4906_s19, %s4901_s8 }
  0x5e   : > { %p4910_p9 = scmp.lt.u32.totalorder %s4901_s8, %s5531_s10 }
  0x5f   : > { %p4904_p10 = pnand %p4903_p6, %p4902_p4  ;;  %p4909_p1 = por %p4908_p5, %p4907_p2 }
  0x61   : > { %p4905_p13 = pneg %p4904_p10  ;;  %p4911_p8 = por %p4910_p9, %p4909_p1 }
  0x63   : > { %p4912_p0 = pnand %p4911_p8, %p4905_p13 }
  0x65   : > { %4915 = shalt.err (!%p4912_p0)
}
  0x66   : > { %s4916_s7 = scalar_lea.vmem %s5534_s30, 3072  ;;  %s5270_s27 = smov [#allocation6]  }
  0x67   : > { %p4917_p4 = scmp.ne.s32.totalorder %s5534_s30, %s4916_s7  ;;  %s4921_s2 = sshll.u32 %s5270_s27, 4  ;;  %s4922_s2 = int_to_ptr.vmem [resolvable:$false] %s4921_s2 }
  0x68   : > { %s4923_s22 = scalar_lea.vmem %s4922_s2, 6144  ;;  %p4924_p11 = scmp.lt.s32.totalorder %s5534_s30, %s4922_s2 }
  0x69   : > { %p4919_p10 = pnand %p4917_p4, %p4903_p6  ;;  %p4925_p2 = scmp.lt.s32.totalorder %s4923_s22, %s4916_s7 }
  0x6b   : > { %p4920_p7 = pneg %p4919_p10  ;;  %p4926_p5 = por %p4925_p2, %p4924_p11 }
  0x6d   : > { %p4927_p1 = pnand %p4926_p5, %p4920_p7 }
  0x6f   : > { %4930 = shalt.err (!%p4927_p1)
}
  0x70   : > { %s8122_s8 = smov 8   ;;  %s8123_s19 = smov 128  }
  0x71   : > { %4336 = dma.hbm_to_vmem [thread:$0]  (!%p5521_p3), %s5531_s10, 3072, %s5534_s30, %s5539_s9, %s8123_s19, %s8123_s19, %s8122_s8  }
  0x72   : > { %s8124_s11 = smul.u32 3072, %s5253_s13  ;;  %s8125_s1 = sld [smem:[#allocation110_spill]] }
  0x73   : > { %s352_s22 = scalar_lea.vmem [#allocation9], %s5515_s23  ;;  %s8126_s0 = sand.u32 1, %s5265_s16  }
  0x74   : > { %s359_s12 = sshll.u32 %s352_s22, 4  ;;  %s5582_s6 = scalar_lea.sflag [#allocation10], %s8126_s0  ;;  %s5578_s12 = int_to_ptr.vmem [resolvable:$true] %s359_s12 }
  0x78   : > { %s5575_s7 = scalar_lea.hbm %s8125_s1, %s8124_s11  ;;  %s4936_s11 = scalar_lea.hbm %s8125_s1, 6144 }
  0x79   : > { %s4931_s5 = scalar_lea.hbm %s5575_s7, 3072  ;;  %p4937_p11 = scmp.lt.u32.totalorder %s5575_s7, %s8125_s1 }
  0x7a   : > { %p4932_p8 = scmp.ne.s32.totalorder %s5575_s7, %s4931_s5  ;;  %p4938_p0 = scmp.lt.u32.totalorder %s4936_s11, %s4931_s5 }
  0x7b   : > { %p4940_p4 = scmp.lt.u32.totalorder %s4931_s5, %s5575_s7 }
  0x7c   : > { %p4934_p7 = pnand %p4932_p8, %p4903_p6  ;;  %p4939_p13 = por %p4938_p0, %p4937_p11 }
  0x7e   : > { %p4935_p9 = pneg %p4934_p7  ;;  %p4941_p10 = por %p4940_p4, %p4939_p13 }
  0x80   : > { %p4942_p2 = pnand %p4941_p10, %p4935_p9 }
  0x82   : > { %4945 = shalt.err (!%p4942_p2)
}
  0x83   : > { %s4946_s0 = scalar_lea.vmem %s5578_s12, 3072  ;;  %s5271_s23 = smov [#allocation9]  }
  0x84   : > { %p4947_p5 = scmp.ne.s32.totalorder %s5578_s12, %s4946_s0  ;;  %s4951_s22 = sshll.u32 %s5271_s23, 4  ;;  %s4952_s22 = int_to_ptr.vmem [resolvable:$false] %s4951_s22 }
  0x85   : > { %s4953_s10 = scalar_lea.vmem %s4952_s22, 6144  ;;  %p4954_p7 = scmp.lt.s32.totalorder %s5578_s12, %s4952_s22 }
  0x86   : > { %p4949_p1 = pnand %p4947_p5, %p4903_p6  ;;  %p4955_p11 = scmp.lt.s32.totalorder %s4953_s10, %s4946_s0 }
  0x88   : > { %p4950_p8 = pneg %p4949_p1  ;;  %p4956_p0 = por %p4955_p11, %p4954_p7 }
  0x8a   : > { %p4957_p13 = pnand %p4956_p0, %p4950_p8 }
  0x8c   : > { %4960 = shalt.err (!%p4957_p13)
}
  0x8d   : > { %4339 = dma.hbm_to_vmem [thread:$0]  (!%p5521_p3), %s5575_s7, 3072, %s5578_s12, %s5582_s6, %s8123_s19, %s8123_s19, %s8122_s8  }
  0x8e   : > { %s168_s5 = sadd.s32 1, %s5225_s29  ;;  %p175_p6 = scmp.ne.s32.totalorder %s5225_s29, %s5221_s28 }
  0x8f   : > { %p8127_p9 = scmp.eq.s32.totalorder %s5507_s21, 0  ;;  %p8128_p4 = scmp.eq.s32.totalorder %s5265_s16, 0 }
  0x90   : > { %p8129_p2 = scmp.eq.s32.totalorder %s5404_s17, 7  ;;  %s371_s11 = sand.u32 1, %s5225_s29  }
  0x91   : > { %s5617_s20 = scalar_select %p8127_p9, %s5225_s29, %s168_s5  }
  0x92   : > { %p177_p10 = por %p175_p6, %p8128_p4  ;;  %p5623_p5 = por %p8129_p2, %p175_p6 }
  0x93   : > { %s8131_s27 = smul.u32 48, %s5253_s13  ;;  %p8132_p1 = scmp.lt.s32.totalorder %s5265_s16, 8 }
  0x94   : > { %s8130_s30 = scalar_select %p5623_p5, 1, 0 }
  0x95   : > { %s379_s2 = sadd.s32 %s5257_s14, %s8131_s27  ;;  %s4296_s0 = smul.u32 96, %s371_s11 }
  0x96   : > { %p5633_p8 = pnand %p8132_p1, %p177_p10  ;;  %s7902_s21 = smul.u32 96, %s5261_s15 }
  0x97   : > { %s373_s7 = scalar_lea.vmem [#allocation14], %s4296_s0  ;;  %s8134_s4 = sld [smem:[#allocation113_spill]] }
  0x98   : > { %s381_s12 = sadd.s32 %s7902_s21, %s379_s2  ;;  %s384_s22 = sshll.u32 %s373_s7, 4  ;;  %s5640_s22 = int_to_ptr.vmem [resolvable:$true] %s384_s22 }
  0x99   : > { %s3711_s10 = sshll.u32 %s381_s12, 6  ;;  %p4963_p7 = pneg %p5633_p8 }
  0x9d   : > { %s5645_s27 = scalar_lea.hbm %s8134_s4, %s3711_s10  ;;  %s4966_s12 = scalar_lea.hbm %s8134_s4, 12288 }
  0x9e   : > { %s4961_s11 = scalar_lea.hbm %s5645_s27, 1536  ;;  %p4967_p13 = scmp.lt.u32.totalorder %s5645_s27, %s8134_s4 }
  0x9f   : > { %p4962_p3 = scmp.ne.s32.totalorder %s5645_s27, %s4961_s11  ;;  %p4968_p6 = scmp.lt.u32.totalorder %s4966_s12, %s4961_s11 }
  0xa0   : > { %p4970_p4 = scmp.lt.u32.totalorder %s4961_s11, %s5645_s27 }
  0xa1   : > { %p4964_p11 = pnand %p4963_p7, %p4962_p3  ;;  %p4969_p9 = por %p4968_p6, %p4967_p13 }
  0xa3   : > { %p4965_p0 = pneg %p4964_p11  ;;  %p4971_p10 = por %p4970_p4, %p4969_p9 }
  0xa5   : > { %p4972_p2 = pnand %p4971_p10, %p4965_p0 }
  0xa7   : > { %4975 = shalt.err (!%p4972_p2)
}
  0xa8   : > { %s4976_s10 = scalar_lea.vmem %s5640_s22, 1536  ;;  %s5272_s5 = smov [#allocation14]  }
  0xa9   : > { %p4977_p1 = scmp.ne.s32.totalorder %s5640_s22, %s4976_s10  ;;  %s4981_s2 = sshll.u32 %s5272_s5, 4  ;;  %s4982_s2 = int_to_ptr.vmem [resolvable:$false] %s4981_s2 }
  0xaa   : > { %s4983_s0 = scalar_lea.vmem %s4982_s2, 3072  ;;  %p4984_p5 = scmp.lt.s32.totalorder %s5640_s22, %s4982_s2 }
  0xab   : > { %p4979_p3 = pnand %p4977_p1, %p4963_p7  ;;  %p4985_p13 = scmp.lt.s32.totalorder %s4983_s0, %s4976_s10 }
  0xad   : > { %p4980_p11 = pneg %p4979_p3  ;;  %p4986_p6 = por %p4985_p13, %p4984_p5 }
  0xaf   : > { %p4987_p9 = pnand %p4986_p6, %p4980_p11 }
  0xb1   : > { %4990 = shalt.err (!%p4987_p9)
}
  0xb2   : > { %s7904_s11 = smov 64   ;;  %s7906_s12 = smov 4  }
  0xb3   : > { %4342 = dma.hbm_to_vmem [thread:$0]  (!%p5633_p8), %s5645_s27, 1536, %s5640_s22, %s5539_s9, %s8123_s19, %s7904_s11, %s7906_s12  }
  0xb4   : > { %s5275_s7 = smov [#allocation12]   ;;  %s198_s10 = sadd.s32 1, %s5213_s26 }
  0xb5   : > { %s313_s1 = sshll.u32 %s5275_s7, 4  ;;  %s8135_s3 = sld [smem:[#allocation112_spill]]  ;;  %s314_s1 = int_to_ptr.vmem [resolvable:$true] %s313_s1 }
  0xb6   : > { %p8136_p7 = pneg %p5438_p12 }
  0xbb   : > { %s4991_s0 = scalar_lea.hbm %s8135_s3, 6144 }
  0xbc   : > { %p4992_p5 = scmp.ne.s32.totalorder %s8135_s3, %s4991_s0  ;;  %p4998_p8 = scmp.lt.u32.totalorder %s4991_s0, %s8135_s3 }
  0xbe   : > { %p4994_p0 = pnand %p4992_p5, %p8136_p7 }
  0xc0   : > { %p4995_p4 = pneg %p4994_p0 }
  0xc2   : > { %p5000_p10 = pnand %p4998_p8, %p4995_p4 }
  0xc4   : > { %5003 = shalt.err (!%p5000_p10)
}
  0xc5   : > { %s5004_s22 = scalar_lea.vmem %s314_s1, 6144  ;;  %p8137_p1 = pmov %p8136_p7 }
  0xc6   : > { %p5005_p2 = scmp.ne.s32.totalorder %s314_s1, %s5004_s22  ;;  %p5012_p13 = scmp.lt.s32.totalorder %s314_s1, %s314_s1 }
  0xc7   : > { %p5013_p6 = scmp.lt.s32.totalorder %s5004_s22, %s5004_s22 }
  0xc8   : > { %p5007_p3 = pnand %p5005_p2, %p8137_p1 }
  0xc9   : > { %p5014_p9 = por %p5013_p6, %p5012_p13 }
  0xca   : > { %p5008_p11 = pneg %p5007_p3 }
  0xcc   : > { %p5015_p5 = pnand %p5014_p9, %p5008_p11 }
  0xce   : > { %5018 = shalt.err (!%p5015_p5)
}
  0xcf   : > { %4332 = dma.hbm_to_vmem [thread:$0]  (!%p5438_p12), %s8135_s3, 6144, %s314_s1, [#allocation13], %s8123_s19, %s8123_s19, %s8122_s8  }
  0xd0   : > { %p8138_p7 = scmp.ne.s32.totalorder %s8118_s24, 0  ;;  %p205_p0 = scmp.ne.s32.totalorder %s5213_s26, %s5209_s25 }
  0xd1   : > { %s396_s18 = sand.u32 1, %s5213_s26   ;;  %s8139_s7 = smul.u32 96, %s5261_s15 }
  0xd2   : > { %s5703_s21 = scalar_select %p8138_p7, %s5213_s26, %s198_s10  }
  0xd3   : > { %s5708_s27 = smul.u32 192, %s396_s18  ;;  %s406_s5 = sadd.s32 %s5257_s14, %s8139_s7 }
  0xd4   : > { %p8140_p4 = scmp.eq.s32.totalorder %s5265_s16, 0  ;;  %s3712_s2 = sshll.u32 %s406_s5, 6 }
  0xd5   : > { %s8141_s22 = sld [smem:[#allocation114_spill]]  ;;  %s398_s24 = scalar_lea.vmem [#allocation15], %s5708_s27 }
  0xd6   : > { %p207_p8 = por %p205_p0, %p8140_p4  ;;  %s409_s8 = sshll.u32 %s398_s24, 4  ;;  %s5727_s8 = int_to_ptr.vmem [resolvable:$true] %s409_s8 }
  0xd7   : > { %p8142_p12 = scmp.lt.s32.totalorder %s5265_s16, 8  ;;  %s8144_s18 = sld [smem:[#allocation115_spill]] }
  0xd9   : > { %p5723_p10 = pnand %p8142_p12, %p207_p8 }
  0xdb   : > { %s5718_s4 = scalar_lea.hbm %s8141_s22, %s3712_s2  ;;  %p5021_p1 = pneg %p5723_p10 }
  0xdc   : > { %s5019_s5 = scalar_lea.hbm %s5718_s4, 3072  ;;  %s5024_s24 = scalar_lea.hbm %s8141_s22, 12288 }
  0xdd   : > { %s5732_s7 = scalar_lea.hbm %s8144_s18, %s3712_s2  ;;  %p5020_p2 = scmp.ne.s32.totalorder %s5718_s4, %s5019_s5 }
  0xde   : > { %p5025_p13 = scmp.lt.u32.totalorder %s5718_s4, %s8141_s22  ;;  %p5026_p6 = scmp.lt.u32.totalorder %s5024_s24, %s5019_s5 }
  0xdf   : > { %p5022_p3 = pnand %p5021_p1, %p5020_p2  ;;  %p5028_p5 = scmp.lt.u32.totalorder %s5019_s5, %s5718_s4 }
  0xe0   : > { %p5027_p9 = por %p5026_p6, %p5025_p13 }
  0xe1   : > { %p5023_p11 = pneg %p5022_p3 }
  0xe2   : > { %p5029_p7 = por %p5028_p5, %p5027_p9 }
  0xe4   : > { %p5030_p0 = pnand %p5029_p7, %p5023_p11 }
  0xe6   : > { %5033 = shalt.err (!%p5030_p0)
}
  0xe7   : > { %s5034_s2 = scalar_lea.vmem %s5727_s8, 3072  ;;  %s5276_s10 = smov [#allocation15]  }
  0xe8   : > { %p5035_p4 = scmp.ne.s32.totalorder %s5727_s8, %s5034_s2  ;;  %s5039_s13 = sshll.u32 %s5276_s10, 4  ;;  %s5040_s13 = int_to_ptr.vmem [resolvable:$false] %s5039_s13 }
  0xe9   : > { %s5041_s11 = scalar_lea.vmem %s5040_s13, 6144  ;;  %p5042_p2 = scmp.lt.s32.totalorder %s5727_s8, %s5040_s13 }
  0xea   : > { %p5037_p8 = pnand %p5035_p4, %p5021_p1  ;;  %p5043_p3 = scmp.lt.s32.totalorder %s5041_s11, %s5034_s2 }
  0xec   : > { %p5038_p12 = pneg %p5037_p8  ;;  %p5044_p13 = por %p5043_p3, %p5042_p2 }
  0xee   : > { %p5045_p6 = pnand %p5044_p13, %p5038_p12 }
  0xf0   : > { %5048 = shalt.err (!%p5045_p6)
}
  0xf1   : > { %s8145_s12 = smov 4   ;;  %s8146_s5 = smov 64  }
  0xf2   : > { %4345 = dma.hbm_to_vmem [thread:$0]  (!%p5723_p10), %s5718_s4, 3072, %s5727_s8, %s5582_s6, %s8123_s19, %s8146_s5, %s8145_s12  }
  0xf3   : > { %s423_s0 = scalar_lea.vmem [#allocation16], %s5708_s27  ;;  %s5049_s24 = scalar_lea.hbm %s5732_s7, 3072 }
  0xf4   : > { %s434_s23 = sshll.u32 %s423_s0, 4  ;;  %p5050_p11 = scmp.ne.s32.totalorder %s5732_s7, %s5049_s24  ;;  %s5764_s23 = int_to_ptr.vmem [resolvable:$true] %s434_s23 }
  0xf5   : > { %s5054_s13 = scalar_lea.hbm %s8144_s18, 12288  ;;  %p5055_p7 = scmp.lt.u32.totalorder %s5732_s7, %s8144_s18 }
  0xf6   : > { %p5052_p9 = pnand %p5050_p11, %p5021_p1  ;;  %p5056_p0 = scmp.lt.u32.totalorder %s5054_s13, %s5049_s24 }
  0xf7   : > { %p5058_p8 = scmp.lt.u32.totalorder %s5049_s24, %s5732_s7 }
  0xf8   : > { %p5053_p5 = pneg %p5052_p9  ;;  %p5057_p4 = por %p5056_p0, %p5055_p7 }
  0xfa   : > { %p5059_p12 = por %p5058_p8, %p5057_p4 }
  0xfc   : > { %p5060_p2 = pnand %p5059_p12, %p5053_p5 }
  0xfe   : > { %5063 = shalt.err (!%p5060_p2)
}
  0xff   : > { %s5064_s6 = scalar_lea.vmem %s5764_s23, 3072  ;;  %s5277_s27 = smov [#allocation16]  }
 0x100   : > { %p5065_p3 = scmp.ne.s32.totalorder %s5764_s23, %s5064_s6  ;;  %s5069_s4 = sshll.u32 %s5277_s27, 4  ;;  %s5070_s4 = int_to_ptr.vmem [resolvable:$false] %s5069_s4 }
 0x101   : > { %s5071_s3 = scalar_lea.vmem %s5070_s4, 6144  ;;  %p5072_p11 = scmp.lt.s32.totalorder %s5764_s23, %s5070_s4 }
 0x102   : > { %p5067_p13 = pnand %p5065_p3, %p5021_p1  ;;  %p5073_p9 = scmp.lt.s32.totalorder %s5071_s3, %s5064_s6 }
 0x104   : > { %p5068_p6 = pneg %p5067_p13  ;;  %p5074_p7 = por %p5073_p9, %p5072_p11 }
 0x106   : > { %p5075_p0 = pnand %p5074_p7, %p5068_p6 }
 0x108   : > { %5078 = shalt.err (!%p5075_p0)
}
 0x109   : > { %4348 = dma.hbm_to_vmem [thread:$0]  (!%p5723_p10), %s5732_s7, 3072, %s5764_s23, %s5539_s9, %s8123_s19, %s8146_s5, %s8145_s12  }
 0x10a   : > { %s8147_s8 = sld [smem:[#allocation36_spill]] }
 0x110   : > { %p8148_p1 = scmp.ne.s32.totalorder %s8147_s8, 0 }
 0x112   : > { %446 = sbr.rel (%p8148_p1) target bundleno = 1534 (0x5fe), region = 48 }
 0x119   : > { %s8149_s0 = sld [smem:[#allocation27_spill]]  ;;  %s8150_s24 = sld [smem:[#allocation40_spill]] }
 0x11a   : > { %s448_s2 = sand.u32 1, %s5404_s17  }
 0x11b   : > { %s449_s11 = scalar_lea.sflag [#allocation7], %s448_s2 }
 0x11f   : > { %s450_s10 = sand.u32 1, %s8149_s0   ;;  %p8151_p5 = scmp.ne.s32.totalorder %s8150_s24, 0 }
 0x120   : > { %s4302_s13 = smul.u32 192, %s450_s10 }
 0x122   : > { %s5797_s6 = scalar_lea.vmem [#allocation6], %s4302_s13 }
 0x123   : > { %5172 = dma.done.wait (%p8151_p5), %s449_s11, 3072  }
 0x124   : > { %5174 = vsyncadd (%p8151_p5), %s449_s11, 4294964224  ;;  %s458_s1 = scalar_lea.sflag [#allocation10], %s448_s2  ;;  %s5803_s9 = scalar_lea.vmem [#allocation9], %s4302_s13 }
 0x125   : > { %5176 = dma.done.wait (%p8151_p5), %s458_s1, 3072  }
 0x126   : > { %5178 = vsyncadd (%p8151_p5), %s458_s1, 4294964224  ;;  %p8152_p10 = scmp.eq.s32.totalorder %s5404_s17, 0 }
 0x128   : > { %5180 = dma.done.wait (%p8152_p10), [#allocation10], 6144   ;;  %p8153_p4 = pmov %p8152_p10 }
 0x12a   : > { %5182 = vsyncadd (%p8153_p4), [#allocation10], 4294961152  ;;  %p8154_p8 = pmov %p8153_p4 }
 0x12b   : > { %p8155_p12 = pmov %p8153_p4 }
 0x12c   : > { %5184 = dma.done.wait (%p8154_p8), [#allocation13], 6144  }
 0x12d   : > { %5186 = vsyncadd (%p8155_p12), [#allocation13], 4294961152  ;;  %s8156_s19 = sld [smem:[#allocation33_spill]]  ;;  %s476_s7 = sand.u32 1, %s5221_s28  }
 0x12e   : > { %s5820_s12 = smul.u32 96, %s476_s7 }
 0x130   : > { %s5823_s5 = scalar_lea.vmem [#allocation14], %s5820_s12 }
 0x133   : > { %p8157_p2 = scmp.ne.s32.totalorder %s8156_s19, 0 }
 0x135   : > { %5188 = dma.done.wait (%p8157_p2), %s449_s11, 1536  }
 0x136   : > { %5190 = vsyncadd (%p8157_p2), %s449_s11, 4294965760  ;;  %s8158_s23 = sld [smem:[#allocation34_spill]]  ;;  %s485_s27 = sand.u32 1, %s5209_s25  }
 0x137   : > { %s4304_s17 = smul.u32 192, %s485_s27 }
 0x139   : > { %s5830_s4 = scalar_lea.vmem [#allocation15], %s4304_s17 }
 0x13c   : > { %p8159_p3 = scmp.ne.s32.totalorder %s8158_s23, 0 }
 0x13e   : > { %5192 = dma.done.wait (%p8159_p3), %s458_s1, 3072  }
 0x13f   : > { %5194 = vsyncadd (%p8159_p3), %s458_s1, 4294964224  ;;  %s5836_s3 = scalar_lea.vmem [#allocation16], %s4304_s17 }
 0x140   : > { %5196 = dma.done.wait (%p8159_p3), %s449_s11, 3072  }
 0x141   : > { %5198 = vsyncadd (%p8159_p3), %s449_s11, 4294964224  ;;  %v5843_v0 = vld [vmem:[%s5830_s4 + $0x40] sm:$0xff]   ;;  %v5856_v7 = vld [vmem:[%s5830_s4 + $0x48] sm:$0xff]   ;;  %s5278_s8 = smov 64   ;;  %vm560_vm0 = vcmask 7168   ;;  %s7725_s0 = scalar_lea.vmem [#allocation17], %s5820_s12 }
 0x142   : > { %v5846_v1 = vld [vmem:[%s5830_s4] sm:$0xff]   ;;  %v3879_v3 = vunpack.c.l.bf16 %v5843_v0  ;;  %v3880_v4 = vunpack.c.h.bf16 %v5843_v0  ;;  %v7973_v10 = vunpack.c.l.bf16 %v5856_v7  ;;  %v7972_v11 = vunpack.c.h.bf16 %v5856_v7  ;;  %v5863_v12 = vld [vmem:[%s5830_s4 + $0x8] sm:$0xff]   ;;  %v5891_v22 = vld [vmem:[%s5830_s4 + $0x50] sm:$0xff]   ;;  %s8434_s24 = sld [smem:[#allocation29_spill]]  ;;  %s8435_s2 = sld [smem:[#allocation31_spill]] }
 0x143   : > { %v5849_v2 = vld [vmem:[%s5830_s4 + $0x80] sm:$0xff]   ;;  %v3847_v5 = vunpack.c.l.bf16 %v5846_v1  ;;  %v3848_v6 = vunpack.c.h.bf16 %v5846_v1  ;;  %v5870_v14 = vld [vmem:[%s5830_s4 + $0x88] sm:$0xff]   ;;  %v7971_v17 = vunpack.c.l.bf16 %v5863_v12  ;;  %v7968_v18 = vunpack.c.h.bf16 %v5863_v12  ;;  %v5894_v23 = vld [vmem:[%s5830_s4 + $0x10] sm:$0xff]   ;;  %s8436_s10 = sld [smem:[#allocation30_spill]]  ;;  %s8437_s23 = sld [smem:[#allocation116_spill]] }
 0x144   : > { %v3911_v8 = vunpack.c.l.bf16 %v5849_v2  ;;  %v7974_v9 = vunpack.c.h.bf16 %v5849_v2  ;;  %v4499_v13 = vpack.i.bf16 %v3880_v4, %v3879_v3  ;;  %v4514_v19 = vpack.i.bf16 %v7972_v11, %v7973_v10  ;;  %v5911_v30 = vld [vmem:[%s5830_s4 + $0x90] sm:$0xff]   ;;  %v5914_v31 = vld [vmem:[%s5830_s4 + $0x58] sm:$0xff]   ;;  %v5951_v46 = vld [vmem:[%s5830_s4 + $0x60] sm:$0xff]   ;;  %s7780_s17 = scalar_lea.sflag [#allocation8], %s476_s7  ;;  %p8438_p6 = scmp.ne.s32.totalorder %s8130_s30, 0 }
 0x145   : > { %v4504_v16 = vpack.i.bf16 %v3848_v6, %v3847_v5  ;;  %v7967_v20 = vunpack.c.l.bf16 %v5870_v14  ;;  %v7966_v21 = vunpack.c.h.bf16 %v5870_v14  ;;  %v4519_v24 = vpack.i.bf16 %v7968_v18, %v7971_v17  ;;  %v5931_v38 = vld [vmem:[%s5830_s4 + $0x18] sm:$0xff]   ;;  %v5954_v47 = vld [vmem:[%s5830_s4 + $0x20] sm:$0xff]   ;;  %v5974_v55 = vld [vmem:[%s5830_s4 + $0x68] sm:$0xff]  }
 0x146   : > { %v4509_v15 = vpack.i.bf16 %v7974_v9, %v3911_v8  ;;  %4500 = vrot.lane.b32.xlu0 %v4499_v13, %s5278_s8  ;;  %v7965_v25 = vunpack.c.l.bf16 %v5891_v22  ;;  %v7962_v26 = vunpack.c.h.bf16 %v5891_v22  ;;  %v7961_v28 = vunpack.c.l.bf16 %v5894_v23  ;;  %v5934_v39 = vld [vmem:[%s5830_s4 + $0x98] sm:$0xff]   ;;  %v5971_v54 = vld [vmem:[%s5830_s4 + $0xa0] sm:$0xff]   ;;  %v5991_v62 = vld [vmem:[%s5830_s4 + $0x28] sm:$0xff]  }
 0x147   : > { %v4524_v27 = vpack.i.bf16 %v7966_v21, %v7967_v20  ;;  %v7960_v29 = vunpack.c.h.bf16 %v5894_v23  ;;  %v7959_v33 = vunpack.c.l.bf16 %v5911_v30  ;;  %v7950_v34 = vunpack.c.h.bf16 %v5911_v30  ;;  %v5994_v63 = vld [vmem:[%s5830_s4 + $0xa8] sm:$0xff]   ;;  %v989_v21 = vld [vmem:[#allocation11 + $0xa0] sm:$0xff] }
 0x148   : > { %4510 = vrot.lane.b32.xlu1 %v4509_v15, %s5278_s8  ;;  %v4529_v32 = vpack.i.bf16 %v7962_v26, %v7965_v25  ;;  %v7949_v36 = vunpack.c.l.bf16 %v5914_v31  ;;  %v7944_v37 = vunpack.c.h.bf16 %v5914_v31  ;;  %v7943_v41 = vunpack.c.l.bf16 %v5931_v38  ;;  %v988_v26 = vld [vmem:[#allocation11 + $0x98] sm:$0xff]  ;;  %v990_v20 = vld [vmem:[#allocation11 + $0xa8] sm:$0xff]  ;;  %v973_v18 = vld [vmem:[#allocation11 + $0x20] sm:$0xff]  ;;  %s3796_s13 = smul.u32 48, %s8434_s24 }
 0x149   : > { %v4534_v35 = vpack.i.bf16 %v7960_v29, %v7961_v28  ;;  %v4539_v40 = vpack.i.bf16 %v7950_v34, %v7959_v33  ;;  %v7938_v42 = vunpack.c.h.bf16 %v5931_v38  ;;  %v7937_v44 = vunpack.c.l.bf16 %v5934_v39  ;;  %v6174_v34 = vld [vmem:[%s5823_s5 + $0x58] sm:$0xff]   ;;  %v1001_v33 = vld [vmem:[#allocation11 + $0x100] sm:$0xff]  ;;  %v1002_v29 = vld [vmem:[#allocation11 + $0x108] sm:$0xff]  ;;  %s4305_s11 = smul.u32 96, %s8435_s2 }
 0x14a   : > { %4505 = vrot.lane.b32.xlu0 %v4504_v16, %s5278_s8  ;;  %v4544_v43 = vpack.i.bf16 %v7944_v37, %v7949_v36  ;;  %v7934_v45 = vunpack.c.h.bf16 %v5934_v39  ;;  %v7931_v49 = vunpack.c.l.bf16 %v5951_v46  ;;  %v7926_v50 = vunpack.c.h.bf16 %v5951_v46  ;;  %v6154_v37 = vld [vmem:[%s5823_s5 + $0x48] sm:$0xff]   ;;  %v6171_v36 = vld [vmem:[%s5823_s5 + $0x50] sm:$0xff]   ;;  %8172 = vst [vmem:[#allocation54_spill] sm:$0xff] %v6174_v34  ;;  %v1004_v25 = vld [vmem:[#allocation11 + $0x118] sm:$0xff] }
 0x14b   : > { %v4549_v48 = vpack.i.bf16 %v7938_v42, %v7943_v41  ;;  %v7925_v52 = vunpack.c.l.bf16 %v5954_v47  ;;  %v7922_v53 = vunpack.c.h.bf16 %v5954_v47  ;;  %v7919_v57 = vunpack.c.l.bf16 %v5971_v54  ;;  %v6134_v42 = vld [vmem:[%s5823_s5 + $0x38] sm:$0xff]   ;;  %8170 = vst [vmem:[#allocation52_spill] sm:$0xff] %v6154_v37  ;;  %8171 = vst [vmem:[#allocation53_spill] sm:$0xff] %v6171_v36  ;;  %v987_v28 = vld [vmem:[#allocation11 + $0x90] sm:$0xff] }
 0x14c   : > { %4515 = vrot.lane.b32.xlu1 %v4514_v19, %s5278_s8  ;;  %v4554_v51 = vpack.i.bf16 %v7934_v45, %v7937_v44  ;;  %v4559_v56 = vpack.i.bf16 %v7926_v50, %v7931_v49  ;;  %v7914_v58 = vunpack.c.h.bf16 %v5971_v54  ;;  %v7913_v60 = vunpack.c.l.bf16 %v5974_v55  ;;  %v6094_v50 = vld [vmem:[%s5823_s5 + $0x18] sm:$0xff]   ;;  %v6131_v44 = vld [vmem:[%s5823_s5 + $0x30] sm:$0xff]   ;;  %8168 = vst [vmem:[#allocation50_spill] sm:$0xff] %v6134_v42  ;;  %v974_v17 = vld [vmem:[#allocation11 + $0x28] sm:$0xff] }
 0x14d   : > { %v4564_v59 = vpack.i.bf16 %v7922_v53, %v7925_v52  ;;  %v7910_v61 = vunpack.c.h.bf16 %v5974_v55  ;;  %v7909_v15 = vunpack.c.l.bf16 %v5991_v62  ;;  %v7908_v16 = vunpack.c.h.bf16 %v5991_v62  ;;  %v6091_v52 = vld [vmem:[%s5823_s5 + $0x10] sm:$0xff]   ;;  %8164 = vst [vmem:[#allocation46_spill] sm:$0xff] %v6094_v50  ;;  %8167 = vst [vmem:[#allocation49_spill] sm:$0xff] %v6131_v44  ;;  %v1005_v11 = vld [vmem:[#allocation11 + $0x120] sm:$0xff] }
 0x14e   : > { %4520 = vrot.lane.b32.xlu0 %v4519_v24, %s5278_s8  ;;  %v4569_v13 = vpack.i.bf16 %v7914_v58, %v7919_v57  ;;  %v7912_v24 = vunpack.c.l.bf16 %v5994_v63  ;;  %v6054_v58 = vld [vmem:[%s5830_s4 + $0xb8] sm:$0xff]   ;;  %8163 = vst [vmem:[#allocation45_spill] sm:$0xff] %v6091_v52  ;;  %v7941_v49 = vunpack.c.l.bf16 %v6094_v50  ;;  %v7953_v41 = vunpack.c.h.bf16 %v6134_v42  ;;  %v1006_v10 = vld [vmem:[#allocation11 + $0x128] sm:$0xff] }
 0x14f   : > { %v4574_v19 = vpack.i.bf16 %v7910_v61, %v7913_v60  ;;  %v6051_v60 = vld [vmem:[%s5830_s4 + $0x38] sm:$0xff]   ;;  %8160 = vst [vmem:[#allocation42_spill] sm:$0xff] %v6054_v58  ;;  %v7929_v57 = vunpack.c.l.bf16 %v6054_v58  ;;  %v6220_v9 = vmul.f32 %v3911_v8, %v1001_v33  ;;  %v8177_v8 = vunpack.c.h.bf16 %v5863_v12 }
 0x150   : > { %4525 = vrot.lane.b32.xlu1 %v4524_v27, %s5278_s8  ;;  %v7911_v27 = vunpack.c.h.bf16 %v5994_v63 }
 0x152   : > { %4530 = vrot.lane.b32.xlu0 %v4529_v32, %s5278_s8  ;;  %v6011_v32 = vld [vmem:[%s5830_s4 + $0x70] sm:$0xff]  }
 0x154   : > { %4535 = vrot.lane.b32.xlu1 %v4534_v35, %s5278_s8  ;;  %v6014_v35 = vld [vmem:[%s5830_s4 + $0x30] sm:$0xff]  }
 0x156   : > { %4540 = vrot.lane.b32.xlu0 %v4539_v40, %s5278_s8  ;;  %v4579_v40 = vpack.i.bf16 %v7908_v16, %v7909_v15  ;;  %v7916_v16 = vunpack.c.h.bf16 %v6014_v35 }
 0x158   : > { %4545 = vrot.lane.b32.xlu1 %v4544_v43, %s5278_s8  ;;  %v7918_v43 = vunpack.c.l.bf16 %v6011_v32 }
 0x15a   : > { %4550 = vrot.lane.b32.xlu0 %v4549_v48, %s5278_s8  ;;  %v7915_v48 = vunpack.c.h.bf16 %v6011_v32 }
 0x15c   : > { %4555 = vrot.lane.b32.xlu1 %v4554_v51, %s5278_s8  ;;  %v6024_v51 = vld [vmem:[%s5830_s4 + $0xb0] sm:$0xff]   ;;  %v4589_v15 = vpack.i.bf16 %v7915_v48, %v7918_v43  ;;  %v6057_v48 = vld [vmem:[%s5823_s5] sm:$0xff]   ;;  %v6067_v43 = vld [vmem:[%s5823_s5 + $0x8] sm:$0xff]  }
 0x15d   : > { %v7921_v61 = vunpack.c.l.bf16 %v6024_v51  ;;  %8161 = vst [vmem:[#allocation43_spill] sm:$0xff] %v6057_v48  ;;  %8162 = vst [vmem:[#allocation44_spill] sm:$0xff] %v6067_v43  ;;  %v7933_v53 = vunpack.c.l.bf16 %v6057_v48 }
 0x15e   : > { %4560 = vrot.lane.b32.xlu0 %v4559_v56, %s5278_s8  ;;  %v6027_v56 = vld [vmem:[%s5830_s4 + $0x78] sm:$0xff]  }
 0x160   : > { %4565 = vrot.lane.b32.xlu1 %v4564_v59, %s5278_s8  ;;  %v4584_v59 = vpack.i.bf16 %v7911_v27, %v7912_v24  ;;  %v7924_v24 = vunpack.c.l.bf16 %v6027_v56 }
 0x162   : > { %4570 = vrot.lane.b32.xlu0 %v4569_v13, %s5278_s8  ;;  %v7917_v13 = vunpack.c.l.bf16 %v6014_v35 }
 0x164   : > { %4575 = vrot.lane.b32.xlu1 %v4574_v19, %s5278_s8  ;;  %v7920_v19 = vunpack.c.h.bf16 %v6024_v51  ;;  %v4594_v27 = vpack.i.bf16 %v7916_v16, %v7917_v13  ;;  %v7930_v16 = vunpack.c.l.bf16 %v6051_v60  ;;  %v7927_v13 = vunpack.c.h.bf16 %v6051_v60 }
 0x166   : > { %4580 = vrot.lane.b32.xlu0 %v4579_v40, %s5278_s8  ;;  %v7923_v40 = vunpack.c.h.bf16 %v6027_v56 }
 0x168   : > { %4585 = vrot.lane.b32.xlu1 %v4584_v59, %s5278_s8  ;;  %v4599_v59 = vpack.i.bf16 %v7920_v19, %v7921_v61  ;;  %v7928_v19 = vunpack.c.h.bf16 %v6054_v58  ;;  %v4609_v61 = vpack.i.bf16 %v7927_v13, %v7930_v16  ;;  %v6097_v13 = vld [vmem:[%s5823_s5 + $0x20] sm:$0xff]   ;;  %v6107_v16 = vld [vmem:[%s5823_s5 + $0x28] sm:$0xff]  }
 0x169   : > { %8165 = vst [vmem:[#allocation47_spill] sm:$0xff] %v6097_v13  ;;  %8166 = vst [vmem:[#allocation48_spill] sm:$0xff] %v6107_v16  ;;  %v7946_v45 = vunpack.c.l.bf16 %v6097_v13 }
 0x16a   : > { %4590 = vrot.lane.b32.xlu0 %v4589_v15, %s5278_s8  ;;  %v4604_v15 = vpack.i.bf16 %v7923_v40, %v7924_v24  ;;  %v4614_v40 = vpack.i.bf16 %v7928_v19, %v7929_v57  ;;  %v7936_v24 = vunpack.c.l.bf16 %v6067_v43  ;;  %v7942_v19 = vunpack.c.l.bf16 %v6091_v52 }
 0x16b   : > { %v7939_v57 = vunpack.c.h.bf16 %v6091_v52 }
 0x16c   : > { %4595 = vrot.lane.b32.xlu1 %v4594_v27, %s5278_s8  ;;  %v7932_v27 = vunpack.c.h.bf16 %v6057_v48  ;;  %v1162_v48 = vld [vmem:[#allocation12 + $0x8] sm:$0xff] }
 0x16e   : > { %4600 = vrot.lane.b32.xlu0 %v4599_v59, %s5278_s8  ;;  %v7935_v59 = vunpack.c.h.bf16 %v6067_v43 }
 0x170   : > { %4605 = vrot.lane.b32.xlu1 %v4604_v15, %s5278_s8  ;;  %v4619_v15 = vpack.i.bf16 %v7932_v27, %v7933_v53  ;;  %v7940_v27 = vunpack.c.h.bf16 %v6094_v50  ;;  %v4629_v53 = vpack.i.bf16 %v7939_v57, %v7942_v19  ;;  %v6137_v57 = vld [vmem:[%s5823_s5 + $0x40] sm:$0xff]  }
 0x171   : > { %8169 = vst [vmem:[#allocation51_spill] sm:$0xff] %v6137_v57 }
 0x172   : > { %4610 = vrot.lane.b32.xlu0 %v4609_v61, %s5278_s8  ;;  %v4624_v61 = vpack.i.bf16 %v7935_v59, %v7936_v24  ;;  %v4634_v59 = vpack.i.bf16 %v7940_v27, %v7941_v49  ;;  %v7948_v24 = vunpack.c.l.bf16 %v6107_v16  ;;  %v7952_v27 = vunpack.c.l.bf16 %v6131_v44 }
 0x173   : > { %v7951_v49 = vunpack.c.h.bf16 %v6131_v44 }
 0x174   : > { %4615 = vrot.lane.b32.xlu1 %v4614_v40, %s5278_s8  ;;  %v7945_v40 = vunpack.c.h.bf16 %v6097_v13  ;;  %v1194_v13 = vld [vmem:[#allocation12 + $0x108] sm:$0xff] }
 0x176   : > { %4620 = vrot.lane.b32.xlu0 %v4619_v15, %s5278_s8  ;;  %v7947_v15 = vunpack.c.h.bf16 %v6107_v16 }
 0x178   : > { %4625 = vrot.lane.b32.xlu1 %v4624_v61, %s5278_s8  ;;  %v4639_v61 = vpack.i.bf16 %v7945_v40, %v7946_v45  ;;  %v4644_v19 = vpack.i.bf16 %v7947_v15, %v7948_v24  ;;  %v4649_v40 = vpack.i.bf16 %v7951_v49, %v7952_v27  ;;  %v7955_v45 = vunpack.c.h.bf16 %v6137_v57 }
 0x179   : > { %v7957_v24 = vunpack.c.l.bf16 %v6154_v37  ;;  %v7964_v49 = vunpack.c.l.bf16 %v6171_v36  ;;  %v7963_v27 = vunpack.c.h.bf16 %v6171_v36  ;;  %v8180_v36 = vunpack.c.l.bf16 %v5891_v22 }
 0x17a   : > { %4630 = vrot.lane.b32.xlu0 %v4629_v53, %s5278_s8  ;;  %v7954_v53 = vunpack.c.l.bf16 %v6134_v42  ;;  %v8188_v42 = vunpack.c.l.bf16 %v5931_v38 }
 0x17c   : > { %4635 = vrot.lane.b32.xlu1 %v4634_v59, %s5278_s8  ;;  %v7958_v59 = vunpack.c.l.bf16 %v6137_v57  ;;  %v4654_v15 = vpack.i.bf16 %v7953_v41, %v7954_v53  ;;  %v7970_v53 = vunpack.c.l.bf16 %v6174_v34 }
 0x17e   : > { %4640 = vrot.lane.b32.xlu0 %v4639_v61, %s5278_s8  ;;  %v7956_v61 = vunpack.c.h.bf16 %v6154_v37  ;;  %v8184_v37 = vunpack.c.l.bf16 %v5911_v30 }
 0x180   : > { %4645 = vrot.lane.b32.xlu1 %v4644_v19, %s5278_s8  ;;  %v4659_v19 = vpack.i.bf16 %v7955_v45, %v7958_v59  ;;  %v4664_v41 = vpack.i.bf16 %v7956_v61, %v7957_v24  ;;  %v4669_v45 = vpack.i.bf16 %v7963_v27, %v7964_v49  ;;  %v985_v61 = vld [vmem:[#allocation11 + $0x80] sm:$0xff]  ;;  %v986_v24 = vld [vmem:[#allocation11 + $0x88] sm:$0xff]  ;;  %v971_v27 = vld [vmem:[#allocation11 + $0x10] sm:$0xff]  ;;  %v6268_v57 = vmul.f32 %v8184_v37, %v1005_v11 }
 0x181   : > { %v969_v59 = vld [vmem:[#allocation11] sm:$0xff]  ;;  %v972_v49 = vld [vmem:[#allocation11 + $0x18] sm:$0xff]  ;;  %v8190_v37 = vunpack.c.l.bf16 %v5934_v39 }
 0x182   : > { %4650 = vrot.lane.b32.xlu0 %v4649_v40, %s5278_s8  ;;  %v7969_v40 = vunpack.c.h.bf16 %v6174_v34 }
 0x184   : > { %4655 = vrot.lane.b32.xlu1 %v4654_v15, %s5278_s8  ;;  %v4674_v15 = vpack.i.bf16 %v7969_v40, %v7970_v53  ;;  %v6212_v40 = vmul.f32 %v3847_v5, %v969_v59  ;;  %v8175_v5 = vunpack.c.h.bf16 %v5856_v7  ;;  %v992_v59 = vld [vmem:[#allocation11 + $0xb8] sm:$0xff] }
 0x186   : > { %4660 = vrot.lane.b32.xlu0 %v4659_v19, %s5278_s8  ;;  %v970_v19 = vld [vmem:[#allocation11 + $0x8] sm:$0xff]  ;;  %v6232_v1 = vmul.f32 %v8175_v5, %v988_v26  ;;  %v976_v26 = vld [vmem:[#allocation11 + $0x38] sm:$0xff]  ;;  %v1177_v5 = vld [vmem:[#allocation12 + $0x80] sm:$0xff] }
 0x187   : > { %v6216_v53 = vmul.f32 %v3848_v6, %v970_v19  ;;  %v991_v6 = vld [vmem:[#allocation11 + $0xb0] sm:$0xff]  ;;  %v8176_v19 = vunpack.c.l.bf16 %v5863_v12  ;;  %v8181_v12 = vunpack.c.h.bf16 %v5891_v22 }
 0x188   : > { %4665 = vrot.lane.b32.xlu1 %v4664_v41, %s5278_s8  ;;  %v1003_v41 = vld [vmem:[#allocation11 + $0x110] sm:$0xff] }
 0x189   : > { %v6236_v34 = vmul.f32 %v8176_v19, %v971_v27  ;;  %v6252_v27 = vmul.f32 %v8180_v36, %v989_v21  ;;  %v8182_v19 = vunpack.c.l.bf16 %v5894_v23  ;;  %v8185_v21 = vunpack.c.h.bf16 %v5911_v30 }
 0x18a   : > { %4670 = vrot.lane.b32.xlu0 %v4669_v45, %s5278_s8  ;;  %v6204_v45 = vmul.f32 %v3879_v3, %v985_v61  ;;  %v8173_v3 = vunpack.c.h.bf16 %v5849_v2  ;;  %v975_v61 = vld [vmem:[#allocation11 + $0x30] sm:$0xff]  ;;  %v6240_v2 = vmul.f32 %v8177_v8, %v972_v49  ;;  %v6256_v49 = vmul.f32 %v8181_v12, %v990_v20  ;;  %v993_v8 = vld [vmem:[#allocation11 + $0xc0] sm:$0xff]  ;;  %v978_v12 = vld [vmem:[#allocation11 + $0x48] sm:$0xff] }
 0x18b   : > { %v6272_v22 = vmul.f32 %v8185_v21, %v1006_v10  ;;  %v8186_v20 = vunpack.c.l.bf16 %v5914_v31  ;;  %v6284_v11 = vmul.f32 %v8188_v42, %v975_v61  ;;  %v8189_v30 = vunpack.c.h.bf16 %v5931_v38  ;;  %v1009_v21 = vld [vmem:[#allocation11 + $0x140] sm:$0xff] }
 0x18c   : > { %4675 = vrot.lane.b32.xlu1 %v4674_v15, %s5278_s8  ;;  %v6208_v15 = vmul.f32 %v3880_v4, %v986_v24  ;;  %v6224_v0 = vmul.f32 %v8173_v3, %v1002_v29  ;;  %v8174_v4 = vunpack.c.l.bf16 %v5856_v7  ;;  %v8178_v29 = vunpack.c.l.bf16 %v5870_v14  ;;  %v1007_v3 = vld [vmem:[#allocation11 + $0x130] sm:$0xff] }
 0x18d   : > { %v6276_v36 = vmul.f32 %v8186_v20, %v991_v6  ;;  %v6288_v10 = vmul.f32 %v8189_v30, %v976_v26  ;;  %v6292_v6 = vmul.f32 %v8190_v37, %v1007_v3  ;;  %v1010_v20 = vld [vmem:[#allocation11 + $0x148] sm:$0xff]  ;;  %v8192_v42 = vunpack.c.l.bf16 %v5951_v46  ;;  %v995_v3 = vld [vmem:[#allocation11 + $0xd0] sm:$0xff]  ;;  %v996_v30 = vld [vmem:[#allocation11 + $0xd8] sm:$0xff] }
 0x18e   : > { %v6228_v24 = vmul.f32 %v8174_v4, %v987_v28  ;;  %v6244_v33 = vmul.f32 %v8178_v29, %v1003_v41  ;;  %v8179_v28 = vunpack.c.h.bf16 %v5870_v14  ;;  %v1008_v4 = vld [vmem:[#allocation11 + $0x138] sm:$0xff]  ;;  %v6260_v41 = vmul.f32 %v8182_v19, %v973_v18  ;;  %v994_v29 = vld [vmem:[#allocation11 + $0xc8] sm:$0xff] }
 0x18f   : > { %v8183_v14 = vunpack.c.h.bf16 %v5894_v23  ;;  %v8187_v18 = vunpack.c.h.bf16 %v5914_v31  ;;  %v8191_v31 = vunpack.c.h.bf16 %v5934_v39  ;;  %v6300_v61 = vmul.f32 %v8192_v42, %v993_v8 }
 0x190   : > { %v6248_v7 = vmul.f32 %v8179_v28, %v1004_v25  ;;  %v1178_v28 = vld [vmem:[#allocation12 + $0x88] sm:$0xff]  ;;  %v8193_v38 = vunpack.c.h.bf16 %v5951_v46  ;;  %v8196_v8 = vunpack.c.l.bf16 %v5971_v54  ;;  %v8197_v46 = vunpack.c.h.bf16 %v5971_v54  ;;  %v1180_v54 = vld [vmem:[#allocation12 + $0x98] sm:$0xff] }
 0x191   : > { %v6264_v25 = vmul.f32 %v8183_v14, %v974_v17  ;;  %v6280_v23 = vmul.f32 %v8187_v18, %v992_v59  ;;  %v977_v17 = vld [vmem:[#allocation11 + $0x40] sm:$0xff]  ;;  %v6296_v59 = vmul.f32 %v8191_v31, %v1008_v4  ;;  %v8194_v4 = vunpack.c.l.bf16 %v5954_v47 }
 0x192   : > { %v1193_v14 = vld [vmem:[#allocation12 + $0x100] sm:$0xff]  ;;  %v6304_v26 = vmul.f32 %v8193_v38, %v994_v29  ;;  %v6316_v42 = vmul.f32 %v8196_v8, %v1009_v21  ;;  %v6320_v29 = vmul.f32 %v8197_v46, %v1010_v20 }
 0x193   : > { %v6308_v31 = vmul.f32 %v8194_v4, %v977_v17  ;;  %v8198_v4 = vunpack.c.l.bf16 %v5974_v55 }
 0x1b8   : > { %v4501_v19 = vpop.permute.xlu0 %4500 }
 0x1b9   : > { %v4503_v18 = vunpack.i.h.bf16 %v4501_v19  ;;  %v4502_v44 = vunpack.i.l.bf16 %v4501_v19  ;;  %v8195_v19 = vunpack.c.h.bf16 %v5954_v47  ;;  %v6324_v47 = vmul.f32 %v8198_v4, %v995_v3 }
 0x1ba   : > { %v4511_v16 = vpop.permute.xlu1 %4510  ;;  %v8202_v4 = vunpack.c.l.bf16 %v5991_v62 }
 0x1bb   : > { %v4513_v37 = vunpack.i.h.bf16 %v4511_v16  ;;  %v4512_v39 = vunpack.i.l.bf16 %v4511_v16  ;;  %v6312_v50 = vmul.f32 %v8195_v19, %v978_v12  ;;  %v1225_v52 = vmul.f32 %v4502_v44, %v1177_v5  ;;  %v1161_v16 = vld [vmem:[#allocation12] sm:$0xff]  ;;  %8199 = vst [vmem:[#allocation55_spill] sm:$0xff] %v6324_v47  ;;  %v1163_v47 = vld [vmem:[#allocation12 + $0x10] sm:$0xff] }
 0x1bc   : > { %v1226_v43 = vmul.f32 %v4503_v18, %v1178_v28  ;;  %v4506_v38 = vpop.permute.xlu0 %4505  ;;  %v8200_v44 = vunpack.c.h.bf16 %v5974_v55  ;;  %v979_v28 = vld [vmem:[#allocation11 + $0x50] sm:$0xff] }
 0x1bd   : > { %v1241_v58 = vmul.f32 %v4512_v39, %v1193_v14  ;;  %v1242_v17 = vmul.f32 %v4513_v37, %v1194_v13  ;;  %v4508_v12 = vunpack.i.h.bf16 %v4506_v38  ;;  %v4507_v21 = vunpack.i.l.bf16 %v4506_v38  ;;  %v1179_v18 = vld [vmem:[#allocation12 + $0x90] sm:$0xff]  ;;  %v980_v14 = vld [vmem:[#allocation11 + $0x58] sm:$0xff] }
 0x1be   : > { %v6328_v5 = vmul.f32 %v8200_v44, %v996_v30  ;;  %v4516_v20 = vpop.permute.xlu1 %4515  ;;  %v1273_v19 = vadd.f32 %v1225_v52, %v6204_v45  ;;  %v1274_v8 = vadd.f32 %v1226_v43, %v6208_v15  ;;  %v6336_v38 = vmul.f32 %v8202_v4, %v979_v28  ;;  %v1164_v52 = vld [vmem:[#allocation12 + $0x18] sm:$0xff] }
 0x1bf   : > { %v4518_v13 = vunpack.i.h.bf16 %v4516_v20  ;;  %v4517_v37 = vunpack.i.l.bf16 %v4516_v20  ;;  %v1289_v3 = vadd.f32 %v1241_v58, %v6220_v9  ;;  %v1290_v39 = vadd.f32 %v1242_v17, %v6224_v0  ;;  %v1011_v9 = vld [vmem:[#allocation11 + $0x150] sm:$0xff] }
 0x1c0   : > { %8201 = vst [vmem:[#allocation56_spill] sm:$0xff] %v6328_v5  ;;  %v1313_v55 = vpack.c.bf16 %v1274_v8, %v1273_v19  ;;  %v1209_v30 = vmul.f32 %v4507_v21, %v1161_v16  ;;  %v1210_v46 = vmul.f32 %v4508_v12, %v1162_v48  ;;  %v4521_v45 = vpop.permute.xlu0 %4520  ;;  %v8203_v15 = vunpack.c.h.bf16 %v5991_v62  ;;  %v1195_v16 = vld [vmem:[#allocation12 + $0x110] sm:$0xff]  ;;  %v1196_v48 = vld [vmem:[#allocation12 + $0x118] sm:$0xff] }
 0x1c1   : > { %v1228_v44 = vmul.f32 %v4518_v13, %v1180_v54  ;;  %v1227_v5 = vmul.f32 %v4517_v37, %v1179_v18  ;;  %v1321_v43 = vpack.c.bf16 %v1290_v39, %v1289_v3  ;;  %v4523_v58 = vunpack.i.h.bf16 %v4521_v45  ;;  %v1012_v21 = vld [vmem:[#allocation11 + $0x158] sm:$0xff] }
 0x1c2   : > { %v6340_v20 = vmul.f32 %v8203_v15, %v980_v14  ;;  %4046 = vmatprep.subr.bf16.mxu0 %v1313_v55  ;;  %v4522_v0 = vunpack.i.l.bf16 %v4521_v45  ;;  %v4526_v17 = vpop.permute.xlu1 %4525  ;;  %v1257_v28 = vadd.f32 %v1209_v30, %v6212_v40  ;;  %v1258_v12 = vadd.f32 %v1210_v46, %v6216_v53  ;;  %v1181_v55 = vld [vmem:[#allocation12 + $0xa0] sm:$0xff]  ;;  %v1182_v53 = vld [vmem:[#allocation12 + $0xa8] sm:$0xff] }
 0x1c3   : > { %v4528_v18 = vunpack.i.h.bf16 %v4526_v17  ;;  %v4527_v54 = vunpack.i.l.bf16 %v4526_v17  ;;  %4214 = vmatprep.subr.bf16.mxu1 %v1321_v43  ;;  %v1275_v19 = vadd.f32 %v1227_v5, %v6228_v24  ;;  %v1276_v62 = vadd.f32 %v1228_v44, %v6232_v1  ;;  %v997_v24 = vld [vmem:[#allocation11 + $0xe0] sm:$0xff]  ;;  %v1166_v44 = vld [vmem:[#allocation12 + $0x28] sm:$0xff] }
 0x1c4   : > { %v1212_v8 = vmul.f32 %v4523_v58, %v1164_v52  ;;  %v1211_v14 = vmul.f32 %v4522_v0, %v1163_v47  ;;  %v1305_v13 = vpack.c.bf16 %v1258_v12, %v1257_v28  ;;  %4215 = vmatpush3.bf16.xpose.msra.mxu1 %v1321_v43  ;;  %v8204_v37 = vunpack.c.l.bf16 %v5994_v63  ;;  %v4531_v30 = vpop.permute.xlu0 %4530  ;;  %v1165_v5 = vld [vmem:[#allocation12 + $0x20] sm:$0xff] }
 0x1c5   : > { %v1244_v39 = vmul.f32 %v4528_v18, %v1196_v48  ;;  %v1243_v40 = vmul.f32 %v4527_v54, %v1195_v16  ;;  %v1314_v46 = vpack.c.bf16 %v1276_v62, %v1275_v19  ;;  %v8205_v4 = vunpack.c.h.bf16 %v5994_v63  ;;  %v1198_v19 = vld [vmem:[#allocation12 + $0x128] sm:$0xff] }
 0x1c6   : > { %v6348_v3 = vmul.f32 %v8204_v37, %v1011_v9  ;;  %4047 = vmatpush3.bf16.xpose.msra.mxu0 %v1305_v13  ;;  %v4533_v1 = vunpack.i.h.bf16 %v4531_v30  ;;  %v4532_v47 = vunpack.i.l.bf16 %v4531_v30  ;;  %v4536_v52 = vpop.permute.xlu1 %4535  ;;  %v1259_v43 = vadd.f32 %v1211_v14, %v6236_v34  ;;  %v998_v9 = vld [vmem:[#allocation11 + $0xe8] sm:$0xff]  ;;  %v1197_v34 = vld [vmem:[#allocation12 + $0x120] sm:$0xff]  ;;  %v1183_v37 = vld [vmem:[#allocation12 + $0xb0] sm:$0xff] }
 0x1c7   : > { %v6352_v45 = vmul.f32 %v8205_v4, %v1012_v21  ;;  %v1260_v15 = vadd.f32 %v1212_v8, %v6240_v2  ;;  %v4538_v58 = vunpack.i.h.bf16 %v4536_v52  ;;  %v4537_v0 = vunpack.i.l.bf16 %v4536_v52  ;;  %4048 = vmatprep.subr.bf16.mxu0 %v1314_v46  ;;  %v982_v30 = vld [vmem:[#allocation11 + $0x68] sm:$0xff] }
 0x1c8   : > { %v1291_v16 = vadd.f32 %v1243_v40, %v6244_v33  ;;  %v1292_v63 = vadd.f32 %v1244_v39, %v6248_v7  ;;  %v1230_v48 = vmul.f32 %v4533_v1, %v1182_v53  ;;  %v1229_v17 = vmul.f32 %v4532_v47, %v1181_v55  ;;  %v4541_v2 = vpop.permute.xlu0 %4540  ;;  %v981_v33 = vld [vmem:[#allocation11 + $0x60] sm:$0xff]  ;;  %v1184_v39 = vld [vmem:[#allocation12 + $0xb8] sm:$0xff] }
 0x1c9   : > { %v1306_v28 = vpack.c.bf16 %v1260_v15, %v1259_v43  ;;  %v8206_v12 = vunpack.c.l.bf16 %v6011_v32  ;;  %v1214_v18 = vmul.f32 %v4538_v58, %v1166_v44  ;;  %v1213_v54 = vmul.f32 %v4537_v0, %v1165_v5  ;;  %v1167_v43 = vld [vmem:[#allocation12 + $0x30] sm:$0xff]  ;;  %v1168_v15 = vld [vmem:[#allocation12 + $0x38] sm:$0xff]  ;;  %v1013_v0 = vld [vmem:[#allocation11 + $0x160] sm:$0xff] }
 0x1ca   : > { %v1322_v62 = vpack.c.bf16 %v1292_v63, %v1291_v16  ;;  %v8207_v8 = vunpack.c.h.bf16 %v6011_v32  ;;  %v4543_v13 = vunpack.i.h.bf16 %v4541_v2  ;;  %v4542_v7 = vunpack.i.l.bf16 %v4541_v2  ;;  %v4546_v40 = vpop.permute.xlu1 %4545 }
 0x1cb   : > { %v6360_v21 = vmul.f32 %v8206_v12, %v997_v24  ;;  %v1277_v55 = vadd.f32 %v1229_v17, %v6252_v27  ;;  %v1278_v53 = vadd.f32 %v1230_v48, %v6256_v49  ;;  %v4548_v46 = vunpack.i.h.bf16 %v4546_v40  ;;  %v1199_v48 = vld [vmem:[#allocation12 + $0x130] sm:$0xff]  ;;  %v1200_v17 = vld [vmem:[#allocation12 + $0x138] sm:$0xff] }
 0x1cc   : > { %v6364_v14 = vmul.f32 %v8207_v8, %v998_v9  ;;  %4216 = vmatprep.subr.bf16.mxu1 %v1322_v62  ;;  %v4547_v4 = vunpack.i.l.bf16 %v4546_v40  ;;  %v6369_v24 = vadd.f32 %v1213_v54, %v6260_v41  ;;  %v6372_v32 = vadd.f32 %v1214_v18, %v6264_v25  ;;  %v4551_v9 = vpop.permute.xlu0 %4550  ;;  %v1186_v40 = vld [vmem:[#allocation12 + $0xc8] sm:$0xff] }
 0x1cd   : > { %v1246_v1 = vmul.f32 %v4543_v13, %v1198_v19  ;;  %v1245_v47 = vmul.f32 %v4542_v7, %v1197_v34  ;;  %4217 = vmatpush3.bf16.xpose.msra.mxu1 %v1322_v62  ;;  %v1315_v5 = vpack.c.bf16 %v1278_v53, %v1277_v55  ;;  %v8208_v44 = vunpack.c.l.bf16 %v6014_v35  ;;  %v1014_v34 = vld [vmem:[#allocation11 + $0x168] sm:$0xff] }
 0x1ce   : > { %v1232_v27 = vmul.f32 %v4548_v46, %v1184_v39  ;;  %v1231_v49 = vmul.f32 %v4547_v4, %v1183_v37  ;;  %v1307_v41 = vpack.c.bf16 %v6372_v32, %v6369_v24  ;;  %v8209_v58 = vunpack.c.h.bf16 %v6014_v35  ;;  %4049 = vmatpush3.bf16.xpose.msra.mxu0 %v1306_v28  ;;  %v4556_v12 = vpop.permute.xlu1 %4555  ;;  %v1169_v4 = vld [vmem:[#allocation12 + $0x40] sm:$0xff]  ;;  %v1170_v24 = vld [vmem:[#allocation12 + $0x48] sm:$0xff] }
 0x1cf   : > { %v6376_v52 = vmul.f32 %v8208_v44, %v981_v33  ;;  %v4553_v16 = vunpack.i.h.bf16 %v4551_v9  ;;  %v4552_v63 = vunpack.i.l.bf16 %v4551_v9  ;;  %v1293_v18 = vadd.f32 %v1245_v47, %v6268_v57  ;;  %4050 = vmatprep.subr.bf16.mxu0 %v1315_v5  ;;  %v1185_v57 = vld [vmem:[#allocation12 + $0xc0] sm:$0xff]  ;;  %v1000_v5 = vld [vmem:[#allocation11 + $0xf8] sm:$0xff] }
 0x1d0   : > { %v6382_v25 = vmul.f32 %v8209_v58, %v982_v30  ;;  %v1294_v54 = vadd.f32 %v1246_v1, %v6272_v22  ;;  %v4558_v19 = vunpack.i.h.bf16 %v4556_v12  ;;  %v4557_v2 = vunpack.i.l.bf16 %v4556_v12  ;;  %v4561_v22 = vpop.permute.xlu0 %4560 }
 0x1d1   : > { %v1279_v62 = vadd.f32 %v1231_v49, %v6276_v36  ;;  %v1280_v35 = vadd.f32 %v1232_v27, %v6280_v23  ;;  %v1216_v8 = vmul.f32 %v4553_v16, %v1168_v15  ;;  %v1215_v33 = vmul.f32 %v4552_v63, %v1167_v43  ;;  %v999_v36 = vld [vmem:[#allocation11 + $0xf0] sm:$0xff]  ;;  %v1201_v16 = vld [vmem:[#allocation12 + $0x140] sm:$0xff]  ;;  %v1202_v63 = vld [vmem:[#allocation12 + $0x148] sm:$0xff] }
 0x1d2   : > { %v1323_v28 = vpack.c.bf16 %v1294_v54, %v1293_v18  ;;  %v8210_v13 = vunpack.c.l.bf16 %v6024_v51  ;;  %v1248_v37 = vmul.f32 %v4558_v19, %v1200_v17  ;;  %v1247_v39 = vmul.f32 %v4557_v2, %v1199_v48  ;;  %v4566_v32 = vpop.permute.xlu1 %4565  ;;  %v1188_v19 = vld [vmem:[#allocation12 + $0xd8] sm:$0xff] }
 0x1d3   : > { %v1316_v55 = vpack.c.bf16 %v1280_v35, %v1279_v62  ;;  %v8211_v53 = vunpack.c.h.bf16 %v6024_v51  ;;  %v4563_v23 = vunpack.i.h.bf16 %v4561_v22  ;;  %v4562_v46 = vunpack.i.l.bf16 %v4561_v22  ;;  %v1171_v22 = vld [vmem:[#allocation12 + $0x50] sm:$0xff] }
 0x1d4   : > { %v6390_v7 = vmul.f32 %v8210_v13, %v1013_v0  ;;  %4218 = vmatprep.subr.bf16.mxu1 %v1323_v28  ;;  %v6397_v1 = vadd.f32 %v1215_v33, %v6284_v11  ;;  %v6400_v47 = vadd.f32 %v1216_v8, %v6288_v10  ;;  %v4568_v44 = vunpack.i.h.bf16 %v4566_v32  ;;  %v4571_v48 = vpop.permute.xlu0 %4570  ;;  %v984_v8 = vld [vmem:[#allocation11 + $0x78] sm:$0xff] }
 0x1d5   : > { %v6394_v30 = vmul.f32 %v8211_v53, %v1014_v34  ;;  %v4567_v27 = vunpack.i.l.bf16 %v4566_v32  ;;  %v1295_v51 = vadd.f32 %v1247_v39, %v6292_v6  ;;  %v1296_v49 = vadd.f32 %v1248_v37, %v6296_v59  ;;  %4219 = vmatpush3.bf16.xpose.msra.mxu1 %v1323_v28  ;;  %v983_v59 = vld [vmem:[#allocation11 + $0x70] sm:$0xff]  ;;  %v1204_v32 = vld [vmem:[#allocation12 + $0x158] sm:$0xff] }
 0x1d6   : > { %v1234_v43 = vmul.f32 %v4563_v23, %v1186_v40  ;;  %v1233_v15 = vmul.f32 %v4562_v46, %v1185_v57  ;;  %v1308_v9 = vpack.c.bf16 %v6400_v47, %v6397_v1  ;;  %v8212_v58 = vunpack.c.l.bf16 %v6027_v56  ;;  %4051 = vmatpush3.bf16.xpose.msra.mxu0 %v1307_v41  ;;  %v1187_v34 = vld [vmem:[#allocation12 + $0xd0] sm:$0xff]  ;;  %v4576_v2 = vpop.permute.xlu1 %4575 }
 0x1d7   : > { %v1218_v0 = vmul.f32 %v4568_v44, %v1170_v24  ;;  %v1217_v10 = vmul.f32 %v4567_v27, %v1169_v4  ;;  %v1324_v17 = vpack.c.bf16 %v1296_v49, %v1295_v51  ;;  %v8213_v6 = vunpack.c.h.bf16 %v6027_v56  ;;  %4052 = vmatprep.subr.bf16.mxu0 %v1316_v55  ;;  %v1172_v55 = vld [vmem:[#allocation12 + $0x58] sm:$0xff]  ;;  %v1203_v24 = vld [vmem:[#allocation12 + $0x150] sm:$0xff]  ;;  %v8216_v49 = vld [vmem:[#allocation55_spill] sm:$0xff] }
 0x1d8   : > { %v6408_v11 = vmul.f32 %v8212_v58, %v999_v36  ;;  %v4573_v18 = vunpack.i.h.bf16 %v4571_v48  ;;  %v4572_v54 = vunpack.i.l.bf16 %v4571_v48  ;;  %v1281_v62 = vadd.f32 %v1233_v15, %v6300_v61  ;;  %v4581_v53 = vpop.permute.xlu0 %4580  ;;  %v1016_v44 = vld [vmem:[#allocation11 + $0x178] sm:$0xff] }
 0x1d9   : > { %v6412_v12 = vmul.f32 %v8213_v6, %v1000_v5  ;;  %v1282_v35 = vadd.f32 %v1234_v43, %v6304_v26  ;;  %4220 = vmatprep.subr.bf16.mxu1 %v1324_v17  ;;  %v4578_v33 = vunpack.i.h.bf16 %v4576_v2  ;;  %v4577_v28 = vunpack.i.l.bf16 %v4576_v2  ;;  %v1189_v6 = vld [vmem:[#allocation12 + $0xe0] sm:$0xff] }
 0x1da   : > { %v6417_v56 = vadd.f32 %v1217_v10, %v6308_v31  ;;  %v6420_v13 = vadd.f32 %v1218_v0, %v6312_v50  ;;  %v1250_v41 = vmul.f32 %v4573_v18, %v1202_v63  ;;  %v1249_v37 = vmul.f32 %v4572_v54, %v1201_v16  ;;  %v1015_v50 = vld [vmem:[#allocation11 + $0x170] sm:$0xff]  ;;  %v4586_v1 = vpop.permute.xlu1 %4585  ;;  %v8218_v16 = vld [vmem:[#allocation42_spill] sm:$0xff] }
 0x1db   : > { %v1317_v39 = vpack.c.bf16 %v1282_v35, %v1281_v62  ;;  %v8214_v57 = vunpack.c.l.bf16 %v6051_v60  ;;  %v1236_v61 = vmul.f32 %v4578_v33, %v1188_v19  ;;  %v1235_v26 = vmul.f32 %v4577_v28, %v1187_v34  ;;  %v1173_v35 = vld [vmem:[#allocation12 + $0x60] sm:$0xff] }
 0x1dc   : > { %v1309_v36 = vpack.c.bf16 %v6420_v13, %v6417_v56  ;;  %v8215_v31 = vunpack.c.h.bf16 %v6051_v60  ;;  %v4583_v46 = vunpack.i.h.bf16 %v4581_v53  ;;  %v4582_v4 = vunpack.i.l.bf16 %v4581_v53  ;;  %v8217_v60 = vld [vmem:[#allocation56_spill] sm:$0xff]  ;;  %v4591_v18 = vpop.permute.xlu0 %4590 }
 0x1dd   : > { %v6424_v40 = vmul.f32 %v8214_v57, %v983_v59  ;;  %v1297_v47 = vadd.f32 %v1249_v37, %v6316_v42  ;;  %v1298_v5 = vadd.f32 %v1250_v41, %v6320_v29  ;;  %v4588_v27 = vunpack.i.h.bf16 %v4586_v1  ;;  %4221 = vmatpush3.bf16.xpose.msra.mxu1 %v1324_v17  ;;  %v1190_v59 = vld [vmem:[#allocation12 + $0xe8] sm:$0xff]  ;;  %v681_v17 = vld [vmem:[%s5797_s6] sm:$0xff] }
 0x1de   : > { %v6430_v23 = vmul.f32 %v8215_v31, %v984_v8  ;;  %v4587_v51 = vunpack.i.l.bf16 %v4586_v1  ;;  %v6435_v43 = vadd.f32 %v1235_v26, %v8216_v49  ;;  %v6438_v15 = vadd.f32 %v1236_v61, %v8217_v60  ;;  %4053 = vmatpush3.bf16.xpose.msra.mxu0 %v1308_v9  ;;  %v1174_v8 = vld [vmem:[#allocation12 + $0x68] sm:$0xff]  ;;  %v4596_v33 = vpop.permute.xlu1 %4595  ;;  %v683_v1 = vld [vmem:[%s5797_s6 + $0x10] sm:$0xff] }
 0x1df   : > { %v1220_v58 = vmul.f32 %v4583_v46, %v1172_v55  ;;  %v1219_v0 = vmul.f32 %v4582_v4, %v1171_v22  ;;  %v1325_v10 = vpack.c.bf16 %v1298_v5, %v1297_v47  ;;  %v8219_v63 = vunpack.c.l.bf16 %v8218_v16  ;;  %v682_v37 = vld [vmem:[%s5797_s6 + $0x8] sm:$0xff]  ;;  %4054 = vmatprep.subr.bf16.mxu0 %v1317_v39  ;;  %v1205_v39 = vld [vmem:[#allocation12 + $0x160] sm:$0xff] }
 0x1e0   : > { %v1252_v42 = vmul.f32 %v4588_v27, %v1204_v32  ;;  %v1251_v29 = vmul.f32 %v4587_v51, %v1203_v24  ;;  %v1318_v54 = vpack.c.bf16 %v6438_v15, %v6435_v43  ;;  %v8220_v34 = vunpack.c.h.bf16 %v8218_v16  ;;  %v8221_v31 = vld [vmem:[#allocation43_spill] sm:$0xff]  ;;  %v4601_v24 = vpop.permute.xlu0 %4600  ;;  %v1192_v27 = vld [vmem:[#allocation12 + $0xf8] sm:$0xff] }
 0x1e1   : > { %v6442_v48 = vmul.f32 %v8219_v63, %v1015_v50  ;;  %4222 = vmatprep.subr.bf16.mxu1 %v1325_v10  ;;  %v4593_v2 = vunpack.i.h.bf16 %v4591_v18  ;;  %v4592_v62 = vunpack.i.l.bf16 %v4591_v18  ;;  %v6452_v28 = vadd.f32 %v1219_v0, %v6336_v38  ;;  %v1206_v4 = vld [vmem:[#allocation12 + $0x168] sm:$0xff] }
 0x1e2   : > { %v6448_v19 = vmul.f32 %v8220_v34, %v1016_v44  ;;  %v6455_v41 = vadd.f32 %v1220_v58, %v6340_v20  ;;  %v4598_v57 = vunpack.i.h.bf16 %v4596_v33  ;;  %v4597_v61 = vunpack.i.l.bf16 %v4596_v33  ;;  %v1191_v44 = vld [vmem:[#allocation12 + $0xf0] sm:$0xff]  ;;  %v4606_v51 = vpop.permute.xlu1 %4605  ;;  %v684_v58 = vld [vmem:[%s5797_s6 + $0x18] sm:$0xff] }
 0x1e3   : > { %v1299_v26 = vadd.f32 %v1251_v29, %v6348_v3  ;;  %v1300_v9 = vadd.f32 %v1252_v42, %v6352_v45  ;;  %v1238_v22 = vmul.f32 %v4593_v2, %v1190_v59  ;;  %v1237_v55 = vmul.f32 %v4592_v62, %v1189_v6  ;;  %v8224_v59 = vld [vmem:[#allocation44_spill] sm:$0xff]  ;;  %v1176_v2 = vld [vmem:[#allocation12 + $0x78] sm:$0xff] }
 0x1e4   : > { %v1310_v53 = vpack.c.bf16 %v6455_v41, %v6452_v28  ;;  %v8222_v38 = vunpack.c.l.bf16 %v8221_v31  ;;  %v1222_v20 = vmul.f32 %v4598_v57, %v1174_v8  ;;  %v1221_v46 = vmul.f32 %v4597_v61, %v1173_v35  ;;  %v4611_v62 = vpop.permute.xlu0 %4610  ;;  %v685_v8 = vld [vmem:[%s5797_s6 + $0x20] sm:$0xff]  ;;  %v1207_v57 = vld [vmem:[#allocation12 + $0x170] sm:$0xff]  ;;  %v1208_v61 = vld [vmem:[#allocation12 + $0x178] sm:$0xff] }
 0x1e5   : > { %v6466_v32 = vpack.c.bf16 %v1300_v9, %v1299_v26  ;;  %v8223_v3 = vunpack.c.h.bf16 %v8221_v31  ;;  %v4603_v47 = vunpack.i.h.bf16 %v4601_v24  ;;  %v4602_v5 = vunpack.i.l.bf16 %v4601_v24  ;;  %4223 = vmatpush3.bf16.xpose.msra.mxu1 %v1325_v10 }
 0x1e6   : > { %v6464_v50 = vmul.f32 %v8222_v38, %v681_v17  ;;  %v6474_v49 = vadd.f32 %v1237_v55, %v6360_v21  ;;  %v6477_v60 = vadd.f32 %v1238_v22, %v6364_v14  ;;  %v4608_v0 = vunpack.i.h.bf16 %v4606_v51  ;;  %4055 = vmatpush3.bf16.xpose.msra.mxu0 %v1309_v36  ;;  %v4616_v26 = vpop.permute.xlu1 %4615  ;;  %v686_v55 = vld [vmem:[%s5797_s6 + $0x28] sm:$0xff] }
 0x1e7   : > { %v6470_v45 = vmul.f32 %v8223_v3, %v682_v37  ;;  %v4607_v16 = vunpack.i.l.bf16 %v4606_v51  ;;  %v6481_v63 = vadd.f32 %v1221_v46, %v6376_v52  ;;  %v6484_v42 = vadd.f32 %v1222_v20, %v6382_v25  ;;  %4224 = vmatprep.subr.bf16.mxu1 %v6466_v32  ;;  %v1175_v52 = vld [vmem:[#allocation12 + $0x70] sm:$0xff]  ;;  %4056 = vmatprep.subr.bf16.mxu0 %v1318_v54  ;;  %v777_v54 = vld [vmem:[%s5803_s9] sm:$0xff] }
 0x1e8   : > { %v1254_v29 = vmul.f32 %v4603_v47, %v1206_v4  ;;  %v1253_v6 = vmul.f32 %v4602_v5, %v1205_v39  ;;  %v1319_v21 = vpack.c.bf16 %v6477_v60, %v6474_v49  ;;  %v8225_v18 = vunpack.c.l.bf16 %v8224_v59  ;;  %v778_v4 = vld [vmem:[%s5803_s9 + $0x8] sm:$0xff]  ;;  %v4621_v24 = vpop.permute.xlu0 %4620  ;;  %v779_v51 = vld [vmem:[%s5803_s9 + $0x10] sm:$0xff] }
 0x1e9   : > { %v1240_v34 = vmul.f32 %v4608_v0, %v1192_v27  ;;  %v1239_v17 = vmul.f32 %v4607_v16, %v1191_v44  ;;  %v1311_v25 = vpack.c.bf16 %v6484_v42, %v6481_v63  ;;  %v8226_v10 = vunpack.c.h.bf16 %v8224_v59  ;;  %v688_v16 = vld [vmem:[%s5797_s6 + $0x38] sm:$0xff] }
 0x1ea   : > { %v6490_v14 = vmul.f32 %v8225_v18, %v683_v1  ;;  %v4613_v33 = vunpack.i.h.bf16 %v4611_v62  ;;  %v4612_v37 = vunpack.i.l.bf16 %v4611_v62  ;;  %v1301_v9 = vadd.f32 %v1253_v6, %v6390_v7  ;;  %v687_v1 = vld [vmem:[%s5797_s6 + $0x30] sm:$0xff]  ;;  %v4626_v0 = vpop.permute.xlu1 %4625 }
 0x1eb   : > { %v6497_v35 = vmul.f32 %v8226_v10, %v684_v58  ;;  %v1302_v22 = vadd.f32 %v1254_v29, %v6394_v30  ;;  %v4618_v31 = vunpack.i.h.bf16 %v4616_v26  ;;  %v4617_v56 = vunpack.i.l.bf16 %v4616_v26  ;;  %v8227_v30 = vld [vmem:[#allocation45_spill] sm:$0xff] }
 0x1ec   : > { %v6510_v13 = vadd.f32 %v1239_v17, %v6408_v11  ;;  %v6513_v36 = vadd.f32 %v1240_v34, %v6412_v12  ;;  %v1224_v38 = vmul.f32 %v4613_v33, %v1176_v2  ;;  %v1223_v20 = vmul.f32 %v4612_v37, %v1175_v52  ;;  %v780_v58 = vld [vmem:[%s5803_s9 + $0x18] sm:$0xff]  ;;  %v8230_v52 = vld [vmem:[#allocation46_spill] sm:$0xff]  ;;  %v782_v37 = vld [vmem:[%s5803_s9 + $0x28] sm:$0xff] }
 0x1ed   : > { %v1327_v7 = vpack.c.bf16 %v1302_v22, %v1301_v9  ;;  %v8228_v46 = vunpack.c.l.bf16 %v8227_v30  ;;  %v1256_v43 = vmul.f32 %v4618_v31, %v1208_v61  ;;  %v1255_v15 = vmul.f32 %v4617_v56, %v1207_v57  ;;  %4225 = vmatpush3.bf16.xpose.msra.mxu1 %v6466_v32  ;;  %v781_v33 = vld [vmem:[%s5803_s9 + $0x20] sm:$0xff]  ;;  %v4631_v57 = vpop.permute.xlu0 %4630  ;;  %v783_v22 = vld [vmem:[%s5803_s9 + $0x30] sm:$0xff] }
 0x1ee   : > { %v1320_v11 = vpack.c.bf16 %v6513_v36, %v6510_v13  ;;  %v8229_v12 = vunpack.c.h.bf16 %v8227_v30  ;;  %v4623_v47 = vunpack.i.h.bf16 %v4621_v24  ;;  %v4622_v5 = vunpack.i.l.bf16 %v4621_v24  ;;  %4057 = vmatpush3.bf16.xpose.msra.mxu0 %v1310_v53  ;;  %v4636_v31 = vpop.permute.xlu1 %4635 }
 0x1ef   : > { %v709_v39 = vmul.f32 %v8228_v46, %v685_v8  ;;  %v1271_v44 = vadd.f32 %v1223_v20, %v6424_v40  ;;  %v1272_v27 = vadd.f32 %v1224_v38, %v6430_v23  ;;  %v4628_v29 = vunpack.i.h.bf16 %v4626_v0  ;;  %4226 = vmatprep.subr.bf16.mxu1 %v1327_v7  ;;  %4058 = vmatprep.subr.bf16.mxu0 %v1319_v21 }
 0x1f0   : > { %v710_v3 = vmul.f32 %v8229_v12, %v686_v55  ;;  %v4627_v6 = vunpack.i.l.bf16 %v4626_v0  ;;  %v1303_v59 = vadd.f32 %v1255_v15, %v6442_v48  ;;  %v1304_v18 = vadd.f32 %v1256_v43, %v6448_v19  ;;  %v784_v55 = vld [vmem:[%s5803_s9 + $0x38] sm:$0xff] }
 0x1f1   : > { %v802_v34 = vmul.f32 %v4623_v47, %v778_v4  ;;  %v801_v17 = vmul.f32 %v4622_v5, %v777_v54  ;;  %v1312_v40 = vpack.c.bf16 %v1272_v27, %v1271_v44  ;;  %v8231_v23 = vunpack.c.l.bf16 %v8230_v52  ;;  %v786_v54 = vld [vmem:[%s5803_s9 + $0x48] sm:$0xff]  ;;  %v787_v5 = vld [vmem:[%s5803_s9 + $0x50] sm:$0xff] }
 0x1f2   : > { %v804_v62 = vmul.f32 %v4628_v29, %v780_v58  ;;  %v803_v10 = vmul.f32 %v4627_v6, %v779_v51  ;;  %v1328_v8 = vpack.c.bf16 %v1304_v18, %v1303_v59  ;;  %v8232_v48 = vunpack.c.h.bf16 %v8230_v52  ;;  %v690_v4 = vld [vmem:[%s5797_s6 + $0x48] sm:$0xff]  ;;  %v691_v51 = vld [vmem:[%s5797_s6 + $0x50] sm:$0xff]  ;;  %v788_v58 = vld [vmem:[%s5803_s9 + $0x58] sm:$0xff] }
 0x1f3   : > { %v711_v2 = vmul.f32 %v8231_v23, %v687_v1  ;;  %v825_v32 = vadd.f32 %v801_v17, %v6464_v50  ;;  %v826_v61 = vadd.f32 %v802_v34, %v6470_v45  ;;  %v4633_v26 = vunpack.i.h.bf16 %v4631_v57  ;;  %v8233_v1 = vld [vmem:[#allocation47_spill] sm:$0xff]  ;;  %v692_v59 = vld [vmem:[%s5797_s6 + $0x58] sm:$0xff]  ;;  %v693_v18 = vld [vmem:[%s5797_s6 + $0x60] sm:$0xff] }
 0x1f4   : > { %v712_v19 = vmul.f32 %v8232_v48, %v688_v16  ;;  %v4632_v9 = vunpack.i.l.bf16 %v4631_v57  ;;  %v827_v56 = vadd.f32 %v803_v10, %v6490_v14  ;;  %v828_v13 = vadd.f32 %v804_v62, %v6497_v35  ;;  %v4641_v35 = vpop.permute.xlu0 %4640  ;;  %v789_v34 = vld [vmem:[%s5803_s9 + $0x60] sm:$0xff]  ;;  %v790_v17 = vld [vmem:[%s5803_s9 + $0x68] sm:$0xff]  ;;  %v8236_v52 = vld [vmem:[#allocation48_spill] sm:$0xff] }
 0x1f5   : > { %v4638_v36 = vunpack.i.h.bf16 %v4636_v31  ;;  %v4637_v28 = vunpack.i.l.bf16 %v4636_v31  ;;  %v849_v41 = vpack.c.bf16 %v826_v61, %v825_v32  ;;  %v806_v53 = vmul.f32 %v4633_v26, %v782_v37  ;;  %4227 = vmatpush3.bf16.xpose.msra.mxu1 %v1327_v7  ;;  %v689_v7 = vld [vmem:[%s5797_s6 + $0x40] sm:$0xff]  ;;  %v8239_v37 = vld [vmem:[#allocation49_spill] sm:$0xff] }
 0x1f6   : > { %v805_v50 = vmul.f32 %v4632_v9, %v781_v33  ;;  %v850_v38 = vpack.c.bf16 %v828_v13, %v827_v56  ;;  %4228 = vmatprep.subr.bf16.mxu1 %v1328_v8  ;;  %4059 = vmatpush3.bf16.xpose.msra.mxu0 %v1311_v25  ;;  %v4643_v43 = vunpack.i.h.bf16 %v4641_v35  ;;  %v4642_v15 = vunpack.i.l.bf16 %v4641_v35  ;;  %v794_v35 = vld [vmem:[%s5803_s9 + $0x88] sm:$0xff] }
 0x1f7   : > { %v808_v45 = vmul.f32 %v4638_v36, %v784_v55  ;;  %v807_v20 = vmul.f32 %v4637_v28, %v783_v22  ;;  %4062 = vmatprep.mubr.bf16.mxu0 %v849_v41  ;;  %4230 = vmatprep.mubr.bf16.mxu1 %v849_v41  ;;  %v830_v46 = vadd.f32 %v806_v53, %v710_v3  ;;  %v4646_v3 = vpop.permute.xlu1 %4645  ;;  %v8234_v47 = vunpack.c.l.bf16 %v8233_v1  ;;  %v695_v28 = vld [vmem:[%s5797_s6 + $0x70] sm:$0xff] }
 0x1f8   : > { %v829_v30 = vadd.f32 %v805_v50, %v709_v39  ;;  %4060 = vmatprep.subr.bf16.mxu0 %v1320_v11  ;;  %v785_v39 = vld [vmem:[%s5803_s9 + $0x40] sm:$0xff]  ;;  %v810_v24 = vmul.f32 %v4643_v43, %v786_v54  ;;  %v8235_v42 = vunpack.c.h.bf16 %v8233_v1  ;;  %v4651_v11 = vpop.permute.xlu0 %4650  ;;  %v4648_v44 = vunpack.i.h.bf16 %v4646_v3  ;;  %v791_v53 = vld [vmem:[%s5803_s9 + $0x70] sm:$0xff]  ;;  %v792_v50 = vld [vmem:[%s5803_s9 + $0x78] sm:$0xff] }
 0x1f9   : > { %v831_v49 = vadd.f32 %v807_v20, %v711_v2  ;;  %v832_v60 = vadd.f32 %v808_v45, %v712_v19  ;;  %v809_v12 = vmul.f32 %v4642_v15, %v785_v39  ;;  %v713_v63 = vmul.f32 %v8234_v47, %v689_v7  ;;  %v8242_v39 = vld [vmem:[#allocation50_spill] sm:$0xff] }
 0x1fa   : > { %v6550_v21 = vpack.c.bf16 %v830_v46, %v829_v30  ;;  %v714_v25 = vmul.f32 %v8235_v42, %v690_v4  ;;  %v4647_v27 = vunpack.i.l.bf16 %v4646_v3  ;;  %v4653_v29 = vunpack.i.h.bf16 %v4651_v11  ;;  %v8245_v3 = vld [vmem:[#allocation51_spill] sm:$0xff] }
 0x1fb   : > { %v6552_v14 = vpack.c.bf16 %v832_v60, %v831_v49  ;;  %v833_v0 = vadd.f32 %v809_v12, %v713_v63  ;;  %v4652_v6 = vunpack.i.l.bf16 %v4651_v11  ;;  %v8237_v23 = vunpack.c.l.bf16 %v8236_v52  ;;  %v4656_v26 = vpop.permute.xlu1 %4655  ;;  %v697_v49 = vld [vmem:[%s5797_s6 + $0x80] sm:$0xff] }
 0x1fc   : > { %v834_v16 = vadd.f32 %v810_v24, %v714_v25  ;;  %v812_v62 = vmul.f32 %v4648_v44, %v788_v58  ;;  %v811_v10 = vmul.f32 %v4647_v27, %v787_v5  ;;  %v8240_v57 = vunpack.c.l.bf16 %v8239_v37  ;;  %v4661_v55 = vpop.permute.xlu0 %4660  ;;  %v793_v60 = vld [vmem:[%s5803_s9 + $0x80] sm:$0xff] }
 0x1fd   : > { %4229 = vmatpush3.bf16.xpose.msra.mxu1 %v1328_v8  ;;  %v715_v2 = vmul.f32 %v8237_v23, %v691_v51  ;;  %v8238_v8 = vunpack.c.h.bf16 %v8236_v52  ;;  %v814_v32 = vmul.f32 %v4653_v29, %v790_v17  ;;  %v813_v61 = vmul.f32 %v4652_v6, %v789_v34  ;;  %v699_v29 = vld [vmem:[%s5797_s6 + $0x90] sm:$0xff]  ;;  %v700_v6 = vld [vmem:[%s5797_s6 + $0x98] sm:$0xff]  ;;  %v701_v23 = vld [vmem:[%s5797_s6 + $0xa0] sm:$0xff] }
 0x1fe   : > { %4061 = vmatpush3.bf16.xpose.msra.mxu0 %v1312_v40  ;;  %v694_v40 = vld [vmem:[%s5797_s6 + $0x68] sm:$0xff]  ;;  %v717_v48 = vmul.f32 %v8240_v57, %v693_v18  ;;  %v6580_v19 = vpack.c.bf16 %v834_v16, %v833_v0  ;;  %v8241_v9 = vunpack.c.h.bf16 %v8239_v37  ;;  %v4658_v13 = vunpack.i.h.bf16 %v4656_v26  ;;  %v796_v18 = vld [vmem:[%s5803_s9 + $0x98] sm:$0xff] }
 0x1ff   : > { %v716_v33 = vmul.f32 %v8238_v8, %v692_v59  ;;  %v835_v31 = vadd.f32 %v811_v10, %v715_v2  ;;  %v4657_v36 = vunpack.i.l.bf16 %v4656_v26  ;;  %v4663_v30 = vunpack.i.h.bf16 %v4661_v55  ;;  %v4666_v11 = vpop.permute.xlu1 %4665  ;;  %v795_v59 = vld [vmem:[%s5803_s9 + $0x90] sm:$0xff]  ;;  %v797_v2 = vld [vmem:[%s5803_s9 + $0xa0] sm:$0xff] }
 0x200   : > { %v718_v22 = vmul.f32 %v8241_v9, %v694_v40  ;;  %v837_v45 = vadd.f32 %v813_v61, %v717_v48  ;;  %v4662_v46 = vunpack.i.l.bf16 %v4661_v55  ;;  %v8243_v43 = vunpack.c.l.bf16 %v8242_v39  ;;  %v4671_v27 = vpop.permute.xlu0 %4670  ;;  %v8248_v10 = vld [vmem:[#allocation52_spill] sm:$0xff]  ;;  %v8251_v9 = vld [vmem:[#allocation53_spill] sm:$0xff] }
 0x201   : > { %v836_v56 = vadd.f32 %v812_v62, %v716_v33  ;;  %v8244_v54 = vunpack.c.h.bf16 %v8242_v39  ;;  %v816_v24 = vmul.f32 %v4658_v13, %v792_v50  ;;  %v815_v12 = vmul.f32 %v4657_v36, %v791_v53  ;;  %v702_v62 = vld [vmem:[%s5797_s6 + $0xa8] sm:$0xff] }
 0x202   : > { %v838_v20 = vadd.f32 %v814_v32, %v718_v22  ;;  %v719_v15 = vmul.f32 %v8243_v43, %v695_v28  ;;  %v8246_v1 = vunpack.c.l.bf16 %v8245_v3  ;;  %v818_v42 = vmul.f32 %v4663_v30, %v794_v35  ;;  %v704_v30 = vld [vmem:[%s5797_s6 + $0xb8] sm:$0xff]  ;;  %v8254_v43 = vld [vmem:[#allocation54_spill] sm:$0xff] }
 0x203   : > { %v6599_v4 = vpack.c.bf16 %v836_v56, %v835_v31  ;;  %v817_v25 = vmul.f32 %v4662_v46, %v793_v60  ;;  %v8247_v5 = vunpack.c.h.bf16 %v8245_v3  ;;  %v4668_v0 = vunpack.i.h.bf16 %v4666_v11  ;;  %v4676_v48 = vpop.permute.xlu1 %4675 }
 0x204   : > { %4231 = vmatmul.mubr.bf16.vlgmr.msra.gmra.mrb[0].mxu1 %v850_v38  ;;  %v721_v47 = vmul.f32 %v8246_v1, %v697_v49  ;;  %v6603_v63 = vpack.c.bf16 %v838_v20, %v837_v45  ;;  %v839_v51 = vadd.f32 %v815_v12, %v719_v15  ;;  %v4667_v16 = vunpack.i.l.bf16 %v4666_v11  ;;  %v800_v45 = vld [vmem:[%s5803_s9 + $0xb8] sm:$0xff]  ;;  %v703_v20 = vld [vmem:[%s5797_s6 + $0xb0] sm:$0xff] }
 0x205   : > { %4234 = vmatprep.mubr.bf16.mxu1 %v6550_v21  ;;  %4063 = vmatmul.mubr.bf16.vlgmr.msra.gmra.mrb[0].mxu0 %v849_v41  ;;  %v696_v41 = vld [vmem:[%s5797_s6 + $0x78] sm:$0xff]  ;;  %v4673_v40 = vunpack.i.h.bf16 %v4671_v27  ;;  %v4672_v52 = vunpack.i.l.bf16 %v4671_v27  ;;  %v8249_v8 = vunpack.c.l.bf16 %v8248_v10  ;;  %v8250_v37 = vunpack.c.h.bf16 %v8248_v10 }
 0x206   : > { %4064 = vmatprep.mubr.bf16.mxu0 %v850_v38  ;;  %v720_v7 = vmul.f32 %v8244_v54, %v696_v41  ;;  %v841_v34 = vadd.f32 %v817_v25, %v721_v47  ;;  %v820_v61 = vmul.f32 %v4668_v0, %v796_v18  ;;  %v819_v26 = vmul.f32 %v4667_v16, %v795_v59  ;;  %v799_v41 = vld [vmem:[%s5803_s9 + $0xb0] sm:$0xff] }
 0x207   : > { %v723_v33 = vmul.f32 %v8249_v8, %v699_v29  ;;  %v724_v57 = vmul.f32 %v8250_v37, %v700_v6  ;;  %v8252_v22 = vunpack.c.l.bf16 %v8251_v9  ;;  %v821_v13 = vmul.f32 %v4672_v52, %v797_v2 }
 0x208   : > { %v840_v58 = vadd.f32 %v816_v24, %v720_v7  ;;  %v8253_v36 = vunpack.c.h.bf16 %v8251_v9  ;;  %v4678_v53 = vunpack.i.h.bf16 %v4676_v48  ;;  %v4677_v50 = vunpack.i.l.bf16 %v4676_v48 }
 0x209   : > { %v725_v55 = vmul.f32 %v8252_v22, %v701_v23  ;;  %v843_v46 = vadd.f32 %v819_v26, %v723_v33  ;;  %v844_v49 = vadd.f32 %v820_v61, %v724_v57  ;;  %v8255_v15 = vunpack.c.l.bf16 %v8254_v43 }
 0x20a   : > { %v856_v32 = vpack.c.bf16 %v840_v58, %v839_v51  ;;  %v726_v28 = vmul.f32 %v8253_v36, %v702_v62  ;;  %v823_v39 = vmul.f32 %v4677_v50, %v799_v41  ;;  %v8256_v7 = vunpack.c.h.bf16 %v8254_v43 }
 0x20b   : > { %v845_v60 = vadd.f32 %v821_v13, %v725_v55  ;;  %v727_v54 = vmul.f32 %v8255_v15, %v703_v20  ;;  %v858_v12 = vpack.c.bf16 %v844_v49, %v843_v46  ;;  %v5280_v55 = vmov 0  }
 0x20c   : > { %4235 = vmatmul.mubr.bf16.gmra.mrb[4].mxu1 %v6552_v14  ;;  %v728_v24 = vmul.f32 %v8256_v7, %v704_v30  ;;  %4679 = vset.pattern.permute.xlu1 %v5280_v55 }
 0x20d   : > { %4238 = vmatprep.mubr.bf16.mxu1 %v6580_v19  ;;  %4065 = vmatmul.mubr.bf16.gmra.mrb[4].mxu0 %v850_v38  ;;  %v698_v38 = vld [vmem:[%s5797_s6 + $0x88] sm:$0xff]  ;;  %v847_v1 = vadd.f32 %v823_v39, %v727_v54  ;;  %s3482_s6 = sadd.s32 %s8436_s10, %s3796_s13 }
 0x20e   : > { %4066 = vmatprep.mubr.bf16.mxu0 %v6550_v21  ;;  %v722_v44 = vmul.f32 %v8247_v5, %v698_v38  ;;  %v824_v38 = vmul.f32 %v4678_v53, %v800_v45  ;;  %4680 = vset.pattern.permute.xlu0 %v5280_v55  ;;  %s3484_s1 = sadd.s32 %s4305_s11, %s3482_s6 }
 0x20f   : > { %s3766_s19 = sshll.u32 %s3484_s1, 6 }
 0x210   : > { %v842_v17 = vadd.f32 %v818_v42, %v722_v44  ;;  %v848_v47 = vadd.f32 %v824_v38, %v728_v24  ;;  %s7775_s27 = scalar_lea.hbm %s8437_s23, %s3766_s19 }
 0x212   : > { %v857_v31 = vpack.c.bf16 %v842_v17, %v841_v34 }
 0x214   : > { %4239 = vmatmul.mubr.bf16.gmra.mrb[8].mxu1 %v6599_v4 }
 0x215   : > { %4242 = vmatprep.mubr.bf16.mxu1 %v6603_v63  ;;  %4067 = vmatmul.mubr.bf16.gmra.mrb[8].mxu0 %v6550_v21  ;;  %v798_v21 = vld [vmem:[%s5803_s9 + $0xa8] sm:$0xff]  ;;  %s3487_s9 = sshll.u32 %s7725_s0, 4  ;;  %s7770_s9 = int_to_ptr.vmem [resolvable:$true] %s3487_s9 }
 0x216   : > { %4068 = vmatprep.mubr.bf16.mxu0 %v6552_v14  ;;  %v822_v56 = vmul.f32 %v4673_v40, %v798_v21  ;;  %s5079_s4 = scalar_lea.vmem %s7770_s9, 1536 }
 0x217   : > { %p5080_p13 = scmp.ne.s32.totalorder %s7770_s9, %s5079_s4 }
 0x218   : > { %v846_v35 = vadd.f32 %v822_v56, %v726_v28 }
 0x219   : > { %p5081_p11 = pnand %p5080_p13, %p8438_p6 }
 0x21a   : > { %v859_v3 = vpack.c.bf16 %v846_v35, %v845_v60 }
 0x21b   : > { %p5082_p9 = pneg %p5081_p11 }
 0x21c   : > { %4243 = vmatmul.mubr.bf16.gmra.mrb[12].mxu1 %v856_v32 }
 0x21d   : > { %4246 = vmatprep.mubr.bf16.mxu1 %v857_v31  ;;  %4069 = vmatmul.mubr.bf16.gmra.mrb[12].mxu0 %v6552_v14  ;;  %v860_v14 = vpack.c.bf16 %v848_v47, %v847_v1 }
 0x21e   : > { %4070 = vmatprep.mubr.bf16.mxu0 %v6580_v19 }
 0x224   : > { %4247 = vmatmul.mubr.bf16.gmra.mrb[16].mxu1 %v858_v12 }
 0x225   : > { %4250 = vmatprep.mubr.bf16.mxu1 %v859_v3  ;;  %4071 = vmatmul.mubr.bf16.gmra.mrb[16].mxu0 %v6580_v19  ;;  %v5279_v19 = vmov -inf  }
 0x226   : > { %4072 = vmatprep.mubr.bf16.mxu0 %v6599_v4  ;;  %561 = vst.msk [vmem:[#allocation2] sm:$0xff] %vm560_vm0, %v5279_v19  ;;  %562 = vst.msk [vmem:[#allocation2 + $0x8] sm:$0xff] %vm560_vm0, %v5279_v19 }
 0x227   : > { %563 = vst.msk [vmem:[#allocation2 + $0x10] sm:$0xff] %vm560_vm0, %v5279_v19  ;;  %564 = vst.msk [vmem:[#allocation2 + $0x18] sm:$0xff] %vm560_vm0, %v5279_v19 }
 0x228   : > { %565 = vst.msk [vmem:[#allocation2 + $0x20] sm:$0xff] %vm560_vm0, %v5279_v19  ;;  %566 = vst.msk [vmem:[#allocation2 + $0x28] sm:$0xff] %vm560_vm0, %v5279_v19 }
 0x229   : > { %567 = vst.msk [vmem:[#allocation2 + $0x30] sm:$0xff] %vm560_vm0, %v5279_v19  ;;  %568 = vst.msk [vmem:[#allocation2 + $0x38] sm:$0xff] %vm560_vm0, %v5279_v19 }
 0x22a   : > { %569 = vst.msk [vmem:[#allocation2 + $0x40] sm:$0xff] %vm560_vm0, %v5279_v19  ;;  %570 = vst.msk [vmem:[#allocation2 + $0x48] sm:$0xff] %vm560_vm0, %v5279_v19 }
 0x22b   : > { %571 = vst.msk [vmem:[#allocation2 + $0x50] sm:$0xff] %vm560_vm0, %v5279_v19  ;;  %572 = vst.msk [vmem:[#allocation2 + $0x58] sm:$0xff] %vm560_vm0, %v5279_v19 }
 0x22c   : > { %4251 = vmatmul.mubr.bf16.gmra.mrb[20].mxu1 %v860_v14  ;;  %573 = vst.msk [vmem:[#allocation2 + $0x60] sm:$0xff] %vm560_vm0, %v5279_v19  ;;  %574 = vst.msk [vmem:[#allocation2 + $0x68] sm:$0xff] %vm560_vm0, %v5279_v19 }
 0x22d   : > { %4073 = vmatmul.mubr.bf16.gmra.mrb[20].mxu0 %v6599_v4  ;;  %575 = vst.msk [vmem:[#allocation2 + $0x70] sm:$0xff] %vm560_vm0, %v5279_v19  ;;  %576 = vst.msk [vmem:[#allocation2 + $0x78] sm:$0xff] %vm560_vm0, %v5279_v19 }
 0x22e   : > { %4074 = vmatprep.mubr.bf16.mxu0 %v6603_v63  ;;  %577 = vst.msk [vmem:[#allocation2 + $0x80] sm:$0xff] %vm560_vm0, %v5279_v19  ;;  %578 = vst.msk [vmem:[#allocation2 + $0x88] sm:$0xff] %vm560_vm0, %v5279_v19 }
 0x22f   : > { %579 = vst.msk [vmem:[#allocation2 + $0x90] sm:$0xff] %vm560_vm0, %v5279_v19  ;;  %580 = vst.msk [vmem:[#allocation2 + $0x98] sm:$0xff] %vm560_vm0, %v5279_v19 }
 0x230   : > { %581 = vst.msk [vmem:[#allocation2 + $0xa0] sm:$0xff] %vm560_vm0, %v5279_v19  ;;  %582 = vst.msk [vmem:[#allocation2 + $0xa8] sm:$0xff] %vm560_vm0, %v5279_v19 }
 0x231   : > { %583 = vst.msk [vmem:[#allocation2 + $0xb0] sm:$0xff] %vm560_vm0, %v5279_v19  ;;  %584 = vst.msk [vmem:[#allocation2 + $0xb8] sm:$0xff] %vm560_vm0, %v5279_v19 }
 0x235   : > { %4075 = vmatmul.mubr.bf16.gmra.mrb[24].mxu0 %v6603_v63 }
 0x236   : > { %4076 = vmatprep.mubr.bf16.mxu0 %v856_v32 }
 0x23d   : > { %4077 = vmatmul.mubr.bf16.gmra.mrb[28].mxu0 %v856_v32 }
 0x23e   : > { %4078 = vmatprep.mubr.bf16.mxu0 %v857_v31 }
 0x245   : > { %4079 = vmatmul.mubr.bf16.gmra.mrb[32].mxu0 %v857_v31 }
 0x246   : > { %4080 = vmatprep.mubr.bf16.mxu0 %v858_v12 }
 0x24d   : > { %4081 = vmatmul.mubr.bf16.gmra.mrb[36].mxu0 %v858_v12 }
 0x24e   : > { %4082 = vmatprep.mubr.bf16.mxu0 %v859_v3 }
 0x255   : > { %4083 = vmatmul.mubr.bf16.gmra.mrb[40].mxu0 %v859_v3 }
 0x256   : > { %4084 = vmatprep.mubr.bf16.mxu0 %v860_v14 }
 0x25d   : > { %4085 = vmatmul.mubr.bf16.gmra.mrb[44].mxu0 %v860_v14 }
 0x2d7   : > { %v6666_v4 = vpop.f32.mrb[0].mxu1 }
 0x2d8   : > { %v6668_v63 = vpop.f32.mrb[1].mxu1  ;;  %v6670_v42 = vpop.f32.mrb[0].mxu0 }
 0x2d9   : > { %v6672_v25 = vpop.f32.mrb[2].mxu1  ;;  %v6674_v11 = vpop.f32.mrb[1].mxu0 }
 0x2da   : > { %v6676_v5 = vpop.f32.mrb[3].mxu1  ;;  %v1647_v44 = vmax.f32 %v6670_v42, %v6674_v11  ;;  %v6680_v27 = vpop.f32.mrb[2].mxu0 }
 0x2db   : > { %v6682_v51 = vpop.f32.mrb[3].mxu0 }
 0x2dc   : > { %v1651_v58 = vmax.f32 %v6680_v27, %v6682_v51  ;;  %v1648_v0 = vmax.f32 %v1647_v44, %v6668_v63 }
 0x2de   : > { %1649 = vmax.xlane.f32.xlu0 %v1648_v0  ;;  %v1652_v16 = vmax.f32 %v1651_v58, %v6676_v5 }
 0x2df   : > { %v6688_v29 = vpop.f32.mrb[4].mxu1 }
 0x2e0   : > { %8257 = vst [vmem:[#allocation55_spill] sm:$0xff] %v6688_v29  ;;  %v6690_v6 = vpop.f32.mrb[5].mxu1  ;;  %1653 = vmax.xlane.f32.xlu1 %v1652_v16  ;;  %v6692_v59 = vpop.f32.mrb[4].mxu0 }
 0x2e1   : > { %v6694_v18 = vpop.f32.mrb[6].mxu1  ;;  %v6696_v34 = vpop.f32.mrb[5].mxu0 }
 0x2e2   : > { %8258 = vst [vmem:[#allocation56_spill] sm:$0xff] %v6694_v18  ;;  %v6698_v17 = vpop.f32.mrb[7].mxu1  ;;  %v1655_v40 = vmax.f32 %v6692_v59, %v6696_v34  ;;  %v6702_v52 = vpop.f32.mrb[6].mxu0 }
 0x2e3   : > { %v6704_v23 = vpop.f32.mrb[7].mxu0 }
 0x2e4   : > { %v1659_v2 = vmax.f32 %v6702_v52, %v6704_v23  ;;  %v1656_v21 = vmax.f32 %v1655_v40, %v6666_v4 }
 0x2e6   : > { %1657 = vmax.xlane.f32.xlu0 %v1656_v21  ;;  %v1660_v62 = vmax.f32 %v1659_v2, %v6672_v25 }
 0x2e7   : > { %v6710_v10 = vpop.f32.mrb[8].mxu1 }
 0x2e8   : > { %8259 = vst [vmem:[#allocation42_spill] sm:$0xff] %v6710_v10  ;;  %v6712_v8 = vpop.f32.mrb[9].mxu1  ;;  %v6714_v33 = vpop.f32.mrb[8].mxu0 }
 0x2e9   : > { %8260 = vst [vmem:[#allocation43_spill] sm:$0xff] %v6712_v8  ;;  %v6716_v37 = vpop.f32.mrb[10].mxu1  ;;  %v6718_v57 = vpop.f32.mrb[9].mxu0 }
 0x2ea   : > { %8261 = vst [vmem:[#allocation44_spill] sm:$0xff] %v6716_v37  ;;  %v6720_v48 = vpop.f32.mrb[11].mxu1  ;;  %1661 = vmax.xlane.f32.xlu0 %v1660_v62  ;;  %v1663_v32 = vmax.f32 %v6714_v33, %v6718_v57  ;;  %v6724_v61 = vpop.f32.mrb[10].mxu0 }
 0x2eb   : > { %8262 = vst [vmem:[#allocation45_spill] sm:$0xff] %v6720_v48  ;;  %v6726_v26 = vpop.f32.mrb[11].mxu0 }
 0x2ec   : > { %v1667_v9 = vmax.f32 %v6724_v61, %v6726_v26  ;;  %v1664_v22 = vmax.f32 %v1663_v32, %v6690_v6 }
 0x2ee   : > { %1665 = vmax.xlane.f32.xlu1 %v1664_v22  ;;  %v1668_v31 = vmax.f32 %v1667_v9, %v6698_v17 }
 0x2ef   : > { %v6732_v56 = vpop.f32.mrb[12].mxu1 }
 0x2f0   : > { %8263 = vst [vmem:[#allocation46_spill] sm:$0xff] %v6732_v56  ;;  %v6734_v13 = vpop.f32.mrb[13].mxu1  ;;  %v6736_v36 = vpop.f32.mrb[12].mxu0  ;;  %1669 = vmax.xlane.f32.xlu0 %v1668_v31 }
 0x2f1   : > { %8264 = vst [vmem:[#allocation47_spill] sm:$0xff] %v6734_v13  ;;  %v6738_v28 = vpop.f32.mrb[14].mxu1  ;;  %v6740_v41 = vpop.f32.mrb[13].mxu0 }
 0x2f2   : > { %8265 = vst [vmem:[#allocation48_spill] sm:$0xff] %v6738_v28  ;;  %8266 = vst [vmem:[#allocation49_spill] sm:$0xff] %v6740_v41  ;;  %v6742_v53 = vpop.f32.mrb[15].mxu1  ;;  %v1671_v50 = vmax.f32 %v6736_v36, %v6740_v41  ;;  %v6746_v45 = vpop.f32.mrb[14].mxu0 }
 0x2f3   : > { %8267 = vst [vmem:[#allocation50_spill] sm:$0xff] %v6742_v53  ;;  %8268 = vst [vmem:[#allocation51_spill] sm:$0xff] %v6746_v45  ;;  %v6748_v20 = vpop.f32.mrb[15].mxu0 }
 0x2f4   : > { %8269 = vst [vmem:[#allocation52_spill] sm:$0xff] %v6748_v20  ;;  %v1675_v30 = vmax.f32 %v6746_v45, %v6748_v20  ;;  %v1672_v46 = vmax.f32 %v1671_v50, %v6688_v29  ;;  %v5281_v50 = vmov 0.0  }
 0x2f5   : > { %586 = vst.msk [vmem:[#allocation3 + $0x8] sm:$0xff] %vm560_vm0, %v5281_v50  ;;  %585 = vst.msk [vmem:[#allocation3] sm:$0xff] %vm560_vm0, %v5281_v50 }
 0x2f6   : > { %1673 = vmax.xlane.f32.xlu1 %v1672_v46  ;;  %v1676_v49 = vmax.f32 %v1675_v30, %v6694_v18  ;;  %587 = vst.msk [vmem:[#allocation3 + $0x10] sm:$0xff] %vm560_vm0, %v5281_v50  ;;  %588 = vst.msk [vmem:[#allocation3 + $0x18] sm:$0xff] %vm560_vm0, %v5281_v50 }
 0x2f7   : > { %v6754_v60 = vpop.f32.mrb[16].mxu1  ;;  %589 = vst.msk [vmem:[#allocation3 + $0x20] sm:$0xff] %vm560_vm0, %v5281_v50  ;;  %590 = vst.msk [vmem:[#allocation3 + $0x28] sm:$0xff] %vm560_vm0, %v5281_v50 }
 0x2f8   : > { %8270 = vst [vmem:[#allocation53_spill] sm:$0xff] %v6754_v60  ;;  %v6756_v35 = vpop.f32.mrb[17].mxu1  ;;  %v6758_v38 = vpop.f32.mrb[16].mxu0  ;;  %1677 = vmax.xlane.f32.xlu0 %v1676_v49  ;;  %591 = vst.msk [vmem:[#allocation3 + $0x30] sm:$0xff] %vm560_vm0, %v5281_v50 }
 0x2f9   : > { %8271 = vst [vmem:[#allocation54_spill] sm:$0xff] %v6756_v35  ;;  %8272 = vst [vmem:[#allocation57_spill] sm:$0xff] %v6758_v38  ;;  %v6760_v39 = vpop.f32.mrb[18].mxu1  ;;  %v6762_v43 = vpop.f32.mrb[17].mxu0 }
 0x2fa   : > { %8273 = vst [vmem:[#allocation58_spill] sm:$0xff] %v6760_v39  ;;  %8274 = vst [vmem:[#allocation59_spill] sm:$0xff] %v6762_v43  ;;  %v6764_v15 = vpop.f32.mrb[19].mxu1  ;;  %v1679_v54 = vmax.f32 %v6758_v38, %v6762_v43  ;;  %v6768_v7 = vpop.f32.mrb[18].mxu0 }
 0x2fb   : > { %8275 = vst [vmem:[#allocation60_spill] sm:$0xff] %v6764_v15  ;;  %8276 = vst [vmem:[#allocation61_spill] sm:$0xff] %v6768_v7  ;;  %v6770_v24 = vpop.f32.mrb[19].mxu0 }
 0x2fc   : > { %8277 = vst [vmem:[#allocation62_spill] sm:$0xff] %v6770_v24  ;;  %v1683_v12 = vmax.f32 %v6768_v7, %v6770_v24  ;;  %v1680_v3 = vmax.f32 %v1679_v54, %v6712_v8  ;;  %592 = vst.msk [vmem:[#allocation3 + $0x38] sm:$0xff] %vm560_vm0, %v5281_v50  ;;  %v7088_v7 = vld [vmem:[#allocation2 + $0x88] sm:$0xff] }
 0x2fd   : > { %593 = vst.msk [vmem:[#allocation3 + $0x40] sm:$0xff] %vm560_vm0, %v5281_v50  ;;  %594 = vst.msk [vmem:[#allocation3 + $0x48] sm:$0xff] %vm560_vm0, %v5281_v50 }
 0x2fe   : > { %1681 = vmax.xlane.f32.xlu1 %v1680_v3  ;;  %v1684_v1 = vmax.f32 %v1683_v12, %v6720_v48  ;;  %595 = vst.msk [vmem:[#allocation3 + $0x50] sm:$0xff] %vm560_vm0, %v5281_v50  ;;  %596 = vst.msk [vmem:[#allocation3 + $0x58] sm:$0xff] %vm560_vm0, %v5281_v50  ;;  %v7068_v48 = vld [vmem:[#allocation2 + $0x78] sm:$0xff] }
 0x2ff   : > { %v6776_v47 = vpop.f32.mrb[20].mxu1  ;;  %597 = vst.msk [vmem:[#allocation3 + $0x60] sm:$0xff] %vm560_vm0, %v5281_v50  ;;  %598 = vst.msk [vmem:[#allocation3 + $0x68] sm:$0xff] %vm560_vm0, %v5281_v50 }
 0x300   : > { %8278 = vst [vmem:[#allocation63_spill] sm:$0xff] %v6776_v47  ;;  %v6778_v14 = vpop.f32.mrb[21].mxu1  ;;  %v6780_v19 = vpop.f32.mrb[20].mxu0  ;;  %1685 = vmax.xlane.f32.xlu0 %v1684_v1  ;;  %599 = vst.msk [vmem:[#allocation3 + $0x70] sm:$0xff] %vm560_vm0, %v5281_v50 }
 0x301   : > { %8279 = vst [vmem:[#allocation64_spill] sm:$0xff] %v6778_v14  ;;  %8280 = vst [vmem:[#allocation65_spill] sm:$0xff] %v6780_v19  ;;  %v6782_v44 = vpop.f32.mrb[22].mxu1  ;;  %v6784_v58 = vpop.f32.mrb[21].mxu0 }
 0x302   : > { %8281 = vst [vmem:[#allocation66_spill] sm:$0xff] %v6782_v44  ;;  %8282 = vst [vmem:[#allocation67_spill] sm:$0xff] %v6784_v58  ;;  %v6786_v0 = vpop.f32.mrb[23].mxu1  ;;  %v1687_v16 = vmax.f32 %v6780_v19, %v6784_v58  ;;  %v6790_v40 = vpop.f32.mrb[22].mxu0  ;;  %v7031_v19 = vld [vmem:[#allocation2 + $0x58] sm:$0xff] }
 0x303   : > { %8283 = vst [vmem:[#allocation68_spill] sm:$0xff] %v6786_v0  ;;  %8284 = vst [vmem:[#allocation69_spill] sm:$0xff] %v6790_v40  ;;  %v6792_v2 = vpop.f32.mrb[23].mxu0 }
 0x304   : > { %8285 = vst [vmem:[#allocation70_spill] sm:$0xff] %v6792_v2  ;;  %v1691_v21 = vmax.f32 %v6790_v40, %v6792_v2  ;;  %v1688_v62 = vmax.f32 %v1687_v16, %v6710_v10  ;;  %600 = vst.msk [vmem:[#allocation3 + $0x78] sm:$0xff] %vm560_vm0, %v5281_v50  ;;  %v6990_v2 = vld [vmem:[#allocation2 + $0x30] sm:$0xff]  ;;  %v7012_v10 = vld [vmem:[#allocation2 + $0x48] sm:$0xff] }
 0x305   : > { %601 = vst.msk [vmem:[#allocation3 + $0x80] sm:$0xff] %vm560_vm0, %v5281_v50  ;;  %602 = vst.msk [vmem:[#allocation3 + $0x88] sm:$0xff] %vm560_vm0, %v5281_v50 }
 0x306   : > { %1689 = vmax.xlane.f32.xlu1 %v1688_v62  ;;  %v1692_v32 = vmax.f32 %v1691_v21, %v6716_v37  ;;  %603 = vst.msk [vmem:[#allocation3 + $0x90] sm:$0xff] %vm560_vm0, %v5281_v50  ;;  %604 = vst.msk [vmem:[#allocation3 + $0x98] sm:$0xff] %vm560_vm0, %v5281_v50  ;;  %v4702_v37 = vld [vmem:[%s5836_s3 + $0xa8] sm:$0xff]  }
 0x307   : > { %605 = vst.msk [vmem:[#allocation3 + $0xa0] sm:$0xff] %vm560_vm0, %v5281_v50  ;;  %606 = vst.msk [vmem:[#allocation3 + $0xa8] sm:$0xff] %vm560_vm0, %v5281_v50 }
 0x308   : > { %v6798_v9 = vpop.f32.mrb[24].mxu0  ;;  %1693 = vmax.xlane.f32.xlu0 %v1692_v32  ;;  %607 = vst.msk [vmem:[#allocation3 + $0xb0] sm:$0xff] %vm560_vm0, %v5281_v50  ;;  %608 = vst.msk [vmem:[#allocation3 + $0xb8] sm:$0xff] %vm560_vm0, %v5281_v50 }
 0x309   : > { %8286 = vst [vmem:[#allocation71_spill] sm:$0xff] %v6798_v9  ;;  %v6800_v22 = vpop.f32.mrb[25].mxu0  ;;  %8310 = vst [vmem:[#allocation95_spill] sm:$0xff] %v7068_v48 }
 0x30a   : > { %8287 = vst [vmem:[#allocation72_spill] sm:$0xff] %v6800_v22  ;;  %v1695_v55 = vmax.f32 %v6798_v9, %v6800_v22  ;;  %v6804_v31 = vpop.f32.mrb[26].mxu0  ;;  %8313 = vst [vmem:[#allocation98_spill] sm:$0xff] %v7088_v7 }
 0x30b   : > { %8288 = vst [vmem:[#allocation73_spill] sm:$0xff] %v6804_v31  ;;  %v6830_v30 = vpop.f32.mrb[27].mxu0 }
 0x30c   : > { %8289 = vst [vmem:[#allocation74_spill] sm:$0xff] %v6830_v30  ;;  %v1699_v46 = vmax.f32 %v6804_v31, %v6830_v30  ;;  %v1696_v49 = vmax.f32 %v1695_v55, %v6734_v13 }
 0x30e   : > { %1697 = vmax.xlane.f32.xlu1 %v1696_v49  ;;  %v1700_v54 = vmax.f32 %v1699_v46, %v6742_v53 }
 0x310   : > { %v6836_v12 = vpop.f32.mrb[28].mxu0  ;;  %1701 = vmax.xlane.f32.xlu0 %v1700_v54 }
 0x311   : > { %8290 = vst [vmem:[#allocation75_spill] sm:$0xff] %v6836_v12  ;;  %v6838_v3 = vpop.f32.mrb[29].mxu0 }
 0x312   : > { %8291 = vst [vmem:[#allocation76_spill] sm:$0xff] %v6838_v3  ;;  %v1703_v1 = vmax.f32 %v6836_v12, %v6838_v3  ;;  %v6842_v16 = vpop.f32.mrb[30].mxu0  ;;  %v7047_v3 = vld [vmem:[#allocation2 + $0x60] sm:$0xff]  ;;  %v7049_v12 = vld [vmem:[#allocation2 + $0x68] sm:$0xff] }
 0x313   : > { %8292 = vst [vmem:[#allocation77_spill] sm:$0xff] %v6842_v16  ;;  %v6844_v21 = vpop.f32.mrb[31].mxu0 }
 0x314   : > { %8293 = vst [vmem:[#allocation78_spill] sm:$0xff] %v6844_v21  ;;  %v1707_v62 = vmax.f32 %v6842_v16, %v6844_v21  ;;  %v1704_v32 = vmax.f32 %v1703_v1, %v6732_v56 }
 0x316   : > { %1705 = vmax.xlane.f32.xlu1 %v1704_v32  ;;  %v1708_v55 = vmax.f32 %v1707_v62, %v6738_v28 }
 0x318   : > { %v6850_v50 = vpop.f32.mrb[32].mxu0  ;;  %1709 = vmax.xlane.f32.xlu0 %v1708_v55 }
 0x319   : > { %8294 = vst [vmem:[#allocation79_spill] sm:$0xff] %v6850_v50  ;;  %v6852_v46 = vpop.f32.mrb[33].mxu0 }
 0x31a   : > { %8295 = vst [vmem:[#allocation80_spill] sm:$0xff] %v6852_v46  ;;  %v1711_v49 = vmax.f32 %v6850_v50, %v6852_v46  ;;  %v6856_v54 = vpop.f32.mrb[34].mxu0  ;;  %v4703_v46 = vld [vmem:[%s5836_s3 + $0xb0] sm:$0xff]   ;;  %v4704_v50 = vld [vmem:[%s5836_s3 + $0xb8] sm:$0xff]  }
 0x31b   : > { %8296 = vst [vmem:[#allocation81_spill] sm:$0xff] %v6856_v54  ;;  %v6858_v53 = vpop.f32.mrb[35].mxu0 }
 0x31c   : > { %8297 = vst [vmem:[#allocation82_spill] sm:$0xff] %v6858_v53  ;;  %v1715_v21 = vmax.f32 %v6856_v54, %v6858_v53  ;;  %v1712_v1 = vmax.f32 %v1711_v49, %v6756_v35 }
 0x31e   : > { %1713 = vmax.xlane.f32.xlu1 %v1712_v1  ;;  %v1716_v62 = vmax.f32 %v1715_v21, %v6764_v15 }
 0x320   : > { %v6864_v32 = vpop.f32.mrb[36].mxu0  ;;  %1717 = vmax.xlane.f32.xlu0 %v1716_v62 }
 0x321   : > { %8298 = vst [vmem:[#allocation83_spill] sm:$0xff] %v6864_v32  ;;  %v6866_v55 = vpop.f32.mrb[37].mxu0 }
 0x322   : > { %8299 = vst [vmem:[#allocation84_spill] sm:$0xff] %v6866_v55  ;;  %v1719_v28 = vmax.f32 %v6864_v32, %v6866_v55  ;;  %v6870_v16 = vpop.f32.mrb[38].mxu0  ;;  %v6961_v55 = vld [vmem:[#allocation2 + $0x20] sm:$0xff] }
 0x323   : > { %8300 = vst [vmem:[#allocation85_spill] sm:$0xff] %v6870_v16  ;;  %v6872_v30 = vpop.f32.mrb[39].mxu0 }
 0x324   : > { %8301 = vst [vmem:[#allocation86_spill] sm:$0xff] %v6872_v30  ;;  %v1723_v53 = vmax.f32 %v6870_v16, %v6872_v30  ;;  %v1720_v49 = vmax.f32 %v1719_v28, %v6754_v60  ;;  %v4696_v60 = vld [vmem:[%s5836_s3 + $0x98] sm:$0xff]  }
 0x326   : > { %1721 = vmax.xlane.f32.xlu1 %v1720_v49  ;;  %v1724_v21 = vmax.f32 %v1723_v53, %v6760_v39 }
 0x328   : > { %v6878_v1 = vpop.f32.mrb[40].mxu0  ;;  %1725 = vmax.xlane.f32.xlu0 %v1724_v21 }
 0x329   : > { %8302 = vst [vmem:[#allocation87_spill] sm:$0xff] %v6878_v1  ;;  %v6880_v62 = vpop.f32.mrb[41].mxu0 }
 0x32a   : > { %8303 = vst [vmem:[#allocation88_spill] sm:$0xff] %v6880_v62  ;;  %v1727_v15 = vmax.f32 %v6878_v1, %v6880_v62  ;;  %v6884_v54 = vpop.f32.mrb[42].mxu0  ;;  %v6948_v62 = vld [vmem:[#allocation2 + $0x18] sm:$0xff]  ;;  %v4699_v1 = vld [vmem:[%s5836_s3 + $0xa0] sm:$0xff]  }
 0x32b   : > { %8304 = vst [vmem:[#allocation89_spill] sm:$0xff] %v6884_v54  ;;  %v6886_v31 = vpop.f32.mrb[43].mxu0 }
 0x32c   : > { %8305 = vst [vmem:[#allocation90_spill] sm:$0xff] %v6886_v31  ;;  %v1728_v28 = vmax.f32 %v1727_v15, %v6778_v14  ;;  %v1731_v53 = vmax.f32 %v6884_v54, %v6886_v31  ;;  %v4682_v31 = vld [vmem:[%s5836_s3] sm:$0xff]   ;;  %v4683_v54 = vld [vmem:[%s5836_s3 + $0x48] sm:$0xff]  }
 0x32d   : > { %v4687_v14 = vld [vmem:[%s5836_s3 + $0x80] sm:$0xff]  }
 0x32e   : > { %1729 = vmax.xlane.f32.xlu1 %v1728_v28  ;;  %v1732_v49 = vmax.f32 %v1731_v53, %v6786_v0  ;;  %v4681_v0 = vld [vmem:[%s5836_s3 + $0x40] sm:$0xff]   ;;  %4254 = vmatprep.subr.bf16.mxu0 %v4687_v14 }
 0x32f   : > { %4106 = vmatprep.subr.bf16.mxu1 %v4681_v0  ;;  %4255 = vmatpush3.bf16.msra.mxu0 %v4687_v14  ;;  %v4691_v14 = vld [vmem:[%s5836_s3 + $0x60] sm:$0xff]  }
 0x330   : > { %1733 = vmax.xlane.f32.xlu0 %v1732_v49  ;;  %v6892_v21 = vpop.f32.mrb[44].mxu0  ;;  %4107 = vmatpush3.bf16.msra.mxu1 %v4682_v31 }
 0x331   : > { %8306 = vst [vmem:[#allocation91_spill] sm:$0xff] %v6892_v21  ;;  %v6894_v39 = vpop.f32.mrb[45].mxu0  ;;  %4108 = vmatprep.subr.bf16.mxu1 %v4683_v54  ;;  %v4692_v54 = vld [vmem:[%s5836_s3 + $0x20] sm:$0xff]  }
 0x332   : > { %8307 = vst [vmem:[#allocation92_spill] sm:$0xff] %v6894_v39  ;;  %v1735_v30 = vmax.f32 %v6892_v21, %v6894_v39  ;;  %v6898_v16 = vpop.f32.mrb[46].mxu0  ;;  %v4684_v39 = vld [vmem:[%s5836_s3 + $0x8] sm:$0xff]   ;;  %v4685_v21 = vld [vmem:[%s5836_s3 + $0x50] sm:$0xff]  }
 0x333   : > { %8308 = vst [vmem:[#allocation93_spill] sm:$0xff] %v6898_v16  ;;  %v6900_v15 = vpop.f32.mrb[47].mxu0 }
 0x334   : > { %8309 = vst [vmem:[#allocation94_spill] sm:$0xff] %v6900_v15  ;;  %v1739_v28 = vmax.f32 %v6898_v16, %v6900_v15  ;;  %v6905_v53 = vmax.f32 %v1735_v30, %v6776_v47  ;;  %4109 = vmatpush3.bf16.msra.mxu1 %v4684_v39  ;;  %v4686_v15 = vld [vmem:[%s5836_s3 + $0x10] sm:$0xff]   ;;  %v6917_v30 = vld [vmem:[#allocation2] sm:$0xff]  ;;  %v6919_v47 = vld [vmem:[#allocation2 + $0x8] sm:$0xff] }
 0x335   : > { %4110 = vmatprep.subr.bf16.mxu1 %v4685_v21  ;;  %v4689_v21 = vld [vmem:[%s5836_s3 + $0x18] sm:$0xff]   ;;  %v4693_v16 = vld [vmem:[%s5836_s3 + $0x90] sm:$0xff]  }
 0x336   : > { %v6908_v49 = vmax.f32 %v1739_v28, %v6782_v44  ;;  %v4688_v44 = vld [vmem:[%s5836_s3 + $0x58] sm:$0xff]  }
 0x338   : > { %4111 = vmatpush3.bf16.msra.mxu1 %v4686_v15  ;;  %v4690_v15 = vld [vmem:[%s5836_s3 + $0x88] sm:$0xff]  }
 0x339   : > { %4112 = vmatprep.subr.bf16.mxu1 %v4688_v44  ;;  %4256 = vmatprep.subr.bf16.mxu0 %v4690_v15 }
 0x33a   : > { %4257 = vmatpush3.bf16.msra.mxu0 %v4690_v15  ;;  %v4694_v15 = vld [vmem:[%s5836_s3 + $0x68] sm:$0xff]  }
 0x33b   : > { %4258 = vmatprep.subr.bf16.mxu0 %v4693_v16 }
 0x33c   : > { %4113 = vmatpush3.bf16.msra.mxu1 %v4689_v21 }
 0x33d   : > { %4114 = vmatprep.subr.bf16.mxu1 %v4691_v14  ;;  %v4695_v14 = vld [vmem:[%s5836_s3 + $0x28] sm:$0xff]  }
 0x33e   : > { %4259 = vmatpush3.bf16.msra.mxu0 %v4693_v16  ;;  %v4697_v16 = vld [vmem:[%s5836_s3 + $0x70] sm:$0xff]  }
 0x33f   : > { %4260 = vmatprep.subr.bf16.mxu0 %v4696_v60 }
 0x340   : > { %4115 = vmatpush3.bf16.msra.mxu1 %v4692_v54 }
 0x341   : > { %4116 = vmatprep.subr.bf16.mxu1 %v4694_v15  ;;  %v4698_v15 = vld [vmem:[%s5836_s3 + $0x30] sm:$0xff]  }
 0x342   : > { %4261 = vmatpush3.bf16.msra.mxu0 %v4696_v60 }
 0x343   : > { %4262 = vmatprep.subr.bf16.mxu0 %v4699_v1 }
 0x344   : > { %4117 = vmatpush3.bf16.msra.mxu1 %v4695_v14 }
 0x345   : > { %4118 = vmatprep.subr.bf16.mxu1 %v4697_v16  ;;  %v4701_v16 = vld [vmem:[%s5836_s3 + $0x38] sm:$0xff]  }
 0x346   : > { %4263 = vmatpush3.bf16.msra.mxu0 %v4699_v1 }
 0x347   : > { %4264 = vmatprep.subr.bf16.mxu0 %v4702_v37 }
 0x348   : > { %4119 = vmatpush3.bf16.msra.mxu1 %v4698_v15  ;;  %v6992_v15 = vld [vmem:[#allocation2 + $0x38] sm:$0xff] }
 0x34a   : > { %4265 = vmatpush3.bf16.msra.mxu0 %v4702_v37  ;;  %v7010_v37 = vld [vmem:[#allocation2 + $0x40] sm:$0xff] }
 0x34b   : > { %4266 = vmatprep.subr.bf16.mxu0 %v4703_v46 }
 0x34e   : > { %4267 = vmatpush3.bf16.msra.mxu0 %v4703_v46 }
 0x34f   : > { %4268 = vmatprep.subr.bf16.mxu0 %v4704_v50 }
 0x352   : > { %4269 = vmatpush3.bf16.msra.mxu0 %v4704_v50 }
 0x36b   : > { %v1650_v28 = vpop.xlane.xlu0 %1649 }
 0x36c   : > { %v6922_v0 = vmax.f32 %v6917_v30, %v1650_v28  ;;  %v6940_v28 = vld [vmem:[#allocation2 + $0x10] sm:$0xff] }
 0x36d   : > { %v1654_v31 = vpop.xlane.xlu1 %1653 }
 0x36e   : > { %3106 = vst.msk [vmem:[#allocation2] sm:$0xff] %vm560_vm0, %v6922_v0  ;;  %v6930_v39 = vmax.f32 %v6919_v47, %v1654_v31  ;;  %1841 = vperm.xlu1 %4679, %v6922_v0  }
 0x370   : > { %3107 = vst.msk [vmem:[#allocation2 + $0x8] sm:$0xff] %vm560_vm0, %v6930_v39  ;;  %1846 = vperm.xlu0 %4680, %v6930_v39  }
 0x373   : > { %v1658_v31 = vpop.xlane.xlu0 %1657 }
 0x374   : > { %v6944_v44 = vmax.f32 %v6940_v28, %v1658_v31 }
 0x376   : > { %3108 = vst.msk [vmem:[#allocation2 + $0x10] sm:$0xff] %vm560_vm0, %v6944_v44  ;;  %1851 = vperm.xlu1 %4679, %v6944_v44  }
 0x377   : > { %v1662_v21 = vpop.xlane.xlu0 %1661 }
 0x378   : > { %v6957_v31 = vmax.f32 %v6948_v62, %v1662_v21  ;;  %v6968_v21 = vld [vmem:[#allocation2 + $0x28] sm:$0xff] }
 0x37a   : > { %3109 = vst.msk [vmem:[#allocation2 + $0x18] sm:$0xff] %vm560_vm0, %v6957_v31  ;;  %1856 = vperm.xlu1 %4679, %v6957_v31  }
 0x37b   : > { %v1666_v54 = vpop.xlane.xlu1 %1665 }
 0x37c   : > { %v6972_v32 = vmax.f32 %v6961_v55, %v1666_v54  ;;  %v4700_v54 = vld [vmem:[%s5836_s3 + $0x78] sm:$0xff]   ;;  %s5282_s3 = smov [#allocation17]  }
 0x37d   : > { %v1670_v35 = vpop.xlane.xlu0 %1669  ;;  %4120 = vmatprep.subr.bf16.mxu1 %v4700_v54  ;;  %s5083_s24 = sshll.u32 %s5282_s3, 4  ;;  %s5084_s24 = int_to_ptr.vmem [resolvable:$false] %s5083_s24 }
 0x37e   : > { %3110 = vst.msk [vmem:[#allocation2 + $0x20] sm:$0xff] %vm560_vm0, %v6972_v32  ;;  %v6981_v14 = vmax.f32 %v6968_v21, %v1670_v35  ;;  %4121 = vmatpush3.bf16.msra.mxu1 %v4701_v16  ;;  %s5085_s2 = scalar_lea.vmem %s5084_s24, 3072  ;;  %p5086_p7 = scmp.lt.s32.totalorder %s7770_s9, %s5084_s24 }
 0x37f   : > { %p5087_p0 = scmp.lt.s32.totalorder %s5085_s2, %s5079_s4 }
 0x380   : > { %3111 = vst.msk [vmem:[#allocation2 + $0x28] sm:$0xff] %vm560_vm0, %v6981_v14 }
 0x381   : > { %p5088_p1 = por %p5087_p0, %p5086_p7 }
 0x383   : > { %v1674_v35 = vpop.xlane.xlu1 %1673  ;;  %p5089_p5 = pnand %p5088_p1, %p5082_p9 }
 0x384   : > { %v6995_v40 = vmax.f32 %v6990_v2, %v1674_v35 }
 0x385   : > { %v1678_v60 = vpop.xlane.xlu0 %1677 }
 0x386   : > { %3112 = vst.msk [vmem:[#allocation2 + $0x30] sm:$0xff] %vm560_vm0, %v6995_v40  ;;  %v7004_v54 = vmax.f32 %v6992_v15, %v1678_v60 }
 0x388   : > { %3113 = vst.msk [vmem:[#allocation2 + $0x38] sm:$0xff] %vm560_vm0, %v7004_v54 }
 0x38b   : > { %v1682_v35 = vpop.xlane.xlu1 %1681 }
 0x38c   : > { %v7015_v1 = vmax.f32 %v7010_v37, %v1682_v35  ;;  %v7029_v35 = vld [vmem:[#allocation2 + $0x50] sm:$0xff] }
 0x38d   : > { %v1686_v60 = vpop.xlane.xlu0 %1685 }
 0x38e   : > { %3114 = vst.msk [vmem:[#allocation2 + $0x40] sm:$0xff] %vm560_vm0, %v7015_v1  ;;  %v7022_v16 = vmax.f32 %v7012_v10, %v1686_v60 }
 0x38f   : > { %1741 = vmax.xlane.f32.xlu0 %v6908_v49 }
 0x390   : > { %3115 = vst.msk [vmem:[#allocation2 + $0x48] sm:$0xff] %vm560_vm0, %v7022_v16 }
 0x393   : > { %v1690_v50 = vpop.xlane.xlu1 %1689 }
 0x394   : > { %v7034_v58 = vmax.f32 %v7029_v35, %v1690_v50 }
 0x395   : > { %v1694_v56 = vpop.xlane.xlu0 %1693 }
 0x396   : > { %3116 = vst.msk [vmem:[#allocation2 + $0x50] sm:$0xff] %vm560_vm0, %v7034_v58  ;;  %v7041_v49 = vmax.f32 %v7031_v19, %v1694_v56 }
 0x398   : > { %3117 = vst.msk [vmem:[#allocation2 + $0x58] sm:$0xff] %vm560_vm0, %v7041_v49 }
 0x39b   : > { %v1698_v50 = vpop.xlane.xlu1 %1697 }
 0x39c   : > { %v7052_v13 = vmax.f32 %v7047_v3, %v1698_v50  ;;  %v7066_v50 = vld [vmem:[#allocation2 + $0x70] sm:$0xff] }
 0x39d   : > { %v1702_v60 = vpop.xlane.xlu0 %1701 }
 0x39e   : > { %1737 = vmax.xlane.f32.xlu1 %v6905_v53  ;;  %3118 = vst.msk [vmem:[#allocation2 + $0x60] sm:$0xff] %vm560_vm0, %v7052_v13  ;;  %v7060_v46 = vmax.f32 %v7049_v12, %v1702_v60 }
 0x3a0   : > { %3119 = vst.msk [vmem:[#allocation2 + $0x68] sm:$0xff] %vm560_vm0, %v7060_v46 }
 0x3a3   : > { %v1706_v9 = vpop.xlane.xlu1 %1705 }
 0x3a4   : > { %v7071_v53 = vmax.f32 %v7066_v50, %v1706_v9  ;;  %v7086_v9 = vld [vmem:[#allocation2 + $0x80] sm:$0xff] }
 0x3a5   : > { %1861 = vperm.xlu0 %4680, %v6972_v32   ;;  %v1710_v56 = vpop.xlane.xlu0 %1709  ;;  %8312 = vst [vmem:[#allocation97_spill] sm:$0xff] %v7086_v9 }
 0x3a6   : > { %3120 = vst.msk [vmem:[#allocation2 + $0x70] sm:$0xff] %vm560_vm0, %v7071_v53  ;;  %v7079_v22 = vmax.f32 %v7068_v48, %v1710_v56 }
 0x3a8   : > { %8311 = vst [vmem:[#allocation96_spill] sm:$0xff] %v7079_v22  ;;  %3121 = vst.msk [vmem:[#allocation2 + $0x78] sm:$0xff] %vm560_vm0, %v7079_v22 }
 0x3a9   : > { %1866 = vperm.xlu0 %4680, %v6981_v14  }
 0x3ab   : > { %v1714_v24 = vpop.xlane.xlu1 %1713 }
 0x3ac   : > { %v7091_v60 = vmax.f32 %v7086_v9, %v1714_v24  ;;  %v7107_v24 = vld [vmem:[#allocation2 + $0x90] sm:$0xff]  ;;  %v7110_v9 = vld [vmem:[#allocation2 + $0x98] sm:$0xff] }
 0x3ad   : > { %1871 = vperm.xlu0 %4680, %v6995_v40   ;;  %v1718_v56 = vpop.xlane.xlu0 %1717  ;;  %8316 = vst [vmem:[#allocation101_spill] sm:$0xff] %v7107_v24  ;;  %8317 = vst [vmem:[#allocation102_spill] sm:$0xff] %v7110_v9 }
 0x3ae   : > { %8314 = vst [vmem:[#allocation99_spill] sm:$0xff] %v7091_v60  ;;  %3122 = vst.msk [vmem:[#allocation2 + $0x80] sm:$0xff] %vm560_vm0, %v7091_v60  ;;  %v7099_v8 = vmax.f32 %v7088_v7, %v1718_v56 }
 0x3af   : > { %1876 = vperm.xlu1 %4679, %v7004_v54  }
 0x3b0   : > { %8315 = vst [vmem:[#allocation100_spill] sm:$0xff] %v7099_v8  ;;  %3123 = vst.msk [vmem:[#allocation2 + $0x88] sm:$0xff] %vm560_vm0, %v7099_v8 }
 0x3b1   : > { %1881 = vperm.xlu0 %4680, %v7015_v1  }
 0x3b3   : > { %1901 = vperm.xlu1 %4679, %v7052_v13   ;;  %v1722_v43 = vpop.xlane.xlu1 %1721 }
 0x3b4   : > { %v7113_v56 = vmax.f32 %v7107_v24, %v1722_v43  ;;  %v7129_v43 = vld [vmem:[#allocation2 + $0xa0] sm:$0xff]  ;;  %v7132_v24 = vld [vmem:[#allocation2 + $0xa8] sm:$0xff] }
 0x3b5   : > { %1886 = vperm.xlu0 %4680, %v7022_v16   ;;  %v1726_v38 = vpop.xlane.xlu0 %1725  ;;  %8320 = vst [vmem:[#allocation105_spill] sm:$0xff] %v7129_v43  ;;  %8321 = vst [vmem:[#allocation106_spill] sm:$0xff] %v7132_v24 }
 0x3b6   : > { %8318 = vst [vmem:[#allocation103_spill] sm:$0xff] %v7113_v56  ;;  %3124 = vst.msk [vmem:[#allocation2 + $0x90] sm:$0xff] %vm560_vm0, %v7113_v56  ;;  %v7121_v7 = vmax.f32 %v7110_v9, %v1726_v38 }
 0x3b7   : > { %1911 = vperm.xlu1 %4679, %v7071_v53  }
 0x3b8   : > { %8319 = vst [vmem:[#allocation104_spill] sm:$0xff] %v7121_v7  ;;  %3125 = vst.msk [vmem:[#allocation2 + $0x98] sm:$0xff] %vm560_vm0, %v7121_v7 }
 0x3b9   : > { %1891 = vperm.xlu0 %4680, %v7034_v58  }
 0x3bb   : > { %1921 = vperm.xlu1 %4679, %v7091_v60   ;;  %v1730_v48 = vpop.xlane.xlu1 %1729 }
 0x3bc   : > { %v7135_v38 = vmax.f32 %v7129_v43, %v1730_v48 }
 0x3bd   : > { %1896 = vperm.xlu0 %4680, %v7041_v49   ;;  %v1734_v29 = vpop.xlane.xlu0 %1733 }
 0x3be   : > { %8322 = vst [vmem:[#allocation107_spill] sm:$0xff] %v7135_v38  ;;  %3126 = vst.msk [vmem:[#allocation2 + $0xa0] sm:$0xff] %vm560_vm0, %v7135_v38  ;;  %v7143_v9 = vmax.f32 %v7132_v24, %v1734_v29 }
 0x3bf   : > { %1931 = vperm.xlu1 %4679, %v7113_v56  }
 0x3c0   : > { %8323 = vst [vmem:[#allocation108_spill] sm:$0xff] %v7143_v9  ;;  %3127 = vst.msk [vmem:[#allocation2 + $0xa8] sm:$0xff] %vm560_vm0, %v7143_v9 }
 0x3c1   : > { %1906 = vperm.xlu0 %4680, %v7060_v46  }
 0x3c3   : > { %1941 = vperm.xlu1 %4679, %v7135_v38  }
 0x3c5   : > { %1916 = vperm.xlu0 %4680, %v7079_v22  }
 0x3c9   : > { %1926 = vperm.xlu0 %4680, %v7099_v8  }
 0x3cd   : > { %1936 = vperm.xlu0 %4680, %v7121_v7  }
 0x3d1   : > { %1946 = vperm.xlu0 %4680, %v7143_v9  }
 0x3ed   : > { %v1842_v29 = vpop.permute.xlu1 %1841 }
 0x3ee   : > { %v1959_v48 = vsub.f32 %v6670_v42, %v1842_v29  ;;  %v1960_v60 = vsub.f32 %v6674_v11, %v1842_v29  ;;  %v1961_v24 = vsub.f32 %v6668_v63, %v1842_v29 }
 0x3ef   : > { %v1847_v18 = vpop.permute.xlu0 %1846 }
 0x3f0   : > { %v1962_v43 = vsub.f32 %v6680_v27, %v1847_v18  ;;  %v1963_v38 = vsub.f32 %v6682_v51, %v1847_v18  ;;  %v1964_v22 = vsub.f32 %v6676_v5, %v1847_v18 }
 0x3f2   : > { %v2031_v56 = vpack.c.bf16 %v1962_v43, %v1959_v48  ;;  %v2032_v8 = vpack.c.bf16 %v1963_v38, %v1960_v60  ;;  %v2033_v20 = vpack.c.bf16 %v1964_v22, %v1961_v24 }
 0x3f4   : > { %v2068_v7 = vmul.bf16 1069105081, %v2031_v56  ;;  %v2071_v45 = vmul.bf16 1069105081, %v2032_v8  ;;  %v2074_v9 = vmul.bf16 1069105081, %v2033_v20 }
 0x3f5   : > { %v1852_v41 = vpop.permute.xlu1 %1851 }
 0x3f6   : > { %4705 = vpow.bf16 %v2068_v7  ;;  %v1965_v42 = vsub.f32 %v6692_v59, %v1852_v41  ;;  %v1966_v63 = vsub.f32 %v6696_v34, %v1852_v41  ;;  %v1967_v27 = vsub.f32 %v6666_v4, %v1852_v41 }
 0x3f7   : > { %4707 = vpow.bf16 %v2071_v45 }
 0x3f8   : > { %4709 = vpow.bf16 %v2074_v9 }
 0x3f9   : > { %v1857_v11 = vpop.permute.xlu1 %1856 }
 0x3fa   : > { %v1968_v51 = vsub.f32 %v6702_v52, %v1857_v11  ;;  %v1969_v5 = vsub.f32 %v6704_v23, %v1857_v11  ;;  %v1970_v18 = vsub.f32 %v6672_v25, %v1857_v11 }
 0x3fc   : > { %v2034_v22 = vpack.c.bf16 %v1968_v51, %v1965_v42  ;;  %v2035_v8 = vpack.c.bf16 %v1969_v5, %v1966_v63  ;;  %v2036_v20 = vpack.c.bf16 %v1970_v18, %v1967_v27 }
 0x3fe   : > { %v2077_v60 = vmul.bf16 1069105081, %v2034_v22  ;;  %v2080_v7 = vmul.bf16 1069105081, %v2035_v8  ;;  %v2083_v45 = vmul.bf16 1069105081, %v2036_v20 }
 0x400   : > { %4711 = vpow.bf16 %v2077_v60 }
 0x401   : > { %v4706_v9 = vpop.eup %4705  ;;  %4713 = vpow.bf16 %v2080_v7 }
 0x402   : > { %v4708_v59 = vpop.eup %4707  ;;  %4715 = vpow.bf16 %v2083_v45  ;;  %v2226_v34 = vunpack.c.h.bf16 %v4706_v9  ;;  %v2223_v24 = vunpack.c.l.bf16 %v4706_v9  ;;  %v8324_v45 = vsub.f32 %v6919_v47, %v6930_v39 }
 0x403   : > { %v4710_v4 = vpop.eup %4709  ;;  %2832 = vmatprep.mubr.bf16.mxu1 %v4708_v59  ;;  %v2227_v52 = vunpack.c.h.bf16 %v4708_v59  ;;  %v2224_v41 = vunpack.c.l.bf16 %v4708_v59  ;;  %v8325_v59 = vsub.f32 %v6968_v21, %v6981_v14  ;;  %v8327_v39 = vsub.f32 %v7012_v10, %v7022_v16 }
 0x404   : > { %4270 = vmatprep.mubr.bf16.mxu0 %v4710_v4  ;;  %2833 = vmatmul.mubr.bf16.vlgmr.msra.gmra.mrb[24].mxu1 %v4706_v9  ;;  %v2228_v25 = vunpack.c.h.bf16 %v4710_v4  ;;  %v2225_v56 = vunpack.c.l.bf16 %v4710_v4  ;;  %v1793_v9 = vmul.f32 1.442695, %v8324_v45  ;;  %v8326_v4 = vsub.f32 %v6992_v15, %v7004_v54 }
 0x405   : > { %v2299_v23 = vadd.f32 %v2227_v52, %v2226_v34  ;;  %v2295_v43 = vadd.f32 %v2224_v41, %v2223_v24  ;;  %v1801_v34 = vmul.f32 1.442695, %v8325_v59  ;;  %v7182_v24 = vld [vmem:[#allocation2 + $0xb8] sm:$0xff]  ;;  %v1809_v21 = vmul.f32 1.442695, %v8327_v39  ;;  %v8340_v39 = vld [vmem:[#allocation51_spill] sm:$0xff] }
 0x406   : > { %4717 = vpow2.f32 %v1793_v9  ;;  %v1805_v52 = vmul.f32 1.442695, %v8326_v4  ;;  %v8328_v15 = vsub.f32 %v6917_v30, %v6922_v0  ;;  %v8331_v16 = vsub.f32 %v6948_v62, %v6957_v31 }
 0x407   : > { %v7168_v38 = vadd.f32 %v2299_v23, %v2228_v25  ;;  %v7170_v29 = vadd.f32 %v2295_v43, %v2225_v56  ;;  %4719 = vpow2.f32 %v1801_v34  ;;  %v8329_v23 = vsub.f32 %v6940_v28, %v6944_v44 }
 0x408   : > { %4721 = vpow2.f32 %v1805_v52  ;;  %v1791_v54 = vmul.f32 1.442695, %v8328_v15  ;;  %v8330_v43 = vsub.f32 %v7031_v19, %v7041_v49  ;;  %v1797_v30 = vmul.f32 1.442695, %v8331_v16  ;;  %v8339_v52 = vld [vmem:[#allocation49_spill] sm:$0xff]  ;;  %v8341_v15 = vld [vmem:[#allocation52_spill] sm:$0xff] }
 0x409   : > { %v1795_v56 = vmul.f32 1.442695, %v8329_v23  ;;  %4723 = vpow2.f32 %v1809_v21  ;;  %v8332_v0 = vsub.f32 %v6961_v55, %v6972_v32  ;;  %v8333_v44 = vsub.f32 %v6990_v2, %v6995_v40  ;;  %v7231_v2 = vld [vmem:[#allocation2 + $0xb0] sm:$0xff] }
 0x40a   : > { %4725 = vpow2.f32 %v1791_v54  ;;  %v8334_v19 = vsub.f32 %v7049_v12, %v7060_v46  ;;  %v8335_v12 = vsub.f32 %v7010_v37, %v7015_v1  ;;  %v8336_v1 = vsub.f32 %v7029_v35, %v7034_v58  ;;  %v8343_v23 = vld [vmem:[#allocation56_spill] sm:$0xff] }
 0x40b   : > { %v4712_v48 = vpop.eup %4711  ;;  %4727 = vpow2.f32 %v1795_v56  ;;  %v1799_v28 = vmul.f32 1.442695, %v8332_v0  ;;  %v8337_v45 = vsub.f32 %v7047_v3, %v7052_v13  ;;  %v8338_v59 = vsub.f32 %v7066_v50, %v7071_v53  ;;  %v8342_v50 = vld [vmem:[#allocation55_spill] sm:$0xff] }
 0x40c   : > { %v4714_v42 = vpop.eup %4713  ;;  %v2229_v63 = vunpack.c.l.bf16 %v4712_v48  ;;  %v2232_v11 = vunpack.c.h.bf16 %v4712_v48  ;;  %v1817_v49 = vmul.f32 1.442695, %v8334_v19  ;;  %v1811_v37 = vmul.f32 1.442695, %v8336_v1  ;;  %v8352_v1 = vld [vmem:[#allocation71_spill] sm:$0xff] }
 0x40d   : > { %v4716_v27 = vpop.eup %4715  ;;  %2840 = vmatprep.mubr.bf16.mxu1 %v4714_v42  ;;  %v2230_v51 = vunpack.c.l.bf16 %v4714_v42  ;;  %v2233_v5 = vunpack.c.h.bf16 %v4714_v42  ;;  %v1815_v9 = vmul.f32 1.442695, %v8337_v45  ;;  %v1819_v34 = vmul.f32 1.442695, %v8338_v59  ;;  %v8353_v45 = vld [vmem:[#allocation72_spill] sm:$0xff] }
 0x40e   : > { %4271 = vmatmul.mubr.bf16.vlgmr.msra.gmra.mrb[48].mxu0 %v4716_v27  ;;  %2841 = vmatmul.mubr.bf16.gmra.mrb[28].mxu1 %v4712_v48  ;;  %v2231_v18 = vunpack.c.l.bf16 %v4716_v27  ;;  %v2234_v8 = vunpack.c.h.bf16 %v4716_v27  ;;  %v1813_v48 = vmul.f32 1.442695, %v8330_v43 }
 0x40f   : > { %v2303_v22 = vadd.f32 %v2230_v51, %v2229_v63  ;;  %v2307_v20 = vadd.f32 %v2233_v5, %v2232_v11  ;;  %v1803_v63 = vmul.f32 1.442695, %v8333_v44  ;;  %v8344_v44 = vld [vmem:[#allocation57_spill] sm:$0xff] }
 0x410   : > { %v7198_v14 = vpop.eup %4717  ;;  %4729 = vpow2.f32 %v1813_v48 }
 0x411   : > { %v7172_v60 = vadd.f32 %v2303_v22, %v2231_v18  ;;  %v7174_v7 = vadd.f32 %v2307_v20, %v2234_v8  ;;  %v7210_v10 = vpop.eup %4719  ;;  %4731 = vpow2.f32 %v1797_v30 }
 0x412   : > { %v7233_v51 = vpop.eup %4721  ;;  %4733 = vpow2.f32 %v1799_v28 }
 0x413   : > { %4735 = vpow2.f32 %v1817_v49  ;;  %v7242_v8 = vpop.eup %4723 }
 0x414   : > { %4737 = vpow2.f32 %v1803_v63  ;;  %v7260_v4 = vpop.eup %4725 }
 0x415   : > { %v7265_v54 = vpop.eup %4727 }
 0x41a   : > { %v7269_v56 = vpop.eup %4729 }
 0x41b   : > { %v7275_v30 = vpop.eup %4731 }
 0x41c   : > { %v1742_v41 = vpop.xlane.xlu0 %1741  ;;  %v7278_v49 = vpop.eup %4733 }
 0x41d   : > { %v7188_v25 = vmax.f32 %v7182_v24, %v1742_v41 }
 0x41f   : > { %3129 = vst.msk [vmem:[#allocation2 + $0xb8] sm:$0xff] %vm560_vm0, %v7188_v25  ;;  %1956 = vperm.xlu0 %4680, %v7188_v25  }
 0x423   : > { %2471 = vperm.xlu0 %4680, %v7198_v14  }
 0x424   : > { %v1862_v42 = vpop.permute.xlu0 %1861 }
 0x425   : > { %v1971_v11 = vsub.f32 %v6714_v33, %v1862_v42  ;;  %v1972_v62 = vsub.f32 %v6718_v57, %v1862_v42  ;;  %v1973_v27 = vsub.f32 %v6690_v6, %v1862_v42  ;;  %v1807_v33 = vmul.f32 1.442695, %v8335_v12  ;;  %v7283_v12 = vpop.eup %4735 }
 0x427   : > { %2491 = vperm.xlu0 %4680, %v7210_v10   ;;  %4739 = vpow2.f32 %v1807_v33  ;;  %v8348_v33 = vld [vmem:[#allocation43_spill] sm:$0xff] }
 0x428   : > { %v1867_v31 = vpop.permute.xlu0 %1866 }
 0x429   : > { %v1974_v32 = vsub.f32 %v6724_v61, %v1867_v31  ;;  %v1975_v55 = vsub.f32 %v6726_v26, %v1867_v31  ;;  %v1976_v40 = vsub.f32 %v6698_v17, %v1867_v31 }
 0x42b   : > { %v2037_v57 = vpack.c.bf16 %v1974_v32, %v1971_v11  ;;  %v2038_v46 = vpack.c.bf16 %v1975_v55, %v1972_v62  ;;  %v2039_v5 = vpack.c.bf16 %v1976_v40, %v1973_v27  ;;  %2501 = vperm.xlu0 %4680, %v7233_v51   ;;  %v1738_v6 = vpop.xlane.xlu1 %1737  ;;  %v8345_v62 = vld [vmem:[#allocation59_spill] sm:$0xff]  ;;  %v8346_v27 = vld [vmem:[#allocation61_spill] sm:$0xff]  ;;  %v8347_v55 = vld [vmem:[#allocation62_spill] sm:$0xff] }
 0x42c   : > { %v7240_v61 = vmax.f32 %v7231_v2, %v1738_v6  ;;  %v1872_v17 = vpop.permute.xlu0 %1871  ;;  %v7288_v6 = vpop.eup %4737 }
 0x42d   : > { %v2086_v26 = vmul.bf16 1069105081, %v2037_v57  ;;  %v2089_v18 = vmul.bf16 1069105081, %v2038_v46  ;;  %v2092_v22 = vmul.bf16 1069105081, %v2039_v5  ;;  %v1977_v58 = vsub.f32 %v6736_v36, %v1872_v17 }
 0x42e   : > { %3128 = vst.msk [vmem:[#allocation2 + $0xb0] sm:$0xff] %vm560_vm0, %v7240_v61  ;;  %1951 = vperm.xlu1 %4679, %v7240_v61   ;;  %v1978_v41 = vsub.f32 %v8339_v52, %v1872_v17  ;;  %v1979_v53 = vsub.f32 %v8342_v50, %v1872_v17  ;;  %v8349_v46 = vld [vmem:[#allocation45_spill] sm:$0xff]  ;;  %8350 = vst [vmem:[#allocation49_spill] sm:$0xff] %v7288_v6 }
 0x42f   : > { %4741 = vpow.bf16 %v2086_v26  ;;  %2511 = vperm.xlu0 %4680, %v7242_v8   ;;  %v1877_v35 = vpop.permute.xlu1 %1876 }
 0x430   : > { %4743 = vpow.bf16 %v2089_v18  ;;  %v1980_v21 = vsub.f32 %v8340_v39, %v1877_v35  ;;  %v1981_v13 = vsub.f32 %v8341_v15, %v1877_v35  ;;  %v1882_v3 = vpop.permute.xlu0 %1881  ;;  %v1982_v36 = vsub.f32 %v8343_v23, %v1877_v35  ;;  %v8355_v39 = vld [vmem:[#allocation75_spill] sm:$0xff] }
 0x431   : > { %4745 = vpow.bf16 %v2092_v22  ;;  %v1983_v63 = vsub.f32 %v8344_v44, %v1882_v3  ;;  %v1984_v31 = vsub.f32 %v8345_v62, %v1882_v3  ;;  %v1985_v57 = vsub.f32 %v8348_v33, %v1882_v3  ;;  %v7293_v22 = vpop.eup %4739  ;;  %v8356_v3 = vld [vmem:[#allocation76_spill] sm:$0xff] }
 0x432   : > { %4747 = vpow2.f32 %v1811_v37  ;;  %v2040_v43 = vpack.c.bf16 %v1980_v21, %v1977_v58  ;;  %v2041_v48 = vpack.c.bf16 %v1981_v13, %v1978_v41  ;;  %2466 = vperm.xlu1 %4679, %v7260_v4   ;;  %v2042_v42 = vpack.c.bf16 %v1982_v36, %v1979_v53  ;;  %8351 = vst [vmem:[#allocation51_spill] sm:$0xff] %v7293_v22  ;;  %v8354_v58 = vld [vmem:[#allocation47_spill] sm:$0xff]  ;;  %v8357_v53 = vld [vmem:[#allocation46_spill] sm:$0xff]  ;;  %v8358_v36 = vld [vmem:[#allocation65_spill] sm:$0xff] }
 0x433   : > { %4749 = vpow2.f32 %v1815_v9  ;;  %2521 = vperm.xlu0 %4680, %v7269_v56   ;;  %v7273_v16 = vpop.permute.xlu1 %1901 }
 0x434   : > { %4751 = vpow2.f32 %v1819_v34  ;;  %v2095_v0 = vmul.bf16 1069105081, %v2040_v43  ;;  %v2098_v28 = vmul.bf16 1069105081, %v2041_v48  ;;  %v1887_v19 = vpop.permute.xlu0 %1886  ;;  %v2101_v11 = vmul.bf16 1069105081, %v2042_v42 }
 0x435   : > { %v1986_v32 = vsub.f32 %v8346_v27, %v1887_v19  ;;  %v1987_v40 = vsub.f32 %v8347_v55, %v1887_v19  ;;  %v1988_v5 = vsub.f32 %v8349_v46, %v1887_v19  ;;  %v1995_v37 = vsub.f32 %v8352_v1, %v7273_v16  ;;  %v8359_v42 = vld [vmem:[#allocation67_spill] sm:$0xff]  ;;  %v8363_v46 = vld [vmem:[#allocation69_spill] sm:$0xff] }
 0x436   : > { %4753 = vpow.bf16 %v2095_v0  ;;  %2476 = vperm.xlu1 %4679, %v7265_v54   ;;  %v8375_v1 = vld [vmem:[#allocation87_spill] sm:$0xff] }
 0x437   : > { %4755 = vpow.bf16 %v2098_v28  ;;  %v2043_v17 = vpack.c.bf16 %v1986_v32, %v1983_v63  ;;  %v2044_v26 = vpack.c.bf16 %v1987_v40, %v1984_v31  ;;  %2531 = vperm.xlu0 %4680, %v7283_v12   ;;  %v7291_v18 = vpop.permute.xlu1 %1911  ;;  %v2045_v59 = vpack.c.bf16 %v1988_v5, %v1985_v57  ;;  %v8360_v28 = vld [vmem:[#allocation42_spill] sm:$0xff]  ;;  %v8361_v31 = vld [vmem:[#allocation79_spill] sm:$0xff]  ;;  %v8362_v32 = vld [vmem:[#allocation80_spill] sm:$0xff] }
 0x438   : > { %4757 = vpow.bf16 %v2101_v11  ;;  %v1892_v34 = vpop.permute.xlu0 %1891 }
 0x439   : > { %v2104_v52 = vmul.bf16 1069105081, %v2043_v17  ;;  %v2107_v41 = vmul.bf16 1069105081, %v2044_v26  ;;  %v2110_v13 = vmul.bf16 1069105081, %v2045_v59  ;;  %v1989_v43 = vsub.f32 %v8358_v36, %v1892_v34 }
 0x43a   : > { %v4742_v15 = vpop.eup %4741  ;;  %2481 = vperm.xlu1 %4679, %v7275_v30   ;;  %v1990_v0 = vsub.f32 %v8359_v42, %v1892_v34  ;;  %v1991_v44 = vsub.f32 %v8360_v28, %v1892_v34  ;;  %v8364_v17 = vld [vmem:[#allocation70_spill] sm:$0xff]  ;;  %v8365_v59 = vld [vmem:[#allocation44_spill] sm:$0xff]  ;;  %v8369_v36 = vld [vmem:[#allocation53_spill] sm:$0xff] }
 0x43b   : > { %v4744_v48 = vpop.eup %4743  ;;  %4759 = vpow.bf16 %v2104_v52  ;;  %v7311_v63 = vpop.permute.xlu1 %1921  ;;  %v2238_v19 = vunpack.c.h.bf16 %v4742_v15  ;;  %v2235_v33 = vunpack.c.l.bf16 %v4742_v15 }
 0x43c   : > { %v7313_v11 = vpop.eup %4745  ;;  %4761 = vpow.bf16 %v2107_v41  ;;  %2848 = vmatprep.mubr.bf16.mxu1 %v4744_v48  ;;  %v1897_v40 = vpop.permute.xlu0 %1896  ;;  %v8366_v41 = vld [vmem:[#allocation54_spill] sm:$0xff]  ;;  %v2239_v42 = vunpack.c.h.bf16 %v4744_v48 }
 0x43d   : > { %v7315_v62 = vpop.eup %4747  ;;  %4763 = vpow.bf16 %v2110_v13  ;;  %4274 = vmatprep.mubr.bf16.mxu0 %v7313_v11  ;;  %v1992_v5 = vsub.f32 %v8363_v46, %v1897_v40  ;;  %v1993_v26 = vsub.f32 %v8364_v17, %v1897_v40  ;;  %v1994_v34 = vsub.f32 %v8365_v59, %v1897_v40  ;;  %2849 = vmatmul.mubr.bf16.gmra.mrb[32].mxu1 %v4742_v15  ;;  %v8367_v15 = vld [vmem:[#allocation83_spill] sm:$0xff]  ;;  %v8368_v59 = vld [vmem:[#allocation84_spill] sm:$0xff]  ;;  %v8372_v40 = vld [vmem:[#allocation50_spill] sm:$0xff] }
 0x43e   : > { %v7321_v57 = vpop.eup %4749  ;;  %2486 = vperm.xlu1 %4679, %v7278_v49   ;;  %v2240_v28 = vunpack.c.h.bf16 %v7313_v11  ;;  %v2236_v13 = vunpack.c.l.bf16 %v4744_v48  ;;  %v2315_v21 = vadd.f32 %v2239_v42, %v2238_v19 }
 0x43f   : > { %v7327_v52 = vpop.eup %4751  ;;  %v2046_v47 = vpack.c.bf16 %v1992_v5, %v1989_v43  ;;  %v2047_v20 = vpack.c.bf16 %v1993_v26, %v1990_v0  ;;  %v2048_v55 = vpack.c.bf16 %v1994_v34, %v1991_v44  ;;  %v7333_v46 = vpop.permute.xlu1 %1931  ;;  %v8370_v44 = vld [vmem:[#allocation73_spill] sm:$0xff]  ;;  %v8371_v34 = vld [vmem:[#allocation74_spill] sm:$0xff] }
 0x440   : > { %v1907_v50 = vpop.permute.xlu0 %1906  ;;  %v7350_v27 = vadd.f32 %v2315_v21, %v2240_v28  ;;  %v8373_v21 = vsub.f32 %v8353_v45, %v7273_v16  ;;  %v8374_v28 = vsub.f32 %v8354_v58, %v7273_v16  ;;  %v8378_v58 = vld [vmem:[#allocation77_spill] sm:$0xff] }
 0x441   : > { %v7342_v35 = vpop.eup %4753  ;;  %v2113_v43 = vmul.bf16 1069105081, %v2046_v47  ;;  %v2116_v48 = vmul.bf16 1069105081, %v2047_v20  ;;  %v2119_v0 = vmul.bf16 1069105081, %v2048_v55  ;;  %v1998_v5 = vsub.f32 %v8370_v44, %v1907_v50 }
 0x442   : > { %v7345_v26 = vpop.eup %4755  ;;  %v1999_v17 = vsub.f32 %v8371_v34, %v1907_v50  ;;  %v2000_v9 = vsub.f32 %v8372_v40, %v1907_v50  ;;  %2496 = vperm.xlu1 %4679, %v7288_v6   ;;  %v2244_v23 = vunpack.c.h.bf16 %v7342_v35  ;;  %v2311_v50 = vadd.f32 %v2236_v13, %v2235_v33  ;;  %v8377_v13 = vld [vmem:[#allocation64_spill] sm:$0xff]  ;;  %v8379_v34 = vld [vmem:[#allocation78_spill] sm:$0xff] }
 0x443   : > { %v7353_v19 = vpop.eup %4757  ;;  %4765 = vpow.bf16 %v2113_v43  ;;  %v2049_v47 = vpack.c.bf16 %v1998_v5, %v1995_v37  ;;  %2856 = vmatprep.mubr.bf16.mxu1 %v7345_v26  ;;  %v7359_v20 = vpop.permute.xlu1 %1941  ;;  %v2245_v55 = vunpack.c.h.bf16 %v7345_v26  ;;  %v8376_v5 = vld [vmem:[#allocation88_spill] sm:$0xff] }
 0x444   : > { %4767 = vpow.bf16 %v2116_v48  ;;  %v2050_v42 = vpack.c.bf16 %v1999_v17, %v8373_v21  ;;  %v2051_v40 = vpack.c.bf16 %v2000_v9, %v8374_v28  ;;  %4275 = vmatmul.mubr.bf16.gmra.mrb[52].mxu0 %v7353_v19  ;;  %v1917_v43 = vpop.permute.xlu0 %1916  ;;  %v2246_v33 = vunpack.c.h.bf16 %v7353_v19 }
 0x445   : > { %4769 = vpow.bf16 %v2119_v0  ;;  %v2122_v44 = vmul.bf16 1069105081, %v2049_v47  ;;  %2857 = vmatmul.mubr.bf16.gmra.mrb[36].mxu1 %v7342_v35  ;;  %v2004_v17 = vsub.f32 %v8378_v58, %v1917_v43  ;;  %v2005_v21 = vsub.f32 %v8379_v34, %v1917_v43  ;;  %v8380_v47 = vld [vmem:[#allocation48_spill] sm:$0xff] }
 0x446   : > { %v7376_v45 = vpop.eup %4759  ;;  %v2125_v16 = vmul.bf16 1069105081, %v2050_v42  ;;  %v2128_v9 = vmul.bf16 1069105081, %v2051_v40  ;;  %2506 = vperm.xlu1 %4679, %v7293_v22   ;;  %v2006_v28 = vsub.f32 %v8380_v47, %v1917_v43  ;;  %v2323_v48 = vadd.f32 %v2245_v55, %v2244_v23  ;;  %v8384_v43 = vld [vmem:[#allocation81_spill] sm:$0xff] }
 0x447   : > { %v7381_v0 = vpop.eup %4761  ;;  %4771 = vpow.bf16 %v2122_v44  ;;  %v8381_v42 = vsub.f32 %v8355_v39, %v7291_v18  ;;  %v8382_v58 = vsub.f32 %v8356_v3, %v7291_v18  ;;  %v2250_v44 = vunpack.c.h.bf16 %v7376_v45  ;;  %v8385_v39 = vld [vmem:[#allocation82_spill] sm:$0xff]  ;;  %v8386_v3 = vld [vmem:[#allocation60_spill] sm:$0xff] }
 0x448   : > { %v7385_v37 = vpop.eup %4763  ;;  %4773 = vpow.bf16 %v2125_v16  ;;  %2864 = vmatprep.mubr.bf16.mxu1 %v7381_v0  ;;  %v1927_v22 = vpop.permute.xlu0 %1926  ;;  %v8383_v23 = vsub.f32 %v8357_v53, %v7291_v18  ;;  %v8388_v53 = vsub.f32 %v8362_v32, %v7311_v63 }
 0x449   : > { %v2052_v40 = vpack.c.bf16 %v2004_v17, %v8381_v42  ;;  %v2053_v34 = vpack.c.bf16 %v2005_v21, %v8382_v58  ;;  %4775 = vpow.bf16 %v2128_v9  ;;  %4278 = vmatprep.mubr.bf16.mxu0 %v7385_v37  ;;  %v2010_v16 = vsub.f32 %v8384_v43, %v1927_v22 }
 0x44a   : > { %v2054_v55 = vpack.c.bf16 %v2006_v28, %v8383_v23  ;;  %v2011_v17 = vsub.f32 %v8385_v39, %v1927_v22  ;;  %v2012_v21 = vsub.f32 %v8386_v3, %v1927_v22  ;;  %2516 = vperm.xlu1 %4679, %v7315_v62   ;;  %v7403_v58 = vadd.f32 %v2323_v48, %v2246_v33 }
 0x44b   : > { %v2131_v47 = vmul.bf16 1069105081, %v2052_v40  ;;  %v2134_v42 = vmul.bf16 1069105081, %v2053_v34  ;;  %v8387_v9 = vsub.f32 %v8361_v31, %v7311_v63  ;;  %v2251_v23 = vunpack.c.h.bf16 %v7381_v0 }
 0x44c   : > { %v2137_v6 = vmul.bf16 1069105081, %v2054_v55  ;;  %v2056_v28 = vpack.c.bf16 %v2011_v17, %v8388_v53  ;;  %v8389_v40 = vsub.f32 %v8366_v41, %v7311_v63  ;;  %v1937_v34 = vpop.permute.xlu0 %1936  ;;  %v2252_v33 = vunpack.c.h.bf16 %v7385_v37  ;;  %v8392_v63 = vld [vmem:[#allocation86_spill] sm:$0xff] }
 0x44d   : > { %v2055_v18 = vpack.c.bf16 %v2010_v16, %v8387_v9  ;;  %4777 = vpow.bf16 %v2131_v47  ;;  %v8390_v48 = vunpack.c.l.bf16 %v7313_v11  ;;  %v8391_v16 = vld [vmem:[#allocation85_spill] sm:$0xff]  ;;  %2865 = vmatmul.mubr.bf16.gmra.mrb[40].mxu1 %v7376_v45  ;;  %v2017_v41 = vsub.f32 %v8392_v63, %v1937_v34  ;;  %v8393_v47 = vld [vmem:[#allocation58_spill] sm:$0xff] }
 0x44e   : > { %v2057_v22 = vpack.c.bf16 %v2012_v21, %v8389_v40  ;;  %4779 = vpow.bf16 %v2134_v42  ;;  %v2143_v43 = vmul.bf16 1069105081, %v2056_v28  ;;  %v2016_v32 = vsub.f32 %v8391_v16, %v1937_v34  ;;  %v7422_v39 = vpop.eup %4765  ;;  %2526 = vperm.xlu1 %4679, %v7321_v57  }
 0x44f   : > { %v7418_v55 = vadd.f32 %v2311_v50, %v8390_v48  ;;  %v2140_v31 = vmul.bf16 1069105081, %v2055_v18  ;;  %4781 = vpow.bf16 %v2137_v6  ;;  %v2018_v3 = vsub.f32 %v8393_v47, %v1937_v34  ;;  %v7427_v11 = vpop.eup %4767  ;;  %v8398_v48 = vld [vmem:[#allocation90_spill] sm:$0xff] }
 0x450   : > { %v2146_v17 = vmul.bf16 1069105081, %v2057_v22  ;;  %v8394_v50 = vsub.f32 %v8367_v15, %v7333_v46  ;;  %v2331_v21 = vadd.f32 %v2251_v23, %v2250_v44  ;;  %v2256_v9 = vunpack.c.h.bf16 %v7422_v39  ;;  %v7433_v18 = vpop.eup %4769  ;;  %2872 = vmatprep.mubr.bf16.mxu1 %v7427_v11  ;;  %v1947_v22 = vpop.permute.xlu0 %1946  ;;  %v8397_v23 = vld [vmem:[#allocation89_spill] sm:$0xff] }
 0x451   : > { %4783 = vpow.bf16 %v2140_v31  ;;  %v8395_v6 = vsub.f32 %v8368_v59, %v7333_v46  ;;  %v8396_v28 = vsub.f32 %v8369_v36, %v7333_v46  ;;  %v2257_v15 = vunpack.c.h.bf16 %v7427_v11  ;;  %4279 = vmatmul.mubr.bf16.gmra.mrb[56].mxu0 %v7433_v18 }
 0x452   : > { %v2058_v42 = vpack.c.bf16 %v2016_v32, %v8394_v50  ;;  %4785 = vpow.bf16 %v2143_v43  ;;  %v2022_v34 = vsub.f32 %v8397_v23, %v1947_v22  ;;  %v2023_v31 = vsub.f32 %v8398_v48, %v1947_v22  ;;  %v7446_v43 = vpop.eup %4771  ;;  %v8399_v32 = vld [vmem:[#allocation68_spill] sm:$0xff]  ;;  %2536 = vperm.xlu1 %4679, %v7327_v52  }
 0x453   : > { %v2059_v53 = vpack.c.bf16 %v2017_v41, %v8395_v6  ;;  %v2060_v40 = vpack.c.bf16 %v2018_v3, %v8396_v28  ;;  %4787 = vpow.bf16 %v2146_v17  ;;  %v2024_v36 = vsub.f32 %v8399_v32, %v1947_v22  ;;  %v7452_v63 = vpop.eup %4773 }
 0x454   : > { %v2149_v44 = vmul.bf16 1069105081, %v2058_v42  ;;  %v7450_v46 = vadd.f32 %v2331_v21, %v2252_v33  ;;  %v8400_v17 = vsub.f32 %v8375_v1, %v7359_v20  ;;  %v8401_v47 = vsub.f32 %v8376_v5, %v7359_v20  ;;  %v7461_v42 = vpop.eup %4775 }
 0x455   : > { %v2152_v59 = vmul.bf16 1069105081, %v2059_v53  ;;  %v2155_v16 = vmul.bf16 1069105081, %v2060_v40  ;;  %v2258_v50 = vunpack.c.h.bf16 %v7433_v18  ;;  %v8402_v33 = vsub.f32 %v8377_v13, %v7359_v20  ;;  %4282 = vmatprep.mubr.bf16.mxu0 %v7461_v42  ;;  %2873 = vmatmul.mubr.bf16.gmra.mrb[44].mxu1 %v7422_v39 }
 0x456   : > { %4789 = vpow.bf16 %v2149_v44  ;;  %v2061_v41 = vpack.c.bf16 %v2022_v34, %v8400_v17  ;;  %v2062_v3 = vpack.c.bf16 %v2023_v31, %v8401_v47  ;;  %v2339_v6 = vadd.f32 %v2257_v15, %v2256_v9  ;;  %2880 = vmatprep.mubr.bf16.mxu1 %v7452_v63  ;;  %2301 = vadd.xlane.f32.xlu0 %v7168_v38 }
 0x457   : > { %4791 = vpow.bf16 %v2152_v59  ;;  %v2063_v21 = vpack.c.bf16 %v2024_v36, %v8402_v33  ;;  %v2262_v53 = vunpack.c.h.bf16 %v7446_v43  ;;  %v2263_v5 = vunpack.c.h.bf16 %v7452_v63 }
 0x458   : > { %4793 = vpow.bf16 %v2155_v16  ;;  %v2158_v28 = vmul.bf16 1069105081, %v2061_v41  ;;  %v2161_v1 = vmul.bf16 1069105081, %v2062_v3  ;;  %v7472_v22 = vadd.f32 %v2339_v6, %v2258_v50  ;;  %v7476_v9 = vpop.eup %4777 }
 0x459   : > { %v2164_v40 = vmul.bf16 1069105081, %v2063_v21  ;;  %v2264_v20 = vunpack.c.h.bf16 %v7461_v42  ;;  %v2241_v13 = vunpack.c.l.bf16 %v7342_v35  ;;  %v2347_v15 = vadd.f32 %v2263_v5, %v2262_v53  ;;  %v4780_v34 = vpop.eup %4779 }
 0x45a   : > { %4795 = vpow.bf16 %v2158_v28  ;;  %v2242_v44 = vunpack.c.l.bf16 %v7345_v26  ;;  %v2243_v23 = vunpack.c.l.bf16 %v7353_v19  ;;  %v2268_v48 = vunpack.c.h.bf16 %v7476_v9  ;;  %v4782_v59 = vpop.eup %4781  ;;  %2305 = vadd.xlane.f32.xlu0 %v7172_v60 }
 0x45b   : > { %4797 = vpow.bf16 %v2161_v1  ;;  %v2247_v38 = vunpack.c.l.bf16 %v7376_v45  ;;  %v2248_v31 = vunpack.c.l.bf16 %v7381_v0  ;;  %v7483_v16 = vadd.f32 %v2347_v15, %v2264_v20  ;;  %4283 = vmatmul.mubr.bf16.gmra.mrb[60].mxu0 %v4782_v59 }
 0x45c   : > { %4799 = vpow.bf16 %v2164_v40  ;;  %v2269_v35 = vunpack.c.h.bf16 %v4780_v34  ;;  %v2319_v32 = vadd.f32 %v2242_v44, %v2241_v13  ;;  %v7485_v36 = vpop.eup %4783  ;;  %v2270_v26 = vunpack.c.h.bf16 %v4782_v59 }
 0x45d   : > { %v2249_v19 = vunpack.c.l.bf16 %v7385_v37  ;;  %v2327_v17 = vadd.f32 %v2248_v31, %v2247_v38  ;;  %v2253_v41 = vunpack.c.l.bf16 %v7422_v39  ;;  %v4786_v45 = vpop.eup %4785  ;;  %v2274_v0 = vunpack.c.h.bf16 %v7485_v36  ;;  %2881 = vmatmul.mubr.bf16.gmra.mrb[48].mxu1 %v7446_v43 }
 0x45e   : > { %v2355_v47 = vadd.f32 %v2269_v35, %v2268_v48  ;;  %v7491_v3 = vadd.f32 %v2319_v32, %v2243_v23  ;;  %v2254_v50 = vunpack.c.l.bf16 %v7427_v11  ;;  %v4788_v33 = vpop.eup %4787  ;;  %v2275_v21 = vunpack.c.h.bf16 %v4786_v45  ;;  %2888 = vmatprep.mubr.bf16.mxu1 %v4780_v34  ;;  %2309 = vadd.xlane.f32.xlu0 %v7174_v7 }
 0x45f   : > { %v7494_v6 = vadd.f32 %v2327_v17, %v2249_v19  ;;  %v2255_v60 = vunpack.c.l.bf16 %v7433_v18  ;;  %v2259_v53 = vunpack.c.l.bf16 %v7446_v43  ;;  %4286 = vmatprep.mubr.bf16.mxu0 %v4788_v33  ;;  %v2276_v39 = vunpack.c.h.bf16 %v4788_v33 }
 0x460   : > { %v2356_v37 = vadd.f32 %v2355_v47, %v2270_v26  ;;  %v2335_v28 = vadd.f32 %v2254_v50, %v2253_v41  ;;  %v2260_v1 = vunpack.c.l.bf16 %v7452_v63  ;;  %v2363_v11 = vadd.f32 %v2275_v21, %v2274_v0 }
 0x461   : > { %v4790_v5 = vpop.eup %4789  ;;  %v2261_v40 = vunpack.c.l.bf16 %v7461_v42  ;;  %v2265_v20 = vunpack.c.l.bf16 %v7476_v9  ;;  %v2266_v18 = vunpack.c.l.bf16 %v4780_v34  ;;  %v2267_v43 = vunpack.c.l.bf16 %v4782_v59 }
 0x462   : > { %v4792_v13 = vpop.eup %4791  ;;  %v2280_v15 = vunpack.c.h.bf16 %v4790_v5  ;;  %v2336_v44 = vadd.f32 %v2335_v28, %v2255_v60  ;;  %v2343_v23 = vadd.f32 %v2260_v1, %v2259_v53  ;;  %v2364_v38 = vadd.f32 %v2363_v11, %v2276_v39  ;;  %2317 = vadd.xlane.f32.xlu0 %v7350_v27 }
 0x463   : > { %v4794_v48 = vpop.eup %4793  ;;  %v2281_v31 = vunpack.c.h.bf16 %v4792_v13  ;;  %v2351_v35 = vadd.f32 %v2266_v18, %v2265_v20  ;;  %v2271_v63 = vunpack.c.l.bf16 %v7485_v36  ;;  %v2272_v7 = vunpack.c.l.bf16 %v4786_v45 }
 0x464   : > { %v2282_v32 = vunpack.c.h.bf16 %v4794_v48  ;;  %v2344_v26 = vadd.f32 %v2343_v23, %v2261_v40  ;;  %v2273_v19 = vunpack.c.l.bf16 %v4788_v33  ;;  %4287 = vmatmul.mubr.bf16.gmra.mrb[64].mxu0 %v4794_v48  ;;  %v2277_v41 = vunpack.c.l.bf16 %v4790_v5 }
 0x465   : > { %v4796_v17 = vpop.eup %4795  ;;  %v2371_v42 = vadd.f32 %v2281_v31, %v2280_v15  ;;  %v2352_v34 = vadd.f32 %v2351_v35, %v2267_v43  ;;  %v2278_v47 = vunpack.c.l.bf16 %v4792_v13  ;;  %v2359_v50 = vadd.f32 %v2272_v7, %v2271_v63  ;;  %2889 = vmatmul.mubr.bf16.gmra.mrb[52].mxu1 %v7476_v9 }
 0x466   : > { %v4798_v0 = vpop.eup %4797  ;;  %v2286_v59 = vunpack.c.h.bf16 %v4796_v17  ;;  %v2279_v21 = vunpack.c.l.bf16 %v4794_v48  ;;  %v2283_v60 = vunpack.c.l.bf16 %v4796_v17  ;;  %2896 = vmatprep.mubr.bf16.mxu1 %v4786_v45  ;;  %2325 = vadd.xlane.f32.xlu0 %v7403_v58  ;;  %v8406_v45 = vld [vmem:[#allocation91_spill] sm:$0xff] }
 0x467   : > { %v4800_v53 = vpop.eup %4799  ;;  %v2372_v39 = vadd.f32 %v2371_v42, %v2282_v32  ;;  %v2287_v28 = vunpack.c.h.bf16 %v4798_v0  ;;  %v2367_v1 = vadd.f32 %v2278_v47, %v2277_v41  ;;  %v2284_v11 = vunpack.c.l.bf16 %v4798_v0 }
 0x468   : > { %4290 = vmatprep.mubr.bf16.mxu0 %v4800_v53  ;;  %v2288_v33 = vunpack.c.h.bf16 %v4800_v53  ;;  %v2360_v40 = vadd.f32 %v2359_v50, %v2273_v19  ;;  %v2285_v18 = vunpack.c.l.bf16 %v4800_v53 }
 0x469   : > { %v2379_v27 = vadd.f32 %v2287_v28, %v2286_v59  ;;  %v2368_v20 = vadd.f32 %v2367_v1, %v2279_v21  ;;  %v2375_v15 = vadd.f32 %v2284_v11, %v2283_v60  ;;  %v8410_v28 = vld [vmem:[#allocation99_spill] sm:$0xff] }
 0x46a   : > { %2333 = vadd.xlane.f32.xlu0 %v7450_v46  ;;  %v8403_v46 = vld [vmem:[#allocation93_spill] sm:$0xff] }
 0x46b   : > { %v2380_v23 = vadd.f32 %v2379_v27, %v2288_v33  ;;  %v2376_v43 = vadd.f32 %v2375_v15, %v2285_v18  ;;  %v8412_v33 = vld [vmem:[#allocation101_spill] sm:$0xff]  ;;  %v8415_v15 = vld [vmem:[#allocation95_spill] sm:$0xff] }
 0x46d   : > { %2897 = vmatmul.mubr.bf16.gmra.mrb[56].mxu1 %v7485_v36 }
 0x46e   : > { %2904 = vmatprep.mubr.bf16.mxu1 %v4792_v13  ;;  %2341 = vadd.xlane.f32.xlu0 %v7472_v22  ;;  %v8408_v13 = vld [vmem:[#allocation63_spill] sm:$0xff] }
 0x472   : > { %2349 = vadd.xlane.f32.xlu0 %v7483_v16 }
 0x475   : > { %2905 = vmatmul.mubr.bf16.gmra.mrb[60].mxu1 %v4790_v5 }
 0x476   : > { %2912 = vmatprep.mubr.bf16.mxu1 %v4798_v0  ;;  %2357 = vadd.xlane.f32.xlu0 %v2356_v37 }
 0x477   : > { %2297 = vadd.xlane.f32.xlu1 %v7170_v29  ;;  %v8404_v29 = vld [vmem:[#allocation94_spill] sm:$0xff] }
 0x47a   : > { %2365 = vadd.xlane.f32.xlu0 %v2364_v38 }
 0x47b   : > { %2313 = vadd.xlane.f32.xlu1 %v7418_v55  ;;  %v8405_v55 = vld [vmem:[#allocation66_spill] sm:$0xff] }
 0x47d   : > { %2913 = vmatmul.mubr.bf16.gmra.mrb[64].mxu1 %v4796_v17 }
 0x47e   : > { %2373 = vadd.xlane.f32.xlu0 %v2372_v39  ;;  %v8409_v39 = vld [vmem:[#allocation97_spill] sm:$0xff] }
 0x47f   : > { %2321 = vadd.xlane.f32.xlu1 %v7491_v3  ;;  %v8407_v3 = vld [vmem:[#allocation92_spill] sm:$0xff]  ;;  %v8411_v1 = vsub.f32 %v8409_v39, %v8410_v28 }
 0x481   : > { %v1823_v11 = vmul.f32 1.442695, %v8411_v1 }
 0x482   : > { %2381 = vadd.xlane.f32.xlu0 %v2380_v23  ;;  %v8416_v23 = vld [vmem:[#allocation96_spill] sm:$0xff] }
 0x483   : > { %2329 = vadd.xlane.f32.xlu1 %v7494_v6 }
 0x487   : > { %2337 = vadd.xlane.f32.xlu1 %v2336_v44 }
 0x48b   : > { %2345 = vadd.xlane.f32.xlu1 %v2344_v26 }
 0x48f   : > { %2353 = vadd.xlane.f32.xlu1 %v2352_v34 }
 0x493   : > { %2361 = vadd.xlane.f32.xlu1 %v2360_v40  ;;  %v8413_v40 = vld [vmem:[#allocation103_spill] sm:$0xff] }
 0x494   : > { %v8414_v27 = vsub.f32 %v8412_v33, %v8413_v40  ;;  %v2176_v33 = vld [vmem:[#allocation3 + $0x8] sm:$0xff] }
 0x497   : > { %2369 = vadd.xlane.f32.xlu1 %v2368_v20  ;;  %v1827_v20 = vmul.f32 1.442695, %v8414_v27 }
 0x49b   : > { %2377 = vadd.xlane.f32.xlu1 %v2376_v43  ;;  %v8417_v43 = vsub.f32 %v8415_v15, %v8416_v23 }
 0x49e   : > { %v1957_v58 = vpop.permute.xlu0 %1956 }
 0x49f   : > { %v2028_v22 = vsub.f32 %v8403_v46, %v1957_v58  ;;  %v2029_v9 = vsub.f32 %v8404_v29, %v1957_v58  ;;  %v2030_v36 = vsub.f32 %v8405_v55, %v1957_v58  ;;  %v1821_v58 = vmul.f32 1.442695, %v8417_v43  ;;  %v8419_v29 = vld [vmem:[#allocation107_spill] sm:$0xff]  ;;  %v8421_v55 = vld [vmem:[#allocation98_spill] sm:$0xff] }
 0x4a2   : > { %v7521_v42 = vpop.permute.xlu0 %2471 }
 0x4a6   : > { %v7523_v53 = vpop.permute.xlu0 %2491 }
 0x4aa   : > { %v7531_v18 = vpop.permute.xlu0 %2501 }
 0x4ad   : > { %v1952_v16 = vpop.permute.xlu1 %1951 }
 0x4ae   : > { %v2025_v37 = vsub.f32 %v8406_v45, %v1952_v16  ;;  %v2026_v5 = vsub.f32 %v8407_v3, %v1952_v16  ;;  %v2027_v6 = vsub.f32 %v8408_v13, %v1952_v16  ;;  %v7542_v3 = vpop.permute.xlu0 %2511  ;;  %v8424_v13 = vsub.f32 %v7231_v2, %v7240_v61  ;;  %v8429_v2 = vld [vmem:[#allocation108_spill] sm:$0xff] }
 0x4b0   : > { %v2064_v44 = vpack.c.bf16 %v2028_v22, %v2025_v37  ;;  %v2065_v48 = vpack.c.bf16 %v2029_v9, %v2026_v5  ;;  %v2066_v38 = vpack.c.bf16 %v2030_v36, %v2027_v6  ;;  %v8418_v22 = vld [vmem:[#allocation105_spill] sm:$0xff]  ;;  %v8422_v36 = vld [vmem:[#allocation100_spill] sm:$0xff]  ;;  %v1835_v6 = vmul.f32 1.442695, %v8424_v13 }
 0x4b1   : > { %v2467_v46 = vpop.permute.xlu1 %2466  ;;  %v8420_v9 = vsub.f32 %v8418_v22, %v8419_v29  ;;  %v8423_v45 = vsub.f32 %v8421_v55, %v8422_v36  ;;  %v2200_v29 = vmul.f32 %v7198_v14, %v2176_v33 }
 0x4b2   : > { %v2167_v31 = vmul.bf16 1069105081, %v2064_v44  ;;  %v2170_v35 = vmul.bf16 1069105081, %v2065_v48  ;;  %v2173_v63 = vmul.bf16 1069105081, %v2066_v38 }
 0x4b3   : > { %v1831_v16 = vmul.f32 1.442695, %v8420_v9  ;;  %v1825_v37 = vmul.f32 1.442695, %v8423_v45  ;;  %v8425_v44 = vld [vmem:[#allocation102_spill] sm:$0xff]  ;;  %v8426_v48 = vld [vmem:[#allocation104_spill] sm:$0xff] }
 0x4b4   : > { %4801 = vpow.bf16 %v2167_v31  ;;  %v8427_v38 = vsub.f32 %v8425_v44, %v8426_v48 }
 0x4b5   : > { %4803 = vpow.bf16 %v2170_v35  ;;  %v2477_v5 = vpop.permute.xlu1 %2476 }
 0x4b6   : > { %4805 = vpow.bf16 %v2173_v63  ;;  %v1829_v31 = vmul.f32 1.442695, %v8427_v38  ;;  %v2586_v55 = vmul.f32 0.0, %v2477_v5 }
 0x4b7   : > { %4807 = vpow2.f32 %v1823_v11 }
 0x4b8   : > { %4809 = vpow2.f32 %v1827_v20 }
 0x4b9   : > { %4811 = vpow2.f32 %v1821_v58 }
 0x4ba   : > { %4813 = vpow2.f32 %v1831_v16  ;;  %v2585_v16 = vmul.f32 0.0, %v7521_v42 }
 0x4bb   : > { %4815 = vpow2.f32 %v1825_v37  ;;  %v2177_v37 = vld [vmem:[#allocation3 + $0x10] sm:$0xff] }
 0x4bc   : > { %4817 = vpow2.f32 %v1835_v6  ;;  %v2201_v14 = vmul.f32 %v7265_v54, %v2177_v37 }
 0x4bd   : > { %4819 = vpow2.f32 %v1829_v31 }
 0x4bf   : > { %v4802_v32 = vpop.eup %4801 }
 0x4c0   : > { %v4804_v26 = vpop.eup %4803  ;;  %v2292_v7 = vunpack.c.h.bf16 %v4802_v32  ;;  %v2289_v19 = vunpack.c.l.bf16 %v4802_v32 }
 0x4c1   : > { %v4806_v17 = vpop.eup %4805  ;;  %2920 = vmatprep.mubr.bf16.mxu1 %v4804_v26  ;;  %v2293_v34 = vunpack.c.h.bf16 %v4804_v26  ;;  %v2290_v41 = vunpack.c.l.bf16 %v4804_v26  ;;  %v7553_v26 = vpop.permute.xlu0 %2521 }
 0x4c2   : > { %4291 = vmatmul.mubr.bf16.gmra.mrb[68].mxu0 %v4806_v17  ;;  %2921 = vmatmul.mubr.bf16.gmra.mrb[68].mxu1 %v4802_v32  ;;  %v2294_v47 = vunpack.c.h.bf16 %v4806_v17  ;;  %v2291_v59 = vunpack.c.l.bf16 %v4806_v17  ;;  %v7550_v35 = vpop.eup %4807  ;;  %v8428_v17 = vld [vmem:[#allocation106_spill] sm:$0xff] }
 0x4c3   : > { %v2387_v0 = vadd.f32 %v2293_v34, %v2292_v7  ;;  %v2383_v50 = vadd.f32 %v2290_v41, %v2289_v19  ;;  %v8430_v61 = vsub.f32 %v8428_v17, %v8429_v2  ;;  %v2482_v41 = vpop.permute.xlu1 %2481  ;;  %v2178_v17 = vld [vmem:[#allocation3 + $0x18] sm:$0xff] }
 0x4c4   : > { %v2202_v54 = vmul.f32 %v7275_v30, %v2178_v17 }
 0x4c5   : > { %v2388_v21 = vadd.f32 %v2387_v0, %v2294_v47  ;;  %v2384_v60 = vadd.f32 %v2383_v50, %v2291_v59  ;;  %v1833_v34 = vmul.f32 1.442695, %v8430_v61  ;;  %v7558_v0 = vpop.eup %4809  ;;  %v7571_v1 = vpop.permute.xlu0 %2531 }
 0x4c6   : > { %v7560_v50 = vpop.eup %4811 }
 0x4c7   : > { %2389 = vadd.xlane.f32.xlu0 %v2388_v21  ;;  %2385 = vadd.xlane.f32.xlu1 %v2384_v60  ;;  %4821 = vpow2.f32 %v1833_v34  ;;  %v8431_v21 = vsub.f32 %v7182_v24, %v7188_v25  ;;  %v7567_v39 = vpop.eup %4813  ;;  %v7573_v11 = vpop.permute.xlu1 %2486  ;;  %v2584_v25 = vmul.f32 0.0, %v2467_v46 }
 0x4c8   : > { %v7569_v28 = vpop.eup %4815 }
 0x4c9   : > { %v1837_v60 = vmul.f32 1.442695, %v8431_v21  ;;  %v7577_v24 = vpop.eup %4817 }
 0x4ca   : > { %v7580_v9 = vpop.eup %4819 }
 0x4cb   : > { %4823 = vpow2.f32 %v1837_v60 }
 0x4d1   : > { %v7593_v31 = vpop.eup %4821 }
 0x4d5   : > { %v7602_v34 = vpop.eup %4823 }
 0x4d7   : > { %v4122_v63 = vpop.f32.mrb[24].mxu1 }
 0x4d8   : > { %v4123_v32 = vpop.f32.mrb[25].mxu1  ;;  %2546 = vperm.xlu1 %4679, %v7550_v35  }
 0x4d9   : > { %v4124_v7 = vadd.f32 %v4123_v32, %v4122_v63  ;;  %v4125_v19 = vpop.f32.mrb[26].mxu1  ;;  %v2587_v63 = vmul.f32 0.0, %v2482_v41  ;;  %v7595_v32 = vpop.permute.xlu1 %2496 }
 0x4da   : > { %v4126_v47 = vpop.f32.mrb[27].mxu1 }
 0x4db   : > { %v4127_v59 = vadd.f32 %v4126_v47, %v4125_v19 }
 0x4dc   : > { %2556 = vperm.xlu1 %4679, %v7558_v0  }
 0x4dd   : > { %2541 = vperm.xlu0 %4680, %v7560_v50   ;;  %v7605_v41 = vpop.permute.xlu1 %2506 }
 0x4e0   : > { %2566 = vperm.xlu1 %4679, %v7567_v39  }
 0x4e1   : > { %v4272_v40 = vpop.f32.mrb[48].mxu0  ;;  %v4128_v27 = vpop.f32.mrb[28].mxu1  ;;  %2551 = vperm.xlu0 %4680, %v7569_v28  }
 0x4e2   : > { %v2963_v20 = vpop.f32.mrb[49].mxu0  ;;  %v4129_v15 = vpop.f32.mrb[29].mxu1 }
 0x4e3   : > { %v2964_v23 = vadd.f32 %v4124_v7, %v2963_v20  ;;  %v4130_v43 = vadd.f32 %v4129_v15, %v4128_v27  ;;  %v4273_v58 = vpop.f32.mrb[50].mxu0  ;;  %v4131_v22 = vpop.f32.mrb[30].mxu1  ;;  %v2182_v27 = vld [vmem:[#allocation3 + $0x38] sm:$0xff] }
 0x4e4   : > { %v2966_v36 = vpop.f32.mrb[51].mxu0  ;;  %v2302_v45 = vpop.xlane.xlu0 %2301  ;;  %2576 = vperm.xlu1 %4679, %v7577_v24   ;;  %v2206_v30 = vmul.f32 %v7233_v51, %v2182_v27 }
 0x4e5   : > { %v2972_v13 = vadd.f32 %v4272_v40, %v4130_v43  ;;  %v2967_v6 = vadd.f32 %v4127_v59, %v2966_v36  ;;  %v2392_v44 = vadd.f32 %v2302_v45, %v2200_v29  ;;  %v4132_v46 = vpop.f32.mrb[31].mxu1  ;;  %2561 = vperm.xlu0 %4680, %v7580_v9   ;;  %v7585_v48 = vadd.f32 %v2964_v23, %v2584_v25  ;;  %v2180_v59 = vld [vmem:[#allocation3 + $0x28] sm:$0xff]  ;;  %v7611_v15 = vpop.permute.xlu1 %2516 }
 0x4e6   : > { %v4133_v38 = vadd.f32 %v4132_v46, %v4131_v22  ;;  %v2204_v33 = vmul.f32 %v7210_v10, %v2180_v59  ;;  %v2184_v23 = vld [vmem:[#allocation3 + $0x48] sm:$0xff]  ;;  %v2186_v10 = vld [vmem:[#allocation3 + $0x58] sm:$0xff] }
 0x4e7   : > { %2417 = vst.msk [vmem:[#allocation3 + $0x8] sm:$0xff] %vm560_vm0, %v2392_v44  ;;  %v7589_v42 = vadd.f32 %v2967_v6, %v2585_v16  ;;  %v7591_v5 = vadd.f32 %v2972_v13, %v2586_v55  ;;  %v2208_v22 = vmul.f32 %v7242_v8, %v2184_v23  ;;  %v2210_v51 = vmul.f32 %v7269_v56, %v2186_v10  ;;  %v2188_v13 = vld [vmem:[#allocation3 + $0x68] sm:$0xff]  ;;  %v8432_v10 = vld [vmem:[#allocation49_spill] sm:$0xff] }
 0x4e8   : > { %v2975_v7 = vadd.f32 %v4273_v58, %v4133_v38  ;;  %v2306_v19 = vpop.xlane.xlu0 %2305  ;;  %v2212_v8 = vmul.f32 %v7283_v12, %v2188_v13  ;;  %v2192_v59 = vld [vmem:[#allocation3 + $0x88] sm:$0xff]  ;;  %v2179_v12 = vld [vmem:[#allocation3 + $0x20] sm:$0xff] }
 0x4e9   : > { %v2393_v2 = vadd.f32 %v2306_v19, %v2201_v14  ;;  %2571 = vperm.xlu0 %4680, %v7593_v31   ;;  %v7615_v36 = vpop.permute.xlu1 %2526  ;;  %v2190_v14 = vld [vmem:[#allocation3 + $0x78] sm:$0xff]  ;;  %v2216_v27 = vmul.f32 %v7569_v28, %v2192_v59  ;;  %v2183_v13 = vld [vmem:[#allocation3 + $0x40] sm:$0xff] }
 0x4ea   : > { %v7598_v61 = vadd.f32 %v2975_v7, %v2587_v63  ;;  %v2175_v63 = vld [vmem:[#allocation3] sm:$0xff]  ;;  %v2214_v56 = vmul.f32 %v7560_v50, %v2190_v14  ;;  %v2203_v50 = vmul.f32 %v7278_v49, %v2179_v12  ;;  %v8433_v14 = vld [vmem:[#allocation51_spill] sm:$0xff] }
 0x4eb   : > { %2418 = vst.msk [vmem:[#allocation3 + $0x10] sm:$0xff] %vm560_vm0, %v2393_v2  ;;  %v2199_v2 = vmul.f32 %v7260_v4, %v2175_v63  ;;  %v2207_v63 = vmul.f32 %v8433_v14, %v2183_v13 }
 0x4ec   : > { %v2310_v47 = vpop.xlane.xlu0 %2309 }
 0x4ed   : > { %v2394_v21 = vadd.f32 %v2310_v47, %v2202_v54  ;;  %2581 = vperm.xlu0 %4680, %v7602_v34   ;;  %v7621_v46 = vpop.permute.xlu1 %2536 }
 0x4ee   : > { %v3134_v60 = vld [vmem:[#allocation3 + $0x8] sm:$0xff] }
 0x4ef   : > { %4825 = vrcp.f32 %v3134_v60  ;;  %2419 = vst.msk [vmem:[#allocation3 + $0x18] sm:$0xff] %vm560_vm0, %v2394_v21 }
 0x4f0   : > { %v2318_v40 = vpop.xlane.xlu0 %2317 }
 0x4f1   : > { %v2396_v20 = vadd.f32 %v2318_v40, %v2204_v33 }
 0x4f3   : > { %2421 = vst.msk [vmem:[#allocation3 + $0x28] sm:$0xff] %vm560_vm0, %v2396_v20 }
 0x4f4   : > { %v2326_v25 = vpop.xlane.xlu0 %2325 }
 0x4f5   : > { %v2398_v43 = vadd.f32 %v2326_v25, %v2206_v30  ;;  %v2194_v30 = vld [vmem:[#allocation3 + $0x98] sm:$0xff]  ;;  %v2181_v25 = vld [vmem:[#allocation3 + $0x30] sm:$0xff] }
 0x4f6   : > { %v3136_v58 = vld [vmem:[#allocation3 + $0x18] sm:$0xff]  ;;  %v2205_v28 = vmul.f32 %v8432_v10, %v2181_v25 }
 0x4f7   : > { %4827 = vrcp.f32 %v3136_v58  ;;  %2423 = vst.msk [vmem:[#allocation3 + $0x38] sm:$0xff] %vm560_vm0, %v2398_v43 }
 0x4f8   : > { %v2334_v29 = vpop.xlane.xlu0 %2333 }
 0x4f9   : > { %v4826_v16 = vpop.eup %4825  ;;  %v2400_v55 = vadd.f32 %v2334_v29, %v2208_v22  ;;  %v2218_v29 = vmul.f32 %v7580_v9, %v2194_v30 }
 0x4fa   : > { %v3138_v45 = vld [vmem:[#allocation3 + $0x28] sm:$0xff]  ;;  %3212 = vperm.xlu0 %4680, %v4826_v16  }
 0x4fb   : > { %4829 = vrcp.f32 %v3138_v45  ;;  %2425 = vst.msk [vmem:[#allocation3 + $0x48] sm:$0xff] %vm560_vm0, %v2400_v55  ;;  %v2196_v55 = vld [vmem:[#allocation3 + $0xa8] sm:$0xff] }
 0x4fc   : > { %v2342_v37 = vpop.xlane.xlu0 %2341 }
 0x4fd   : > { %v2402_v6 = vadd.f32 %v2342_v37, %v2210_v51 }
 0x4fe   : > { %v3140_v44 = vld [vmem:[#allocation3 + $0x38] sm:$0xff] }
 0x4ff   : > { %4831 = vrcp.f32 %v3140_v44  ;;  %2427 = vst.msk [vmem:[#allocation3 + $0x58] sm:$0xff] %vm560_vm0, %v2402_v6 }
 0x500   : > { %v2350_v38 = vpop.xlane.xlu0 %2349 }
 0x501   : > { %v4828_v7 = vpop.eup %4827  ;;  %v2404_v19 = vadd.f32 %v2350_v38, %v2212_v8  ;;  %v2220_v8 = vmul.f32 %v7593_v31, %v2196_v55 }
 0x502   : > { %v3142_v17 = vld [vmem:[#allocation3 + $0x48] sm:$0xff]  ;;  %3222 = vperm.xlu0 %4680, %v4828_v7  }
 0x503   : > { %4833 = vrcp.f32 %v3142_v17  ;;  %2429 = vst.msk [vmem:[#allocation3 + $0x68] sm:$0xff] %vm560_vm0, %v2404_v19  ;;  %v3135_v19 = vld [vmem:[#allocation3 + $0x10] sm:$0xff] }
 0x504   : > { %v2358_v54 = vpop.xlane.xlu0 %2357  ;;  %v2298_v47 = vpop.xlane.xlu1 %2297 }
 0x505   : > { %v4830_v21 = vpop.eup %4829  ;;  %v2406_v60 = vadd.f32 %v2358_v54, %v2214_v56  ;;  %v2391_v33 = vadd.f32 %v2298_v47, %v2199_v2  ;;  %v2185_v54 = vld [vmem:[#allocation3 + $0x50] sm:$0xff] }
 0x506   : > { %v3144_v40 = vld [vmem:[#allocation3 + $0x58] sm:$0xff]  ;;  %3232 = vperm.xlu0 %4680, %v4830_v21  }
 0x507   : > { %4835 = vrcp.f32 %v3144_v40  ;;  %2431 = vst.msk [vmem:[#allocation3 + $0x78] sm:$0xff] %vm560_vm0, %v2406_v60  ;;  %2416 = vst.msk [vmem:[#allocation3] sm:$0xff] %vm560_vm0, %v2391_v33  ;;  %v2209_v33 = vmul.f32 %v7315_v62, %v2185_v54 }
 0x508   : > { %v2366_v20 = vpop.xlane.xlu0 %2365  ;;  %v2314_v4 = vpop.xlane.xlu1 %2313 }
 0x509   : > { %v4832_v23 = vpop.eup %4831  ;;  %v2408_v43 = vadd.f32 %v2366_v20, %v2216_v27  ;;  %v2395_v58 = vadd.f32 %v2314_v4, %v2203_v50  ;;  %v2187_v20 = vld [vmem:[#allocation3 + $0x60] sm:$0xff] }
 0x50a   : > { %v3146_v22 = vld [vmem:[#allocation3 + $0x68] sm:$0xff]  ;;  %3242 = vperm.xlu0 %4680, %v4832_v23  }
 0x50b   : > { %4837 = vrcp.f32 %v3146_v22  ;;  %2433 = vst.msk [vmem:[#allocation3 + $0x88] sm:$0xff] %vm560_vm0, %v2408_v43  ;;  %2420 = vst.msk [vmem:[#allocation3 + $0x20] sm:$0xff] %vm560_vm0, %v2395_v58  ;;  %v2211_v58 = vmul.f32 %v7321_v57, %v2187_v20 }
 0x50c   : > { %v2374_v16 = vpop.xlane.xlu0 %2373  ;;  %v2322_v49 = vpop.xlane.xlu1 %2321 }
 0x50d   : > { %v4834_v45 = vpop.eup %4833  ;;  %v2410_v51 = vadd.f32 %v2374_v16, %v2218_v29  ;;  %v2397_v37 = vadd.f32 %v2322_v49, %v2205_v28  ;;  %v2588_v29 = vmul.f32 0.0, %v7573_v11  ;;  %v2189_v49 = vld [vmem:[#allocation3 + $0x70] sm:$0xff] }
 0x50e   : > { %v3148_v6 = vld [vmem:[#allocation3 + $0x78] sm:$0xff]  ;;  %v3133_v44 = vld [vmem:[#allocation3] sm:$0xff]  ;;  %3252 = vperm.xlu0 %4680, %v4834_v45   ;;  %v2589_v45 = vmul.f32 0.0, %v7523_v53  ;;  %v2590_v53 = vmul.f32 0.0, %v7595_v32 }
 0x50f   : > { %4839 = vrcp.f32 %v3148_v6  ;;  %2435 = vst.msk [vmem:[#allocation3 + $0x98] sm:$0xff] %vm560_vm0, %v2410_v51  ;;  %2422 = vst.msk [vmem:[#allocation3 + $0x30] sm:$0xff] %vm560_vm0, %v2397_v37 }
 0x510   : > { %4841 = vrcp.f32 %v3133_v44  ;;  %v4134_v9 = vpop.f32.mrb[32].mxu1  ;;  %v2382_v38 = vpop.xlane.xlu0 %2381 }
 0x511   : > { %v4836_v7 = vpop.eup %4835  ;;  %v2412_v17 = vadd.f32 %v2382_v38, %v2220_v8  ;;  %v2330_v56 = vpop.xlane.xlu1 %2329  ;;  %v2213_v38 = vmul.f32 %v7327_v52, %v2189_v49 }
 0x512   : > { %v4135_v2 = vpop.f32.mrb[33].mxu1  ;;  %v3150_v47 = vld [vmem:[#allocation3 + $0x88] sm:$0xff]  ;;  %v2399_v59 = vadd.f32 %v2330_v56, %v2207_v63  ;;  %3262 = vperm.xlu0 %4680, %v4836_v7   ;;  %v3137_v27 = vld [vmem:[#allocation3 + $0x20] sm:$0xff] }
 0x513   : > { %v4136_v12 = vadd.f32 %v4135_v2, %v4134_v9  ;;  %v4137_v21 = vpop.f32.mrb[34].mxu1  ;;  %4843 = vrcp.f32 %v3150_v47  ;;  %2437 = vst.msk [vmem:[#allocation3 + $0xa8] sm:$0xff] %vm560_vm0, %v2412_v17  ;;  %v2191_v56 = vld [vmem:[#allocation3 + $0x80] sm:$0xff] }
 0x514   : > { %v4138_v31 = vpop.f32.mrb[35].mxu1  ;;  %4845 = vrcp.f32 %v3135_v19  ;;  %2424 = vst.msk [vmem:[#allocation3 + $0x40] sm:$0xff] %vm560_vm0, %v2399_v59  ;;  %v2591_v59 = vmul.f32 0.0, %v7531_v18  ;;  %v2215_v32 = vmul.f32 %v7550_v35, %v2191_v56 }
 0x515   : > { %v4139_v60 = vadd.f32 %v4138_v31, %v4137_v21  ;;  %v4838_v40 = vpop.eup %4837  ;;  %v2338_v50 = vpop.xlane.xlu1 %2337 }
 0x516   : > { %v3152_v4 = vld [vmem:[#allocation3 + $0x98] sm:$0xff]  ;;  %v2401_v30 = vadd.f32 %v2338_v50, %v2209_v33  ;;  %3272 = vperm.xlu0 %4680, %v4838_v40   ;;  %v3139_v62 = vld [vmem:[#allocation3 + $0x30] sm:$0xff] }
 0x517   : > { %4847 = vrcp.f32 %v3152_v4  ;;  %v4276_v25 = vpop.f32.mrb[52].mxu0 }
 0x518   : > { %4849 = vrcp.f32 %v3137_v27  ;;  %2426 = vst.msk [vmem:[#allocation3 + $0x50] sm:$0xff] %vm560_vm0, %v2401_v30  ;;  %v2979_v23 = vpop.f32.mrb[53].mxu0  ;;  %v4140_v43 = vpop.f32.mrb[36].mxu1  ;;  %v2193_v27 = vld [vmem:[#allocation3 + $0x90] sm:$0xff] }
 0x519   : > { %v4840_v22 = vpop.eup %4839  ;;  %v2980_v10 = vadd.f32 %v4136_v12, %v2979_v23  ;;  %v4277_v28 = vpop.f32.mrb[54].mxu0  ;;  %v2217_v35 = vmul.f32 %v7558_v0, %v2193_v27 }
 0x51a   : > { %v2346_v16 = vpop.xlane.xlu1 %2345  ;;  %v4842_v55 = vpop.eup %4841  ;;  %v3154_v51 = vld [vmem:[#allocation3 + $0xa8] sm:$0xff]  ;;  %3282 = vperm.xlu0 %4680, %v4840_v22  }
 0x51b   : > { %v2403_v37 = vadd.f32 %v2346_v16, %v2211_v58  ;;  %v4141_v13 = vpop.f32.mrb[37].mxu1  ;;  %v2982_v6 = vpop.f32.mrb[55].mxu0  ;;  %4851 = vrcp.f32 %v3154_v51  ;;  %3207 = vperm.xlu1 %4679, %v4842_v55   ;;  %v7645_v9 = vadd.f32 %v2980_v10, %v2588_v29  ;;  %v3141_v63 = vld [vmem:[#allocation3 + $0x40] sm:$0xff]  ;;  %v2592_v16 = vmul.f32 0.0, %v7605_v41 }
 0x51c   : > { %v4142_v44 = vadd.f32 %v4141_v13, %v4140_v43  ;;  %v2983_v8 = vadd.f32 %v4139_v60, %v2982_v6  ;;  %v4143_v57 = vpop.f32.mrb[38].mxu1  ;;  %4853 = vrcp.f32 %v3139_v62  ;;  %v2195_v58 = vld [vmem:[#allocation3 + $0xa0] sm:$0xff]  ;;  %v2593_v13 = vmul.f32 0.0, %v7542_v3 }
 0x51d   : > { %2428 = vst.msk [vmem:[#allocation3 + $0x60] sm:$0xff] %vm560_vm0, %v2403_v37  ;;  %v4144_v11 = vpop.f32.mrb[39].mxu1  ;;  %v4844_v14 = vpop.eup %4843  ;;  %4855 = vrcp.f32 %v3141_v63  ;;  %v2219_v37 = vmul.f32 %v7567_v39, %v2195_v58  ;;  %v2594_v3 = vmul.f32 0.0, %v7611_v15  ;;  %v2597_v58 = vmul.f32 0.0, %v7571_v1 }
 0x51e   : > { %v2988_v7 = vadd.f32 %v4276_v25, %v4142_v44  ;;  %v4145_v19 = vadd.f32 %v4144_v11, %v4143_v57  ;;  %v2354_v17 = vpop.xlane.xlu1 %2353  ;;  %v7650_v2 = vadd.f32 %v2983_v8, %v2589_v45  ;;  %v4846_v54 = vpop.eup %4845  ;;  %3292 = vperm.xlu0 %4680, %v4844_v14  }
 0x51f   : > { %v2405_v47 = vadd.f32 %v2354_v17, %v2213_v38  ;;  %3217 = vperm.xlu1 %4679, %v4846_v54   ;;  %v3143_v60 = vld [vmem:[#allocation3 + $0x50] sm:$0xff] }
 0x520   : > { %v2991_v12 = vadd.f32 %v4277_v28, %v4145_v19  ;;  %v7653_v21 = vadd.f32 %v2988_v7, %v2590_v53  ;;  %v4146_v52 = vpop.f32.mrb[40].mxu1  ;;  %4857 = vrcp.f32 %v3143_v60 }
 0x521   : > { %2430 = vst.msk [vmem:[#allocation3 + $0x70] sm:$0xff] %vm560_vm0, %v2405_v47  ;;  %v4848_v31 = vpop.eup %4847  ;;  %v4147_v40 = vpop.f32.mrb[41].mxu1  ;;  %v2595_v47 = vmul.f32 0.0, %v7553_v26  ;;  %v2596_v26 = vmul.f32 0.0, %v7615_v36 }
 0x522   : > { %v2362_v33 = vpop.xlane.xlu1 %2361  ;;  %v7657_v50 = vadd.f32 %v2991_v12, %v2591_v59  ;;  %v4850_v20 = vpop.eup %4849  ;;  %v4148_v18 = vadd.f32 %v4147_v40, %v4146_v52  ;;  %3302 = vperm.xlu0 %4680, %v4848_v31  }
 0x523   : > { %v2407_v4 = vadd.f32 %v2362_v33, %v2215_v32  ;;  %v4149_v30 = vpop.f32.mrb[42].mxu1  ;;  %3227 = vperm.xlu1 %4679, %v4850_v20  }
 0x524   : > { %v4150_v25 = vpop.f32.mrb[43].mxu1  ;;  %v4280_v43 = vpop.f32.mrb[56].mxu0  ;;  %v3145_v29 = vld [vmem:[#allocation3 + $0x60] sm:$0xff] }
 0x525   : > { %2432 = vst.msk [vmem:[#allocation3 + $0x80] sm:$0xff] %vm560_vm0, %v2407_v4  ;;  %v4151_v23 = vadd.f32 %v4150_v25, %v4149_v30  ;;  %v4852_v22 = vpop.eup %4851  ;;  %v2995_v62 = vpop.f32.mrb[57].mxu0  ;;  %4859 = vrcp.f32 %v3145_v29 }
 0x526   : > { %v2370_v10 = vpop.xlane.xlu1 %2369  ;;  %v4854_v28 = vpop.eup %4853  ;;  %v2996_v49 = vadd.f32 %v4148_v18, %v2995_v62  ;;  %3312 = vperm.xlu0 %4680, %v4852_v22  }
 0x527   : > { %v2409_v55 = vadd.f32 %v2370_v10, %v2217_v35  ;;  %v4281_v45 = vpop.f32.mrb[58].mxu0  ;;  %3237 = vperm.xlu1 %4679, %v4854_v28   ;;  %v4856_v11 = vpop.eup %4855 }
 0x528   : > { %v2998_v51 = vpop.f32.mrb[59].mxu0  ;;  %v4152_v6 = vpop.f32.mrb[44].mxu1  ;;  %v7665_v44 = vadd.f32 %v2996_v49, %v2592_v16  ;;  %v3147_v8 = vld [vmem:[#allocation3 + $0x70] sm:$0xff] }
 0x529   : > { %2434 = vst.msk [vmem:[#allocation3 + $0x90] sm:$0xff] %vm560_vm0, %v2409_v55  ;;  %v2999_v0 = vadd.f32 %v4151_v23, %v2998_v51  ;;  %v4153_v41 = vpop.f32.mrb[45].mxu1  ;;  %4861 = vrcp.f32 %v3147_v8 }
 0x52a   : > { %v2378_v57 = vpop.xlane.xlu1 %2377  ;;  %v4154_v14 = vadd.f32 %v4153_v41, %v4152_v6  ;;  %v4155_v53 = vpop.f32.mrb[46].mxu1 }
 0x52b   : > { %v2411_v38 = vadd.f32 %v2378_v57, %v2219_v37  ;;  %v7667_v63 = vadd.f32 %v2999_v0, %v2593_v13  ;;  %3247 = vperm.xlu1 %4679, %v4856_v11   ;;  %v4156_v39 = vpop.f32.mrb[47].mxu1  ;;  %v4858_v54 = vpop.eup %4857  ;;  %v2598_v13 = vmul.f32 0.0, %v7621_v46 }
 0x52c   : > { %v3004_v7 = vadd.f32 %v4280_v43, %v4154_v14  ;;  %v4157_v19 = vadd.f32 %v4156_v39, %v4155_v53  ;;  %v3149_v17 = vld [vmem:[#allocation3 + $0x80] sm:$0xff] }
 0x52d   : > { %2436 = vst.msk [vmem:[#allocation3 + $0xa0] sm:$0xff] %vm560_vm0, %v2411_v38  ;;  %4863 = vrcp.f32 %v3149_v17 }
 0x52e   : > { %v4284_v56 = vpop.f32.mrb[60].mxu0  ;;  %v3007_v59 = vadd.f32 %v4281_v45, %v4157_v19  ;;  %v7672_v52 = vadd.f32 %v3004_v7, %v2594_v3 }
 0x52f   : > { %v3011_v12 = vpop.f32.mrb[61].mxu0  ;;  %3257 = vperm.xlu1 %4679, %v4858_v54   ;;  %v4860_v27 = vpop.eup %4859 }
 0x530   : > { %v4285_v32 = vpop.f32.mrb[62].mxu0  ;;  %v4158_v60 = vpop.f32.mrb[48].mxu1  ;;  %v7674_v15 = vadd.f32 %v3007_v59, %v2595_v47  ;;  %v3151_v33 = vld [vmem:[#allocation3 + $0x90] sm:$0xff] }
 0x531   : > { %v3014_v31 = vpop.f32.mrb[63].mxu0  ;;  %v4159_v40 = vpop.f32.mrb[49].mxu1  ;;  %4865 = vrcp.f32 %v3151_v33  ;;  %v2197_v33 = vld [vmem:[#allocation3 + $0xb0] sm:$0xff] }
 0x532   : > { %v4160_v20 = vadd.f32 %v4159_v40, %v4158_v60  ;;  %v4161_v4 = vpop.f32.mrb[50].mxu1  ;;  %v2198_v60 = vld [vmem:[#allocation3 + $0xb8] sm:$0xff] }
 0x533   : > { %3267 = vperm.xlu1 %4679, %v4860_v27   ;;  %v4162_v18 = vpop.f32.mrb[51].mxu1  ;;  %v4862_v35 = vpop.eup %4861 }
 0x534   : > { %v3012_v30 = vadd.f32 %v4160_v20, %v3011_v12  ;;  %v4163_v25 = vadd.f32 %v4162_v18, %v4161_v4  ;;  %v3153_v23 = vld [vmem:[#allocation3 + $0xa0] sm:$0xff]  ;;  %v2222_v18 = vmul.f32 %v7602_v34, %v2198_v60 }
 0x535   : > { %4867 = vrcp.f32 %v3153_v23 }
 0x536   : > { %v3015_v22 = vadd.f32 %v4163_v25, %v3014_v31  ;;  %v7678_v62 = vadd.f32 %v3012_v30, %v2596_v26  ;;  %v2221_v26 = vmul.f32 %v7577_v24, %v2197_v33 }
 0x537   : > { %v4288_v43 = vpop.f32.mrb[64].mxu0  ;;  %3277 = vperm.xlu1 %4679, %v4862_v35   ;;  %v4864_v55 = vpop.eup %4863 }
 0x538   : > { %v3027_v29 = vpop.f32.mrb[65].mxu0  ;;  %v4164_v16 = vpop.f32.mrb[52].mxu1  ;;  %v7680_v49 = vadd.f32 %v3015_v22, %v2597_v58 }
 0x539   : > { %v4289_v10 = vpop.f32.mrb[66].mxu0  ;;  %v4165_v36 = vpop.f32.mrb[53].mxu1 }
 0x53a   : > { %v3030_v28 = vpop.f32.mrb[67].mxu0  ;;  %v4166_v45 = vadd.f32 %v4165_v36, %v4164_v16  ;;  %v4167_v51 = vpop.f32.mrb[54].mxu1 }
 0x53b   : > { %3287 = vperm.xlu1 %4679, %v4864_v55   ;;  %v4168_v37 = vpop.f32.mrb[55].mxu1  ;;  %v4866_v6 = vpop.eup %4865 }
 0x53c   : > { %v3020_v1 = vadd.f32 %v4284_v56, %v4166_v45  ;;  %v4169_v0 = vadd.f32 %v4168_v37, %v4167_v51 }
 0x53e   : > { %v7683_v8 = vadd.f32 %v4285_v32, %v4169_v0  ;;  %v7685_v57 = vadd.f32 %v3020_v1, %v2598_v13 }
 0x53f   : > { %3297 = vperm.xlu1 %4679, %v4866_v6   ;;  %v4868_v38 = vpop.eup %4867 }
 0x540   : > { %v4170_v41 = vpop.f32.mrb[56].mxu1 }
 0x541   : > { %v4171_v11 = vpop.f32.mrb[57].mxu1 }
 0x542   : > { %v4172_v14 = vadd.f32 %v4171_v11, %v4170_v41  ;;  %v4173_v53 = vpop.f32.mrb[58].mxu1 }
 0x543   : > { %3307 = vperm.xlu1 %4679, %v4868_v38   ;;  %v4174_v39 = vpop.f32.mrb[59].mxu1 }
 0x544   : > { %v7687_v3 = vadd.f32 %v4172_v14, %v3027_v29  ;;  %v4175_v7 = vadd.f32 %v4174_v39, %v4173_v53 }
 0x546   : > { %v7689_v19 = vadd.f32 %v4175_v7, %v3030_v28 }
 0x548   : > { %v4176_v46 = vpop.f32.mrb[60].mxu1 }
 0x549   : > { %v4177_v17 = vpop.f32.mrb[61].mxu1 }
 0x54a   : > { %v4178_v56 = vadd.f32 %v4177_v17, %v4176_v46  ;;  %v4179_v54 = vpop.f32.mrb[62].mxu1 }
 0x54b   : > { %v4180_v47 = vpop.f32.mrb[63].mxu1 }
 0x54c   : > { %v7691_v59 = vadd.f32 %v4288_v43, %v4178_v56  ;;  %v4181_v12 = vadd.f32 %v4180_v47, %v4179_v54 }
 0x54e   : > { %v7693_v32 = vadd.f32 %v4289_v10, %v4181_v12 }
 0x550   : > { %v4182_v31 = vpop.f32.mrb[64].mxu1 }
 0x551   : > { %v4183_v40 = vpop.f32.mrb[65].mxu1 }
 0x552   : > { %v4184_v27 = vadd.f32 %v4183_v40, %v4182_v31  ;;  %v4185_v20 = vpop.f32.mrb[66].mxu1 }
 0x553   : > { %v4186_v4 = vpop.f32.mrb[67].mxu1 }
 0x554   : > { %v4187_v30 = vadd.f32 %v4186_v4, %v4185_v20  ;;  %v2390_v25 = vpop.xlane.xlu0 %2389  ;;  %v2386_v23 = vpop.xlane.xlu1 %2385 }
 0x555   : > { %v2414_v35 = vadd.f32 %v2390_v25, %v2222_v18  ;;  %v2413_v43 = vadd.f32 %v2386_v23, %v2221_v26 }
 0x557   : > { %2439 = vst.msk [vmem:[#allocation3 + $0xb8] sm:$0xff] %vm560_vm0, %v2414_v35  ;;  %2438 = vst.msk [vmem:[#allocation3 + $0xb0] sm:$0xff] %vm560_vm0, %v2413_v43 }
 0x558   : > { %v7707_v36 = vpop.permute.xlu1 %2546 }
 0x55c   : > { %v7699_v28 = vpop.permute.xlu0 %2541  ;;  %v7709_v51 = vpop.permute.xlu1 %2556 }
 0x55e   : > { %v3156_v58 = vld [vmem:[#allocation3 + $0xb8] sm:$0xff]  ;;  %v3155_v22 = vld [vmem:[#allocation3 + $0xb0] sm:$0xff] }
 0x55f   : > { %4869 = vrcp.f32 %v3156_v58 }
 0x560   : > { %4871 = vrcp.f32 %v3155_v22  ;;  %v7701_v24 = vpop.permute.xlu0 %2551  ;;  %v7711_v13 = vpop.permute.xlu1 %2566 }
 0x564   : > { %v7703_v34 = vpop.permute.xlu0 %2561  ;;  %v2577_v0 = vpop.permute.xlu1 %2576 }
 0x565   : > { %v2606_v47 = vmul.f32 0.0, %v2577_v0 }
 0x568   : > { %v7705_v16 = vpop.permute.xlu0 %2571 }
 0x569   : > { %v4870_v29 = vpop.eup %4869 }
 0x56a   : > { %v4872_v10 = vpop.eup %4871  ;;  %3322 = vperm.xlu0 %4680, %v4870_v29  }
 0x56b   : > { %3317 = vperm.xlu1 %4679, %v4872_v10  }
 0x56c   : > { %v2582_v55 = vpop.permute.xlu0 %2581 }
 0x56d   : > { %v2607_v20 = vmul.f32 0.0, %v2582_v55 }
 0x579   : > { %v3213_v45 = vpop.permute.xlu0 %3212 }
 0x57a   : > { %v3326_v33 = vmul.f32 %v3213_v45, %v7589_v42 }
 0x581   : > { %v3223_v37 = vpop.permute.xlu0 %3222 }
 0x585   : > { %v3233_v1 = vpop.permute.xlu0 %3232 }
 0x586   : > { %v3330_v58 = vmul.f32 %v3233_v1, %v7650_v2 }
 0x589   : > { %v3243_v11 = vpop.permute.xlu0 %3242 }
 0x58a   : > { %v3332_v10 = vmul.f32 %v3243_v11, %v7657_v50 }
 0x595   : > { %v4292_v6 = vpop.f32.mrb[68].mxu0  ;;  %v4188_v41 = vpop.f32.mrb[68].mxu1 }
 0x596   : > { %v3043_v38 = vpop.f32.mrb[69].mxu0  ;;  %v4189_v53 = vpop.f32.mrb[69].mxu1 }
 0x597   : > { %v7713_v14 = vadd.f32 %v4184_v27, %v3043_v38  ;;  %v4293_v39 = vpop.f32.mrb[70].mxu0  ;;  %v4190_v7 = vadd.f32 %v4189_v53, %v4188_v41  ;;  %v4191_v46 = vpop.f32.mrb[70].mxu1 }
 0x598   : > { %v3046_v17 = vpop.f32.mrb[71].mxu0  ;;  %v4192_v54 = vpop.f32.mrb[71].mxu1 }
 0x599   : > { %v7715_v56 = vadd.f32 %v4187_v30, %v3046_v17  ;;  %v3052_v12 = vadd.f32 %v4292_v6, %v4190_v7  ;;  %v4193_v31 = vadd.f32 %v4192_v54, %v4191_v46  ;;  %v3253_v27 = vpop.permute.xlu0 %3252  ;;  %v3328_v30 = vmul.f32 %v3223_v37, %v7598_v61 }
 0x59a   : > { %v3208_v60 = vpop.permute.xlu1 %3207  ;;  %v3334_v0 = vmul.f32 %v3253_v27, %v7667_v63  ;;  %v2601_v7 = vmul.f32 0.0, %v7701_v24 }
 0x59b   : > { %v3325_v40 = vmul.f32 %v3208_v60, %v7585_v48  ;;  %v3055_v4 = vadd.f32 %v4293_v39, %v4193_v31  ;;  %v7719_v18 = vadd.f32 %v3052_v12, %v2606_v47 }
 0x59d   : > { %v3944_v26 = vpack.c.bf16 %v3326_v33, %v3325_v40  ;;  %v7721_v23 = vadd.f32 %v3055_v4, %v2607_v20  ;;  %v3263_v35 = vpop.permute.xlu0 %3262 }
 0x59e   : > { %v3218_v25 = vpop.permute.xlu1 %3217  ;;  %v3336_v41 = vmul.f32 %v3263_v35, %v7674_v15 }
 0x59f   : > { %3945 = vst [vmem:[%s7725_s0] sm:$0xff] %v3944_v26   ;;  %v3327_v42 = vmul.f32 %v3218_v25, %v7591_v5 }
 0x5a1   : > { %v3949_v48 = vpack.c.bf16 %v3328_v30, %v3327_v42  ;;  %v3273_v45 = vpop.permute.xlu0 %3272 }
 0x5a2   : > { %v3228_v43 = vpop.permute.xlu1 %3227  ;;  %v3338_v53 = vmul.f32 %v3273_v45, %v7680_v49  ;;  %v2602_v49 = vmul.f32 0.0, %v7709_v51  ;;  %v2604_v51 = vmul.f32 0.0, %v7711_v13 }
 0x5a3   : > { %4035 = vst [vmem:[%s7725_s0 + $0x8] sm:$0xff] %v3949_v48   ;;  %v3329_v22 = vmul.f32 %v3228_v43, %v7645_v9 }
 0x5a4   : > { %v3078_v4 = vadd.f32 %v7713_v14, %v2604_v51 }
 0x5a5   : > { %v3954_v29 = vpack.c.bf16 %v3330_v58, %v3329_v22  ;;  %v3283_v6 = vpop.permute.xlu0 %3282 }
 0x5a6   : > { %v3238_v61 = vpop.permute.xlu1 %3237 }
 0x5a7   : > { %4036 = vst [vmem:[%s7725_s0 + $0x10] sm:$0xff] %v3954_v29   ;;  %v3331_v55 = vmul.f32 %v3238_v61, %v7653_v21  ;;  %v2599_v21 = vmul.f32 0.0, %v7699_v28 }
 0x5a9   : > { %v3959_v5 = vpack.c.bf16 %v3332_v10, %v3331_v55  ;;  %v3293_v39 = vpop.permute.xlu0 %3292  ;;  %v3073_v15 = vadd.f32 %v7683_v8, %v2599_v21 }
 0x5aa   : > { %v3248_v37 = vpop.permute.xlu1 %3247 }
 0x5ab   : > { %4037 = vst [vmem:[%s7725_s0 + $0x18] sm:$0xff] %v3959_v5   ;;  %v3333_v2 = vmul.f32 %v3248_v37, %v7665_v44  ;;  %v2600_v44 = vmul.f32 0.0, %v7707_v36  ;;  %v3075_v36 = vadd.f32 %v7689_v19, %v2601_v7  ;;  %v2605_v19 = vmul.f32 0.0, %v7705_v16 }
 0x5ad   : > { %v3964_v1 = vpack.c.bf16 %v3334_v0, %v3333_v2  ;;  %v3074_v54 = vadd.f32 %v7687_v3, %v2600_v44  ;;  %v3303_v12 = vpop.permute.xlu0 %3302  ;;  %v3342_v31 = vmul.f32 %v3293_v39, %v3075_v36  ;;  %v3079_v27 = vadd.f32 %v7715_v56, %v2605_v19 }
 0x5ae   : > { %v3258_v9 = vpop.permute.xlu1 %3257 }
 0x5af   : > { %4038 = vst [vmem:[%s7725_s0 + $0x20] sm:$0xff] %v3964_v1   ;;  %v3335_v50 = vmul.f32 %v3258_v9, %v7672_v52  ;;  %v3340_v52 = vmul.f32 %v3283_v6, %v3073_v15 }
 0x5b1   : > { %v3969_v11 = vpack.c.bf16 %v3336_v41, %v3335_v50  ;;  %v3313_v20 = vpop.permute.xlu0 %3312 }
 0x5b2   : > { %v3268_v38 = vpop.permute.xlu1 %3267  ;;  %v3346_v26 = vmul.f32 %v3313_v20, %v3079_v27 }
 0x5b3   : > { %4039 = vst [vmem:[%s7725_s0 + $0x28] sm:$0xff] %v3969_v11   ;;  %v3337_v63 = vmul.f32 %v3268_v38, %v7678_v62  ;;  %v2603_v62 = vmul.f32 0.0, %v7703_v34 }
 0x5b5   : > { %v3974_v46 = vpack.c.bf16 %v3338_v53, %v3337_v63  ;;  %v3077_v60 = vadd.f32 %v7693_v32, %v2603_v62 }
 0x5b6   : > { %v3278_v17 = vpop.permute.xlu1 %3277 }
 0x5b7   : > { %4040 = vst [vmem:[%s7725_s0 + $0x30] sm:$0xff] %v3974_v46   ;;  %v3339_v28 = vmul.f32 %v3278_v17, %v7685_v57  ;;  %v3076_v57 = vadd.f32 %v7691_v59, %v2602_v49  ;;  %v3344_v34 = vmul.f32 %v3303_v12, %v3077_v60 }
 0x5b9   : > { %v3979_v47 = vpack.c.bf16 %v3340_v52, %v3339_v28 }
 0x5ba   : > { %v3288_v24 = vpop.permute.xlu1 %3287 }
 0x5bb   : > { %4041 = vst [vmem:[%s7725_s0 + $0x38] sm:$0xff] %v3979_v47   ;;  %v3341_v8 = vmul.f32 %v3288_v24, %v3074_v54 }
 0x5bd   : > { %v3984_v33 = vpack.c.bf16 %v3342_v31, %v3341_v8 }
 0x5be   : > { %v3298_v3 = vpop.permute.xlu1 %3297 }
 0x5bf   : > { %4042 = vst [vmem:[%s7725_s0 + $0x40] sm:$0xff] %v3984_v33   ;;  %v3343_v40 = vmul.f32 %v3298_v3, %v3076_v57 }
 0x5c1   : > { %v3989_v32 = vpack.c.bf16 %v3344_v34, %v3343_v40 }
 0x5c2   : > { %v3308_v59 = vpop.permute.xlu1 %3307 }
 0x5c3   : > { %4043 = vst [vmem:[%s7725_s0 + $0x48] sm:$0xff] %v3989_v32   ;;  %v3345_v25 = vmul.f32 %v3308_v59, %v3078_v4 }
 0x5c5   : > { %v3994_v13 = vpack.c.bf16 %v3346_v26, %v3345_v25 }
 0x5c7   : > { %4044 = vst [vmem:[%s7725_s0 + $0x50] sm:$0xff] %v3994_v13  }
 0x5e9   : > { %v3323_v16 = vpop.permute.xlu0 %3322 }
 0x5ea   : > { %v3348_v56 = vmul.f32 %v3323_v16, %v7721_v23  ;;  %v3318_v30 = vpop.permute.xlu1 %3317 }
 0x5eb   : > { %v3347_v14 = vmul.f32 %v3318_v30, %v7719_v18 }
 0x5ed   : > { %v3999_v42 = vpack.c.bf16 %v3348_v56, %v3347_v14 }
 0x5ef   : > { %4045 = vst [vmem:[%s7725_s0 + $0x58] sm:$0xff] %v3999_v42  }
 0x5f0   : > { %5092 = shalt.err (!%p5089_p5)
}
 0x5f1   : > { %s5093_s7 = scalar_lea.hbm %s7775_s27, 1536  ;;  %s5097_s13 = scalar_lea.hbm %s8437_s23, 12288 }
 0x5f2   : > { %p5094_p10 = scmp.ne.s32.totalorder %s7775_s27, %s5093_s7  ;;  %p5098_p12 = scmp.lt.u32.totalorder %s7775_s27, %s8437_s23 }
 0x5f3   : > { %p5099_p2 = scmp.lt.u32.totalorder %s5097_s13, %s5093_s7  ;;  %p5101_p13 = scmp.lt.u32.totalorder %s5093_s7, %s7775_s27 }
 0x5f4   : > { %p5095_p4 = pnand %p5094_p10, %p8438_p6 }
 0x5f5   : > { %p5100_p3 = por %p5099_p2, %p5098_p12 }
 0x5f6   : > { %p5096_p8 = pneg %p5095_p4 }
 0x5f7   : > { %p5102_p11 = por %p5101_p13, %p5100_p3 }
 0x5f9   : > { %p5103_p9 = pnand %p5102_p11, %p5096_p8 }
 0x5fb   : > { %5106 = shalt.err (!%p5103_p9)
}
 0x5fc   : > { %s5283_s1 = smov 128   ;;  %s5284_s19 = smov 4  }
 0x5fd   : > { %4324 = dma.vmem_to_hbm [thread:$0]  (%p8438_p6), %s7770_s9, 1536, %s7775_s27, %s7780_s17, %s5278_s8, %s5283_s1, %s5284_s19  }
 0x5fe PF: > { %s8439_s12 = sld [smem:[#allocation26_spill]]  ;;  %s8440_s5 = sld [smem:[#allocation35_spill]] }
 0x5ff   : > { %p4358_p7 = scmp.ge.s32.totalorder %s5265_s16, 2 }
 0x604   : > { %s3502_s4 = sand.u32 1, %s8439_s12   ;;  %p8441_p0 = scmp.ne.s32.totalorder %s8440_s5, 0 }
 0x605   : > { %s3503_s3 = scalar_lea.sflag [#allocation8], %s3502_s4 }
 0x606   : > { %p4350_p1 = pnand %p4358_p7, %p8441_p0 }
 0x608   : > { %5200 = dma.done.wait (!%p4350_p1), %s3503_s3, 1536  }
 0x609   : > { %5202 = vsyncadd (!%p4350_p1), %s3503_s3, 4294965760  ;;  %s27_s16 = sadd.s32 1, %s5265_s16   ;;  %s8444_s30 = sld [smem:[#allocation27_spill]] }
 0x60a   : > { %p7810_p5 = scmp.ge.s32.totalorder %s27_s16, 10   ;;  %s8445_s8 = sld [smem:[#allocation28_spill]] }
 0x60b   : > { %s8446_s9 = sld [smem:[#allocation39_spill]]  ;;  %s8447_s10 = sld [smem:[#allocation32_spill]] }
 0x60c   : > { %s8448_s13 = sld [smem:[#allocation37_spill]]  ;;  %s8449_s17 = sld [smem:[#allocation38_spill]] }
 0x60d   : > { %s8450_s7 = sld [smem:[#allocation41_spill]]  ;;  %s8451_s24 = smov %s5209_s25 }
 0x60e   : > { %s8452_s25 = smov %s5213_s26  ;;  %s8453_s26 = smov %s5703_s21 }
 0x60f   : > { %s8454_s27 = smov %s5221_s28  ;;  %s8455_s28 = smov %s5225_s29 }
 0x610   : > { %s8456_s29 = smov %s5617_s20  ;;  %s8457_s11 = smov %s5257_s14 }
 0x611   : > { %s8458_s12 = smov %s5261_s15  ;;  %26 = sbr.rel (!%p7810_p5) target bundleno = 23 (0x17), region = 157 }
 0x612   : > { %s8459_s14 = smov %s8449_s17 }
 0x613   : > { %s8460_s15 = smov %s8450_s7 }
 0x618   :  { %3508 = vsyncpa [#allocation7], 1 }
 0x619   :  { %3510 = vsyncpa [#allocation7 + $0x1], 1 }
 0x61a   :  { %3511 = vsyncpa [#allocation10], 1 }
 0x61b   :  { %3513 = vsyncpa [#allocation10 + $0x1], 1 }
 0x61c   :  { %3514 = vsyncpa [#allocation13], 1 }
 0x61d   :  { %3515 = vsyncpa [#allocation8], 1 }
 0x61e   :  { %3517 = vsyncpa [#allocation8 + $0x1], 1 }

// kernel: hd_attention_forward.3
= control target key start
LH: loop header
LB: loop body
LE: loop exit
PB: predicated region body
PF: predicated region fallthrough
CT: control target
= control target key end

     0   :  { %s5865_s0 = inlined_call_operand.hbm [shape: s32[6], index: 0, kind: input, shape index: {}]   ;;  %s5866_s1 = inlined_call_operand.hbm [shape: bf16[768,256], index: 1, kind: input, shape index: {}]   ;;  %s5867_s2 = inlined_call_operand.hbm [shape: bf16[2,256,768], index: 2, kind: input, shape index: {}]   ;;  %s5868_s3 = inlined_call_operand.hbm [shape: f32[2,1,768], index: 3, kind: input, shape index: {}]   ;;  %s5869_s4 = inlined_call_operand.hbm [shape: f32[2,1,256], index: 4, kind: input, shape index: {}]   ;;  %s5870_s5 = inlined_call_operand.hbm [shape: f32[2,1,256], index: 5, kind: input, shape index: {}]   ;;  %s5871_s6 = inlined_call_operand.hbm [shape: bf16[768,256], index: 6, kind: output, shape index: {0}]   ;;  %s5872_s7 = inlined_call_operand.hbm [shape: bf16[768,256], index: 7, kind: output, shape index: {1}]   ;;  %s5873_s8 = inlined_call_operand.hbm [shape: bf16[768,256], index: 8, kind: output, shape index: {2}]  }
   0x1   :  { %5927 = sst [smem:[#allocation76_spill]] %s5866_s1  ;;  %s3912_s29 = scalar_lea.hbm %s5865_s0, 16 }
   0x2   :  { %5928 = sst [smem:[#allocation77_spill]] %s5867_s2  ;;  %p3913_p0 = scmp.ne.s32.totalorder %s5865_s0, %s3912_s29 }
   0x3   :  { %5929 = sst [smem:[#allocation78_spill]] %s5868_s3  ;;  %p3916_p1 = scmp.lt.u32.totalorder %s3912_s29, %s5865_s0 }
   0x4   :  { %5930 = sst [smem:[#allocation79_spill]] %s5869_s4 }
   0x5   :  { %5931 = sst [smem:[#allocation80_spill]] %s5870_s5  ;;  %p3918_p2 = pnand %p3916_p1, %p3913_p0 }
   0x6   :  { %5932 = sst [smem:[#allocation81_spill]] %s5871_s6 }
   0x7   :  { %5933 = sst [smem:[#allocation82_spill]] %s5872_s7 }
   0x8   :  { %5934 = sst [smem:[#allocation83_spill]] %s5873_s8 }
   0x9   :  { %3921 = shalt.err (!%p3918_p2)  }
   0xa   :  { %s4330_s12 = smov [#allocation4]  }
   0xb   :  { %15 = dma.hbm_to_smem %s5865_s0, 16, %s4330_s12, [#allocation3] }
   0xc   :  { %4228 = dma.done.wait [#allocation3], 16 }
   0xd   :  { %4229 = vsyncadd [#allocation3], 4294967280 }
   0xe   :  { %17 = sfence }
   0xf   :  { %18 = vsyncpa [#allocation6], 0 }
  0x10   :  { %20 = vsyncpa [#allocation6 + $0x1], 0 }
  0x11   :  { %21 = vsyncpa [#allocation9], 0 }
  0x12   :  { %23 = vsyncpa [#allocation9 + $0x1], 0 }
  0x13   :  { %24 = vsyncpa [#allocation12], 0 }
  0x14   :  { %26 = vsyncpa [#allocation12 + $0x1], 0 }
  0x15   :  { %27 = vsyncpa [#allocation7], 0 }
  0x16   :  { %29 = vsyncpa [#allocation7 + $0x1], 0 }
  0x17   :  { %30 = vsyncpa [#allocation16], 0 }
  0x18   :  { %32 = vsyncpa [#allocation16 + $0x1], 0  ;;  %s4402_s15 = smov 0   ;;  %s4404_s16 = smov 0  }
  0x19   :  { %s4406_s17 = smov 0   ;;  %s4408_s0 = smov 0  }
  0x1a   :  { %s4410_s18 = smov 0   ;;  %s4412_s19 = smov 0  }
  0x1b   :  { %s4414_s20 = smov 0   ;;  %s4416_s21 = smov 0  }
  0x1c   :  { %s4418_s22 = smov 0   ;;  %s4420_s23 = smov 0  }
  0x1d   :  { %s4422_s24 = smov 0   ;;  %s4424_s25 = smov 0  }
  0x1e   :  { %s4426_s26 = smov 0   ;;  %s4428_s27 = smov 0  }
  0x1f   :  { %s4430_s28 = smov 0   ;;  %s4432_s29 = smov 0  }
  0x20   :  { %s4434_s30 = smov 0   ;;  %s4436_s9 = smov 0  }
  0x21 LB: > { %5935 = sst [smem:[#allocation34_spill]] %s4260_s15  ;;  %s4491_s10 = sadd.s32 4294967295, %s4328_s9   ;;  %s4328_s9 = sphi %s4436_s9, %s38_s9   ;;  %s4324_s30 = sphi %s4434_s30, %s6092_s30   ;;  %s4320_s29 = sphi %s4432_s29, %s6091_s29   ;;  %s4316_s28 = sphi %s4430_s28, %s6080_s28   ;;  %s4312_s27 = sphi %s4428_s27, %s6090_s27   ;;  %s4308_s26 = sphi %s4426_s26, %s6089_s26   ;;  %s4304_s25 = sphi %s4424_s25, %s6078_s25   ;;  %s4300_s24 = sphi %s4422_s24, %s6077_s24   ;;  %s4296_s23 = sphi %s4420_s23, %s6088_s23   ;;  %s4292_s22 = sphi %s4418_s22, %s6087_s22   ;;  %s4288_s21 = sphi %s4416_s21, %s6086_s21   ;;  %s4284_s20 = sphi %s4414_s20, %s6085_s20   ;;  %s4280_s19 = sphi %s4412_s19, %s6073_s19   ;;  %s4276_s18 = sphi %s4410_s18, %s6084_s18   ;;  %s4272_s0 = sphi %s4408_s0, %s6083_s0   ;;  %s4268_s17 = sphi %s4406_s17, %s6081_s17   ;;  %s4264_s16 = sphi %s4404_s16, %s6071_s16   ;;  %s4260_s15 = sphi %s4402_s15, %s6070_s15  }
  0x22   : > { %5936 = sst [smem:[#allocation35_spill]] %s4264_s16  ;;  %s50_s11 = sadd.s32 1, %s4324_s30 }
  0x23   : > { %5937 = sst [smem:[#allocation36_spill]] %s4268_s17  ;;  %p52_p3 = scmp.ge.s32.totalorder %s50_s11, 6 }
  0x24   : > { %5938 = sst [smem:[#allocation37_spill]] %s4280_s19  ;;  %p5887_p4 = scmp.eq.s32.totalorder %s4328_s9, 0 }
  0x25   : > { %5939 = sst [smem:[#allocation38_spill]] %s4292_s22  ;;  %p5886_p5 = scmp.eq.s32.totalorder %s4491_s10, 0 }
  0x26   : > { %5940 = sst [smem:[#allocation39_spill]] %s4300_s24  ;;  %s6094_s11 = smov (%p52_p3, %s50_s11), 0 }
  0x27   : > { %5941 = sst [smem:[#allocation40_spill]] %s4304_s25  ;;  %s89_s13 = sadd.s32 1, %s4304_s25 }
  0x28   : > { %5942 = sst [smem:[#allocation41_spill]] %s4308_s26  ;;  %p96_p6 = scmp.ne.s32.totalorder %s4304_s25, %s4300_s24 }
  0x29   : > { %5943 = sst [smem:[#allocation42_spill]] %s4316_s28  ;;  %p102_p7 = scmp.ne.s32.totalorder %s4300_s24, %s4296_s23 }
  0x2a   : > { %5944 = sst [smem:[#allocation43_spill]] %s4320_s29  ;;  %p4506_p8 = por %p96_p6, %p5887_p4 }
  0x2b   : > { %s82_s12 = sld [smem:[#allocation4 + %s4324_s30]]  ;;  %p4512_p9 = por %p102_p7, %p5886_p5 }
  0x2c   : > { %s83_s14 = sld [smem:[#allocation4 + %s6094_s11]]  ;;  %p5885_p10 = scmp.lt.s32.totalorder %s4328_s9, 6 }
  0x2d   : > { %s5946_s8 = scalar_select %p4512_p9, 1, 0 }
  0x2e   : > { %s314_s29 = sand.u32 1, %s4304_s25   ;;  %p4537_p12 = pnand %p5885_p10, %p4506_p8 }
  0x2f   : > { %5947 = sst [smem:[#allocation44_spill]] %s5946_s8  ;;  %s3463_s23 = smul.u32 768, %s314_s29 }
  0x30   : > { %s3470_s24 = scalar_select %p4506_p8, [#allocation4], [#allocation18] }
  0x31   : > { %s316_s3 = scalar_lea.vmem [#allocation8], %s3463_s23  ;;  %p3192_p13 = scmp.ge.s32.totalorder %s4328_s9, 1 }
  0x32   : > { %s84_s5 = ssub.s32 %s82_s12, %s83_s14  ;;  %s327_s15 = sshll.u32 %s316_s3, 4  ;;  %s4531_s15 = int_to_ptr.vmem [resolvable:$true] %s327_s15 }
  0x33   : > { %p87_p11 = scmp.eq.s32.totalorder %s84_s5, 0  ;;  %s6096_s24 = smov (!%p5885_p10, %s3470_s24), [#allocation22] }
  0x34   : > { %s3471_s17 = scalar_select %p4506_p8, %s4324_s30, 0 }
  0x35   : > { %s4525_s16 = scalar_select %p87_p11, %s4304_s25, %s89_s13  }
  0x36   : > { %s6098_s17 = smov (!%p5885_p10, %s3471_s17), 0  ;;  %p395_p0 = scmp.lt.s32.totalorder %s4328_s9, 7 }
  0x37   : > { %5948 = sst [smem:[#allocation45_spill]] %s4525_s16  ;;  %s5951_s2 = sld [smem:[#allocation77_spill]] }
  0x38   : > { %s317_s3 = sld [smem:[%s6096_s24 + %s6098_s17]]  ;;  %p4543_p1 = pnand %p3192_p13, %p395_p0 }
  0x39   : > { %s4548_s13 = sld [smem:[#allocation4 + %s4324_s30]]  ;;  %s145_s17 = sadd.s32 1, %s4280_s19 }
  0x3a   : > { %s5950_s5 = scalar_select %p4543_p1, 1, 0 }
  0x3b   : > { %s4551_s14 = sld [smem:[#allocation4 + %s6094_s11]]  ;;  %s5952_s24 = sand.u32 1, %s4328_s9  }
  0x3c   : > { %s4561_s16 = scalar_lea.sflag [#allocation9], %s5952_s24  ;;  %p3924_p3 = pneg %p4537_p12 }
  0x3e   : > { %s3464_s12 = smul.u32 12288, %s317_s3 }
  0x40   : > { %s4556_s7 = scalar_lea.hbm %s5951_s2, %s3464_s12  ;;  %s3927_s12 = scalar_lea.hbm %s5951_s2, 24576 }
  0x41   : > { %s3922_s25 = scalar_lea.hbm %s4556_s7, 12288  ;;  %p3928_p8 = scmp.lt.u32.totalorder %s4556_s7, %s5951_s2 }
  0x42   : > { %p3923_p2 = scmp.ne.s32.totalorder %s4556_s7, %s3922_s25  ;;  %p3929_p11 = scmp.lt.u32.totalorder %s3927_s12, %s3922_s25 }
  0x43   : > { %p3931_p0 = scmp.lt.u32.totalorder %s3922_s25, %s4556_s7 }
  0x44   : > { %p3925_p6 = pnand %p3924_p3, %p3923_p2  ;;  %p3930_p13 = por %p3929_p11, %p3928_p8 }
  0x46   : > { %p3926_p7 = pneg %p3925_p6  ;;  %p3932_p10 = por %p3931_p0, %p3930_p13 }
  0x48   : > { %p3933_p5 = pnand %p3932_p10, %p3926_p7 }
  0x4a   : > { %3936 = shalt.err (!%p3933_p5)
}
  0x4b   : > { %s3937_s24 = scalar_lea.vmem %s4531_s15, 12288  ;;  %s4331_s3 = smov [#allocation8]  }
  0x4c   : > { %p3938_p2 = scmp.ne.s32.totalorder %s4531_s15, %s3937_s24  ;;  %s3942_s6 = sshll.u32 %s4331_s3, 4  ;;  %s3943_s6 = int_to_ptr.vmem [resolvable:$false] %s3942_s6 }
  0x4d   : > { %s3944_s8 = scalar_lea.vmem %s3943_s6, 24576  ;;  %p3945_p9 = scmp.lt.s32.totalorder %s4531_s15, %s3943_s6 }
  0x4e   : > { %p3940_p6 = pnand %p3938_p2, %p3924_p3  ;;  %p3946_p8 = scmp.lt.s32.totalorder %s3944_s8, %s3937_s24 }
  0x50   : > { %p3941_p4 = pneg %p3940_p6  ;;  %p3947_p11 = por %p3946_p8, %p3945_p9 }
  0x52   : > { %p3948_p13 = pnand %p3947_p11, %p3941_p4 }
  0x54   : > { %3951 = shalt.err (!%p3948_p13)
}
  0x55   : > { %s4332_s25 = smov 384   ;;  %s4333_s12 = smov 24  }
  0x56   : > { %3501 = dma.hbm_to_vmem [thread:$0]  (!%p4537_p12), %s4556_s7, 12288, %s4531_s15, %s4561_s16, %s4332_s25, %s4332_s25, %s4333_s12  }
  0x57   : > { %p152_p4 = scmp.ne.s32.totalorder %s4280_s19, %s4276_s18  ;;  %p158_p5 = scmp.ne.s32.totalorder %s4276_s18, %s4272_s0 }
  0x58   : > { %s359_s23 = sand.u32 1, %s4280_s19   ;;  %p5953_p9 = scmp.eq.s32.totalorder %s4328_s9, 0 }
  0x59   : > { %p5954_p3 = scmp.eq.s32.totalorder %s4491_s10, 0  ;;  %s142_s3 = ssub.s32 %s4548_s13, %s4551_s14 }
  0x5a   : > { %p154_p10 = por %p152_p4, %p5953_p9  ;;  %s3186_s6 = sshll.u32 %s359_s23, 1 }
  0x5b   : > { %p4598_p7 = por %p158_p5, %p5954_p3  ;;  %p143_p0 = scmp.eq.s32.totalorder %s142_s3, 0 }
  0x5c   : > { %s3476_s29 = scalar_select %p154_p10, [#allocation4], [#allocation20] }
  0x5d   : > { %s5955_s24 = scalar_select %p4598_p7, 1, 0 }
  0x5e   : > { %s4607_s7 = scalar_select %p143_p0, %s4280_s19, %s145_s17  }
  0x5f   : > { %s3477_s15 = scalar_select %p154_p10, %s4324_s30, 0 }
  0x60   : > { %5956 = sst [smem:[#allocation46_spill]] %s4607_s7  ;;  %p5957_p12 = scmp.lt.s32.totalorder %s4328_s9, 6 }
  0x61   : > { %s361_s0 = scalar_lea.vmem [#allocation11], %s3186_s6  ;;  %s5890_s14 = sadd.s32 4294967294, %s4328_s9  }
  0x62   : > { %s6100_s29 = smov (!%p5957_p12, %s3476_s29), [#allocation24]  ;;  %p5958_p2 = pmov %p5957_p12 }
  0x63   : > { %s370_s8 = sshll.u32 %s361_s0, 4  ;;  %s54_s12 = ssub.s32 %s4324_s30, %s6094_s11  ;;  %s4620_s8 = int_to_ptr.vmem [resolvable:$true] %s370_s8 }
  0x64   : > { %s6102_s15 = smov (!%p5958_p2, %s3477_s15), 0  ;;  %p5959_p6 = pmov %p5958_p2 }
  0x65   : > { %s362_s13 = sld [smem:[%s6100_s29 + %s6102_s15]]  ;;  %p4630_p11 = scmp.eq.s32.totalorder %s54_s12, 0 }
  0x66   : > { %p4616_p8 = pnand %p5959_p6, %p154_p10  ;;  %s5961_s4 = sld [smem:[#allocation79_spill]] }
  0x67   : > { %s5963_s0 = sand.u32 1, %s4328_s9  }
  0x68   : > { %s4636_s29 = scalar_lea.sflag [#allocation12], %s5963_s0  ;;  %p3954_p4 = pneg %p4616_p8 }
  0x6b   : > { %s3375_s17 = sshll.u32 %s362_s13, 5 }
  0x6c   : > { %s4628_s2 = scalar_lea.hbm %s5961_s4, %s3375_s17  ;;  %s3957_s23 = scalar_lea.hbm %s5961_s4, 64 }
  0x6d   : > { %s3952_s15 = scalar_lea.hbm %s4628_s2, 32  ;;  %p3958_p10 = scmp.lt.u32.totalorder %s4628_s2, %s5961_s4 }
  0x6e   : > { %p3953_p13 = scmp.ne.s32.totalorder %s4628_s2, %s3952_s15  ;;  %p3959_p3 = scmp.lt.u32.totalorder %s3957_s23, %s3952_s15 }
  0x6f   : > { %p3961_p12 = scmp.lt.u32.totalorder %s3952_s15, %s4628_s2 }
  0x70   : > { %p3955_p5 = pnand %p3954_p4, %p3953_p13  ;;  %p3960_p0 = por %p3959_p3, %p3958_p10 }
  0x72   : > { %p3956_p9 = pneg %p3955_p5  ;;  %p3962_p2 = por %p3961_p12, %p3960_p0 }
  0x74   : > { %p3963_p6 = pnand %p3962_p2, %p3956_p9 }
  0x76   : > { %3966 = shalt.err (!%p3963_p6)
}
  0x77   : > { %s3967_s0 = scalar_lea.vmem %s4620_s8, 32  ;;  %s4334_s13 = smov [#allocation11]  }
  0x78   : > { %p3968_p13 = scmp.ne.s32.totalorder %s4620_s8, %s3967_s0  ;;  %s3972_s17 = sshll.u32 %s4334_s13, 4  ;;  %s3973_s17 = int_to_ptr.vmem [resolvable:$false] %s3972_s17 }
  0x79   : > { %s3974_s3 = scalar_lea.vmem %s3973_s17, 64  ;;  %p3975_p1 = scmp.lt.s32.totalorder %s4620_s8, %s3973_s17 }
  0x7a   : > { %p3970_p5 = pnand %p3968_p13, %p3954_p4  ;;  %p3976_p10 = scmp.lt.s32.totalorder %s3974_s3, %s3967_s0 }
  0x7c   : > { %p3971_p7 = pneg %p3970_p5  ;;  %p3977_p3 = por %p3976_p10, %p3975_p1 }
  0x7e   : > { %p3978_p0 = pnand %p3977_p3, %p3971_p7 }
  0x80   : > { %3981 = shalt.err (!%p3978_p0)
}
  0x81   : > { %3511 = dma.hbm_to_vmem [thread:$0]  (!%p4616_p8), %s4628_s2, 32, %s4620_s8, %s4636_s29  }
  0x82   : > { %s59_s15 = sadd.s32 1, %s4316_s28  ;;  %p66_p1 = scmp.ne.s32.totalorder %s4316_s28, %s4312_s27 }
  0x83   : > { %s4670_s25 = scalar_select %p4630_p11, %s4316_s28, %s59_s15  }
  0x84   : > { %p5965_p7 = scmp.eq.s32.totalorder %s4328_s9, 0  ;;  %p72_p9 = scmp.ne.s32.totalorder %s4312_s27, %s4308_s26 }
  0x85   : > { %5964 = sst [smem:[#allocation47_spill]] %s4670_s25  ;;  %p210_p12 = scmp.eq.s32.totalorder %s4491_s10, 5 }
  0x86   : > { %p4674_p4 = por %p5965_p7, %p66_p1  ;;  %p216_p2 = scmp.eq.s32.totalorder %s5890_s14, 5 }
  0x87   : > { %p5967_p6 = scmp.eq.s32.totalorder %s4491_s10, 0  ;;  %s288_s2 = sand.u32 1, %s4316_s28  }
  0x88   : > { %p4690_p8 = por %p210_p12, %p66_p1  ;;  %p4694_p11 = por %p216_p2, %p72_p9 }
  0x89   : > { %p4685_p13 = por %p5967_p6, %p72_p9  ;;  %s3180_s0 = sshll.u32 %s288_s2, 7 }
  0x8a   : > { %s5969_s8 = scalar_select %p4690_p8, 1, 0 }
  0x8b   : > { %s5968_s12 = scalar_select %p4685_p13, 1, 0 }
  0x8c   : > { %5970 = sst [smem:[#allocation48_spill]] %s5969_s8  ;;  %s3374_s13 = sshll.u32 %s4324_s30, 11 }
  0x8d   : > { %s5971_s6 = scalar_select %p4694_p11, 1, 0 }
  0x8e   : > { %s5973_s1 = sld [smem:[#allocation76_spill]]  ;;  %s292_s14 = scalar_lea.vmem [#allocation5], %s3180_s0 }
  0x8f   : > { %5972 = sst [smem:[#allocation49_spill]] %s5971_s6  ;;  %s302_s4 = sshll.u32 %s292_s14, 4  ;;  %s4704_s4 = int_to_ptr.vmem [resolvable:$true] %s302_s4 }
  0x90   : > { %p5974_p5 = scmp.lt.s32.totalorder %s4328_s9, 6  ;;  %s4714_s28 = scalar_lea.sflag [#allocation6], %s288_s2 }
  0x92   : > { %p4710_p10 = pnand %p5974_p5, %p4674_p4 }
  0x94   : > { %s4702_s15 = scalar_lea.hbm %s5973_s1, %s3374_s13  ;;  %p3984_p0 = pneg %p4710_p10 }
  0x95   : > { %s3982_s13 = scalar_lea.hbm %s4702_s15, 2048  ;;  %s3987_s23 = scalar_lea.hbm %s5973_s1, 12288 }
  0x96   : > { %p3983_p3 = scmp.ne.s32.totalorder %s4702_s15, %s3982_s13  ;;  %p3988_p4 = scmp.lt.u32.totalorder %s4702_s15, %s5973_s1 }
  0x97   : > { %p3989_p9 = scmp.lt.u32.totalorder %s3987_s23, %s3982_s13  ;;  %p3991_p2 = scmp.lt.u32.totalorder %s3982_s13, %s4702_s15 }
  0x98   : > { %p3985_p1 = pnand %p3984_p0, %p3983_p3 }
  0x99   : > { %p3990_p12 = por %p3989_p9, %p3988_p4 }
  0x9a   : > { %p3986_p7 = pneg %p3985_p1 }
  0x9b   : > { %p3992_p6 = por %p3991_p2, %p3990_p12 }
  0x9d   : > { %p3993_p5 = pnand %p3992_p6, %p3986_p7 }
  0x9f   : > { %3996 = shalt.err (!%p3993_p5)
}
  0xa0   : > { %s3997_s2 = scalar_lea.vmem %s4704_s4, 2048  ;;  %s4335_s14 = smov [#allocation5]  }
  0xa1   : > { %p3998_p3 = scmp.ne.s32.totalorder %s4704_s4, %s3997_s2  ;;  %s4002_s0 = sshll.u32 %s4335_s14, 4  ;;  %s4003_s0 = int_to_ptr.vmem [resolvable:$false] %s4002_s0 }
  0xa2   : > { %s4004_s17 = scalar_lea.vmem %s4003_s0, 4096  ;;  %p4005_p8 = scmp.lt.s32.totalorder %s4704_s4, %s4003_s0 }
  0xa3   : > { %p4000_p1 = pnand %p3998_p3, %p3984_p0  ;;  %p4006_p4 = scmp.lt.s32.totalorder %s4004_s17, %s3997_s2 }
  0xa5   : > { %p4001_p11 = pneg %p4000_p1  ;;  %p4007_p9 = por %p4006_p4, %p4005_p8 }
  0xa7   : > { %p4008_p12 = pnand %p4007_p9, %p4001_p11 }
  0xa9   : > { %4011 = shalt.err (!%p4008_p12)
}
  0xaa   : > { %s4336_s13 = smov 128   ;;  %s4337_s23 = smov 8  }
  0xab   : > { %3496 = dma.hbm_to_vmem [thread:$0]  (!%p4710_p10), %s4702_s15, 2048, %s4704_s4, %s4714_s28, %s4336_s13, %s4336_s13, %s4337_s23  }
  0xac   : > { %s112_s3 = sld [smem:[#allocation4 + %s4324_s30]]  ;;  %p124_p8 = scmp.ne.s32.totalorder %s4292_s22, %s4288_s21 }
  0xad   : > { %s113_s2 = sld [smem:[#allocation4 + %s6094_s11]]  ;;  %p130_p11 = scmp.ne.s32.totalorder %s4288_s21, %s4284_s20 }
  0xae   : > { %s117_s14 = sadd.s32 1, %s4292_s22  ;;  %s339_s0 = sand.u32 1, %s4292_s22  }
  0xaf   : > { %p5976_p0 = scmp.eq.s32.totalorder %s4328_s9, 0  ;;  %p5977_p2 = scmp.eq.s32.totalorder %s4491_s10, 0 }
  0xb0   : > { %s5978_s17 = sld [smem:[#allocation35_spill]]  ;;  %s5979_s1 = sld [smem:[#allocation36_spill]] }
  0xb1   : > { %p126_p7 = por %p124_p8, %p5976_p0  ;;  %p4754_p6 = por %p130_p11, %p5977_p2 }
  0xb2   : > { %s5981_s4 = sld [smem:[#allocation34_spill]]  ;;  %s3465_s28 = smul.u32 6, %s339_s0 }
  0xb3   : > { %s5980_s7 = scalar_select %p4754_p6, 1, 0 }
  0xb4   : > { %s3473_s25 = scalar_select %p126_p7, [#allocation4], [#allocation19] }
  0xb5   : > { %s114_s15 = ssub.s32 %s112_s3, %s113_s2  ;;  %p5983_p5 = scmp.lt.s32.totalorder %s4328_s9, 6 }
  0xb6   : > { %p115_p10 = scmp.eq.s32.totalorder %s114_s15, 0  ;;  %s341_s23 = scalar_lea.vmem [#allocation10], %s3465_s28 }
  0xb7   : > { %s3474_s20 = scalar_select %p126_p7, %s4324_s30, 0 }
  0xb8   : > { %s4760_s13 = scalar_select %p115_p10, %s4292_s22, %s117_s14  }
  0xb9   : > { %s6104_s25 = smov (!%p5983_p5, %s3473_s25), [#allocation23]  ;;  %p5984_p3 = pmov %p5983_p5 }
  0xba   : > { %5982 = sst [smem:[#allocation50_spill]] %s4760_s13  ;;  %s350_s19 = sshll.u32 %s341_s23, 4  ;;  %s4782_s19 = int_to_ptr.vmem [resolvable:$true] %s350_s19 }
  0xbb   : > { %s6106_s20 = smov (!%p5984_p3, %s3474_s20), 0  ;;  %p5985_p1 = pmov %p5984_p3 }
  0xbc   : > { %s342_s3 = sld [smem:[%s6104_s25 + %s6106_s20]]  ;;  %p180_p9 = scmp.ne.s32.totalorder %s5979_s1, %s5978_s17 }
  0xbd   : > { %p4768_p4 = pnand %p5985_p1, %p126_p7  ;;  %s4773_s2 = sld [smem:[#allocation4 + %s4324_s30]] }
  0xbe   : > { %s4776_s0 = sld [smem:[#allocation4 + %s6094_s11]]  ;;  %p186_p12 = scmp.ne.s32.totalorder %s5978_s17, %s5981_s4 }
  0xbf   : > { %p5987_p8 = pmov %p5977_p2  ;;  %s379_s15 = sand.u32 1, %s5979_s1  }
  0xc0   : > { %s5989_s22 = sld [smem:[#allocation78_spill]]  ;;  %p4798_p7 = por %p180_p9, %p5976_p0 }
  0xc1   : > { %p4786_p11 = por %p186_p12, %p5987_p8  ;;  %p4014_p10 = pneg %p4768_p4 }
  0xc2   : > { %s3466_s14 = smul.u32 96, %s342_s3 }
  0xc3   : > { %s5988_s28 = scalar_select %p4786_p11, 1, 0 }
  0xc6   : > { %s5990_s8 = smov %s5989_s22  ;;  %s4794_s26 = scalar_lea.hbm %s5989_s22, %s3466_s14 }
  0xc7   : > { %s4012_s4 = scalar_lea.hbm %s4794_s26, 96  ;;  %s4017_s20 = scalar_lea.hbm %s5990_s8, 192 }
  0xc8   : > { %p4013_p2 = scmp.ne.s32.totalorder %s4794_s26, %s4012_s4  ;;  %p4018_p1 = scmp.lt.u32.totalorder %s4794_s26, %s5990_s8 }
  0xc9   : > { %p4019_p9 = scmp.lt.u32.totalorder %s4017_s20, %s4012_s4  ;;  %p4021_p8 = scmp.lt.u32.totalorder %s4012_s4, %s4794_s26 }
  0xca   : > { %p4015_p5 = pnand %p4014_p10, %p4013_p2 }
  0xcb   : > { %p4020_p12 = por %p4019_p9, %p4018_p1 }
  0xcc   : > { %p4016_p3 = pneg %p4015_p5 }
  0xcd   : > { %p4022_p0 = por %p4021_p8, %p4020_p12 }
  0xcf   : > { %p4023_p11 = pnand %p4022_p0, %p4016_p3 }
  0xd1   : > { %4026 = shalt.err (!%p4023_p11)
}
  0xd2   : > { %s4027_s14 = scalar_lea.vmem %s4782_s19, 96  ;;  %s4338_s23 = smov [#allocation10]  }
  0xd3   : > { %p4028_p2 = scmp.ne.s32.totalorder %s4782_s19, %s4027_s14  ;;  %s4032_s25 = sshll.u32 %s4338_s23, 4  ;;  %s4033_s25 = int_to_ptr.vmem [resolvable:$false] %s4032_s25 }
  0xd4   : > { %s4034_s22 = scalar_lea.vmem %s4033_s25, 192  ;;  %p4035_p13 = scmp.lt.s32.totalorder %s4782_s19, %s4033_s25 }
  0xd5   : > { %p4030_p5 = pnand %p4028_p2, %p4014_p10  ;;  %p4036_p1 = scmp.lt.s32.totalorder %s4034_s22, %s4027_s14 }
  0xd7   : > { %p4031_p6 = pneg %p4030_p5  ;;  %p4037_p9 = por %p4036_p1, %p4035_p13 }
  0xd9   : > { %p4038_p12 = pnand %p4037_p9, %p4031_p6 }
  0xdb   : > { %4041 = shalt.err (!%p4038_p12)
}
  0xdc   : > { %3506 = dma.hbm_to_vmem [thread:$0]  (!%p4768_p4), %s4794_s26, 96, %s4782_s19, %s4561_s16  }
  0xdd   : > { %s170_s4 = ssub.s32 %s4773_s2, %s4776_s0  ;;  %s173_s20 = sadd.s32 1, %s5979_s1 }
  0xde   : > { %p171_p13 = scmp.eq.s32.totalorder %s170_s4, 0  ;;  %s3189_s6 = sshll.u32 %s379_s15, 1 }
  0xdf   : > { %s3479_s13 = scalar_select %p4798_p7, [#allocation4], [#allocation21] }
  0xe0   : > { %s6108_s1 = smov (!%p171_p13, %s5979_s1), %s173_s20  ;;  %p5992_p6 = scmp.lt.s32.totalorder %s4328_s9, 6 }
  0xe1   : > { %s3480_s3 = scalar_select %p4798_p7, %s4324_s30, 0 }
  0xe2   : > { %s6110_s13 = smov (!%p5992_p6, %s3479_s13), [#allocation25]  ;;  %p5993_p11 = pmov %p5992_p6 }
  0xe3   : > { %p5994_p10 = pmov %p5992_p6  ;;  %s381_s19 = scalar_lea.vmem [#allocation13], %s3189_s6 }
  0xe4   : > { %s6112_s3 = smov (!%p5993_p11, %s3480_s3), 0  ;;  %s390_s26 = sshll.u32 %s381_s19, 4  ;;  %s4853_s26 = int_to_ptr.vmem [resolvable:$true] %s390_s26 }
  0xe5   : > { %p4849_p3 = pnand %p5994_p10, %p4798_p7  ;;  %s382_s16 = sld [smem:[%s6110_s13 + %s6112_s3]] }
  0xe6   : > { %s5996_s23 = sld [smem:[#allocation80_spill]] }
  0xe7   : > { %p4044_p8 = pneg %p4849_p3 }
  0xeb   : > { %s3376_s2 = sshll.u32 %s382_s16, 5 }
  0xec   : > { %s5997_s4 = smov %s5996_s23  ;;  %s388_s25 = scalar_lea.hbm %s5996_s23, %s3376_s2 }
  0xed   : > { %s4042_s22 = scalar_lea.hbm %s388_s25, 32  ;;  %s4047_s6 = scalar_lea.hbm %s5997_s4, 64 }
  0xee   : > { %p4043_p4 = scmp.ne.s32.totalorder %s388_s25, %s4042_s22  ;;  %p4048_p2 = scmp.lt.u32.totalorder %s388_s25, %s5997_s4 }
  0xef   : > { %p4049_p5 = scmp.lt.u32.totalorder %s4047_s6, %s4042_s22  ;;  %p4051_p9 = scmp.lt.u32.totalorder %s4042_s22, %s388_s25 }
  0xf0   : > { %p4045_p7 = pnand %p4044_p8, %p4043_p4 }
  0xf1   : > { %p4050_p1 = por %p4049_p5, %p4048_p2 }
  0xf2   : > { %p4046_p0 = pneg %p4045_p7 }
  0xf3   : > { %p4052_p12 = por %p4051_p9, %p4050_p1 }
  0xf5   : > { %p4053_p13 = pnand %p4052_p12, %p4046_p0 }
  0xf7   : > { %4056 = shalt.err (!%p4053_p13)
}
  0xf8   : > { %s4057_s16 = scalar_lea.vmem %s4853_s26, 32  ;;  %s4339_s19 = smov [#allocation13]  }
  0xf9   : > { %p4058_p6 = scmp.ne.s32.totalorder %s4853_s26, %s4057_s16  ;;  %s4062_s2 = sshll.u32 %s4339_s19, 4  ;;  %s4063_s2 = int_to_ptr.vmem [resolvable:$false] %s4062_s2 }
  0xfa   : > { %s4064_s0 = scalar_lea.vmem %s4063_s2, 64  ;;  %p4065_p4 = scmp.lt.s32.totalorder %s4853_s26, %s4063_s2 }
  0xfb   : > { %p4060_p11 = pnand %p4058_p6, %p4044_p8  ;;  %p4066_p7 = scmp.lt.s32.totalorder %s4064_s0, %s4057_s16 }
  0xfd   : > { %p4061_p10 = pneg %p4060_p11  ;;  %p4067_p2 = por %p4066_p7, %p4065_p4 }
  0xff   : > { %p4068_p5 = pnand %p4067_p2, %p4061_p10 }
 0x101   : > { %4071 = shalt.err (!%p4068_p5)
}
 0x102   : > { %3516 = dma.hbm_to_vmem [thread:$0]  (!%p4849_p3), %s388_s25, 32, %s4853_s26, %s4636_s29  }
 0x103   : > { %p5998_p0 = scmp.ne.s32.totalorder %s5950_s5, 0 }
 0x105   : > { %399 = sbr.rel (%p5998_p0) target bundleno = 874 (0x36a), region = 40 }
 0x10c   : > { %s4882_s15 = sand.u32 1, %s4312_s27   ;;  %p5999_p8 = scmp.ne.s32.totalorder %s5968_s12, 0 }
 0x10d   : > { %s4885_s23 = sshll.u32 %s4882_s15, 7  ;;  %s402_s22 = scalar_lea.sflag [#allocation6], %s4882_s15 }
 0x10e   : > { %s4889_s17 = scalar_lea.vmem [#allocation5], %s4885_s23 }
 0x10f   : > { %4231 = dma.done.wait (%p5999_p8), %s402_s22, 2048  }
 0x110   : > { %4233 = vsyncadd (%p5999_p8), %s402_s22, 4294965248  ;;  %s6000_s5 = sld [smem:[#allocation39_spill]]  ;;  %s6001_s29 = sld [smem:[#allocation44_spill]] }
 0x111   : > { %s4896_s14 = sand.u32 1, %s4491_s10  }
 0x112   : > { %s411_s20 = scalar_lea.sflag [#allocation9], %s4896_s14 }
 0x116   : > { %s412_s26 = sand.u32 1, %s6000_s5   ;;  %p6002_p3 = scmp.ne.s32.totalorder %s6001_s29, 0 }
 0x117   : > { %s3467_s25 = smul.u32 768, %s412_s26 }
 0x119   : > { %s4900_s6 = scalar_lea.vmem [#allocation8], %s3467_s25 }
 0x11a   : > { %4235 = dma.done.wait (%p6002_p3), %s411_s20, 12288  }
 0x11b   : > { %4237 = vsyncadd (%p6002_p3), %s411_s20, 4294955008  ;;  %s421_s12 = sand.u32 1, %s4288_s21   ;;  %p6003_p1 = scmp.ne.s32.totalorder %s5980_s7, 0 }
 0x11c   : > { %s4907_s13 = smul.u32 6, %s421_s12 }
 0x11e   : > { %s423_s3 = scalar_lea.vmem [#allocation10], %s4907_s13 }
 0x11f   : > { %4239 = dma.done.wait (%p6003_p1), %s411_s20, 96  }
 0x120   : > { %4241 = vsyncadd (%p6003_p1), %s411_s20, 4294967200  ;;  %s430_s10 = sand.u32 1, %s4276_s18   ;;  %s429_s19 = scalar_lea.sflag [#allocation12], %s4896_s14 }
 0x121   : > { %s4915_s16 = sshll.u32 %s430_s10, 1  ;;  %p6004_p9 = scmp.ne.s32.totalorder %s5955_s24, 0 }
 0x122   : > { %s432_s2 = scalar_lea.vmem [#allocation11], %s4915_s16 }
 0x123   : > { %4243 = dma.done.wait (%p6004_p9), %s429_s19, 32  }
 0x124   : > { %4245 = vsyncadd (%p6004_p9), %s429_s19, 4294967264  ;;  %s6005_s0 = sld [smem:[#allocation35_spill]]  ;;  %p6006_p12 = scmp.ne.s32.totalorder %s5988_s28, 0 }
 0x12a   : > { %s439_s22 = sand.u32 1, %s6005_s0  }
 0x12b   : > { %s4924_s5 = sshll.u32 %s439_s22, 1 }
 0x12c   : > { %s441_s7 = scalar_lea.vmem [#allocation13], %s4924_s5 }
 0x12d   : > { %4247 = dma.done.wait (%p6006_p12), %s429_s19, 32  }
 0x12e   : > { %4249 = vsyncadd (%p6006_p12), %s429_s19, 4294967264  ;;  %v3680_v0 = vld [vmem:[%s4900_s6 + $0x4] ss:$24 sps:$4 sm:$0xff]   ;;  %v3684_v2 = vld [vmem:[%s4900_s6] ss:$24 sps:$4 sm:$0xff]   ;;  %s5463_s24 = scalar_lea.vmem [#allocation17], %s4885_s23 }
 0x12f   : > { %v3682_v1 = vld [vmem:[%s4900_s6 + $0xc] ss:$24 sps:$4 sm:$0xff]   ;;  %1380 = vmatprep.subr.bf16.mxu0 %v3680_v0  ;;  %v3685_v3 = vld [vmem:[%s4900_s6 + $0x8] ss:$24 sps:$4 sm:$0xff]   ;;  %v3688_v5 = vld [vmem:[%s4900_s6 + $0x3c] ss:$24 sps:$4 sm:$0xff]  }
 0x130   : > { %1493 = vmatprep.subr.bf16.mxu1 %v3682_v1  ;;  %v3686_v4 = vld [vmem:[%s4900_s6 + $0x34] ss:$24 sps:$4 sm:$0xff]   ;;  %1381 = vmatpush1.bf16.msra.mxu0 %v3684_v2  ;;  %v3690_v6 = vld [vmem:[%s4900_s6 + $0x30] ss:$24 sps:$4 sm:$0xff]   ;;  %v3692_v8 = vld [vmem:[%s4900_s6 + $0x64] ss:$24 sps:$4 sm:$0xff]  }
 0x131   : > { %1494 = vmatpush1.bf16.msra.mxu1 %v3685_v3  ;;  %1382 = vmatprep.subr.bf16.mxu0 %v3686_v4  ;;  %v3691_v7 = vld [vmem:[%s4900_s6 + $0x38] ss:$24 sps:$4 sm:$0xff]   ;;  %v3694_v9 = vld [vmem:[%s4900_s6 + $0x6c] ss:$24 sps:$4 sm:$0xff]   ;;  %v3697_v11 = vld [vmem:[%s4900_s6 + $0x68] ss:$24 sps:$4 sm:$0xff]  }
 0x132   : > { %1495 = vmatprep.subr.bf16.mxu1 %v3688_v5  ;;  %v3696_v10 = vld [vmem:[%s4900_s6 + $0x60] ss:$24 sps:$4 sm:$0xff]   ;;  %v3698_v12 = vld [vmem:[%s4900_s6 + $0x94] ss:$24 sps:$4 sm:$0xff]   ;;  %v3702_v14 = vld [vmem:[%s4900_s6 + $0x90] ss:$24 sps:$4 sm:$0xff]  }
 0x133   : > { %v3700_v13 = vld [vmem:[%s4900_s6 + $0x9c] ss:$24 sps:$4 sm:$0xff]   ;;  %v3703_v15 = vld [vmem:[%s4900_s6 + $0x98] ss:$24 sps:$4 sm:$0xff]   ;;  %v3706_v17 = vld [vmem:[%s4900_s6 + $0xcc] ss:$24 sps:$4 sm:$0xff]  }
 0x134   : > { %1383 = vmatpush1.bf16.msra.mxu0 %v3690_v6  ;;  %v3704_v16 = vld [vmem:[%s4900_s6 + $0xc4] ss:$24 sps:$4 sm:$0xff]   ;;  %v3708_v18 = vld [vmem:[%s4900_s6 + $0xc0] ss:$24 sps:$4 sm:$0xff]   ;;  %v3710_v20 = vld [vmem:[%s4900_s6 + $0xf4] ss:$24 sps:$4 sm:$0xff]  }
 0x135   : > { %1496 = vmatpush1.bf16.msra.mxu1 %v3691_v7  ;;  %1384 = vmatprep.subr.bf16.mxu0 %v3692_v8  ;;  %v3709_v19 = vld [vmem:[%s4900_s6 + $0xc8] ss:$24 sps:$4 sm:$0xff]   ;;  %v3712_v21 = vld [vmem:[%s4900_s6 + $0xfc] ss:$24 sps:$4 sm:$0xff]   ;;  %v3715_v23 = vld [vmem:[%s4900_s6 + $0xf8] ss:$24 sps:$4 sm:$0xff]  }
 0x136   : > { %1497 = vmatprep.subr.bf16.mxu1 %v3694_v9  ;;  %v3714_v22 = vld [vmem:[%s4900_s6 + $0xf0] ss:$24 sps:$4 sm:$0xff]   ;;  %v3716_v24 = vld [vmem:[%s4900_s6 + $0x124] ss:$24 sps:$4 sm:$0xff]   ;;  %v3720_v26 = vld [vmem:[%s4900_s6 + $0x120] ss:$24 sps:$4 sm:$0xff]  }
 0x137   : > { %v3718_v25 = vld [vmem:[%s4900_s6 + $0x12c] ss:$24 sps:$4 sm:$0xff]   ;;  %v3721_v27 = vld [vmem:[%s4900_s6 + $0x128] ss:$24 sps:$4 sm:$0xff]   ;;  %v3724_v29 = vld [vmem:[%s4900_s6 + $0x15c] ss:$24 sps:$4 sm:$0xff]  }
 0x138   : > { %1385 = vmatpush1.bf16.msra.mxu0 %v3696_v10  ;;  %v3722_v28 = vld [vmem:[%s4900_s6 + $0x154] ss:$24 sps:$4 sm:$0xff]   ;;  %v3726_v30 = vld [vmem:[%s4900_s6 + $0x150] ss:$24 sps:$4 sm:$0xff]   ;;  %v3728_v32 = vld [vmem:[%s4900_s6 + $0x184] ss:$24 sps:$4 sm:$0xff]  }
 0x139   : > { %1498 = vmatpush1.bf16.msra.mxu1 %v3697_v11  ;;  %1386 = vmatprep.subr.bf16.mxu0 %v3698_v12  ;;  %v3727_v31 = vld [vmem:[%s4900_s6 + $0x158] ss:$24 sps:$4 sm:$0xff]   ;;  %v3730_v33 = vld [vmem:[%s4900_s6 + $0x18c] ss:$24 sps:$4 sm:$0xff]   ;;  %v3733_v35 = vld [vmem:[%s4900_s6 + $0x188] ss:$24 sps:$4 sm:$0xff]  }
 0x13a   : > { %1499 = vmatprep.subr.bf16.mxu1 %v3700_v13  ;;  %v3732_v34 = vld [vmem:[%s4900_s6 + $0x180] ss:$24 sps:$4 sm:$0xff]   ;;  %v3734_v36 = vld [vmem:[%s4900_s6 + $0x1b4] ss:$24 sps:$4 sm:$0xff]   ;;  %v3738_v38 = vld [vmem:[%s4900_s6 + $0x1b0] ss:$24 sps:$4 sm:$0xff]  }
 0x13b   : > { %v3736_v37 = vld [vmem:[%s4900_s6 + $0x1bc] ss:$24 sps:$4 sm:$0xff]   ;;  %v3739_v39 = vld [vmem:[%s4900_s6 + $0x1b8] ss:$24 sps:$4 sm:$0xff]   ;;  %v3742_v41 = vld [vmem:[%s4900_s6 + $0x1ec] ss:$24 sps:$4 sm:$0xff]  }
 0x13c   : > { %1387 = vmatpush1.bf16.msra.mxu0 %v3702_v14  ;;  %v3740_v40 = vld [vmem:[%s4900_s6 + $0x1e4] ss:$24 sps:$4 sm:$0xff]   ;;  %v3744_v42 = vld [vmem:[%s4900_s6 + $0x1e0] ss:$24 sps:$4 sm:$0xff]   ;;  %v3746_v44 = vld [vmem:[%s4900_s6 + $0x214] ss:$24 sps:$4 sm:$0xff]  }
 0x13d   : > { %1500 = vmatpush1.bf16.msra.mxu1 %v3703_v15  ;;  %1388 = vmatprep.subr.bf16.mxu0 %v3704_v16  ;;  %v3745_v43 = vld [vmem:[%s4900_s6 + $0x1e8] ss:$24 sps:$4 sm:$0xff]   ;;  %v3748_v45 = vld [vmem:[%s4900_s6 + $0x21c] ss:$24 sps:$4 sm:$0xff]   ;;  %v3751_v47 = vld [vmem:[%s4900_s6 + $0x218] ss:$24 sps:$4 sm:$0xff]  }
 0x13e   : > { %1501 = vmatprep.subr.bf16.mxu1 %v3706_v17  ;;  %v3750_v46 = vld [vmem:[%s4900_s6 + $0x210] ss:$24 sps:$4 sm:$0xff]   ;;  %v4980_v48 = vld [vmem:[%s4889_s17 + $0x4] ss:$8 sps:$4 sm:$0xff]   ;;  %v3756_v51 = vld [vmem:[%s4900_s6 + $0x240] ss:$24 sps:$4 sm:$0xff]  }
 0x13f   : > { %v3752_v49 = vld [vmem:[%s4900_s6 + $0x244] ss:$24 sps:$4 sm:$0xff]   ;;  %1412 = vmatprep.mubr.bf16.mxu0 %v4980_v48  ;;  %1525 = vmatprep.mubr.bf16.mxu1 %v4980_v48  ;;  %v3757_v52 = vld [vmem:[%s4900_s6 + $0x248] ss:$24 sps:$4 sm:$0xff]   ;;  %v3758_v53 = vld [vmem:[%s4900_s6 + $0x274] ss:$24 sps:$4 sm:$0xff]  }
 0x140   : > { %1389 = vmatpush1.bf16.msra.mxu0 %v3708_v18  ;;  %v3754_v50 = vld [vmem:[%s4900_s6 + $0x24c] ss:$24 sps:$4 sm:$0xff]   ;;  %v3760_v54 = vld [vmem:[%s4900_s6 + $0x27c] ss:$24 sps:$4 sm:$0xff]   ;;  %v3762_v55 = vld [vmem:[%s4900_s6 + $0x270] ss:$24 sps:$4 sm:$0xff]  }
 0x141   : > { %1502 = vmatpush1.bf16.msra.mxu1 %v3709_v19  ;;  %1390 = vmatprep.subr.bf16.mxu0 %v3710_v20  ;;  %v3763_v56 = vld [vmem:[%s4900_s6 + $0x278] ss:$24 sps:$4 sm:$0xff]   ;;  %v3764_v57 = vld [vmem:[%s4900_s6 + $0x2a4] ss:$24 sps:$4 sm:$0xff]   ;;  %v3769_v60 = vld [vmem:[%s4900_s6 + $0x2a8] ss:$24 sps:$4 sm:$0xff]  }
 0x142   : > { %1503 = vmatprep.subr.bf16.mxu1 %v3712_v21  ;;  %v3766_v58 = vld [vmem:[%s4900_s6 + $0x2ac] ss:$24 sps:$4 sm:$0xff]   ;;  %v3768_v59 = vld [vmem:[%s4900_s6 + $0x2a0] ss:$24 sps:$4 sm:$0xff]   ;;  %v3772_v62 = vld [vmem:[%s4900_s6 + $0x2dc] ss:$24 sps:$4 sm:$0xff]  }
 0x143   : > { %v3770_v61 = vld [vmem:[%s4900_s6 + $0x2d4] ss:$24 sps:$4 sm:$0xff]   ;;  %v3774_v63 = vld [vmem:[%s4900_s6 + $0x2d0] ss:$24 sps:$4 sm:$0xff]   ;;  %v3805_v5 = vld [vmem:[%s4900_s6 + $0x44] ss:$24 sps:$4 sm:$0xff]  }
 0x144   : > { %1391 = vmatpush1.bf16.msra.mxu0 %v3714_v22  ;;  %v3775_v0 = vld [vmem:[%s4900_s6 + $0x2d8] ss:$24 sps:$4 sm:$0xff]   ;;  %v3802_v1 = vld [vmem:[%s4900_s6 + $0x14] ss:$24 sps:$4 sm:$0xff]   ;;  %v5002_v2 = vld [vmem:[%s4889_s17] ss:$8 sps:$4 sm:$0xff]  }
 0x145   : > { %1504 = vmatpush1.bf16.msra.mxu1 %v3715_v23  ;;  %1392 = vmatprep.subr.bf16.mxu0 %v3716_v24  ;;  %v5005_v3 = vld [vmem:[%s4889_s17 + $0x14] ss:$8 sps:$4 sm:$0xff]   ;;  %v3800_v4 = vld [vmem:[%s4900_s6 + $0x10] ss:$24 sps:$4 sm:$0xff]   ;;  %v3803_v6 = vld [vmem:[%s4900_s6 + $0x40] ss:$24 sps:$4 sm:$0xff]  }
 0x146   : > { %1505 = vmatprep.subr.bf16.mxu1 %v3718_v25  ;;  %v3808_v7 = vld [vmem:[%s4900_s6 + $0x74] ss:$24 sps:$4 sm:$0xff]   ;;  %v5016_v8 = vld [vmem:[%s4889_s17 + $0x10] ss:$8 sps:$4 sm:$0xff]   ;;  %v3811_v11 = vld [vmem:[%s4900_s6 + $0xa4] ss:$24 sps:$4 sm:$0xff]  }
 0x147   : > { %v5019_v9 = vld [vmem:[%s4889_s17 + $0x24] ss:$8 sps:$4 sm:$0xff]   ;;  %v3806_v10 = vld [vmem:[%s4900_s6 + $0x70] ss:$24 sps:$4 sm:$0xff]   ;;  %v3809_v12 = vld [vmem:[%s4900_s6 + $0xa0] ss:$24 sps:$4 sm:$0xff]  }
 0x148   : > { %1393 = vmatpush1.bf16.msra.mxu0 %v3720_v26  ;;  %v3814_v13 = vld [vmem:[%s4900_s6 + $0xd4] ss:$24 sps:$4 sm:$0xff]   ;;  %v5030_v14 = vld [vmem:[%s4889_s17 + $0x20] ss:$8 sps:$4 sm:$0xff]   ;;  %v3817_v17 = vld [vmem:[%s4900_s6 + $0x104] ss:$24 sps:$4 sm:$0xff]  }
 0x149   : > { %1506 = vmatpush1.bf16.msra.mxu1 %v3721_v27  ;;  %1394 = vmatprep.subr.bf16.mxu0 %v3722_v28  ;;  %v5033_v15 = vld [vmem:[%s4889_s17 + $0x34] ss:$8 sps:$4 sm:$0xff]   ;;  %v3812_v16 = vld [vmem:[%s4900_s6 + $0xd0] ss:$24 sps:$4 sm:$0xff]   ;;  %v3815_v18 = vld [vmem:[%s4900_s6 + $0x100] ss:$24 sps:$4 sm:$0xff]  }
 0x14a   : > { %1507 = vmatprep.subr.bf16.mxu1 %v3724_v29  ;;  %v3820_v19 = vld [vmem:[%s4900_s6 + $0x134] ss:$24 sps:$4 sm:$0xff]   ;;  %v5044_v20 = vld [vmem:[%s4889_s17 + $0x30] ss:$8 sps:$4 sm:$0xff]   ;;  %v3823_v23 = vld [vmem:[%s4900_s6 + $0x164] ss:$24 sps:$4 sm:$0xff]  }
 0x14b   : > { %v5047_v21 = vld [vmem:[%s4889_s17 + $0x44] ss:$8 sps:$4 sm:$0xff]   ;;  %v3818_v22 = vld [vmem:[%s4900_s6 + $0x130] ss:$24 sps:$4 sm:$0xff]   ;;  %v3821_v24 = vld [vmem:[%s4900_s6 + $0x160] ss:$24 sps:$4 sm:$0xff]  }
 0x14c   : > { %1395 = vmatpush1.bf16.msra.mxu0 %v3726_v30  ;;  %v3826_v25 = vld [vmem:[%s4900_s6 + $0x194] ss:$24 sps:$4 sm:$0xff]   ;;  %v5058_v26 = vld [vmem:[%s4889_s17 + $0x40] ss:$8 sps:$4 sm:$0xff]   ;;  %v3829_v29 = vld [vmem:[%s4900_s6 + $0x1c4] ss:$24 sps:$4 sm:$0xff]  }
 0x14d   : > { %1508 = vmatpush1.bf16.msra.mxu1 %v3727_v31  ;;  %1396 = vmatprep.subr.bf16.mxu0 %v3728_v32  ;;  %v5061_v27 = vld [vmem:[%s4889_s17 + $0x54] ss:$8 sps:$4 sm:$0xff]   ;;  %v3824_v28 = vld [vmem:[%s4900_s6 + $0x190] ss:$24 sps:$4 sm:$0xff]   ;;  %v3827_v30 = vld [vmem:[%s4900_s6 + $0x1c0] ss:$24 sps:$4 sm:$0xff]  }
 0x14e   : > { %1509 = vmatprep.subr.bf16.mxu1 %v3730_v33  ;;  %v3832_v31 = vld [vmem:[%s4900_s6 + $0x1f4] ss:$24 sps:$4 sm:$0xff]   ;;  %v3793_v32 = vld [vmem:[%s4889_s17 + $0x50] ss:$8 sps:$4 sm:$0xff]   ;;  %s5532_s28 = scalar_lea.vmem [#allocation15], %s4885_s23  ;;  %s2942_s25 = sshll.u32 %s5463_s24, 4  ;;  %s5701_s25 = int_to_ptr.vmem [resolvable:$true] %s2942_s25 }
 0x14f   : > { %v3794_v33 = vld [vmem:[%s4889_s17 + $0x64] ss:$8 sps:$4 sm:$0xff]   ;;  %s2925_s26 = sshll.u32 %s5532_s28, 4  ;;  %s6057_s20 = sld [smem:[#allocation48_spill]]  ;;  %s5691_s26 = int_to_ptr.vmem [resolvable:$true] %s2925_s26 }
 0x150   : > { %1397 = vmatpush1.bf16.msra.mxu0 %v3732_v34  ;;  %v3830_v34 = vld [vmem:[%s4900_s6 + $0x1f0] ss:$24 sps:$4 sm:$0xff]   ;;  %s6058_s13 = sld [smem:[#allocation82_spill]]  ;;  %s6060_s19 = sld [smem:[#allocation83_spill]] }
 0x151   : > { %1510 = vmatpush1.bf16.msra.mxu1 %v3733_v35  ;;  %1398 = vmatprep.subr.bf16.mxu0 %v3734_v36  ;;  %v3835_v35 = vld [vmem:[%s4900_s6 + $0x224] ss:$24 sps:$4 sm:$0xff]   ;;  %v3833_v36 = vld [vmem:[%s4900_s6 + $0x220] ss:$24 sps:$4 sm:$0xff]   ;;  %s2889_s5 = scalar_lea.sflag [#allocation16], %s4896_s14 }
 0x152   : > { %1511 = vmatprep.subr.bf16.mxu1 %v3736_v37  ;;  %v3838_v37 = vld [vmem:[%s4900_s6 + $0x254] ss:$24 sps:$4 sm:$0xff]  }
 0x154   : > { %1399 = vmatpush1.bf16.msra.mxu0 %v3738_v38  ;;  %v3796_v38 = vld [vmem:[%s4889_s17 + $0x60] ss:$8 sps:$4 sm:$0xff]  }
 0x155   : > { %1512 = vmatpush1.bf16.msra.mxu1 %v3739_v39  ;;  %1400 = vmatprep.subr.bf16.mxu0 %v3740_v40  ;;  %v3797_v39 = vld [vmem:[%s4889_s17 + $0x74] ss:$8 sps:$4 sm:$0xff]   ;;  %v3836_v40 = vld [vmem:[%s4900_s6 + $0x250] ss:$24 sps:$4 sm:$0xff]   ;;  %p6062_p6 = scmp.ne.s32.totalorder %s6057_s20, 0 }
 0x156   : > { %1513 = vmatprep.subr.bf16.mxu1 %v3742_v41  ;;  %v3841_v41 = vld [vmem:[%s4900_s6 + $0x284] ss:$24 sps:$4 sm:$0xff]  }
 0x158   : > { %1401 = vmatpush1.bf16.msra.mxu0 %v3744_v42  ;;  %v3839_v42 = vld [vmem:[%s4900_s6 + $0x280] ss:$24 sps:$4 sm:$0xff]  }
 0x159   : > { %1514 = vmatpush1.bf16.msra.mxu1 %v3745_v43  ;;  %1402 = vmatprep.subr.bf16.mxu0 %v3746_v44  ;;  %v3844_v43 = vld [vmem:[%s4900_s6 + $0x2b4] ss:$24 sps:$4 sm:$0xff]   ;;  %v3799_v44 = vld [vmem:[%s4889_s17 + $0x70] ss:$8 sps:$4 sm:$0xff]   ;;  %s5538_s17 = scalar_lea.vmem [#allocation14], %s4885_s23  ;;  %s6050_s23 = sld [smem:[#allocation43_spill]] }
 0x15a   : > { %1515 = vmatprep.subr.bf16.mxu1 %v3748_v45  ;;  %v3842_v45 = vld [vmem:[%s4900_s6 + $0x2b0] ss:$24 sps:$4 sm:$0xff]   ;;  %s2908_s22 = sshll.u32 %s5538_s17, 4  ;;  %s5769_s22 = int_to_ptr.vmem [resolvable:$true] %s2908_s22 }
 0x15c   : > { %1403 = vmatpush1.bf16.msra.mxu0 %v3750_v46  ;;  %v3847_v46 = vld [vmem:[%s4900_s6 + $0x2e4] ss:$24 sps:$4 sm:$0xff]  }
 0x15d   : > { %1516 = vmatpush1.bf16.msra.mxu1 %v3751_v47  ;;  %1404 = vmatprep.subr.bf16.mxu0 %v3752_v49  ;;  %v3845_v47 = vld [vmem:[%s4900_s6 + $0x2e0] ss:$24 sps:$4 sm:$0xff]  }
 0x15e   : > { %1517 = vmatprep.subr.bf16.mxu1 %v3754_v50 }
 0x15f   : > { %s5673_s29 = sshll.u32 %s6050_s23, 11 }
 0x160   : > { %1405 = vmatpush1.bf16.msra.mxu0 %v3756_v51  ;;  %v5103_v51 = vld [vmem:[%s423_s3] sm:$0x3f]  ;;  %s5689_s3 = scalar_lea.hbm %s6058_s13, %s5673_s29  ;;  %s5699_s0 = scalar_lea.hbm %s6060_s19, %s5673_s29 }
 0x161   : > { %1518 = vmatpush1.bf16.msra.mxu1 %v3757_v52  ;;  %1406 = vmatprep.subr.bf16.mxu0 %v3758_v53 }
 0x162   : > { %1519 = vmatprep.subr.bf16.mxu1 %v3760_v54 }
 0x164   : > { %1407 = vmatpush1.bf16.msra.mxu0 %v3762_v55 }
 0x165   : > { %1520 = vmatpush1.bf16.msra.mxu1 %v3763_v56  ;;  %1408 = vmatprep.subr.bf16.mxu0 %v3764_v57 }
 0x166   : > { %1521 = vmatprep.subr.bf16.mxu1 %v3766_v58 }
 0x168   : > { %1409 = vmatpush1.bf16.msra.mxu0 %v3768_v59 }
 0x169   : > { %1522 = vmatpush1.bf16.msra.mxu1 %v3769_v60  ;;  %1410 = vmatprep.subr.bf16.mxu0 %v3770_v61 }
 0x16a   : > { %1523 = vmatprep.subr.bf16.mxu1 %v3772_v62 }
 0x16c   : > { %1411 = vmatpush1.bf16.msra.mxu0 %v3774_v63 }
 0x16d   : > { %1524 = vmatpush1.bf16.msra.mxu1 %v3775_v0  ;;  %1606 = vmatprep.subr.bf16.mxu0 %v3802_v1 }
 0x16e   : > { %3431 = vmatprep.subr.bf16.mxu1 %v3802_v1 }
 0x16f   : > { %1413 = vmatmul.mubr.bf16.vlgmr.msra.gmra.mrb[0].mxu0 %v5002_v2 }
 0x170   : > { %1526 = vmatmul.mubr.bf16.vlgmr.msra.gmra.mrb[0].mxu1 %v5002_v2  ;;  %1422 = vmatprep.mubr.bf16.mxu0 %v5005_v3 }
 0x171   : > { %1535 = vmatprep.mubr.bf16.mxu1 %v5005_v3  ;;  %1607 = vmatpush1.bf16.msra.mxu0 %v3800_v4 }
 0x172   : > { %3447 = vmatpush1.bf16.msra.mxu1 %v3800_v4  ;;  %1608 = vmatprep.subr.bf16.mxu0 %v3805_v5 }
 0x173   : > { %3432 = vmatprep.subr.bf16.mxu1 %v3805_v5 }
 0x175   : > { %1609 = vmatpush1.bf16.msra.mxu0 %v3803_v6 }
 0x176   : > { %3448 = vmatpush1.bf16.msra.mxu1 %v3803_v6  ;;  %1610 = vmatprep.subr.bf16.mxu0 %v3808_v7 }
 0x177   : > { %3433 = vmatprep.subr.bf16.mxu1 %v3808_v7  ;;  %1423 = vmatmul.mubr.bf16.gmra.mrb[4].mxu0 %v5016_v8 }
 0x178   : > { %1536 = vmatmul.mubr.bf16.gmra.mrb[4].mxu1 %v5016_v8  ;;  %1432 = vmatprep.mubr.bf16.mxu0 %v5019_v9 }
 0x179   : > { %1545 = vmatprep.mubr.bf16.mxu1 %v5019_v9  ;;  %1611 = vmatpush1.bf16.msra.mxu0 %v3806_v10 }
 0x17a   : > { %3449 = vmatpush1.bf16.msra.mxu1 %v3806_v10  ;;  %1612 = vmatprep.subr.bf16.mxu0 %v3811_v11 }
 0x17b   : > { %3434 = vmatprep.subr.bf16.mxu1 %v3811_v11 }
 0x17d   : > { %1613 = vmatpush1.bf16.msra.mxu0 %v3809_v12 }
 0x17e   : > { %3450 = vmatpush1.bf16.msra.mxu1 %v3809_v12  ;;  %1614 = vmatprep.subr.bf16.mxu0 %v3814_v13 }
 0x17f   : > { %3435 = vmatprep.subr.bf16.mxu1 %v3814_v13  ;;  %1433 = vmatmul.mubr.bf16.gmra.mrb[8].mxu0 %v5030_v14 }
 0x180   : > { %1546 = vmatmul.mubr.bf16.gmra.mrb[8].mxu1 %v5030_v14  ;;  %1442 = vmatprep.mubr.bf16.mxu0 %v5033_v15 }
 0x181   : > { %1555 = vmatprep.mubr.bf16.mxu1 %v5033_v15  ;;  %1615 = vmatpush1.bf16.msra.mxu0 %v3812_v16 }
 0x182   : > { %3451 = vmatpush1.bf16.msra.mxu1 %v3812_v16  ;;  %1616 = vmatprep.subr.bf16.mxu0 %v3817_v17 }
 0x183   : > { %3436 = vmatprep.subr.bf16.mxu1 %v3817_v17 }
 0x185   : > { %1617 = vmatpush1.bf16.msra.mxu0 %v3815_v18 }
 0x186   : > { %3452 = vmatpush1.bf16.msra.mxu1 %v3815_v18  ;;  %1618 = vmatprep.subr.bf16.mxu0 %v3820_v19 }
 0x187   : > { %3437 = vmatprep.subr.bf16.mxu1 %v3820_v19  ;;  %1443 = vmatmul.mubr.bf16.gmra.mrb[12].mxu0 %v5044_v20 }
 0x188   : > { %1556 = vmatmul.mubr.bf16.gmra.mrb[12].mxu1 %v5044_v20  ;;  %1452 = vmatprep.mubr.bf16.mxu0 %v5047_v21 }
 0x189   : > { %1565 = vmatprep.mubr.bf16.mxu1 %v5047_v21  ;;  %1619 = vmatpush1.bf16.msra.mxu0 %v3818_v22 }
 0x18a   : > { %3453 = vmatpush1.bf16.msra.mxu1 %v3818_v22  ;;  %1620 = vmatprep.subr.bf16.mxu0 %v3823_v23 }
 0x18b   : > { %3438 = vmatprep.subr.bf16.mxu1 %v3823_v23 }
 0x18d   : > { %1621 = vmatpush1.bf16.msra.mxu0 %v3821_v24 }
 0x18e   : > { %3454 = vmatpush1.bf16.msra.mxu1 %v3821_v24  ;;  %1622 = vmatprep.subr.bf16.mxu0 %v3826_v25 }
 0x18f   : > { %3439 = vmatprep.subr.bf16.mxu1 %v3826_v25  ;;  %1453 = vmatmul.mubr.bf16.gmra.mrb[16].mxu0 %v5058_v26 }
 0x190   : > { %1566 = vmatmul.mubr.bf16.gmra.mrb[16].mxu1 %v5058_v26  ;;  %1462 = vmatprep.mubr.bf16.mxu0 %v5061_v27 }
 0x191   : > { %1575 = vmatprep.mubr.bf16.mxu1 %v5061_v27  ;;  %1623 = vmatpush1.bf16.msra.mxu0 %v3824_v28 }
 0x192   : > { %3455 = vmatpush1.bf16.msra.mxu1 %v3824_v28  ;;  %1624 = vmatprep.subr.bf16.mxu0 %v3829_v29 }
 0x193   : > { %3440 = vmatprep.subr.bf16.mxu1 %v3829_v29 }
 0x195   : > { %1625 = vmatpush1.bf16.msra.mxu0 %v3827_v30 }
 0x196   : > { %3456 = vmatpush1.bf16.msra.mxu1 %v3827_v30  ;;  %1626 = vmatprep.subr.bf16.mxu0 %v3832_v31 }
 0x197   : > { %3441 = vmatprep.subr.bf16.mxu1 %v3832_v31  ;;  %1463 = vmatmul.mubr.bf16.gmra.mrb[20].mxu0 %v3793_v32 }
 0x198   : > { %1576 = vmatmul.mubr.bf16.gmra.mrb[20].mxu1 %v3793_v32  ;;  %1472 = vmatprep.mubr.bf16.mxu0 %v3794_v33 }
 0x199   : > { %1585 = vmatprep.mubr.bf16.mxu1 %v3794_v33  ;;  %1627 = vmatpush1.bf16.msra.mxu0 %v3830_v34 }
 0x19a   : > { %3457 = vmatpush1.bf16.msra.mxu1 %v3830_v34  ;;  %1628 = vmatprep.subr.bf16.mxu0 %v3835_v35 }
 0x19b   : > { %3442 = vmatprep.subr.bf16.mxu1 %v3835_v35 }
 0x19d   : > { %1629 = vmatpush1.bf16.msra.mxu0 %v3833_v36 }
 0x19e   : > { %3458 = vmatpush1.bf16.msra.mxu1 %v3833_v36  ;;  %1630 = vmatprep.subr.bf16.mxu0 %v3838_v37 }
 0x19f   : > { %3443 = vmatprep.subr.bf16.mxu1 %v3838_v37  ;;  %1473 = vmatmul.mubr.bf16.gmra.mrb[24].mxu0 %v3796_v38 }
 0x1a0   : > { %1586 = vmatmul.mubr.bf16.gmra.mrb[24].mxu1 %v3796_v38  ;;  %1482 = vmatprep.mubr.bf16.mxu0 %v3797_v39 }
 0x1a1   : > { %1595 = vmatprep.mubr.bf16.mxu1 %v3797_v39  ;;  %1631 = vmatpush1.bf16.msra.mxu0 %v3836_v40 }
 0x1a2   : > { %3459 = vmatpush1.bf16.msra.mxu1 %v3836_v40  ;;  %1632 = vmatprep.subr.bf16.mxu0 %v3841_v41 }
 0x1a3   : > { %3444 = vmatprep.subr.bf16.mxu1 %v3841_v41 }
 0x1a5   : > { %1633 = vmatpush1.bf16.msra.mxu0 %v3839_v42 }
 0x1a6   : > { %3460 = vmatpush1.bf16.msra.mxu1 %v3839_v42  ;;  %1634 = vmatprep.subr.bf16.mxu0 %v3844_v43 }
 0x1a7   : > { %3445 = vmatprep.subr.bf16.mxu1 %v3844_v43  ;;  %1483 = vmatmul.mubr.bf16.gmra.mrb[28].mxu0 %v3799_v44 }
 0x1a8   : > { %1596 = vmatmul.mubr.bf16.gmra.mrb[28].mxu1 %v3799_v44  ;;  %1638 = vmatprep.mubr.bf16.mxu0 %v4980_v48  ;;  %v2012_v48 = vlaneseq }
 0x1a9   : > { %1678 = vmatprep.mubr.bf16.mxu1 %v5047_v21  ;;  %1635 = vmatpush1.bf16.msra.mxu0 %v3842_v45 }
 0x1aa   : > { %3461 = vmatpush1.bf16.msra.mxu1 %v3842_v45  ;;  %1636 = vmatprep.subr.bf16.mxu0 %v3847_v46  ;;  %v5098_v49 = vshrl.u32 %v2012_v48, 7 }
 0x1ab   : > { %3446 = vmatprep.subr.bf16.mxu1 %v3847_v46 }
 0x1ac   : > { %v2022_v50 = vsub.s32 2, %v5098_v49  ;;  %v5106_v52 = vsub.s32 0, %v5098_v49  ;;  %v5109_v53 = vsub.s32 1, %v5098_v49  ;;  %v2026_v54 = vsub.s32 3, %v5098_v49 }
 0x1ad   : > { %1637 = vmatpush1.bf16.msra.mxu0 %v3845_v47 }
 0x1ae   : > { %3462 = vmatpush1.bf16.msra.mxu1 %v3845_v47  ;;  %v5113_v55 = vrot.slane %v5103_v51, %v2022_v50  ;;  %v5117_v56 = vrot.slane %v5103_v51, %v5106_v52  ;;  %v5121_v57 = vrot.slane %v5103_v51, %v5109_v53  ;;  %v5124_v58 = vrot.slane %v5103_v51, %v2026_v54 }
 0x1b0   : > { %1639 = vmatmul.mubr.bf16.vlgmr.msra.gmra.mrb[32].mxu0 %v5002_v2 }
 0x1b1   : > { %1679 = vmatmul.mubr.bf16.vlgmr.msra.gmra.mrb[32].mxu1 %v5058_v26  ;;  %1648 = vmatprep.mubr.bf16.mxu0 %v5005_v3 }
 0x1b2   : > { %1688 = vmatprep.mubr.bf16.mxu1 %v5061_v27 }
 0x1b8   : > { %1649 = vmatmul.mubr.bf16.gmra.mrb[36].mxu0 %v5016_v8 }
 0x1b9   : > { %1689 = vmatmul.mubr.bf16.gmra.mrb[36].mxu1 %v3793_v32  ;;  %1658 = vmatprep.mubr.bf16.mxu0 %v5019_v9 }
 0x1ba   : > { %1698 = vmatprep.mubr.bf16.mxu1 %v3794_v33 }
 0x1c0   : > { %1659 = vmatmul.mubr.bf16.gmra.mrb[40].mxu0 %v5030_v14 }
 0x1c1   : > { %1699 = vmatmul.mubr.bf16.gmra.mrb[40].mxu1 %v3796_v38  ;;  %1668 = vmatprep.mubr.bf16.mxu0 %v5033_v15 }
 0x1c2   : > { %1708 = vmatprep.mubr.bf16.mxu1 %v3797_v39 }
 0x1c8   : > { %1669 = vmatmul.mubr.bf16.gmra.mrb[44].mxu0 %v5044_v20 }
 0x1c9   : > { %1709 = vmatmul.mubr.bf16.gmra.mrb[44].mxu1 %v3799_v44 }
 0x242   : > { %v1414_v59 = vpop.f32.mrb[0].mxu0 }
 0x243   : > { %v1527_v60 = vpop.f32.mrb[0].mxu1  ;;  %v1416_v62 = vpop.f32.mrb[1].mxu0  ;;  %v5130_v0 = vadd.f32 %v5117_v56, %v1414_v59 }
 0x244   : > { %v5127_v61 = vadd.f32 %v5113_v55, %v1527_v60  ;;  %v1529_v63 = vpop.f32.mrb[1].mxu1  ;;  %v5133_v1 = vadd.f32 %v5121_v57, %v1416_v62  ;;  %v1418_v3 = vpop.f32.mrb[2].mxu0 }
 0x245   : > { %v5136_v2 = vadd.f32 %v5124_v58, %v1529_v63  ;;  %v1531_v4 = vpop.f32.mrb[2].mxu1  ;;  %v5139_v5 = vadd.f32 %v5117_v56, %v1418_v3  ;;  %v1420_v6 = vpop.f32.mrb[3].mxu0  ;;  %v2138_v14 = vmul.f32 %v5130_v0, %v5130_v0 }
 0x246   : > { %v1533_v7 = vpop.f32.mrb[3].mxu1  ;;  %v2299_v8 = vmul.f32 %v5127_v61, %v5127_v61  ;;  %v5144_v9 = vadd.f32 %v5121_v57, %v1420_v6  ;;  %v5149_v11 = vadd.f32 %v5113_v55, %v1531_v4  ;;  %v2139_v15 = vmul.f32 %v5133_v1, %v5133_v1 }
 0x247   : > { %v2300_v10 = vmul.f32 %v5136_v2, %v5136_v2  ;;  %v5152_v12 = vadd.f32 %v5124_v58, %v1533_v7  ;;  %v2140_v13 = vmul.f32 %v5139_v5, %v5139_v5 }
 0x248   : > { %v2141_v17 = vmul.f32 %v5144_v9, %v5144_v9  ;;  %v2301_v21 = vmul.f32 %v5149_v11, %v5149_v11  ;;  %v2170_v29 = vadd.f32 %v2139_v15, %v2138_v14 }
 0x249   : > { %v2331_v16 = vadd.f32 %v2300_v10, %v2299_v8  ;;  %v2302_v22 = vmul.f32 %v5152_v12, %v5152_v12 }
 0x24a   : > { %v2173_v19 = vadd.f32 %v2141_v17, %v2140_v13  ;;  %v1424_v20 = vpop.f32.mrb[4].mxu0 }
 0x24b   : > { %2332 = vadd.xlane.f32.xlu0 %v2331_v16  ;;  %v1537_v18 = vpop.f32.mrb[4].mxu1  ;;  %v5170_v25 = vadd.f32 %v5117_v56, %v1424_v20  ;;  %v1426_v26 = vpop.f32.mrb[5].mxu0  ;;  %v2334_v41 = vadd.f32 %v2302_v22, %v2301_v21 }
 0x24c   : > { %v5167_v23 = vadd.f32 %v5113_v55, %v1537_v18  ;;  %v1539_v24 = vpop.f32.mrb[5].mxu1  ;;  %2174 = vadd.xlane.f32.xlu1 %v2173_v19  ;;  %v5176_v30 = vadd.f32 %v5121_v57, %v1426_v26  ;;  %v1428_v31 = vpop.f32.mrb[6].mxu0 }
 0x24d   : > { %v5173_v27 = vadd.f32 %v5124_v58, %v1539_v24  ;;  %v1541_v28 = vpop.f32.mrb[6].mxu1  ;;  %v1430_v35 = vpop.f32.mrb[7].mxu0  ;;  %v2142_v37 = vmul.f32 %v5170_v25, %v5170_v25  ;;  %v5193_v40 = vadd.f32 %v5117_v56, %v1428_v31 }
 0x24e   : > { %v2303_v32 = vmul.f32 %v5167_v23, %v5167_v23  ;;  %v5181_v33 = vadd.f32 %v5113_v55, %v1541_v28  ;;  %v1543_v34 = vpop.f32.mrb[7].mxu1  ;;  %v2143_v39 = vmul.f32 %v5176_v30, %v5176_v30  ;;  %v5200_v44 = vadd.f32 %v5121_v57, %v1430_v35 }
 0x24f   : > { %v2304_v36 = vmul.f32 %v5173_v27, %v5173_v27  ;;  %v5188_v38 = vadd.f32 %v5124_v58, %v1543_v34  ;;  %2171 = vadd.xlane.f32.xlu0 %v2170_v29  ;;  %v2144_v50 = vmul.f32 %v5193_v40, %v5193_v40 }
 0x250   : > { %v2305_v42 = vmul.f32 %v5181_v33, %v5181_v33  ;;  %v2176_v48 = vadd.f32 %v2143_v39, %v2142_v37  ;;  %v2145_v63 = vmul.f32 %v5200_v44, %v5200_v44 }
 0x251   : > { %v2306_v43 = vmul.f32 %v5188_v38, %v5188_v38  ;;  %v2337_v45 = vadd.f32 %v2304_v36, %v2303_v32 }
 0x252   : > { %v1434_v47 = vpop.f32.mrb[8].mxu0  ;;  %v2179_v28 = vadd.f32 %v2145_v63, %v2144_v50 }
 0x253   : > { %v1547_v46 = vpop.f32.mrb[8].mxu1  ;;  %2335 = vadd.xlane.f32.xlu0 %v2334_v41  ;;  %2338 = vadd.xlane.f32.xlu1 %v2337_v45  ;;  %v5208_v60 = vadd.f32 %v5117_v56, %v1434_v47  ;;  %v1436_v62 = vpop.f32.mrb[9].mxu0  ;;  %v2340_v6 = vadd.f32 %v2306_v43, %v2305_v42 }
 0x254   : > { %v5205_v54 = vadd.f32 %v5113_v55, %v1547_v46  ;;  %v1549_v59 = vpop.f32.mrb[9].mxu1  ;;  %v5216_v7 = vadd.f32 %v5121_v57, %v1436_v62  ;;  %v1438_v8 = vpop.f32.mrb[10].mxu0 }
 0x255   : > { %v5213_v3 = vadd.f32 %v5124_v58, %v1549_v59  ;;  %v1551_v4 = vpop.f32.mrb[10].mxu1  ;;  %v2146_v14 = vmul.f32 %v5208_v60, %v5208_v60  ;;  %v1440_v16 = vpop.f32.mrb[11].mxu0  ;;  %v5233_v20 = vadd.f32 %v5117_v56, %v1438_v8 }
 0x256   : > { %v2307_v10 = vmul.f32 %v5205_v54, %v5205_v54  ;;  %v5221_v13 = vadd.f32 %v5113_v55, %v1551_v4  ;;  %v1553_v15 = vpop.f32.mrb[11].mxu1  ;;  %v2147_v19 = vmul.f32 %v5216_v7, %v5216_v7  ;;  %v5236_v21 = vadd.f32 %v5121_v57, %v1440_v16 }
 0x257   : > { %v2308_v17 = vmul.f32 %v5213_v3, %v5213_v3  ;;  %v5228_v18 = vadd.f32 %v5124_v58, %v1553_v15  ;;  %2341 = vadd.xlane.f32.xlu1 %v2340_v6  ;;  %2177 = vadd.xlane.f32.xlu0 %v2176_v48  ;;  %v2148_v34 = vmul.f32 %v5233_v20, %v5233_v20 }
 0x258   : > { %v2309_v22 = vmul.f32 %v5221_v13, %v5221_v13  ;;  %v2182_v32 = vadd.f32 %v2147_v19, %v2146_v14  ;;  %v2149_v35 = vmul.f32 %v5236_v21, %v5236_v21 }
 0x259   : > { %v2310_v24 = vmul.f32 %v5228_v18, %v5228_v18  ;;  %v2343_v26 = vadd.f32 %v2308_v17, %v2307_v10 }
 0x25a   : > { %v1444_v31 = vpop.f32.mrb[12].mxu0  ;;  %v2185_v14 = vadd.f32 %v2149_v35, %v2148_v34 }
 0x25b   : > { %v1557_v29 = vpop.f32.mrb[12].mxu1  ;;  %2344 = vadd.xlane.f32.xlu0 %v2343_v26  ;;  %2180 = vadd.xlane.f32.xlu1 %v2179_v28  ;;  %v5250_v39 = vadd.f32 %v5117_v56, %v1444_v31  ;;  %v1446_v41 = vpop.f32.mrb[13].mxu0  ;;  %v2346_v45 = vadd.f32 %v2310_v24, %v2309_v22 }
 0x25c   : > { %v5247_v36 = vadd.f32 %v5113_v55, %v1557_v29  ;;  %v1559_v37 = vpop.f32.mrb[13].mxu1  ;;  %v5256_v46 = vadd.f32 %v5121_v57, %v1446_v41  ;;  %v1448_v47 = vpop.f32.mrb[14].mxu0 }
 0x25d   : > { %v5253_v42 = vadd.f32 %v5124_v58, %v1559_v37  ;;  %v1561_v43 = vpop.f32.mrb[14].mxu1  ;;  %v2150_v59 = vmul.f32 %v5250_v39, %v5250_v39  ;;  %v1450_v63 = vpop.f32.mrb[15].mxu0  ;;  %v5273_v10 = vadd.f32 %v5117_v56, %v1448_v47 }
 0x25e   : > { %v2311_v48 = vmul.f32 %v5247_v36, %v5247_v36  ;;  %v5261_v50 = vadd.f32 %v5113_v55, %v1561_v43  ;;  %v1563_v62 = vpop.f32.mrb[15].mxu1  ;;  %v2151_v8 = vmul.f32 %v5256_v46, %v5256_v46  ;;  %v5280_v17 = vadd.f32 %v5121_v57, %v1450_v63 }
 0x25f   : > { %v2312_v4 = vmul.f32 %v5253_v42, %v5253_v42  ;;  %v5268_v6 = vadd.f32 %v5124_v58, %v1563_v62  ;;  %2347 = vadd.xlane.f32.xlu1 %v2346_v45  ;;  %2183 = vadd.xlane.f32.xlu0 %v2182_v32  ;;  %v2152_v28 = vmul.f32 %v5273_v10, %v5273_v10 }
 0x260   : > { %v2313_v15 = vmul.f32 %v5261_v50, %v5261_v50  ;;  %v2188_v26 = vadd.f32 %v2151_v8, %v2150_v59  ;;  %v2153_v35 = vmul.f32 %v5280_v17, %v5280_v17 }
 0x261   : > { %v2314_v16 = vmul.f32 %v5268_v6, %v5268_v6  ;;  %v2349_v19 = vadd.f32 %v2312_v4, %v2311_v48 }
 0x262   : > { %v1454_v24 = vpop.f32.mrb[16].mxu0 }
 0x263   : > { %v1567_v22 = vpop.f32.mrb[16].mxu1  ;;  %2350 = vadd.xlane.f32.xlu0 %v2349_v19  ;;  %2186 = vadd.xlane.f32.xlu1 %v2185_v14  ;;  %v5288_v32 = vadd.f32 %v5117_v56, %v1454_v24  ;;  %v1456_v34 = vpop.f32.mrb[17].mxu0  ;;  %v2352_v43 = vadd.f32 %v2314_v16, %v2313_v15 }
 0x264   : > { %v5285_v29 = vadd.f32 %v5113_v55, %v1567_v22  ;;  %v1569_v31 = vpop.f32.mrb[17].mxu1  ;;  %v5296_v45 = vadd.f32 %v5121_v57, %v1456_v34  ;;  %v1458_v47 = vpop.f32.mrb[18].mxu0  ;;  %v2191_v34 = vadd.f32 %v2153_v35, %v2152_v28 }
 0x265   : > { %6007 = vst [vmem:[#allocation51_spill] sm:$0xff] %v5288_v32  ;;  %v5293_v37 = vadd.f32 %v5124_v58, %v1569_v31  ;;  %v1571_v41 = vpop.f32.mrb[18].mxu1  ;;  %v2154_v62 = vmul.f32 %v5288_v32, %v5288_v32  ;;  %v1460_v4 = vpop.f32.mrb[19].mxu0  ;;  %v5313_v16 = vadd.f32 %v5117_v56, %v1458_v47 }
 0x266   : > { %6008 = vst [vmem:[#allocation52_spill] sm:$0xff] %v5296_v45  ;;  %v2315_v48 = vmul.f32 %v5285_v29, %v5285_v29  ;;  %v5301_v59 = vadd.f32 %v5113_v55, %v1571_v41  ;;  %v1573_v63 = vpop.f32.mrb[19].mxu1  ;;  %v2155_v15 = vmul.f32 %v5296_v45, %v5296_v45  ;;  %v5316_v19 = vadd.f32 %v5121_v57, %v1460_v4 }
 0x267   : > { %v2316_v8 = vmul.f32 %v5293_v37, %v5293_v37  ;;  %v5308_v14 = vadd.f32 %v5124_v58, %v1573_v63  ;;  %2353 = vadd.xlane.f32.xlu1 %v2352_v43  ;;  %2189 = vadd.xlane.f32.xlu0 %v2188_v26  ;;  %6010 = vst [vmem:[#allocation54_spill] sm:$0xff] %v5313_v16 }
 0x268   : > { %6011 = vst [vmem:[#allocation55_spill] sm:$0xff] %v5316_v19  ;;  %v2317_v22 = vmul.f32 %v5301_v59, %v5301_v59  ;;  %v2194_v43 = vadd.f32 %v2155_v15, %v2154_v62  ;;  %v2156_v47 = vmul.f32 %v5313_v16, %v5313_v16  ;;  %v2157_v63 = vmul.f32 %v5316_v19, %v5316_v19 }
 0x269   : > { %6009 = vst [vmem:[#allocation53_spill] sm:$0xff] %v5308_v14  ;;  %v2318_v24 = vmul.f32 %v5308_v14, %v5308_v14  ;;  %v2355_v31 = vadd.f32 %v2316_v8, %v2315_v48 }
 0x26a   : > { %v1464_v26 = vpop.f32.mrb[20].mxu0 }
 0x26b   : > { %v1577_v41 = vpop.f32.mrb[20].mxu1  ;;  %2356 = vadd.xlane.f32.xlu0 %v2355_v31  ;;  %2192 = vadd.xlane.f32.xlu1 %v2191_v34  ;;  %v5330_v32 = vadd.f32 %v5117_v56, %v1464_v26  ;;  %v1466_v48 = vpop.f32.mrb[21].mxu0  ;;  %v2358_v8 = vadd.f32 %v2318_v24, %v2317_v22 }
 0x26c   : > { %v5327_v4 = vadd.f32 %v5113_v55, %v1577_v41  ;;  %v1579_v45 = vpop.f32.mrb[21].mxu1  ;;  %v5336_v62 = vadd.f32 %v5121_v57, %v1466_v48  ;;  %v1468_v15 = vpop.f32.mrb[22].mxu0 }
 0x26d   : > { %6013 = vst [vmem:[#allocation57_spill] sm:$0xff] %v5330_v32  ;;  %v5333_v28 = vadd.f32 %v5124_v58, %v1579_v45  ;;  %v1581_v35 = vpop.f32.mrb[22].mxu1  ;;  %v2158_v41 = vmul.f32 %v5330_v32, %v5330_v32  ;;  %v1470_v19 = vpop.f32.mrb[23].mxu0  ;;  %v5353_v48 = vadd.f32 %v5117_v56, %v1468_v15 }
 0x26e   : > { %6012 = vst [vmem:[#allocation56_spill] sm:$0xff] %v5327_v4  ;;  %6015 = vst [vmem:[#allocation59_spill] sm:$0xff] %v5336_v62  ;;  %v2319_v31 = vmul.f32 %v5327_v4, %v5327_v4  ;;  %v5341_v34 = vadd.f32 %v5113_v55, %v1581_v35  ;;  %v1583_v26 = vpop.f32.mrb[23].mxu1  ;;  %v2159_v24 = vmul.f32 %v5336_v62, %v5336_v62 }
 0x26f   : > { %6014 = vst [vmem:[#allocation58_spill] sm:$0xff] %v5333_v28  ;;  %v2320_v45 = vmul.f32 %v5333_v28, %v5333_v28  ;;  %v5348_v22 = vadd.f32 %v5124_v58, %v1583_v26  ;;  %2359 = vadd.xlane.f32.xlu1 %v2358_v8  ;;  %2195 = vadd.xlane.f32.xlu0 %v2194_v43  ;;  %6018 = vst [vmem:[#allocation62_spill] sm:$0xff] %v5353_v48 }
 0x270   : > { %6016 = vst [vmem:[#allocation60_spill] sm:$0xff] %v5341_v34  ;;  %v2197_v35 = vadd.f32 %v2157_v63, %v2156_v47  ;;  %v2321_v32 = vmul.f32 %v5341_v34, %v5341_v34  ;;  %v5360_v28 = vadd.f32 %v5121_v57, %v1470_v19  ;;  %v2200_v8 = vadd.f32 %v2159_v24, %v2158_v41 }
 0x271   : > { %6017 = vst [vmem:[#allocation61_spill] sm:$0xff] %v5348_v22  ;;  %v2322_v16 = vmul.f32 %v5348_v22, %v5348_v22  ;;  %v2361_v26 = vadd.f32 %v2320_v45, %v2319_v31  ;;  %v2160_v15 = vmul.f32 %v5353_v48, %v5353_v48 }
 0x272   : > { %6019 = vst [vmem:[#allocation63_spill] sm:$0xff] %v5360_v28  ;;  %v1474_v43 = vpop.f32.mrb[24].mxu0  ;;  %v2161_v19 = vmul.f32 %v5360_v28, %v5360_v28 }
 0x273   : > { %v1587_v4 = vpop.f32.mrb[24].mxu1  ;;  %2362 = vadd.xlane.f32.xlu0 %v2361_v26  ;;  %2198 = vadd.xlane.f32.xlu1 %v2197_v35  ;;  %v5368_v62 = vadd.f32 %v5117_v56, %v1474_v43  ;;  %v1476_v22 = vpop.f32.mrb[25].mxu0  ;;  %v2364_v35 = vadd.f32 %v2322_v16, %v2321_v32 }
 0x274   : > { %v5365_v47 = vadd.f32 %v5113_v55, %v1587_v4  ;;  %v1589_v63 = vpop.f32.mrb[25].mxu1  ;;  %v5376_v41 = vadd.f32 %v5121_v57, %v1476_v22  ;;  %v1478_v24 = vpop.f32.mrb[26].mxu0 }
 0x275   : > { %6021 = vst [vmem:[#allocation65_spill] sm:$0xff] %v5368_v62  ;;  %v5373_v31 = vadd.f32 %v5124_v58, %v1589_v63  ;;  %v1591_v45 = vpop.f32.mrb[26].mxu1  ;;  %v2162_v43 = vmul.f32 %v5368_v62, %v5368_v62  ;;  %v1480_v28 = vpop.f32.mrb[27].mxu0  ;;  %v5393_v22 = vadd.f32 %v5117_v56, %v1478_v24 }
 0x276   : > { %6020 = vst [vmem:[#allocation64_spill] sm:$0xff] %v5365_v47  ;;  %6023 = vst [vmem:[#allocation67_spill] sm:$0xff] %v5376_v41  ;;  %v2323_v4 = vmul.f32 %v5365_v47, %v5365_v47  ;;  %v5381_v26 = vadd.f32 %v5113_v55, %v1591_v45  ;;  %v1593_v48 = vpop.f32.mrb[27].mxu1  ;;  %v2163_v16 = vmul.f32 %v5376_v41, %v5376_v41 }
 0x277   : > { %6022 = vst [vmem:[#allocation66_spill] sm:$0xff] %v5373_v31  ;;  %v2324_v63 = vmul.f32 %v5373_v31, %v5373_v31  ;;  %v5388_v32 = vadd.f32 %v5124_v58, %v1593_v48  ;;  %2365 = vadd.xlane.f32.xlu1 %v2364_v35  ;;  %2201 = vadd.xlane.f32.xlu0 %v2200_v8  ;;  %6025 = vst [vmem:[#allocation69_spill] sm:$0xff] %v5393_v22 }
 0x278   : > { %6024 = vst [vmem:[#allocation68_spill] sm:$0xff] %v5381_v26  ;;  %v5396_v45 = vadd.f32 %v5121_v57, %v1480_v28  ;;  %v2325_v62 = vmul.f32 %v5381_v26, %v5381_v26  ;;  %v2203_v48 = vadd.f32 %v2161_v19, %v2160_v15  ;;  %v2206_v35 = vadd.f32 %v2163_v16, %v2162_v43 }
 0x279   : > { %v2326_v31 = vmul.f32 %v5388_v32, %v5388_v32  ;;  %v2367_v47 = vadd.f32 %v2324_v63, %v2323_v4  ;;  %v2164_v24 = vmul.f32 %v5393_v22, %v5393_v22 }
 0x27a   : > { %6026 = vst [vmem:[#allocation70_spill] sm:$0xff] %v5396_v45  ;;  %v1484_v8 = vpop.f32.mrb[28].mxu0  ;;  %v2165_v28 = vmul.f32 %v5396_v45, %v5396_v45 }
 0x27b   : > { %v1597_v34 = vpop.f32.mrb[28].mxu1  ;;  %2368 = vadd.xlane.f32.xlu0 %v2367_v47  ;;  %2204 = vadd.xlane.f32.xlu1 %v2203_v48  ;;  %v5410_v14 = vadd.f32 %v5117_v56, %v1484_v8  ;;  %v1486_v4 = vpop.f32.mrb[29].mxu0  ;;  %v2370_v19 = vadd.f32 %v2326_v31, %v2325_v62 }
 0x27c   : > { %v5407_v41 = vadd.f32 %v5113_v55, %v1597_v34  ;;  %v1599_v26 = vpop.f32.mrb[29].mxu1  ;;  %v5416_v43 = vadd.f32 %v5121_v57, %v1486_v4  ;;  %v1488_v63 = vpop.f32.mrb[30].mxu0 }
 0x27d   : > { %6027 = vst [vmem:[#allocation71_spill] sm:$0xff] %v5410_v14  ;;  %v5413_v15 = vadd.f32 %v5124_v58, %v1599_v26  ;;  %v1601_v47 = vpop.f32.mrb[30].mxu1  ;;  %v2166_v48 = vmul.f32 %v5410_v14, %v5410_v14  ;;  %v1490_v45 = vpop.f32.mrb[31].mxu0  ;;  %v5433_v4 = vadd.f32 %v5117_v56, %v1488_v63 }
 0x27e   : > { %6028 = vst [vmem:[#allocation72_spill] sm:$0xff] %v5416_v43  ;;  %v2327_v16 = vmul.f32 %v5407_v41, %v5407_v41  ;;  %v5421_v34 = vadd.f32 %v5113_v55, %v1601_v47  ;;  %v1603_v8 = vpop.f32.mrb[31].mxu1  ;;  %v2167_v31 = vmul.f32 %v5416_v43, %v5416_v43  ;;  %v2209_v55 = vadd.f32 %v2165_v28, %v2164_v24 }
 0x27f   : > { %v2328_v26 = vmul.f32 %v5413_v15, %v5413_v15  ;;  %v5428_v62 = vadd.f32 %v5124_v58, %v1603_v8  ;;  %2371 = vadd.xlane.f32.xlu1 %v2370_v19  ;;  %2207 = vadd.xlane.f32.xlu0 %v2206_v35  ;;  %6030 = vst [vmem:[#allocation74_spill] sm:$0xff] %v5433_v4  ;;  %v2030_v8 = vsub.s32 4, %v5098_v49 }
 0x280   : > { %v2329_v47 = vmul.f32 %v5421_v34, %v5421_v34  ;;  %v5440_v22 = vadd.f32 %v5121_v57, %v1490_v45  ;;  %v2212_v35 = vadd.f32 %v2167_v31, %v2166_v48  ;;  %v2168_v19 = vmul.f32 %v5433_v4, %v5433_v4 }
 0x281   : > { %6029 = vst [vmem:[#allocation73_spill] sm:$0xff] %v5428_v62  ;;  %v2330_v14 = vmul.f32 %v5428_v62, %v5428_v62  ;;  %v2373_v58 = vadd.f32 %v2328_v26, %v2327_v16  ;;  %v2034_v45 = vsub.s32 5, %v5098_v49  ;;  %v5449_v48 = vrot.slane %v5103_v51, %v2030_v8 }
 0x282   : > { %6031 = vst [vmem:[#allocation75_spill] sm:$0xff] %v5440_v22  ;;  %v2169_v56 = vmul.f32 %v5440_v22, %v5440_v22 }
 0x283   : > { %2374 = vadd.xlane.f32.xlu0 %v2373_v58  ;;  %2210 = vadd.xlane.f32.xlu1 %v2209_v55  ;;  %v2376_v24 = vadd.f32 %v2330_v14, %v2329_v47  ;;  %v1640_v63 = vpop.f32.mrb[32].mxu0  ;;  %v5452_v31 = vrot.slane %v5103_v51, %v2034_v45 }
 0x284   : > { %v2215_v28 = vadd.f32 %v2169_v56, %v2168_v19  ;;  %v1680_v57 = vpop.f32.mrb[32].mxu1  ;;  %v1642_v26 = vpop.f32.mrb[33].mxu0 }
 0x285   : > { %v1682_v16 = vpop.f32.mrb[33].mxu1  ;;  %v1644_v55 = vpop.f32.mrb[34].mxu0  ;;  %v2094_v19 = vadd.f32 %v5449_v48, %v1680_v57  ;;  %v2047_v49 = vadd.f32 %v5452_v31, %v1642_v26 }
 0x286   : > { %v1684_v14 = vpop.f32.mrb[34].mxu1  ;;  %v1646_v47 = vpop.f32.mrb[35].mxu0  ;;  %v2095_v56 = vadd.f32 %v5452_v31, %v1682_v16 }
 0x287   : > { %2377 = vadd.xlane.f32.xlu1 %v2376_v24  ;;  %2213 = vadd.xlane.f32.xlu0 %v2212_v35  ;;  %v1686_v58 = vpop.f32.mrb[35].mxu1  ;;  %v2046_v35 = vadd.f32 %v5449_v48, %v1640_v63  ;;  %v2052_v24 = vadd.f32 %v5449_v48, %v1644_v55  ;;  %v2053_v51 = vadd.f32 %v5452_v31, %v1646_v47 }
 0x288   : > { %v2101_v8 = vadd.f32 %v5452_v31, %v1686_v58  ;;  %v3417_v45 = vpack.c.bf16 %v2095_v56, %v2094_v19 }
 0x289   : > { %v3409_v22 = vpack.c.bf16 %v2047_v49, %v2046_v35  ;;  %v3410_v4 = vpack.c.bf16 %v2053_v51, %v2052_v24 }
 0x28a   : > { %2875 = vst [vmem:[%s5463_s24 + $0x40] sm:$0xff] %v3417_v45 }
 0x28b   : > { %2216 = vadd.xlane.f32.xlu1 %v2215_v28  ;;  %v2100_v28 = vadd.f32 %v5449_v48, %v1684_v14  ;;  %2867 = vst [vmem:[%s5463_s24] sm:$0xff] %v3409_v22  ;;  %v1650_v63 = vpop.f32.mrb[36].mxu0  ;;  %2868 = vst [vmem:[%s5463_s24 + $0x8] sm:$0xff] %v3410_v4 }
 0x28c   : > { %v1690_v57 = vpop.f32.mrb[36].mxu1  ;;  %v1652_v26 = vpop.f32.mrb[37].mxu0  ;;  %v2058_v35 = vadd.f32 %v5449_v48, %v1650_v63 }
 0x28d   : > { %v3418_v43 = vpack.c.bf16 %v2101_v8, %v2100_v28  ;;  %v1692_v16 = vpop.f32.mrb[37].mxu1  ;;  %v1654_v55 = vpop.f32.mrb[38].mxu0  ;;  %v2106_v19 = vadd.f32 %v5449_v48, %v1690_v57  ;;  %v2059_v56 = vadd.f32 %v5452_v31, %v1652_v26 }
 0x28e   : > { %v1694_v14 = vpop.f32.mrb[38].mxu1  ;;  %v1656_v47 = vpop.f32.mrb[39].mxu0  ;;  %v2107_v22 = vadd.f32 %v5452_v31, %v1692_v16 }
 0x28f   : > { %2876 = vst [vmem:[%s5463_s24 + $0x48] sm:$0xff] %v3418_v43  ;;  %v1696_v58 = vpop.f32.mrb[39].mxu1  ;;  %v2064_v43 = vadd.f32 %v5449_v48, %v1654_v55  ;;  %v2112_v4 = vadd.f32 %v5449_v48, %v1694_v14  ;;  %v2065_v49 = vadd.f32 %v5452_v31, %v1656_v47  ;;  %v3411_v51 = vpack.c.bf16 %v2059_v56, %v2058_v35 }
 0x290   : > { %v2113_v24 = vadd.f32 %v5452_v31, %v1696_v58  ;;  %v3419_v28 = vpack.c.bf16 %v2107_v22, %v2106_v19 }
 0x291   : > { %v3412_v8 = vpack.c.bf16 %v2065_v49, %v2064_v43  ;;  %2869 = vst [vmem:[%s5463_s24 + $0x10] sm:$0xff] %v3411_v51 }
 0x292   : > { %v3420_v45 = vpack.c.bf16 %v2113_v24, %v2112_v4  ;;  %2877 = vst [vmem:[%s5463_s24 + $0x50] sm:$0xff] %v3419_v28 }
 0x293   : > { %v1660_v63 = vpop.f32.mrb[40].mxu0  ;;  %2870 = vst [vmem:[%s5463_s24 + $0x18] sm:$0xff] %v3412_v8 }
 0x294   : > { %v1700_v57 = vpop.f32.mrb[40].mxu1  ;;  %2878 = vst [vmem:[%s5463_s24 + $0x58] sm:$0xff] %v3420_v45  ;;  %v1662_v16 = vpop.f32.mrb[41].mxu0  ;;  %v2070_v58 = vadd.f32 %v5449_v48, %v1660_v63 }
 0x295   : > { %v1702_v26 = vpop.f32.mrb[41].mxu1  ;;  %v1664_v62 = vpop.f32.mrb[42].mxu0  ;;  %v2118_v35 = vadd.f32 %v5449_v48, %v1700_v57  ;;  %v2071_v19 = vadd.f32 %v5452_v31, %v1662_v16 }
 0x296   : > { %v1704_v55 = vpop.f32.mrb[42].mxu1  ;;  %v1666_v14 = vpop.f32.mrb[43].mxu0  ;;  %v2119_v22 = vadd.f32 %v5452_v31, %v1702_v26  ;;  %v2076_v56 = vadd.f32 %v5449_v48, %v1664_v62 }
 0x297   : > { %v1706_v47 = vpop.f32.mrb[43].mxu1  ;;  %v2124_v43 = vadd.f32 %v5449_v48, %v1704_v55  ;;  %v2077_v4 = vadd.f32 %v5452_v31, %v1666_v14  ;;  %v3413_v24 = vpack.c.bf16 %v2071_v19, %v2070_v58 }
 0x298   : > { %v2125_v49 = vadd.f32 %v5452_v31, %v1706_v47  ;;  %v3421_v28 = vpack.c.bf16 %v2119_v22, %v2118_v35 }
 0x299   : > { %v3414_v51 = vpack.c.bf16 %v2077_v4, %v2076_v56  ;;  %2871 = vst [vmem:[%s5463_s24 + $0x20] sm:$0xff] %v3413_v24 }
 0x29a   : > { %v3422_v8 = vpack.c.bf16 %v2125_v49, %v2124_v43  ;;  %2879 = vst [vmem:[%s5463_s24 + $0x60] sm:$0xff] %v3421_v28 }
 0x29b   : > { %v1670_v45 = vpop.f32.mrb[44].mxu0  ;;  %2872 = vst [vmem:[%s5463_s24 + $0x28] sm:$0xff] %v3414_v51 }
 0x29c   : > { %v1710_v63 = vpop.f32.mrb[44].mxu1  ;;  %2880 = vst [vmem:[%s5463_s24 + $0x68] sm:$0xff] %v3422_v8  ;;  %v1672_v57 = vpop.f32.mrb[45].mxu0  ;;  %v2082_v47 = vadd.f32 %v5449_v48, %v1670_v45 }
 0x29d   : > { %v1712_v16 = vpop.f32.mrb[45].mxu1  ;;  %v1674_v26 = vpop.f32.mrb[46].mxu0  ;;  %v2130_v58 = vadd.f32 %v5449_v48, %v1710_v63  ;;  %v2083_v35 = vadd.f32 %v5452_v31, %v1672_v57 }
 0x29e   : > { %v1714_v62 = vpop.f32.mrb[46].mxu1  ;;  %v1676_v55 = vpop.f32.mrb[47].mxu0  ;;  %v2131_v19 = vadd.f32 %v5452_v31, %v1712_v16  ;;  %v2088_v22 = vadd.f32 %v5449_v48, %v1674_v26 }
 0x29f   : > { %v1716_v14 = vpop.f32.mrb[47].mxu1  ;;  %v2136_v56 = vadd.f32 %v5449_v48, %v1714_v62  ;;  %v2089_v43 = vadd.f32 %v5452_v31, %v1676_v55  ;;  %v3415_v49 = vpack.c.bf16 %v2083_v35, %v2082_v47  ;;  %v2615_v35 = vld [vmem:[%s441_s7] sm:$0x3]  ;;  %s4072_s7 = scalar_lea.vmem %s5691_s26, 2048 }
 0x2a0   : > { %v2137_v4 = vadd.f32 %v5452_v31, %v1716_v14  ;;  %v3423_v24 = vpack.c.bf16 %v2131_v19, %v2130_v58  ;;  %p4073_p13 = scmp.ne.s32.totalorder %s5691_s26, %s4072_s7 }
 0x2a1   : > { %v3416_v28 = vpack.c.bf16 %v2089_v43, %v2088_v22  ;;  %2873 = vst [vmem:[%s5463_s24 + $0x30] sm:$0xff] %v3415_v49 }
 0x2a2   : > { %v3424_v51 = vpack.c.bf16 %v2137_v4, %v2136_v56  ;;  %2881 = vst [vmem:[%s5463_s24 + $0x70] sm:$0xff] %v3423_v24  ;;  %v2459_v4 = vld [vmem:[%s432_s2] sm:$0x3]  ;;  %s6061_s2 = smov %s6060_s19  ;;  %p4074_p11 = pnand %p4073_p13, %p6062_p6 }
 0x2a3   : > { %2874 = vst [vmem:[%s5463_s24 + $0x38] sm:$0xff] %v3416_v28  ;;  %v5510_v28 = vrot.slane %v2615_v35, %v5106_v52 }
 0x2a4   : > { %2882 = vst [vmem:[%s5463_s24 + $0x78] sm:$0xff] %v3424_v51  ;;  %v5513_v51 = vrot.slane %v2615_v35, %v5109_v53  ;;  %p4075_p10 = pneg %p4074_p11  ;;  %s4340_s24 = smov [#allocation15]  }
 0x2a5   : > { %s4076_s23 = sshll.u32 %s4340_s24, 4  ;;  %s4077_s23 = int_to_ptr.vmem [resolvable:$false] %s4076_s23 }
 0x2a6   : > { %s4078_s6 = scalar_lea.vmem %s4077_s23, 4096  ;;  %p4079_p4 = scmp.lt.s32.totalorder %s5691_s26, %s4077_s23 }
 0x2a7   : > { %p4080_p7 = scmp.lt.s32.totalorder %s4078_s6, %s4072_s7 }
 0x2a9   : > { %p4081_p2 = por %p4080_p7, %p4079_p4 }
 0x2ab   : > { %p4082_p5 = pnand %p4081_p2, %p4075_p10 }
 0x2d8   : > { %v2333_v8 = vpop.xlane.xlu0 %2332 }
 0x2d9   : > { %v2379_v45 = vmul.f32 0.00390625, %v2333_v8  ;;  %v2175_v63 = vpop.xlane.xlu1 %2174 }
 0x2da   : > { %v2220_v16 = vmul.f32 0.00390625, %v2175_v63 }
 0x2db   : > { %v2395_v57 = vadd.f32 1e-05, %v2379_v45 }
 0x2dc   : > { %v2172_v26 = vpop.xlane.xlu0 %2171  ;;  %v2236_v48 = vadd.f32 1e-05, %v2220_v16 }
 0x2dd   : > { %3848 = vrsqrt.f32 %v2395_v57  ;;  %v2219_v62 = vmul.f32 0.00390625, %v2172_v26  ;;  %v5518_v26 = vrot.slane %v2459_v4, %v5106_v52 }
 0x2de   : > { %3850 = vrsqrt.f32 %v2236_v48  ;;  %v5521_v48 = vrot.slane %v2459_v4, %v5109_v53 }
 0x2df   : > { %v2235_v31 = vadd.f32 1e-05, %v2219_v62 }
 0x2e0   : > { %v2336_v55 = vpop.xlane.xlu0 %2335  ;;  %v2339_v14 = vpop.xlane.xlu1 %2338 }
 0x2e1   : > { %3852 = vrsqrt.f32 %v2235_v31  ;;  %v2380_v47 = vmul.f32 0.00390625, %v2336_v55  ;;  %v2381_v58 = vmul.f32 0.00390625, %v2339_v14 }
 0x2e3   : > { %v2396_v19 = vadd.f32 1e-05, %v2380_v47  ;;  %v2397_v22 = vadd.f32 1e-05, %v2381_v58 }
 0x2e4   : > { %v2342_v56 = vpop.xlane.xlu1 %2341  ;;  %v2178_v43 = vpop.xlane.xlu0 %2177 }
 0x2e5   : > { %3854 = vrsqrt.f32 %v2396_v19  ;;  %v2382_v49 = vmul.f32 0.00390625, %v2342_v56  ;;  %v2221_v24 = vmul.f32 0.00390625, %v2178_v43 }
 0x2e6   : > { %3856 = vrsqrt.f32 %v2397_v22 }
 0x2e7   : > { %v3849_v8 = vpop.eup %3848  ;;  %v2398_v45 = vadd.f32 1e-05, %v2382_v49  ;;  %v2237_v63 = vadd.f32 1e-05, %v2221_v24 }
 0x2e8   : > { %v2427_v57 = vmul.f32 %v3849_v8, %v5127_v61  ;;  %v2428_v16 = vmul.f32 %v3849_v8, %v5136_v2  ;;  %v2345_v62 = vpop.xlane.xlu0 %2344  ;;  %v2181_v31 = vpop.xlane.xlu1 %2180 }
 0x2e9   : > { %v3851_v55 = vpop.eup %3850  ;;  %3858 = vrsqrt.f32 %v2398_v45  ;;  %v2383_v14 = vmul.f32 0.00390625, %v2345_v62  ;;  %v2222_v47 = vmul.f32 0.00390625, %v2181_v31 }
 0x2ea   : > { %v2627_v58 = vmul.f32 %v5510_v28, %v2427_v57  ;;  %v2628_v35 = vmul.f32 %v5513_v51, %v2428_v16  ;;  %v2269_v61 = vmul.f32 %v3851_v55, %v5139_v5  ;;  %v2270_v2 = vmul.f32 %v3851_v55, %v5144_v9 }
 0x2eb   : > { %v3853_v52 = vpop.eup %3852  ;;  %3860 = vrsqrt.f32 %v2237_v63  ;;  %v2399_v19 = vadd.f32 1e-05, %v2383_v14  ;;  %v2238_v53 = vadd.f32 1e-05, %v2222_v47 }
 0x2ec   : > { %v3393_v22 = vpack.c.bf16 %v2628_v35, %v2627_v58  ;;  %v2473_v56 = vmul.f32 %v5518_v26, %v2269_v61  ;;  %v2474_v43 = vmul.f32 %v5521_v48, %v2270_v2  ;;  %v2267_v4 = vmul.f32 %v3853_v52, %v5130_v0  ;;  %v2348_v49 = vpop.xlane.xlu1 %2347  ;;  %v2184_v24 = vpop.xlane.xlu0 %2183 }
 0x2ed   : > { %v2268_v8 = vmul.f32 %v3853_v52, %v5133_v1  ;;  %3862 = vrsqrt.f32 %v2399_v19  ;;  %v2384_v5 = vmul.f32 0.00390625, %v2348_v49  ;;  %v2223_v45 = vmul.f32 0.00390625, %v2184_v24 }
 0x2ee   : > { %2755 = vst [vmem:[%s5532_s28] sm:$0xff] %v3393_v22  ;;  %v3378_v9 = vpack.c.bf16 %v2474_v43, %v2473_v56  ;;  %v2471_v63 = vmul.f32 %v5518_v26, %v2267_v4  ;;  %3864 = vrsqrt.f32 %v2238_v53 }
 0x2ef   : > { %v3855_v57 = vpop.eup %3854  ;;  %v2472_v16 = vmul.f32 %v5521_v48, %v2268_v8  ;;  %v2400_v0 = vadd.f32 1e-05, %v2384_v5  ;;  %v2239_v62 = vadd.f32 1e-05, %v2223_v45 }
 0x2f0   : > { %v3857_v31 = vpop.eup %3856  ;;  %2600 = vst [vmem:[%s5538_s17 + $0x8] sm:$0xff] %v3378_v9  ;;  %v2429_v1 = vmul.f32 %v3855_v57, %v5149_v11  ;;  %v2430_v55 = vmul.f32 %v3855_v57, %v5152_v12  ;;  %v2351_v14 = vpop.xlane.xlu0 %2350 }
 0x2f1   : > { %v2187_v47 = vpop.xlane.xlu1 %2186  ;;  %v3377_v58 = vpack.c.bf16 %v2472_v16, %v2471_v63  ;;  %v2431_v35 = vmul.f32 %v3857_v31, %v5167_v23  ;;  %v2432_v61 = vmul.f32 %v3857_v31, %v5173_v27  ;;  %3866 = vrsqrt.f32 %v2400_v0 }
 0x2f2   : > { %v2629_v2 = vmul.f32 %v5510_v28, %v2429_v1  ;;  %v2630_v52 = vmul.f32 %v5513_v51, %v2430_v55  ;;  %3868 = vrsqrt.f32 %v2239_v62  ;;  %v2385_v19 = vmul.f32 0.00390625, %v2351_v14 }
 0x2f3   : > { %v3859_v53 = vpop.eup %3858  ;;  %2599 = vst [vmem:[%s5538_s17] sm:$0xff] %v3377_v58  ;;  %v2631_v11 = vmul.f32 %v5510_v28, %v2431_v35  ;;  %v2632_v12 = vmul.f32 %v5513_v51, %v2432_v61  ;;  %v2224_v22 = vmul.f32 0.00390625, %v2187_v47 }
 0x2f4   : > { %v3394_v56 = vpack.c.bf16 %v2630_v52, %v2629_v2  ;;  %v2433_v23 = vmul.f32 %v3859_v53, %v5181_v33  ;;  %v2434_v27 = vmul.f32 %v3859_v53, %v5188_v38  ;;  %v2401_v43 = vadd.f32 1e-05, %v2385_v19  ;;  %v2190_v49 = vpop.xlane.xlu0 %2189 }
 0x2f5   : > { %v2354_v4 = vpop.xlane.xlu1 %2353  ;;  %v3861_v24 = vpop.eup %3860  ;;  %v3395_v8 = vpack.c.bf16 %v2632_v12, %v2631_v11  ;;  %v2240_v5 = vadd.f32 1e-05, %v2224_v22  ;;  %v2225_v9 = vmul.f32 0.00390625, %v2190_v49 }
 0x2f6   : > { %v2386_v45 = vmul.f32 0.00390625, %v2354_v4  ;;  %2756 = vst [vmem:[%s5532_s28 + $0x8] sm:$0xff] %v3394_v56  ;;  %v2633_v63 = vmul.f32 %v5510_v28, %v2433_v23  ;;  %v2634_v57 = vmul.f32 %v5513_v51, %v2434_v27  ;;  %v2271_v16 = vmul.f32 %v3861_v24, %v5170_v25 }
 0x2f7   : > { %v2272_v33 = vmul.f32 %v3861_v24, %v5176_v30  ;;  %v3863_v0 = vpop.eup %3862  ;;  %2757 = vst [vmem:[%s5532_s28 + $0x10] sm:$0xff] %v3395_v8  ;;  %3870 = vrsqrt.f32 %v2401_v43  ;;  %v2241_v62 = vadd.f32 1e-05, %v2225_v9 }
 0x2f8   : > { %v2402_v38 = vadd.f32 1e-05, %v2386_v45  ;;  %v3865_v31 = vpop.eup %3864  ;;  %v3396_v1 = vpack.c.bf16 %v2634_v57, %v2633_v63  ;;  %v2475_v55 = vmul.f32 %v5518_v26, %v2271_v16  ;;  %v2435_v47 = vmul.f32 %v3863_v0, %v5205_v54  ;;  %v2357_v58 = vpop.xlane.xlu0 %2356 }
 0x2f9   : > { %v2476_v14 = vmul.f32 %v5521_v48, %v2272_v33  ;;  %v2193_v35 = vpop.xlane.xlu1 %2192  ;;  %v2436_v25 = vmul.f32 %v3863_v0, %v5213_v3  ;;  %v2273_v30 = vmul.f32 %v3865_v31, %v5193_v40  ;;  %v2274_v61 = vmul.f32 %v3865_v31, %v5200_v44 }
 0x2fa   : > { %3872 = vrsqrt.f32 %v2240_v5  ;;  %2758 = vst [vmem:[%s5532_s28 + $0x18] sm:$0xff] %v3396_v1  ;;  %v2635_v52 = vmul.f32 %v5510_v28, %v2435_v47  ;;  %v2387_v19 = vmul.f32 0.00390625, %v2357_v58  ;;  %v2226_v56 = vmul.f32 0.00390625, %v2193_v35 }
 0x2fb   : > { %v3379_v2 = vpack.c.bf16 %v2476_v14, %v2475_v55  ;;  %3874 = vrsqrt.f32 %v2402_v38  ;;  %v3867_v53 = vpop.eup %3866  ;;  %v2636_v11 = vmul.f32 %v5513_v51, %v2436_v25  ;;  %v2477_v54 = vmul.f32 %v5518_v26, %v2273_v30 }
 0x2fc   : > { %v2478_v12 = vmul.f32 %v5521_v48, %v2274_v61  ;;  %3876 = vrsqrt.f32 %v2241_v62  ;;  %v3869_v3 = vpop.eup %3868  ;;  %v2437_v40 = vmul.f32 %v3867_v53, %v5221_v13  ;;  %v2438_v44 = vmul.f32 %v3867_v53, %v5228_v18  ;;  %v2196_v27 = vpop.xlane.xlu0 %2195 }
 0x2fd   : > { %2601 = vst [vmem:[%s5538_s17 + $0x10] sm:$0xff] %v3379_v2  ;;  %v2403_v22 = vadd.f32 1e-05, %v2387_v19  ;;  %v2360_v23 = vpop.xlane.xlu1 %2359  ;;  %v3397_v43 = vpack.c.bf16 %v2636_v11, %v2635_v52  ;;  %v2275_v49 = vmul.f32 %v3869_v3, %v5208_v60  ;;  %v2276_v24 = vmul.f32 %v3869_v3, %v5216_v7 }
 0x2fe   : > { %v3380_v4 = vpack.c.bf16 %v2478_v12, %v2477_v54  ;;  %v2637_v8 = vmul.f32 %v5510_v28, %v2437_v40  ;;  %v2638_v5 = vmul.f32 %v5513_v51, %v2438_v44  ;;  %v2242_v45 = vadd.f32 1e-05, %v2226_v56 }
 0x2ff   : > { %3878 = vrsqrt.f32 %v2403_v22  ;;  %2759 = vst [vmem:[%s5532_s28 + $0x20] sm:$0xff] %v3397_v43  ;;  %v2479_v13 = vmul.f32 %v5518_v26, %v2275_v49  ;;  %v2480_v18 = vmul.f32 %v5521_v48, %v2276_v24  ;;  %v2388_v9 = vmul.f32 0.00390625, %v2360_v23 }
 0x300   : > { %2602 = vst [vmem:[%s5538_s17 + $0x18] sm:$0xff] %v3380_v4  ;;  %v2227_v63 = vmul.f32 0.00390625, %v2196_v27  ;;  %v3398_v57 = vpack.c.bf16 %v2638_v5, %v2637_v8  ;;  %3880 = vrsqrt.f32 %v2242_v45  ;;  %v2363_v60 = vpop.xlane.xlu0 %2362 }
 0x301   : > { %v2199_v7 = vpop.xlane.xlu1 %2198  ;;  %v3871_v16 = vpop.eup %3870  ;;  %v3381_v33 = vpack.c.bf16 %v2480_v18, %v2479_v13  ;;  %v2404_v0 = vadd.f32 1e-05, %v2388_v9  ;;  %v2389_v62 = vmul.f32 0.00390625, %v2363_v60 }
 0x302   : > { %v2243_v38 = vadd.f32 1e-05, %v2227_v63  ;;  %2760 = vst [vmem:[%s5532_s28 + $0x28] sm:$0xff] %v3398_v57  ;;  %v2439_v31 = vmul.f32 %v3871_v16, %v5247_v36  ;;  %v2440_v1 = vmul.f32 %v3871_v16, %v5253_v42  ;;  %v2228_v55 = vmul.f32 0.00390625, %v2199_v7 }
 0x303   : > { %2603 = vst [vmem:[%s5538_s17 + $0x20] sm:$0xff] %v3381_v33  ;;  %3882 = vrsqrt.f32 %v2404_v0  ;;  %v2405_v47 = vadd.f32 1e-05, %v2389_v62 }
 0x304   : > { %v3873_v14 = vpop.eup %3872  ;;  %v2639_v35 = vmul.f32 %v5510_v28, %v2439_v31  ;;  %v2640_v25 = vmul.f32 %v5513_v51, %v2440_v1  ;;  %v2202_v52 = vpop.xlane.xlu0 %2201  ;;  %3884 = vrsqrt.f32 %v2243_v38  ;;  %v2244_v53 = vadd.f32 1e-05, %v2228_v55 }
 0x305   : > { %v3875_v58 = vpop.eup %3874  ;;  %v2277_v30 = vmul.f32 %v3873_v14, %v5233_v20  ;;  %v2278_v61 = vmul.f32 %v3873_v14, %v5236_v21  ;;  %v2366_v2 = vpop.xlane.xlu1 %2365  ;;  %3886 = vrsqrt.f32 %v2405_v47  ;;  %v2229_v24 = vmul.f32 0.00390625, %v2202_v52  ;;  %v6034_v52 = vld [vmem:[#allocation52_spill] sm:$0xff] }
 0x306   : > { %v3877_v36 = vpop.eup %3876  ;;  %v2441_v42 = vmul.f32 %v3875_v58, %v5261_v50  ;;  %v2442_v19 = vmul.f32 %v3875_v58, %v5268_v6  ;;  %v3399_v11 = vpack.c.bf16 %v2640_v25, %v2639_v35  ;;  %3888 = vrsqrt.f32 %v2244_v53  ;;  %v6033_v25 = vld [vmem:[#allocation51_spill] sm:$0xff] }
 0x307   : > { %v2481_v54 = vmul.f32 %v5518_v26, %v2277_v30  ;;  %v2482_v12 = vmul.f32 %v5521_v48, %v2278_v61  ;;  %v2279_v3 = vmul.f32 %v3877_v36, %v5250_v39  ;;  %v2280_v40 = vmul.f32 %v3877_v36, %v5256_v46 }
 0x308   : > { %v2641_v20 = vmul.f32 %v5510_v28, %v2441_v42  ;;  %v2642_v21 = vmul.f32 %v5513_v51, %v2442_v19  ;;  %2761 = vst [vmem:[%s5532_s28 + $0x30] sm:$0xff] %v3399_v11  ;;  %v2390_v22 = vmul.f32 0.00390625, %v2366_v2  ;;  %v2369_v56 = vpop.xlane.xlu0 %2368 }
 0x309   : > { %v3879_v50 = vpop.eup %3878  ;;  %v3382_v6 = vpack.c.bf16 %v2482_v12, %v2481_v54  ;;  %v2483_v44 = vmul.f32 %v5518_v26, %v2279_v3  ;;  %v2205_v23 = vpop.xlane.xlu1 %2204  ;;  %v2484_v39 = vmul.f32 %v5521_v48, %v2280_v40  ;;  %v2391_v8 = vmul.f32 0.00390625, %v2369_v56  ;;  %v6035_v12 = vld [vmem:[#allocation56_spill] sm:$0xff] }
 0x30a   : > { %v3400_v27 = vpack.c.bf16 %v2642_v21, %v2641_v20  ;;  %v2443_v43 = vmul.f32 %v3879_v50, %v5285_v29  ;;  %v2444_v4 = vmul.f32 %v3879_v50, %v5293_v37  ;;  %v3881_v49 = vpop.eup %3880  ;;  %v2406_v46 = vadd.f32 1e-05, %v2390_v22  ;;  %v6036_v20 = vld [vmem:[#allocation58_spill] sm:$0xff] }
 0x30b   : > { %2604 = vst [vmem:[%s5538_s17 + $0x28] sm:$0xff] %v3382_v6  ;;  %v2230_v5 = vmul.f32 0.00390625, %v2205_v23  ;;  %v3383_v45 = vpack.c.bf16 %v2484_v39, %v2483_v44  ;;  %v2281_v9 = vmul.f32 %v3881_v49, %v5273_v10  ;;  %v2282_v63 = vmul.f32 %v3881_v49, %v5280_v17  ;;  %v6032_v10 = vld [vmem:[#allocation53_spill] sm:$0xff]  ;;  %v6037_v50 = vld [vmem:[#allocation54_spill] sm:$0xff]  ;;  %v6038_v44 = vld [vmem:[#allocation55_spill] sm:$0xff] }
 0x30c   : > { %2762 = vst [vmem:[%s5532_s28 + $0x38] sm:$0xff] %v3400_v27  ;;  %v2643_v13 = vmul.f32 %v5510_v28, %v2443_v43  ;;  %v2644_v18 = vmul.f32 %v5513_v51, %v2444_v4  ;;  %3890 = vrsqrt.f32 %v2406_v46  ;;  %v2245_v29 = vadd.f32 1e-05, %v2229_v24  ;;  %v2208_v60 = vpop.xlane.xlu0 %2207 }
 0x30d   : > { %v2407_v37 = vadd.f32 1e-05, %v2391_v8  ;;  %v2372_v57 = vpop.xlane.xlu1 %2371  ;;  %v3883_v7 = vpop.eup %3882  ;;  %2605 = vst [vmem:[%s5538_s17 + $0x30] sm:$0xff] %v3383_v45  ;;  %v2485_v33 = vmul.f32 %v5518_v26, %v2281_v9  ;;  %v2246_v0 = vadd.f32 1e-05, %v2230_v5  ;;  %v2486_v62 = vmul.f32 %v5521_v48, %v2282_v63  ;;  %v6039_v9 = vld [vmem:[#allocation60_spill] sm:$0xff] }
 0x30e   : > { %v3401_v16 = vpack.c.bf16 %v2644_v18, %v2643_v13  ;;  %v2392_v38 = vmul.f32 0.00390625, %v2372_v57  ;;  %v2445_v31 = vmul.f32 %v3883_v7, %v5301_v59  ;;  %v2446_v1 = vmul.f32 %v3883_v7, %v6032_v10  ;;  %v3885_v17 = vpop.eup %3884 }
 0x30f   : > { %3892 = vrsqrt.f32 %v2245_v29  ;;  %v2231_v14 = vmul.f32 0.00390625, %v2208_v60  ;;  %v3384_v47 = vpack.c.bf16 %v2486_v62, %v2485_v33  ;;  %v2283_v30 = vmul.f32 %v3885_v17, %v6033_v25  ;;  %v3887_v59 = vpop.eup %3886  ;;  %v6040_v29 = vld [vmem:[#allocation61_spill] sm:$0xff] }
 0x310   : > { %2763 = vst [vmem:[%s5532_s28 + $0x40] sm:$0xff] %v3401_v16  ;;  %3894 = vrsqrt.f32 %v2407_v37  ;;  %v2408_v55 = vadd.f32 1e-05, %v2392_v38  ;;  %v2645_v58 = vmul.f32 %v5510_v28, %v2445_v31  ;;  %v2646_v35 = vmul.f32 %v5513_v51, %v2446_v1  ;;  %v2375_v61 = vpop.xlane.xlu0 %2374  ;;  %v3889_v53 = vpop.eup %3888  ;;  %v6041_v31 = vld [vmem:[#allocation57_spill] sm:$0xff]  ;;  %v6042_v1 = vld [vmem:[#allocation59_spill] sm:$0xff] }
 0x311   : > { %v2211_v2 = vpop.xlane.xlu1 %2210  ;;  %v2284_v36 = vmul.f32 %v3885_v17, %v6034_v52  ;;  %3896 = vrsqrt.f32 %v2246_v0  ;;  %v2247_v42 = vadd.f32 1e-05, %v2231_v14  ;;  %v2393_v19 = vmul.f32 0.00390625, %v2375_v61  ;;  %2606 = vst [vmem:[%s5538_s17 + $0x38] sm:$0xff] %v3384_v47  ;;  %v6044_v47 = vld [vmem:[#allocation66_spill] sm:$0xff] }
 0x312   : > { %v3402_v11 = vpack.c.bf16 %v2646_v35, %v2645_v58  ;;  %v2487_v54 = vmul.f32 %v5518_v26, %v2283_v30  ;;  %v2447_v3 = vmul.f32 %v3887_v59, %v6035_v12  ;;  %v2448_v21 = vmul.f32 %v3887_v59, %v6036_v20 }
 0x313   : > { %v2488_v40 = vmul.f32 %v5521_v48, %v2284_v36  ;;  %v2285_v6 = vmul.f32 %v3889_v53, %v6037_v50  ;;  %v2286_v22 = vmul.f32 %v3889_v53, %v6038_v44  ;;  %3898 = vrsqrt.f32 %v2408_v55  ;;  %v6043_v55 = vld [vmem:[#allocation64_spill] sm:$0xff]  ;;  %v6045_v36 = vld [vmem:[#allocation62_spill] sm:$0xff] }
 0x314   : > { %2764 = vst [vmem:[%s5532_s28 + $0x48] sm:$0xff] %v3402_v11  ;;  %v2647_v56 = vmul.f32 %v5510_v28, %v2447_v3  ;;  %v2648_v23 = vmul.f32 %v5513_v51, %v2448_v21  ;;  %3900 = vrsqrt.f32 %v2247_v42  ;;  %v2409_v27 = vadd.f32 1e-05, %v2393_v19  ;;  %v2214_v43 = vpop.xlane.xlu0 %2213  ;;  %v6046_v19 = vld [vmem:[#allocation63_spill] sm:$0xff]  ;;  %v6047_v50 = vld [vmem:[#allocation68_spill] sm:$0xff] }
 0x315   : > { %v2378_v39 = vpop.xlane.xlu1 %2377  ;;  %v3385_v4 = vpack.c.bf16 %v2488_v40, %v2487_v54  ;;  %v2489_v49 = vmul.f32 %v5518_v26, %v2285_v6  ;;  %v2490_v46 = vmul.f32 %v5521_v48, %v2286_v22  ;;  %v2232_v24 = vmul.f32 0.00390625, %v2211_v2  ;;  %v6048_v22 = vld [vmem:[#allocation65_spill] sm:$0xff] }
 0x316   : > { %v3891_v8 = vpop.eup %3890  ;;  %v3403_v5 = vpack.c.bf16 %v2648_v23, %v2647_v56  ;;  %3902 = vrsqrt.f32 %v2409_v27  ;;  %v2394_v45 = vmul.f32 0.00390625, %v2378_v39  ;;  %v2233_v13 = vmul.f32 0.00390625, %v2214_v43  ;;  %v6049_v23 = vld [vmem:[#allocation67_spill] sm:$0xff] }
 0x317   : > { %2607 = vst [vmem:[%s5538_s17 + $0x40] sm:$0xff] %v3385_v4  ;;  %v3386_v18 = vpack.c.bf16 %v2490_v46, %v2489_v49  ;;  %v2449_v63 = vmul.f32 %v3891_v8, %v6039_v9  ;;  %v2450_v37 = vmul.f32 %v3891_v8, %v6040_v29  ;;  %v2248_v57 = vadd.f32 1e-05, %v2232_v24  ;;  %v6051_v29 = vld [vmem:[#allocation69_spill] sm:$0xff] }
 0x318   : > { %2765 = vst [vmem:[%s5532_s28 + $0x50] sm:$0xff] %v3403_v5  ;;  %v2410_v7 = vadd.f32 1e-05, %v2394_v45  ;;  %v2249_v16 = vadd.f32 1e-05, %v2233_v13 }
 0x319   : > { %v3893_v60 = vpop.eup %3892  ;;  %v2217_v33 = vpop.xlane.xlu1 %2216  ;;  %2608 = vst [vmem:[%s5538_s17 + $0x48] sm:$0xff] %v3386_v18  ;;  %v2649_v38 = vmul.f32 %v5510_v28, %v2449_v63  ;;  %v2650_v62 = vmul.f32 %v5513_v51, %v2450_v37  ;;  %3904 = vrsqrt.f32 %v2248_v57 }
 0x31a   : > { %v3895_v0 = vpop.eup %3894  ;;  %v2287_v10 = vmul.f32 %v3893_v60, %v6041_v31  ;;  %v2288_v17 = vmul.f32 %v3893_v60, %v6042_v1  ;;  %v2234_v35 = vmul.f32 0.00390625, %v2217_v33  ;;  %3906 = vrsqrt.f32 %v2410_v7  ;;  %v6053_v7 = vld [vmem:[#allocation73_spill] sm:$0xff]  ;;  %v6055_v1 = vld [vmem:[#allocation72_spill] sm:$0xff] }
 0x31b   : > { %v2451_v14 = vmul.f32 %v3895_v0, %v6043_v55  ;;  %v2452_v58 = vmul.f32 %v3895_v0, %v6044_v47  ;;  %v3897_v25 = vpop.eup %3896  ;;  %v3404_v30 = vpack.c.bf16 %v2650_v62, %v2649_v38  ;;  %3908 = vrsqrt.f32 %v2249_v16 }
 0x31c   : > { %v2491_v61 = vmul.f32 %v5518_v26, %v2287_v10  ;;  %v2492_v2 = vmul.f32 %v5521_v48, %v2288_v17  ;;  %v2289_v42 = vmul.f32 %v3897_v25, %v6045_v36  ;;  %v2290_v53 = vmul.f32 %v3897_v25, %v6046_v19  ;;  %v6054_v10 = vld [vmem:[#allocation71_spill] sm:$0xff]  ;;  %v6056_v25 = vld [vmem:[#allocation74_spill] sm:$0xff] }
 0x31d   : > { %v2651_v59 = vmul.f32 %v5510_v28, %v2451_v14  ;;  %v2652_v52 = vmul.f32 %v5513_v51, %v2452_v58  ;;  %v3899_v11 = vpop.eup %3898  ;;  %2766 = vst [vmem:[%s5532_s28 + $0x58] sm:$0xff] %v3404_v30  ;;  %v2250_v12 = vadd.f32 1e-05, %v2234_v35 }
 0x31e   : > { %v3387_v54 = vpack.c.bf16 %v2492_v2, %v2491_v61  ;;  %v3901_v3 = vpop.eup %3900  ;;  %v2493_v21 = vmul.f32 %v5518_v26, %v2289_v42  ;;  %v2494_v40 = vmul.f32 %v5521_v48, %v2290_v53  ;;  %v2453_v6 = vmul.f32 %v3899_v11, %v6047_v50 }
 0x31f   : > { %v3405_v20 = vpack.c.bf16 %v2652_v52, %v2651_v59  ;;  %v2454_v44 = vmul.f32 %v3899_v11, %v5388_v32  ;;  %v2291_v56 = vmul.f32 %v3901_v3, %v6048_v22  ;;  %v2292_v27 = vmul.f32 %v3901_v3, %v6049_v23 }
 0x320   : > { %2609 = vst [vmem:[%s5538_s17 + $0x50] sm:$0xff] %v3387_v54  ;;  %3910 = vrsqrt.f32 %v2250_v12  ;;  %v3903_v39 = vpop.eup %3902  ;;  %v3388_v43 = vpack.c.bf16 %v2494_v40, %v2493_v21  ;;  %v2653_v4 = vmul.f32 %v5510_v28, %v2453_v6 }
 0x321   : > { %2767 = vst [vmem:[%s5532_s28 + $0x60] sm:$0xff] %v3405_v20  ;;  %v2654_v49 = vmul.f32 %v5513_v51, %v2454_v44  ;;  %v2495_v46 = vmul.f32 %v5518_v26, %v2291_v56  ;;  %v2496_v24 = vmul.f32 %v5521_v48, %v2292_v27  ;;  %v2455_v32 = vmul.f32 %v3903_v39, %v5407_v41  ;;  %v6052_v41 = vld [vmem:[#allocation70_spill] sm:$0xff] }
 0x322   : > { %2610 = vst [vmem:[%s5538_s17 + $0x58] sm:$0xff] %v3388_v43  ;;  %v2456_v8 = vmul.f32 %v3903_v39, %v5413_v15 }
 0x323   : > { %v3406_v5 = vpack.c.bf16 %v2654_v49, %v2653_v4  ;;  %v3389_v45 = vpack.c.bf16 %v2496_v24, %v2495_v46  ;;  %v2655_v13 = vmul.f32 %v5510_v28, %v2455_v32  ;;  %v3905_v18 = vpop.eup %3904 }
 0x324   : > { %v2656_v9 = vmul.f32 %v5513_v51, %v2456_v8  ;;  %v3907_v63 = vpop.eup %3906  ;;  %v2293_v37 = vmul.f32 %v3905_v18, %v6051_v29  ;;  %v2294_v57 = vmul.f32 %v3905_v18, %v6052_v41 }
 0x325   : > { %2768 = vst [vmem:[%s5532_s28 + $0x68] sm:$0xff] %v3406_v5  ;;  %2611 = vst [vmem:[%s5538_s17 + $0x60] sm:$0xff] %v3389_v45  ;;  %v2457_v15 = vmul.f32 %v3907_v63, %v5421_v34  ;;  %v2458_v16 = vmul.f32 %v3907_v63, %v6053_v7  ;;  %v3909_v33 = vpop.eup %3908 }
 0x326   : > { %v3407_v60 = vpack.c.bf16 %v2656_v9, %v2655_v13  ;;  %v2497_v0 = vmul.f32 %v5518_v26, %v2293_v37  ;;  %v2498_v38 = vmul.f32 %v5521_v48, %v2294_v57  ;;  %v2295_v34 = vmul.f32 %v3909_v33, %v6054_v10 }
 0x327   : > { %v2657_v62 = vmul.f32 %v5510_v28, %v2457_v15  ;;  %v2658_v31 = vmul.f32 %v5513_v51, %v2458_v16  ;;  %v2296_v17 = vmul.f32 %v3909_v33, %v6055_v1  ;;  %v6059_v51 = vld [vmem:[#allocation75_spill] sm:$0xff] }
 0x328   : > { %2769 = vst [vmem:[%s5532_s28 + $0x70] sm:$0xff] %v3407_v60  ;;  %v3390_v14 = vpack.c.bf16 %v2498_v38, %v2497_v0  ;;  %v2499_v58 = vmul.f32 %v5518_v26, %v2295_v34 }
 0x329   : > { %v3408_v47 = vpack.c.bf16 %v2658_v31, %v2657_v62  ;;  %v2500_v35 = vmul.f32 %v5521_v48, %v2296_v17 }
 0x32a   : > { %v3911_v55 = vpop.eup %3910  ;;  %2612 = vst [vmem:[%s5538_s17 + $0x68] sm:$0xff] %v3390_v14 }
 0x32b   : > { %v2297_v28 = vmul.f32 %v3911_v55, %v6056_v25  ;;  %v2298_v30 = vmul.f32 %v3911_v55, %v6059_v51  ;;  %2770 = vst [vmem:[%s5532_s28 + $0x78] sm:$0xff] %v3408_v47  ;;  %v3391_v61 = vpack.c.bf16 %v2500_v35, %v2499_v58 }
 0x32d   : > { %v2501_v2 = vmul.f32 %v5518_v26, %v2297_v28  ;;  %v2502_v59 = vmul.f32 %v5521_v48, %v2298_v30 }
 0x32e   : > { %4085 = shalt.err (!%p4082_p5)
}
 0x32f   : > { %s4086_s28 = scalar_lea.hbm %s5689_s3, 2048  ;;  %s4090_s16 = scalar_lea.hbm %s6058_s13, 12288 }
 0x330   : > { %p4087_p0 = scmp.ne.s32.totalorder %s5689_s3, %s4086_s28  ;;  %p4091_p1 = scmp.lt.u32.totalorder %s5689_s3, %s6058_s13 }
 0x331   : > { %p4092_p9 = scmp.lt.u32.totalorder %s4090_s16, %s4086_s28  ;;  %p4094_p13 = scmp.lt.u32.totalorder %s4086_s28, %s5689_s3 }
 0x332   : > { %p4088_p8 = pnand %p4087_p0, %p6062_p6 }
 0x333   : > { %p4093_p12 = por %p4092_p9, %p4091_p1 }
 0x334   : > { %p4089_p3 = pneg %p4088_p8 }
 0x335   : > { %p4095_p11 = por %p4094_p13, %p4093_p12 }
 0x337   : > { %p4096_p10 = pnand %p4095_p11, %p4089_p3 }
 0x339   : > { %4099 = shalt.err (!%p4096_p10)
}
 0x33a   : > { %s4341_s7 = smov 128   ;;  %s4342_s23 = smov 8   ;;  %2613 = vst [vmem:[%s5538_s17 + $0x70] sm:$0xff] %v3391_v61 }
 0x33b   : > { %3488 = dma.vmem_to_hbm [thread:$0]  (%p6062_p6), %s5691_s26, 2048, %s5689_s3, %s2889_s5, %s4341_s7, %s4341_s7, %s4342_s23  }
 0x33c   : > { %s4100_s6 = scalar_lea.vmem %s5701_s25, 2048  ;;  %s4343_s28 = smov [#allocation17]  }
 0x33d   : > { %p4101_p4 = scmp.ne.s32.totalorder %s5701_s25, %s4100_s6  ;;  %s4104_s12 = sshll.u32 %s4343_s28, 4  ;;  %s4105_s12 = int_to_ptr.vmem [resolvable:$false] %s4104_s12 }
 0x33e   : > { %s4106_s10 = scalar_lea.vmem %s4105_s12, 4096  ;;  %p4107_p5 = scmp.lt.s32.totalorder %s5701_s25, %s4105_s12 }
 0x33f   : > { %p4102_p7 = pnand %p4101_p4, %p6062_p6  ;;  %p4108_p0 = scmp.lt.s32.totalorder %s4106_s10, %s4100_s6 }
 0x341   : > { %p4103_p2 = pneg %p4102_p7  ;;  %p4109_p8 = por %p4108_p0, %p4107_p5 }
 0x343   : > { %p4110_p3 = pnand %p4109_p8, %p4103_p2 }
 0x345   : > { %4113 = shalt.err (!%p4110_p3)
}
 0x346   : > { %s4114_s26 = scalar_lea.hbm %s5699_s0, 2048  ;;  %s4118_s19 = scalar_lea.hbm %s6061_s2, 12288 }
 0x347   : > { %p4115_p1 = scmp.ne.s32.totalorder %s5699_s0, %s4114_s26  ;;  %p4119_p13 = scmp.lt.u32.totalorder %s5699_s0, %s6061_s2 }
 0x348   : > { %p4120_p11 = scmp.lt.u32.totalorder %s4118_s19, %s4114_s26  ;;  %p4122_p4 = scmp.lt.u32.totalorder %s4114_s26, %s5699_s0 }
 0x349   : > { %p4116_p9 = pnand %p4115_p1, %p6062_p6 }
 0x34a   : > { %p4121_p10 = por %p4120_p11, %p4119_p13 }
 0x34b   : > { %p4117_p12 = pneg %p4116_p9 }
 0x34c   : > { %p4123_p7 = por %p4122_p4, %p4121_p10 }
 0x34e   : > { %p4124_p2 = pnand %p4123_p7, %p4117_p12 }
 0x350   : > { %4127 = shalt.err (!%p4124_p2)
}
 0x351   : > { %3489 = dma.vmem_to_hbm [thread:$0]  (%p6062_p6), %s5701_s25, 2048, %s5699_s0, %s2889_s5, %s4341_s7, %s4341_s7, %s4342_s23   ;;  %v3392_v26 = vpack.c.bf16 %v2502_v59, %v2501_v2 }
 0x352   : > { %s6063_s10 = sld [smem:[#allocation81_spill]]  ;;  %s2884_s14 = scalar_lea.sflag [#allocation7], %s4882_s15 }
 0x353   : > { %2614 = vst [vmem:[%s5538_s17 + $0x78] sm:$0xff] %v3392_v26  ;;  %s4128_s3 = scalar_lea.vmem %s5769_s22, 2048  ;;  %s4344_s25 = smov [#allocation14]  }
 0x354   : > { %p4129_p5 = scmp.ne.s32.totalorder %s5769_s22, %s4128_s3  ;;  %s4132_s0 = sshll.u32 %s4344_s25, 4  ;;  %s4133_s0 = int_to_ptr.vmem [resolvable:$false] %s4132_s0 }
 0x355   : > { %s4134_s5 = scalar_lea.vmem %s4133_s0, 4096  ;;  %p4135_p3 = scmp.lt.s32.totalorder %s5769_s22, %s4133_s0 }
 0x356   : > { %p4130_p0 = pnand %p4129_p5, %p6062_p6  ;;  %p4136_p1 = scmp.lt.s32.totalorder %s4134_s5, %s4128_s3 }
 0x358   : > { %s5765_s26 = scalar_lea.hbm %s6063_s10, %s5673_s29  ;;  %p4131_p8 = pneg %p4130_p0 }
 0x359   : > { %p4137_p9 = por %p4136_p1, %p4135_p3 }
 0x35b   : > { %p4138_p12 = pnand %p4137_p9, %p4131_p8 }
 0x35d   : > { %4141 = shalt.err (!%p4138_p12)
}
 0x35e   : > { %s4142_s17 = scalar_lea.hbm %s5765_s26, 2048  ;;  %s4146_s19 = scalar_lea.hbm %s6063_s10, 12288 }
 0x35f   : > { %p4143_p13 = scmp.ne.s32.totalorder %s5765_s26, %s4142_s17  ;;  %p4147_p4 = scmp.lt.u32.totalorder %s5765_s26, %s6063_s10 }
 0x360   : > { %p4148_p7 = scmp.lt.u32.totalorder %s4146_s19, %s4142_s17  ;;  %p4150_p5 = scmp.lt.u32.totalorder %s4142_s17, %s5765_s26 }
 0x361   : > { %p4144_p11 = pnand %p4143_p13, %p6062_p6 }
 0x362   : > { %p4149_p2 = por %p4148_p7, %p4147_p4 }
 0x363   : > { %p4145_p10 = pneg %p4144_p11 }
 0x364   : > { %p4151_p0 = por %p4150_p5, %p4149_p2 }
 0x366   : > { %p4152_p8 = pnand %p4151_p0, %p4145_p10 }
 0x368   : > { %4155 = shalt.err (!%p4152_p8)
}
 0x369   : > { %3487 = dma.vmem_to_hbm [thread:$0]  (%p6062_p6), %s5769_s22, 2048, %s5765_s26, %s2884_s14, %s4341_s7, %s4341_s7, %s4342_s23  }
 0x36a PF: > { %s6064_s6 = sld [smem:[#allocation41_spill]]  ;;  %s6065_s12 = sld [smem:[#allocation49_spill]] }
 0x36b   : > { %p3528_p3 = scmp.ge.s32.totalorder %s4328_s9, 2 }
 0x370   : > { %s2957_s3 = sand.u32 1, %s6064_s6   ;;  %p6066_p1 = scmp.ne.s32.totalorder %s6065_s12, 0 }
 0x371   : > { %s2958_s25 = scalar_lea.sflag [#allocation7], %s2957_s3 }
 0x372   : > { %p3518_p9 = pnand %p3528_p3, %p6066_p1 }
 0x374   : > { %4251 = dma.done.wait (!%p3518_p9), %s2958_s25, 2048  }
 0x375   : > { %4253 = vsyncadd (!%p3518_p9), %s2958_s25, 4294965248  ;;  %s6067_s20 = sadd.s32 4294967294, %s4328_s9  }
 0x376   : > { %s2966_s0 = sand.u32 1, %s6067_s20  }
 0x377   : > { %s2967_s5 = scalar_lea.sflag [#allocation16], %s2966_s0 }
 0x378   : > { %4255 = dma.done.wait (!%p3518_p9), %s2967_s5, 4096  }
 0x379   : > { %4257 = vsyncadd (!%p3518_p9), %s2967_s5, 4294963200  ;;  %s38_s9 = sadd.s32 1, %s4328_s9   ;;  %s6070_s15 = sld [smem:[#allocation35_spill]] }
 0x37a   : > { %p5806_p6 = scmp.ge.s32.totalorder %s38_s9, 8   ;;  %s6071_s16 = sld [smem:[#allocation36_spill]] }
 0x37b   : > { %s6072_s7 = sld [smem:[#allocation37_spill]]  ;;  %s6073_s19 = sld [smem:[#allocation46_spill]] }
 0x37c   : > { %s6074_s23 = sld [smem:[#allocation38_spill]]  ;;  %s6075_s26 = sld [smem:[#allocation50_spill]] }
 0x37d   : > { %s6076_s14 = sld [smem:[#allocation39_spill]]  ;;  %s6077_s24 = sld [smem:[#allocation40_spill]] }
 0x37e   : > { %s6078_s25 = sld [smem:[#allocation45_spill]]  ;;  %s6079_s29 = sld [smem:[#allocation42_spill]] }
 0x37f   : > { %s6080_s28 = sld [smem:[#allocation47_spill]]  ;;  %s6081_s17 = smov %s6108_s1 }
 0x380   : > { %s6083_s0 = smov %s4276_s18  ;;  %s6085_s20 = smov %s4288_s21 }
 0x381   : > { %s6084_s18 = smov %s6072_s7  ;;  %37 = sbr.rel (!%p5806_p6) target bundleno = 33 (0x21), region = 173 }
 0x382   : > { %s6086_s21 = smov %s6074_s23  ;;  %s6087_s22 = smov %s6075_s26 }
 0x383   : > { %s6088_s23 = smov %s6076_s14  ;;  %s6089_s26 = smov %s4312_s27 }
 0x384   : > { %s6090_s27 = smov %s6079_s29  ;;  %s6091_s29 = smov %s4324_s30 }
 0x385   : > { %s6092_s30 = smov %s6094_s11 }
 0x388   :  { %2981 = vsyncpa [#allocation6], 1 }
 0x389   :  { %2983 = vsyncpa [#allocation6 + $0x1], 1 }
 0x38a   :  { %2984 = vsyncpa [#allocation9], 1 }
 0x38b   :  { %2986 = vsyncpa [#allocation9 + $0x1], 1 }
 0x38c   :  { %2987 = vsyncpa [#allocation12], 1 }
 0x38d   :  { %2989 = vsyncpa [#allocation12 + $0x1], 1 }
 0x38e   :  { %2990 = vsyncpa [#allocation7], 1 }
 0x38f   :  { %2992 = vsyncpa [#allocation7 + $0x1], 1 }
 0x390   :  { %2993 = vsyncpa [#allocation16], 1 }
 0x391   :  { %2995 = vsyncpa [#allocation16 + $0x1], 1 }

</bundles_post_ra>
